<compile_context>
chip_gen: v5e
topology: v5e:2x2
jax: 0.10.0
libtpu: 0.0.40
codegen_flags: <defaults>
</compile_context>

<pallas_src>
import math
import functools

import jax
import jax.numpy as jnp
from jax import lax
from jax.experimental import pallas as pl
from jax.experimental.pallas import tpu as pltpu


_VMEM = pl.BlockSpec(memory_space=pltpu.MemorySpace.VMEM)


def _round_up(x, m):
    return ((x + m - 1) // m) * m


@functools.lru_cache(maxsize=1)
def _vmem_limit_bytes():
    # Generation-aware VMEM budget: ~80% of physical capacity
    # (~102 MiB on v5e/v6e's 128 MiB, ~51 MiB on v7x's 64 MiB per-TC VMEM).
    try:
        return int(pltpu.get_tpu_info().vmem_capacity_bytes * 0.8)
    except Exception:
        return None


def _compiler_params():
    return pltpu.CompilerParams(vmem_limit_bytes=_vmem_limit_bytes())


# ---------------------------------------------------------------------------
# Pallas kernels
# ---------------------------------------------------------------------------
def _make_fused_bilstm_kernel(num_layers, T, H, mm_dtype):
    """Kernel running `num_layers` bidirectional LSTM layers entirely in VMEM.

    refs = (x, [wih_cat, whh_f, whh_b, bias_cat] * L, hN, cN,
            xp_s, outf_s, outb_s, hf_s, cf_s, hb_s, cb_s)

      x        : (T*NB, D0)      time-major, flattened; row block [t*NB,(t+1)*NB) = step t
      wih_cat  : (D_l, 8H)       fwd|bwd input->hidden weights merged along lanes
      whh_f/b  : (H, 4H)         recurrent weights (pre-transposed)
      bias_cat : (1, 8H)         (b_ih+b_hh) fwd|bwd, float32
      hN, cN   : (2L, NB, H)     final hidden / cell states
    """

    def kernel(*refs):
        x_ref = refs[0]
        w_refs = refs[1:1 + 4 * num_layers]
        hN_ref = refs[1 + 4 * num_layers]
        cN_ref = refs[2 + 4 * num_layers]
        xp_s, outf_s, outb_s, hf_s, cf_s, hb_s, cb_s = refs[3 + 4 * num_layers:]

        NB = hN_ref.shape[1]      # padded (possibly stacked x1|x2) batch rows per step
        G = 4 * H                 # gate width per direction

        def cell(gates, c_prev):
            # PyTorch gate order: i, f, g, o
            i = jax.nn.sigmoid(gates[:, 0:H])
            f = jax.nn.sigmoid(gates[:, H:2 * H])
            g = jnp.tanh(gates[:, 2 * H:3 * H])
            o = jax.nn.sigmoid(gates[:, 3 * H:4 * H])
            c_new = f * c_prev + i * g
            return o * jnp.tanh(c_new), c_new

        for layer in range(num_layers):
            wih_ref, whhf_ref, whhb_ref, bias_ref = w_refs[4 * layer:4 * layer + 4]
            write_out = layer < num_layers - 1   # last layer's per-step outputs are unused

            # ---- Hoisted input projection: ALL timesteps, fwd|bwd merged along lanes
            # into one (T*NB, 8H) matmul. ----
            if layer == 0:
                xp_s[...] = (jnp.dot(x_ref[...], wih_ref[...],
                                     preferred_element_type=jnp.float32)
                             + bias_ref[...])
            else:
                # Previous layer's fwd/bwd outputs live in two H-wide scratches; split
                # the contraction instead of concatenating them.
                xp_s[...] = (jnp.dot(outf_s[...], wih_ref[0:H, :],
                                     preferred_element_type=jnp.float32)
                             + jnp.dot(outb_s[...], wih_ref[H:2 * H, :],
                                       preferred_element_type=jnp.float32)
                             + bias_ref[...])

            hf_s[...] = jnp.zeros_like(hf_s)
            cf_s[...] = jnp.zeros_like(cf_s)
            hb_s[...] = jnp.zeros_like(hb_s)
            cb_s[...] = jnp.zeros_like(cb_s)

            def step(t, carry):
                rf = pl.multiple_of(t * NB, NB)              # fwd: timestep t
                rb = pl.multiple_of((T - 1 - t) * NB, NB)    # bwd: timestep T-1-t
                gates_f = xp_s[pl.ds(rf, NB), 0:G] + jnp.dot(
                    hf_s[...].astype(mm_dtype), whhf_ref[...],
                    preferred_element_type=jnp.float32)
                gates_b = xp_s[pl.ds(rb, NB), G:2 * G] + jnp.dot(
                    hb_s[...].astype(mm_dtype), whhb_ref[...],
                    preferred_element_type=jnp.float32)
                hf_new, cf_new = cell(gates_f, cf_s[...])
                hb_new, cb_new = cell(gates_b, cb_s[...])
                hf_s[...] = hf_new
                cf_s[...] = cf_new
                hb_s[...] = hb_new
                cb_s[...] = cb_new
                if write_out:
                    outf_s[pl.ds(rf, NB), :] = hf_new.astype(outf_s.dtype)
                    outb_s[pl.ds(rb, NB), :] = hb_new.astype(outb_s.dtype)
                return carry

            # Capped partial unroll: lets the LLO scheduler overlap adjacent steps'
            # fwd/bwd matmuls without blowing the 64-vreg budget at large H.
            lax.fori_loop(0, T, step, 0, unroll=max(1, min(T, 8)))

            hN_ref[2 * layer] = hf_s[...]
            hN_ref[2 * layer + 1] = hb_s[...]
            cN_ref[2 * layer] = cf_s[...]
            cN_ref[2 * layer + 1] = cb_s[...]

    return kernel


def _make_head_kernel(mm_dtype):
    def kernel(h1f_ref, h1b_ref, h2f_ref, h2b_ref,
               w1a_ref, w1b_ref, b1_ref, w2_ref, b2_ref, w3_ref, b3_ref, o_ref):
        # nn.MaxPool1d(2) over cat((h[0].unsqueeze(2), h[1].unsqueeze(2)), 2) is an
        # elementwise max of the layer-0 fwd/bwd final hidden states.
        out1 = jnp.maximum(h1f_ref[...], h1b_ref[...]).astype(mm_dtype)
        out2 = jnp.maximum(h2f_ref[...], h2b_ref[...]).astype(mm_dtype)
        # cat((out1, out2), 1) @ W1^T split into two dots (no in-kernel concat).
        h = (jnp.dot(out1, w1a_ref[...], preferred_element_type=jnp.float32)
             + jnp.dot(out2, w1b_ref[...], preferred_element_type=jnp.float32)
             + b1_ref[...])
        h = (jnp.dot(h.astype(mm_dtype), w2_ref[...],
                     preferred_element_type=jnp.float32) + b2_ref[...])
        # W3/b3 are lane-padded to a multiple of 128 -> dense (unmasked) final store.
        o_ref[...] = (jnp.dot(h.astype(mm_dtype), w3_ref[...],
                              preferred_element_type=jnp.float32) + b3_ref[...])
    return kernel


# ---------------------------------------------------------------------------
# Wrappers around pallas_call
# ---------------------------------------------------------------------------
def fused_bilstm(x2d, T, NB, H, layer_params, mm_dtype):
    """x2d: (T*NB, D) flattened time-major input. Returns (hN, cN), each (2L, NB, H)."""
    num_layers = len(layer_params)
    flat_w = [w for p in layer_params for w in p]
    out_shape = (jax.ShapeDtypeStruct((2 * num_layers, NB, H), jnp.float32),
                 jax.ShapeDtypeStruct((2 * num_layers, NB, H), jnp.float32))
    # TODO(synk): for very long T, stream the time axis with a grid + BlockSpecs
    # (double-buffered x DMA / per-chunk projection) so VMEM stays O(1) in T — this
    # matters most on v7x's 64 MiB VMEM.
    # TODO(synk): on v7x, a grid=(2,) "parallel" dimension over the two batch halves
    # (x1 on TC0, x2 on TC1) would use both TensorCores; omitted because it would
    # serialize the halves on single-TC v5e/v6e.
    return pl.pallas_call(
        _make_fused_bilstm_kernel(num_layers, T, H, mm_dtype),
        out_shape=out_shape,
        in_specs=[_VMEM] * (1 + len(flat_w)),
        out_specs=(_VMEM, _VMEM),
        scratch_shapes=[
            pltpu.VMEM((T * NB, 8 * H), jnp.float32),   # merged fwd|bwd input projection
            pltpu.VMEM((T * NB, H), mm_dtype),          # per-step fwd outputs (next layer)
            pltpu.VMEM((T * NB, H), mm_dtype),          # per-step bwd outputs (next layer)
            pltpu.VMEM((NB, H), jnp.float32),           # h fwd
            pltpu.VMEM((NB, H), jnp.float32),           # c fwd
            pltpu.VMEM((NB, H), jnp.float32),           # h bwd
            pltpu.VMEM((NB, H), jnp.float32),           # c bwd
        ],
        compiler_params=_compiler_params(),
    )(x2d, *flat_w)


def classification_head(h1f, h1b, h2f, h2b, head_params, mm_dtype):
    w1a, w1b, b1, w2, b2, w3p, b3p = head_params
    Bp = h1f.shape[0]
    Op = w3p.shape[1]
    return pl.pallas_call(
        _make_head_kernel(mm_dtype),
        out_shape=jax.ShapeDtypeStruct((Bp, Op), jnp.float32),
        in_specs=[_VMEM] * 11,
        out_specs=_VMEM,
        compiler_params=_compiler_params(),
    )(h1f, h1b, h2f, h2b, w1a, w1b, b1, w2, b2, w3p, b3p)


# ---------------------------------------------------------------------------
# Model
# ---------------------------------------------------------------------------
class ModelMaxBiLSTMPallas:
    def __init__(self, input_dim, lstm_num_hidden, lstm_num_layers, output_dim,
                 key, pad_packed=False, matmul_dtype=jnp.float32):
        self.input_dim = input_dim
        self.H = lstm_num_hidden
        self.num_layers = lstm_num_layers
        self.output_dim = output_dim
        self.pad_packed = pad_packed
        self.mm_dtype = matmul_dtype

        # Raw parameters in PyTorch layout (kept for the reference self-check).
        keys = iter(jax.random.split(key, 8 * lstm_num_layers * 2 + 6))
        k_lstm = 1.0 / math.sqrt(lstm_num_hidden)
        self.lstm_params = {}
        for layer in range(lstm_num_layers):
            in_dim = input_dim if layer == 0 else 2 * lstm_num_hidden
            for direction in range(2):
                w_ih = jax.random.uniform(next(keys), (4 * lstm_num_hidden, in_dim),
                                          jnp.float32, -k_lstm, k_lstm)
                w_hh = jax.random.uniform(next(keys), (4 * lstm_num_hidden, lstm_num_hidden),
                                          jnp.float32, -k_lstm, k_lstm)
                b_ih = jax.random.uniform(next(keys), (4 * lstm_num_hidden,),
                                          jnp.float32, -k_lstm, k_lstm)
                b_hh = jax.random.uniform(next(keys), (4 * lstm_num_hidden,),
                                          jnp.float32, -k_lstm, k_lstm)
                self.lstm_params[(layer, direction)] = (w_ih, w_hh, b_ih, b_hh)

        def linear(key, out_f, in_f):
            k = 1.0 / math.sqrt(in_f)
            kw, kb = jax.random.split(key)
            return (jax.random.uniform(kw, (out_f, in_f), jnp.float32, -k, k),
                    jax.random.uniform(kb, (out_f,), jnp.float32, -k, k))

        W1, b1 = linear(next(keys), 512, 2 * lstm_num_hidden)
        W2, b2 = linear(next(keys), 512, 512)
        W3, b3 = linear(next(keys), output_dim, 512)
        self.cls_params = (W1, b1, W2, b2, W3, b3)

        # Kernel-layout parameters (computed ONCE at init): pre-transposed, fwd|bwd
        # input weights merged along lanes, biases pre-summed, optional bf16 cast.
        H = lstm_num_hidden
        md = matmul_dtype
        self.layer_params = []
        for layer in range(lstm_num_layers):
            w_ih_f, w_hh_f, b_ih_f, b_hh_f = self.lstm_params[(layer, 0)]
            w_ih_b, w_hh_b, b_ih_b, b_hh_b = self.lstm_params[(layer, 1)]
            wih_cat = jnp.concatenate([w_ih_f.T, w_ih_b.T], axis=1).astype(md)   # (D, 8H)
            bias_cat = jnp.concatenate([b_ih_f + b_hh_f,
                                        b_ih_b + b_hh_b]).reshape(1, -1)          # (1, 8H)
            self.layer_params.append((wih_cat,
                                      w_hh_f.T.astype(md),        # (H, 4H)
                                      w_hh_b.T.astype(md),        # (H, 4H)
                                      bias_cat))
        Op = _round_up(max(output_dim, 1), 128)                   # lane-dense final store
        W3p = jnp.zeros((512, Op), jnp.float32).at[:, :output_dim].set(W3.T)
        b3p = jnp.zeros((1, Op), jnp.float32).at[0, :output_dim].set(b3)
        self.head_params = (W1[:, :H].T.astype(md),               # (H, 512)
                            W1[:, H:].T.astype(md),               # (H, 512)
                            b1.reshape(1, -1),
                            W2.T.astype(md), b2.reshape(1, -1),
                            W3p.astype(md), b3p)

    # ------------------------------------------------------------------
    def _run_lstm(self, x):
        """x: (T, Bb, D). Returns padded (hN, cN), each (2L, round_up(Bb,8), H)."""
        T, Bb, D = x.shape
        Bp = _round_up(Bb, 8)
        if Bp != Bb:
            x = jnp.pad(x, ((0, 0), (0, Bp - Bb), (0, 0)))
        x2d = x.reshape(T * Bp, D).astype(self.mm_dtype)
        return fused_bilstm(x2d, T, Bp, self.H, self.layer_params, self.mm_dtype)

    def forward(self, x1, x2, x1_lens=None, x2_lens=None,
                hidden_state1=None, hidden_state2=None):
        # TODO(synk): pad_packed=True path (length sorting + pack_padded_sequence) not
        # implemented; this reproduces the pad_packed=False branch, in which x*_lens and
        # the supplied hidden states are unused (nn.LSTM starts from a zero state).
        B = x1.shape[1]
        if x1.shape == x2.shape:
            # x1/x2 share LSTM weights -> run them as ONE stacked stream through a single
            # fused multi-layer kernel (1 LSTM launch + 1 head launch per forward).
            T, _, D = x1.shape
            Bp = _round_up(B, 8)
            pad = ((0, 0), (0, Bp - B), (0, 0))
            xs = jnp.concatenate([jnp.pad(x1, pad), jnp.pad(x2, pad)], axis=1)
            x2d = xs.reshape(T * 2 * Bp, D).astype(self.mm_dtype)
            hN, cN = fused_bilstm(x2d, T, 2 * Bp, self.H, self.layer_params, self.mm_dtype)
            h1p, c1p = hN[:, :Bp], cN[:, :Bp]
            h2p, c2p = hN[:, Bp:], cN[:, Bp:]
        else:
            h1p, c1p = self._run_lstm(x1)
            h2p, c2p = self._run_lstm(x2)
        # Head runs on the padded (sublane-aligned) batch rows; slice to B only at the end.
        # PyTorch code uses h[0], h[1] (= layer-0 fwd/bwd final states) for the head.
        out_p = classification_head(h1p[0], h1p[1], h2p[0], h2p[1],
                                    self.head_params, self.mm_dtype)
        out = out_p[:B, :self.output_dim]
        h1, c1 = h1p[:, :B], c1p[:, :B]
        h2, c2 = h2p[:, :B], c2p[:, :B]
        return out, (h1, c1), (h2, c2)


# ---------------------------------------------------------------------------
# Pure-JAX reference (for a correctness self-check)
# ---------------------------------------------------------------------------
def _ref_lstm_dir(x, w_ih, w_hh, b_ih, b_hh):
    H = w_hh.shape[1]
    B = x.shape[1]

    def step(carry, x_t):
        h, c = carry
        gates = x_t @ w_ih.T + h @ w_hh.T + b_ih + b_hh
        i = jax.nn.sigmoid(gates[:, 0:H])
        f = jax.nn.sigmoid(gates[:, H:2 * H])
        g = jnp.tanh(gates[:, 2 * H:3 * H])
        o = jax.nn.sigmoid(gates[:, 3 * H:4 * H])
        c = f * c + i * g
        h = o * jnp.tanh(c)
        return (h, c), h

    (h, c), outs = lax.scan(step, (jnp.zeros((B, H)), jnp.zeros((B, H))), x)
    return outs, h, c


def _ref_forward(model, x1, x2):
    def run(x):
        inp = x
        hs, cs = [], []
        for layer in range(model.num_layers):
            of, hf, cf = _ref_lstm_dir(inp, *model.lstm_params[(layer, 0)])
            ob_r, hb, cb = _ref_lstm_dir(inp[::-1], *model.lstm_params[(layer, 1)])
            inp = jnp.concatenate([of, ob_r[::-1]], axis=-1)
            hs += [hf, hb]
            cs += [cf, cb]
        return jnp.stack(hs, 0), jnp.stack(cs, 0)

    h1, c1 = run(x1)
    h2, c2 = run(x2)
    out1 = jnp.maximum(h1[0], h1[1])
    out2 = jnp.maximum(h2[0], h2[1])
    x = jnp.concatenate([out1, out2], axis=1)
    W1, b1, W2, b2, W3, b3 = model.cls_params
    x = x @ W1.T + b1
    x = x @ W2.T + b2
    x = x @ W3.T + b3
    return x, (h1, c1), (h2, c2)


# ---------------------------------------------------------------------------
if __name__ == "__main__":
    T, B = 8, 2
    input_dim, H, num_layers, output_dim = 16, 32, 2, 3

    key = jax.random.PRNGKey(0)
    k_model, k_x1, k_x2 = jax.random.split(key, 3)

    x1 = jax.random.normal(k_x1, (T, B, input_dim), jnp.float32)
    x2 = jax.random.normal(k_x2, (T, B, input_dim), jnp.float32)
    x1_lens = jnp.full((B,), T, jnp.int32)            # unused in pad_packed=False branch
    x2_lens = jnp.full((B,), T, jnp.int32)            # unused
    hidden_state1 = (jnp.zeros((2 * num_layers, B, H)), jnp.zeros((2 * num_layers, B, H)))
    hidden_state2 = (jnp.zeros((2 * num_layers, B, H)), jnp.zeros((2 * num_layers, B, H)))

    # ---- float32 MXU inputs: exact parity with the f32 reference ----
    model = ModelMaxBiLSTMPallas(input_dim, H, num_layers, output_dim,
                                 key=k_model, pad_packed=False)

    @jax.jit
    def run(a, b):
        return model.forward(a, b, x1_lens, x2_lens, hidden_state1, hidden_state2)

    out, (h1, c1), (h2, c2) = run(x1, x2)
    jax.block_until_ready((out, h1, c1, h2, c2))

    out_r, (h1_r, c1_r), (h2_r, c2_r) = _ref_forward(model, x1, x2)
    for a, b in [(out, out_r), (h1, h1_r), (c1, c1_r), (h2, h2_r), (c2, c2_r)]:
        assert a.shape == b.shape, "shape mismatch vs reference"
        assert jnp.allclose(a, b, atol=1e-4, rtol=1e-4), "f32 mismatch vs reference"

    # ---- bfloat16 MXU inputs (f32 accumulation / gates / cell state): looser check ----
    model_bf16 = ModelMaxBiLSTMPallas(input_dim, H, num_layers, output_dim,
                                      key=k_model, pad_packed=False,
                                      matmul_dtype=jnp.bfloat16)

    @jax.jit
    def run_bf16(a, b):
        return model_bf16.forward(a, b, x1_lens, x2_lens, hidden_state1, hidden_state2)

    out_b, (h1_b, c1_b), (h2_b, c2_b) = run_bf16(x1, x2)
    jax.block_until_ready((out_b, h1_b, c1_b, h2_b, c2_b))
    for a, b in [(out_b, out_r), (h1_b, h1_r), (c1_b, c1_r), (h2_b, h2_r), (c2_b, c2_r)]:
        assert a.shape == b.shape, "shape mismatch vs reference (bf16)"
        assert jnp.allclose(a, b, atol=1e-1), "bf16 mismatch vs reference"

    print("KERNEL_OK")
</pallas_src>

<mosaic_0001>
module attributes {stable_mosaic.version = 11 : i64} {
  func.func @kernel(%arg0: memref<128x16xf32, #tpu.memory_space<vmem>>, %arg1: memref<16x256xf32, #tpu.memory_space<vmem>>, %arg2: memref<32x128xf32, #tpu.memory_space<vmem>>, %arg3: memref<32x128xf32, #tpu.memory_space<vmem>>, %arg4: memref<1x256xf32, #tpu.memory_space<vmem>>, %arg5: memref<64x256xf32, #tpu.memory_space<vmem>>, %arg6: memref<32x128xf32, #tpu.memory_space<vmem>>, %arg7: memref<32x128xf32, #tpu.memory_space<vmem>>, %arg8: memref<1x256xf32, #tpu.memory_space<vmem>>, %arg9: memref<4x16x32xf32, #tpu.memory_space<vmem>>, %arg10: memref<4x16x32xf32, #tpu.memory_space<vmem>>, %arg11: memref<128x256xf32, #tpu.memory_space<vmem>>, %arg12: memref<128x32xf32, #tpu.memory_space<vmem>>, %arg13: memref<128x32xf32, #tpu.memory_space<vmem>>, %arg14: memref<16x32xf32, #tpu.memory_space<vmem>>, %arg15: memref<16x32xf32, #tpu.memory_space<vmem>>, %arg16: memref<16x32xf32, #tpu.memory_space<vmem>>, %arg17: memref<16x32xf32, #tpu.memory_space<vmem>>) attributes {dimension_semantics = [], scalar_prefetch = 0 : i64, scratch_operands = 7 : i64, tpu.core_type = #tpu.core_type<tc>} {
    %c0 = arith.constant 0 : index
    %c0_0 = arith.constant 0 : index
    %0 = vector.load %arg0[%c0, %c0_0] : memref<128x16xf32, #tpu.memory_space<vmem>>, vector<128x16xf32>
    %c0_1 = arith.constant 0 : index
    %c0_2 = arith.constant 0 : index
    %1 = vector.load %arg1[%c0_1, %c0_2] : memref<16x256xf32, #tpu.memory_space<vmem>>, vector<16x256xf32>
    %cst = arith.constant dense<0.000000e+00> : vector<128x256xf32>
    %2 = tpu.matmul %0, %1, %cst {dimension_numbers = #tpu.dot_dimension_numbers<[1], [0], [0], [1], [0, 0, 1, 1], [], []>} : vector<128x16xf32>, vector<16x256xf32>, vector<128x256xf32> -> vector<128x256xf32>
    %c0_3 = arith.constant 0 : index
    %c0_4 = arith.constant 0 : index
    %3 = vector.load %arg4[%c0_3, %c0_4] : memref<1x256xf32, #tpu.memory_space<vmem>>, vector<1x256xf32>
    %4 = vector.broadcast %3 : vector<1x256xf32> to vector<128x256xf32>
    %5 = arith.addf %2, %4 : vector<128x256xf32>
    %c0_5 = arith.constant 0 : index
    %c0_6 = arith.constant 0 : index
    %6 = vector.load %arg11[%c0_5, %c0_6] : memref<128x256xf32, #tpu.memory_space<vmem>>, vector<128x256xf32>
    tpu.vector_store %arg11[%c0_5, %c0_6], %5 {strides = array<i32>} : memref<128x256xf32, #tpu.memory_space<vmem>>, vector<128x256xf32>,
    %cst_7 = arith.constant 0.000000e+00 : f32
    %7 = vector.broadcast %cst_7 : f32 to vector<16x32xf32>
    %c0_8 = arith.constant 0 : index
    %c0_9 = arith.constant 0 : index
    %8 = vector.load %arg14[%c0_8, %c0_9] : memref<16x32xf32, #tpu.memory_space<vmem>>, vector<16x32xf32>
    tpu.vector_store %arg14[%c0_8, %c0_9], %7 {strides = array<i32>} : memref<16x32xf32, #tpu.memory_space<vmem>>, vector<16x32xf32>,
    %cst_10 = arith.constant 0.000000e+00 : f32
    %9 = vector.broadcast %cst_10 : f32 to vector<16x32xf32>
    %c0_11 = arith.constant 0 : index
    %c0_12 = arith.constant 0 : index
    %10 = vector.load %arg15[%c0_11, %c0_12] : memref<16x32xf32, #tpu.memory_space<vmem>>, vector<16x32xf32>
    tpu.vector_store %arg15[%c0_11, %c0_12], %9 {strides = array<i32>} : memref<16x32xf32, #tpu.memory_space<vmem>>, vector<16x32xf32>,
    %cst_13 = arith.constant 0.000000e+00 : f32
    %11 = vector.broadcast %cst_13 : f32 to vector<16x32xf32>
    %c0_14 = arith.constant 0 : index
    %c0_15 = arith.constant 0 : index
    %12 = vector.load %arg16[%c0_14, %c0_15] : memref<16x32xf32, #tpu.memory_space<vmem>>, vector<16x32xf32>
    tpu.vector_store %arg16[%c0_14, %c0_15], %11 {strides = array<i32>} : memref<16x32xf32, #tpu.memory_space<vmem>>, vector<16x32xf32>,
    %cst_16 = arith.constant 0.000000e+00 : f32
    %13 = vector.broadcast %cst_16 : f32 to vector<16x32xf32>
    %c0_17 = arith.constant 0 : index
    %c0_18 = arith.constant 0 : index
    %14 = vector.load %arg17[%c0_17, %c0_18] : memref<16x32xf32, #tpu.memory_space<vmem>>, vector<16x32xf32>
    tpu.vector_store %arg17[%c0_17, %c0_18], %13 {strides = array<i32>} : memref<16x32xf32, #tpu.memory_space<vmem>>, vector<16x32xf32>,
    %c0_i32 = arith.constant 0 : i32
    %c16_i32 = arith.constant 16 : i32
    %15 = arith.muli %c0_i32, %c16_i32 : i32
    %16 = tpu.assume_multiple %15, 16 : i32
    %c7_i32 = arith.constant 7 : i32
    %17 = arith.subi %c7_i32, %c0_i32 : i32
    %c16_i32_19 = arith.constant 16 : i32
    %18 = arith.muli %17, %c16_i32_19 : i32
    %19 = tpu.assume_multiple %18, 16 : i32
    %20 = arith.index_cast %16 : i32 to index
    %c0_20 = arith.constant 0 : index
    %21 = vector.load %arg11[%20, %c0_20] : memref<128x256xf32, #tpu.memory_space<vmem>>, vector<16x128xf32>
    %c0_21 = arith.constant 0 : index
    %c0_22 = arith.constant 0 : index
    %22 = vector.load %arg14[%c0_21, %c0_22] : memref<16x32xf32, #tpu.memory_space<vmem>>, vector<16x32xf32>
    %c0_23 = arith.constant 0 : index
    %c0_24 = arith.constant 0 : index
    %23 = vector.load %arg2[%c0_23, %c0_24] : memref<32x128xf32, #tpu.memory_space<vmem>>, vector<32x128xf32>
    %cst_25 = arith.constant dense<0.000000e+00> : vector<16x128xf32>
    %24 = tpu.matmul %22, %23, %cst_25 {dimension_numbers = #tpu.dot_dimension_numbers<[1], [0], [0], [1], [0, 0, 1, 1], [], []>} : vector<16x32xf32>, vector<32x128xf32>, vector<16x128xf32> -> vector<16x128xf32>
    %25 = arith.addf %21, %24 : vector<16x128xf32>
    %26 = arith.index_cast %19 : i32 to index
    %c128 = arith.constant 128 : index
    %27 = vector.load %arg11[%26, %c128] : memref<128x256xf32, #tpu.memory_space<vmem>>, vector<16x128xf32>
    %c0_26 = arith.constant 0 : index
    %c0_27 = arith.constant 0 : index
    %28 = vector.load %arg16[%c0_26, %c0_27] : memref<16x32xf32, #tpu.memory_space<vmem>>, vector<16x32xf32>
    %c0_28 = arith.constant 0 : index
    %c0_29 = arith.constant 0 : index
    %29 = vector.load %arg3[%c0_28, %c0_29] : memref<32x128xf32, #tpu.memory_space<vmem>>, vector<32x128xf32>
    %cst_30 = arith.constant dense<0.000000e+00> : vector<16x128xf32>
    %30 = tpu.matmul %28, %29, %cst_30 {dimension_numbers = #tpu.dot_dimension_numbers<[1], [0], [0], [1], [0, 0, 1, 1], [], []>} : vector<16x32xf32>, vector<32x128xf32>, vector<16x128xf32> -> vector<16x128xf32>
    %31 = arith.addf %27, %30 : vector<16x128xf32>
    %c0_31 = arith.constant 0 : index
    %c0_32 = arith.constant 0 : index
    %32 = vector.load %arg15[%c0_31, %c0_32] : memref<16x32xf32, #tpu.memory_space<vmem>>, vector<16x32xf32>
    %33 = vector.extract_strided_slice %25 {offsets = [0, 0], sizes = [16, 32], strides = [1, 1]} : vector<16x128xf32> to vector<16x32xf32>
    %34 = arith.negf %33 : vector<16x32xf32>
    %35 = math.exp %34 : vector<16x32xf32>
    %cst_33 = arith.constant 1.000000e+00 : f32
    %36 = vector.broadcast %cst_33 : f32 to vector<16x32xf32>
    %37 = arith.addf %36, %35 : vector<16x32xf32>
    %38 = arith.divf %36, %37 : vector<16x32xf32>
    %39 = vector.extract_strided_slice %25 {offsets = [0, 32], sizes = [16, 32], strides = [1, 1]} : vector<16x128xf32> to vector<16x32xf32>
    %40 = arith.negf %39 : vector<16x32xf32>
    %41 = math.exp %40 : vector<16x32xf32>
    %cst_34 = arith.constant 1.000000e+00 : f32
    %42 = vector.broadcast %cst_34 : f32 to vector<16x32xf32>
    %43 = arith.addf %42, %41 : vector<16x32xf32>
    %44 = arith.divf %42, %43 : vector<16x32xf32>
    %45 = vector.extract_strided_slice %25 {offsets = [0, 64], sizes = [16, 32], strides = [1, 1]} : vector<16x128xf32> to vector<16x32xf32>
    %46 = math.tanh %45 : vector<16x32xf32>
    %47 = vector.extract_strided_slice %25 {offsets = [0, 96], sizes = [16, 32], strides = [1, 1]} : vector<16x128xf32> to vector<16x32xf32>
    %48 = arith.negf %47 : vector<16x32xf32>
    %49 = math.exp %48 : vector<16x32xf32>
    %cst_35 = arith.constant 1.000000e+00 : f32
    %50 = vector.broadcast %cst_35 : f32 to vector<16x32xf32>
    %51 = arith.addf %50, %49 : vector<16x32xf32>
    %52 = arith.divf %50, %51 : vector<16x32xf32>
    %53 = arith.mulf %44, %32 : vector<16x32xf32>
    %54 = arith.mulf %38, %46 : vector<16x32xf32>
    %55 = arith.addf %53, %54 : vector<16x32xf32>
    %56 = math.tanh %55 : vector<16x32xf32>
    %57 = arith.mulf %52, %56 : vector<16x32xf32>
    %c0_36 = arith.constant 0 : index
    %c0_37 = arith.constant 0 : index
    %58 = vector.load %arg17[%c0_36, %c0_37] : memref<16x32xf32, #tpu.memory_space<vmem>>, vector<16x32xf32>
    %59 = vector.extract_strided_slice %31 {offsets = [0, 0], sizes = [16, 32], strides = [1, 1]} : vector<16x128xf32> to vector<16x32xf32>
    %60 = arith.negf %59 : vector<16x32xf32>
    %61 = math.exp %60 : vector<16x32xf32>
    %cst_38 = arith.constant 1.000000e+00 : f32
    %62 = vector.broadcast %cst_38 : f32 to vector<16x32xf32>
    %63 = arith.addf %62, %61 : vector<16x32xf32>
    %64 = arith.divf %62, %63 : vector<16x32xf32>
    %65 = vector.extract_strided_slice %31 {offsets = [0, 32], sizes = [16, 32], strides = [1, 1]} : vector<16x128xf32> to vector<16x32xf32>
    %66 = arith.negf %65 : vector<16x32xf32>
    %67 = math.exp %66 : vector<16x32xf32>
    %cst_39 = arith.constant 1.000000e+00 : f32
    %68 = vector.broadcast %cst_39 : f32 to vector<16x32xf32>
    %69 = arith.addf %68, %67 : vector<16x32xf32>
    %70 = arith.divf %68, %69 : vector<16x32xf32>
    %71 = vector.extract_strided_slice %31 {offsets = [0, 64], sizes = [16, 32], strides = [1, 1]} : vector<16x128xf32> to vector<16x32xf32>
    %72 = math.tanh %71 : vector<16x32xf32>
    %73 = vector.extract_strided_slice %31 {offsets = [0, 96], sizes = [16, 32], strides = [1, 1]} : vector<16x128xf32> to vector<16x32xf32>
    %74 = arith.negf %73 : vector<16x32xf32>
    %75 = math.exp %74 : vector<16x32xf32>
    %cst_40 = arith.constant 1.000000e+00 : f32
    %76 = vector.broadcast %cst_40 : f32 to vector<16x32xf32>
    %77 = arith.addf %76, %75 : vector<16x32xf32>
    %78 = arith.divf %76, %77 : vector<16x32xf32>
    %79 = arith.mulf %70, %58 : vector<16x32xf32>
    %80 = arith.mulf %64, %72 : vector<16x32xf32>
    %81 = arith.addf %79, %80 : vector<16x32xf32>
    %82 = math.tanh %81 : vector<16x32xf32>
    %83 = arith.mulf %78, %82 : vector<16x32xf32>
    %c0_41 = arith.constant 0 : index
    %c0_42 = arith.constant 0 : index
    %84 = vector.load %arg14[%c0_41, %c0_42] : memref<16x32xf32, #tpu.memory_space<vmem>>, vector<16x32xf32>
    tpu.vector_store %arg14[%c0_41, %c0_42], %57 {strides = array<i32>} : memref<16x32xf32, #tpu.memory_space<vmem>>, vector<16x32xf32>,
    %c0_43 = arith.constant 0 : index
    %c0_44 = arith.constant 0 : index
    %85 = vector.load %arg15[%c0_43, %c0_44] : memref<16x32xf32, #tpu.memory_space<vmem>>, vector<16x32xf32>
    tpu.vector_store %arg15[%c0_43, %c0_44], %55 {strides = array<i32>} : memref<16x32xf32, #tpu.memory_space<vmem>>, vector<16x32xf32>,
    %c0_45 = arith.constant 0 : index
    %c0_46 = arith.constant 0 : index
    %86 = vector.load %arg16[%c0_45, %c0_46] : memref<16x32xf32, #tpu.memory_space<vmem>>, vector<16x32xf32>
    tpu.vector_store %arg16[%c0_45, %c0_46], %83 {strides = array<i32>} : memref<16x32xf32, #tpu.memory_space<vmem>>, vector<16x32xf32>,
    %c0_47 = arith.constant 0 : index
    %c0_48 = arith.constant 0 : index
    %87 = vector.load %arg17[%c0_47, %c0_48] : memref<16x32xf32, #tpu.memory_space<vmem>>, vector<16x32xf32>
    tpu.vector_store %arg17[%c0_47, %c0_48], %81 {strides = array<i32>} : memref<16x32xf32, #tpu.memory_space<vmem>>, vector<16x32xf32>,
    %88 = arith.index_cast %16 : i32 to index
    %c0_49 = arith.constant 0 : index
    %89 = vector.load %arg12[%88, %c0_49] : memref<128x32xf32, #tpu.memory_space<vmem>>, vector<16x32xf32>
    tpu.vector_store %arg12[%88, %c0_49], %57 {strides = array<i32>} : memref<128x32xf32, #tpu.memory_space<vmem>>, vector<16x32xf32>,
    %90 = arith.index_cast %19 : i32 to index
    %c0_50 = arith.constant 0 : index
    %91 = vector.load %arg13[%90, %c0_50] : memref<128x32xf32, #tpu.memory_space<vmem>>, vector<16x32xf32>
    tpu.vector_store %arg13[%90, %c0_50], %83 {strides = array<i32>} : memref<128x32xf32, #tpu.memory_space<vmem>>, vector<16x32xf32>,
    %c1_i32 = arith.constant 1 : i32
    %c16_i32_51 = arith.constant 16 : i32
    %92 = arith.muli %c1_i32, %c16_i32_51 : i32
    %93 = tpu.assume_multiple %92, 16 : i32
    %c7_i32_52 = arith.constant 7 : i32
    %94 = arith.subi %c7_i32_52, %c1_i32 : i32
    %c16_i32_53 = arith.constant 16 : i32
    %95 = arith.muli %94, %c16_i32_53 : i32
    %96 = tpu.assume_multiple %95, 16 : i32
    %97 = arith.index_cast %93 : i32 to index
    %c0_54 = arith.constant 0 : index
    %98 = vector.load %arg11[%97, %c0_54] : memref<128x256xf32, #tpu.memory_space<vmem>>, vector<16x128xf32>
    %c0_55 = arith.constant 0 : index
    %c0_56 = arith.constant 0 : index
    %99 = vector.load %arg14[%c0_55, %c0_56] : memref<16x32xf32, #tpu.memory_space<vmem>>, vector<16x32xf32>
    %c0_57 = arith.constant 0 : index
    %c0_58 = arith.constant 0 : index
    %100 = vector.load %arg2[%c0_57, %c0_58] : memref<32x128xf32, #tpu.memory_space<vmem>>, vector<32x128xf32>
    %cst_59 = arith.constant dense<0.000000e+00> : vector<16x128xf32>
    %101 = tpu.matmul %99, %100, %cst_59 {dimension_numbers = #tpu.dot_dimension_numbers<[1], [0], [0], [1], [0, 0, 1, 1], [], []>} : vector<16x32xf32>, vector<32x128xf32>, vector<16x128xf32> -> vector<16x128xf32>
    %102 = arith.addf %98, %101 : vector<16x128xf32>
    %103 = arith.index_cast %96 : i32 to index
    %c128_60 = arith.constant 128 : index
    %104 = vector.load %arg11[%103, %c128_60] : memref<128x256xf32, #tpu.memory_space<vmem>>, vector<16x128xf32>
    %c0_61 = arith.constant 0 : index
    %c0_62 = arith.constant 0 : index
    %105 = vector.load %arg16[%c0_61, %c0_62] : memref<16x32xf32, #tpu.memory_space<vmem>>, vector<16x32xf32>
    %c0_63 = arith.constant 0 : index
    %c0_64 = arith.constant 0 : index
    %106 = vector.load %arg3[%c0_63, %c0_64] : memref<32x128xf32, #tpu.memory_space<vmem>>, vector<32x128xf32>
    %cst_65 = arith.constant dense<0.000000e+00> : vector<16x128xf32>
    %107 = tpu.matmul %105, %106, %cst_65 {dimension_numbers = #tpu.dot_dimension_numbers<[1], [0], [0], [1], [0, 0, 1, 1], [], []>} : vector<16x32xf32>, vector<32x128xf32>, vector<16x128xf32> -> vector<16x128xf32>
    %108 = arith.addf %104, %107 : vector<16x128xf32>
    %c0_66 = arith.constant 0 : index
    %c0_67 = arith.constant 0 : index
    %109 = vector.load %arg15[%c0_66, %c0_67] : memref<16x32xf32, #tpu.memory_space<vmem>>, vector<16x32xf32>
    %110 = vector.extract_strided_slice %102 {offsets = [0, 0], sizes = [16, 32], strides = [1, 1]} : vector<16x128xf32> to vector<16x32xf32>
    %111 = arith.negf %110 : vector<16x32xf32>
    %112 = math.exp %111 : vector<16x32xf32>
    %cst_68 = arith.constant 1.000000e+00 : f32
    %113 = vector.broadcast %cst_68 : f32 to vector<16x32xf32>
    %114 = arith.addf %113, %112 : vector<16x32xf32>
    %115 = arith.divf %113, %114 : vector<16x32xf32>
    %116 = vector.extract_strided_slice %102 {offsets = [0, 32], sizes = [16, 32], strides = [1, 1]} : vector<16x128xf32> to vector<16x32xf32>
    %117 = arith.negf %116 : vector<16x32xf32>
    %118 = math.exp %117 : vector<16x32xf32>
    %cst_69 = arith.constant 1.000000e+00 : f32
    %119 = vector.broadcast %cst_69 : f32 to vector<16x32xf32>
    %120 = arith.addf %119, %118 : vector<16x32xf32>
    %121 = arith.divf %119, %120 : vector<16x32xf32>
    %122 = vector.extract_strided_slice %102 {offsets = [0, 64], sizes = [16, 32], strides = [1, 1]} : vector<16x128xf32> to vector<16x32xf32>
    %123 = math.tanh %122 : vector<16x32xf32>
    %124 = vector.extract_strided_slice %102 {offsets = [0, 96], sizes = [16, 32], strides = [1, 1]} : vector<16x128xf32> to vector<16x32xf32>
    %125 = arith.negf %124 : vector<16x32xf32>
    %126 = math.exp %125 : vector<16x32xf32>
    %cst_70 = arith.constant 1.000000e+00 : f32
    %127 = vector.broadcast %cst_70 : f32 to vector<16x32xf32>
    %128 = arith.addf %127, %126 : vector<16x32xf32>
    %129 = arith.divf %127, %128 : vector<16x32xf32>
    %130 = arith.mulf %121, %109 : vector<16x32xf32>
    %131 = arith.mulf %115, %123 : vector<16x32xf32>
    %132 = arith.addf %130, %131 : vector<16x32xf32>
    %133 = math.tanh %132 : vector<16x32xf32>
    %134 = arith.mulf %129, %133 : vector<16x32xf32>
    %c0_71 = arith.constant 0 : index
    %c0_72 = arith.constant 0 : index
    %135 = vector.load %arg17[%c0_71, %c0_72] : memref<16x32xf32, #tpu.memory_space<vmem>>, vector<16x32xf32>
    %136 = vector.extract_strided_slice %108 {offsets = [0, 0], sizes = [16, 32], strides = [1, 1]} : vector<16x128xf32> to vector<16x32xf32>
    %137 = arith.negf %136 : vector<16x32xf32>
    %138 = math.exp %137 : vector<16x32xf32>
    %cst_73 = arith.constant 1.000000e+00 : f32
    %139 = vector.broadcast %cst_73 : f32 to vector<16x32xf32>
    %140 = arith.addf %139, %138 : vector<16x32xf32>
    %141 = arith.divf %139, %140 : vector<16x32xf32>
    %142 = vector.extract_strided_slice %108 {offsets = [0, 32], sizes = [16, 32], strides = [1, 1]} : vector<16x128xf32> to vector<16x32xf32>
    %143 = arith.negf %142 : vector<16x32xf32>
    %144 = math.exp %143 : vector<16x32xf32>
    %cst_74 = arith.constant 1.000000e+00 : f32
    %145 = vector.broadcast %cst_74 : f32 to vector<16x32xf32>
    %146 = arith.addf %145, %144 : vector<16x32xf32>
    %147 = arith.divf %145, %146 : vector<16x32xf32>
    %148 = vector.extract_strided_slice %108 {offsets = [0, 64], sizes = [16, 32], strides = [1, 1]} : vector<16x128xf32> to vector<16x32xf32>
    %149 = math.tanh %148 : vector<16x32xf32>
    %150 = vector.extract_strided_slice %108 {offsets = [0, 96], sizes = [16, 32], strides = [1, 1]} : vector<16x128xf32> to vector<16x32xf32>
    %151 = arith.negf %150 : vector<16x32xf32>
    %152 = math.exp %151 : vector<16x32xf32>
    %cst_75 = arith.constant 1.000000e+00 : f32
    %153 = vector.broadcast %cst_75 : f32 to vector<16x32xf32>
    %154 = arith.addf %153, %152 : vector<16x32xf32>
    %155 = arith.divf %153, %154 : vector<16x32xf32>
    %156 = arith.mulf %147, %135 : vector<16x32xf32>
    %157 = arith.mulf %141, %149 : vector<16x32xf32>
    %158 = arith.addf %156, %157 : vector<16x32xf32>
    %159 = math.tanh %158 : vector<16x32xf32>
    %160 = arith.mulf %155, %159 : vector<16x32xf32>
    %c0_76 = arith.constant 0 : index
    %c0_77 = arith.constant 0 : index
    %161 = vector.load %arg14[%c0_76, %c0_77] : memref<16x32xf32, #tpu.memory_space<vmem>>, vector<16x32xf32>
    tpu.vector_store %arg14[%c0_76, %c0_77], %134 {strides = array<i32>} : memref<16x32xf32, #tpu.memory_space<vmem>>, vector<16x32xf32>,
    %c0_78 = arith.constant 0 : index
    %c0_79 = arith.constant 0 : index
    %162 = vector.load %arg15[%c0_78, %c0_79] : memref<16x32xf32, #tpu.memory_space<vmem>>, vector<16x32xf32>
    tpu.vector_store %arg15[%c0_78, %c0_79], %132 {strides = array<i32>} : memref<16x32xf32, #tpu.memory_space<vmem>>, vector<16x32xf32>,
    %c0_80 = arith.constant 0 : index
    %c0_81 = arith.constant 0 : index
    %163 = vector.load %arg16[%c0_80, %c0_81] : memref<16x32xf32, #tpu.memory_space<vmem>>, vector<16x32xf32>
    tpu.vector_store %arg16[%c0_80, %c0_81], %160 {strides = array<i32>} : memref<16x32xf32, #tpu.memory_space<vmem>>, vector<16x32xf32>,
    %c0_82 = arith.constant 0 : index
    %c0_83 = arith.constant 0 : index
    %164 = vector.load %arg17[%c0_82, %c0_83] : memref<16x32xf32, #tpu.memory_space<vmem>>, vector<16x32xf32>
    tpu.vector_store %arg17[%c0_82, %c0_83], %158 {strides = array<i32>} : memref<16x32xf32, #tpu.memory_space<vmem>>, vector<16x32xf32>,
    %165 = arith.index_cast %93 : i32 to index
    %c0_84 = arith.constant 0 : index
    %166 = vector.load %arg12[%165, %c0_84] : memref<128x32xf32, #tpu.memory_space<vmem>>, vector<16x32xf32>
    tpu.vector_store %arg12[%165, %c0_84], %134 {strides = array<i32>} : memref<128x32xf32, #tpu.memory_space<vmem>>, vector<16x32xf32>,
    %167 = arith.index_cast %96 : i32 to index
    %c0_85 = arith.constant 0 : index
    %168 = vector.load %arg13[%167, %c0_85] : memref<128x32xf32, #tpu.memory_space<vmem>>, vector<16x32xf32>
    tpu.vector_store %arg13[%167, %c0_85], %160 {strides = array<i32>} : memref<128x32xf32, #tpu.memory_space<vmem>>, vector<16x32xf32>,
    %c2_i32 = arith.constant 2 : i32
    %c16_i32_86 = arith.constant 16 : i32
    %169 = arith.muli %c2_i32, %c16_i32_86 : i32
    %170 = tpu.assume_multiple %169, 16 : i32
    %c7_i32_87 = arith.constant 7 : i32
    %171 = arith.subi %c7_i32_87, %c2_i32 : i32
    %c16_i32_88 = arith.constant 16 : i32
    %172 = arith.muli %171, %c16_i32_88 : i32
    %173 = tpu.assume_multiple %172, 16 : i32
    %174 = arith.index_cast %170 : i32 to index
    %c0_89 = arith.constant 0 : index
    %175 = vector.load %arg11[%174, %c0_89] : memref<128x256xf32, #tpu.memory_space<vmem>>, vector<16x128xf32>
    %c0_90 = arith.constant 0 : index
    %c0_91 = arith.constant 0 : index
    %176 = vector.load %arg14[%c0_90, %c0_91] : memref<16x32xf32, #tpu.memory_space<vmem>>, vector<16x32xf32>
    %c0_92 = arith.constant 0 : index
    %c0_93 = arith.constant 0 : index
    %177 = vector.load %arg2[%c0_92, %c0_93] : memref<32x128xf32, #tpu.memory_space<vmem>>, vector<32x128xf32>
    %cst_94 = arith.constant dense<0.000000e+00> : vector<16x128xf32>
    %178 = tpu.matmul %176, %177, %cst_94 {dimension_numbers = #tpu.dot_dimension_numbers<[1], [0], [0], [1], [0, 0, 1, 1], [], []>} : vector<16x32xf32>, vector<32x128xf32>, vector<16x128xf32> -> vector<16x128xf32>
    %179 = arith.addf %175, %178 : vector<16x128xf32>
    %180 = arith.index_cast %173 : i32 to index
    %c128_95 = arith.constant 128 : index
    %181 = vector.load %arg11[%180, %c128_95] : memref<128x256xf32, #tpu.memory_space<vmem>>, vector<16x128xf32>
    %c0_96 = arith.constant 0 : index
    %c0_97 = arith.constant 0 : index
    %182 = vector.load %arg16[%c0_96, %c0_97] : memref<16x32xf32, #tpu.memory_space<vmem>>, vector<16x32xf32>
    %c0_98 = arith.constant 0 : index
    %c0_99 = arith.constant 0 : index
    %183 = vector.load %arg3[%c0_98, %c0_99] : memref<32x128xf32, #tpu.memory_space<vmem>>, vector<32x128xf32>
    %cst_100 = arith.constant dense<0.000000e+00> : vector<16x128xf32>
    %184 = tpu.matmul %182, %183, %cst_100 {dimension_numbers = #tpu.dot_dimension_numbers<[1], [0], [0], [1], [0, 0, 1, 1], [], []>} : vector<16x32xf32>, vector<32x128xf32>, vector<16x128xf32> -> vector<16x128xf32>
    %185 = arith.addf %181, %184 : vector<16x128xf32>
    %c0_101 = arith.constant 0 : index
    %c0_102 = arith.constant 0 : index
    %186 = vector.load %arg15[%c0_101, %c0_102] : memref<16x32xf32, #tpu.memory_space<vmem>>, vector<16x32xf32>
    %187 = vector.extract_strided_slice %179 {offsets = [0, 0], sizes = [16, 32], strides = [1, 1]} : vector<16x128xf32> to vector<16x32xf32>
    %188 = arith.negf %187 : vector<16x32xf32>
    %189 = math.exp %188 : vector<16x32xf32>
    %cst_103 = arith.constant 1.000000e+00 : f32
    %190 = vector.broadcast %cst_103 : f32 to vector<16x32xf32>
    %191 = arith.addf %190, %189 : vector<16x32xf32>
    %192 = arith.divf %190, %191 : vector<16x32xf32>
    %193 = vector.extract_strided_slice %179 {offsets = [0, 32], sizes = [16, 32], strides = [1, 1]} : vector<16x128xf32> to vector<16x32xf32>
    %194 = arith.negf %193 : vector<16x32xf32>
    %195 = math.exp %194 : vector<16x32xf32>
    %cst_104 = arith.constant 1.000000e+00 : f32
    %196 = vector.broadcast %cst_104 : f32 to vector<16x32xf32>
    %197 = arith.addf %196, %195 : vector<16x32xf32>
    %198 = arith.divf %196, %197 : vector<16x32xf32>
    %199 = vector.extract_strided_slice %179 {offsets = [0, 64], sizes = [16, 32], strides = [1, 1]} : vector<16x128xf32> to vector<16x32xf32>
    %200 = math.tanh %199 : vector<16x32xf32>
    %201 = vector.extract_strided_slice %179 {offsets = [0, 96], sizes = [16, 32], strides = [1, 1]} : vector<16x128xf32> to vector<16x32xf32>
    %202 = arith.negf %201 : vector<16x32xf32>
    %203 = math.exp %202 : vector<16x32xf32>
    %cst_105 = arith.constant 1.000000e+00 : f32
    %204 = vector.broadcast %cst_105 : f32 to vector<16x32xf32>
    %205 = arith.addf %204, %203 : vector<16x32xf32>
    %206 = arith.divf %204, %205 : vector<16x32xf32>
    %207 = arith.mulf %198, %186 : vector<16x32xf32>
    %208 = arith.mulf %192, %200 : vector<16x32xf32>
    %209 = arith.addf %207, %208 : vector<16x32xf32>
    %210 = math.tanh %209 : vector<16x32xf32>
    %211 = arith.mulf %206, %210 : vector<16x32xf32>
    %c0_106 = arith.constant 0 : index
    %c0_107 = arith.constant 0 : index
    %212 = vector.load %arg17[%c0_106, %c0_107] : memref<16x32xf32, #tpu.memory_space<vmem>>, vector<16x32xf32>
    %213 = vector.extract_strided_slice %185 {offsets = [0, 0], sizes = [16, 32], strides = [1, 1]} : vector<16x128xf32> to vector<16x32xf32>
    %214 = arith.negf %213 : vector<16x32xf32>
    %215 = math.exp %214 : vector<16x32xf32>
    %cst_108 = arith.constant 1.000000e+00 : f32
    %216 = vector.broadcast %cst_108 : f32 to vector<16x32xf32>
    %217 = arith.addf %216, %215 : vector<16x32xf32>
    %218 = arith.divf %216, %217 : vector<16x32xf32>
    %219 = vector.extract_strided_slice %185 {offsets = [0, 32], sizes = [16, 32], strides = [1, 1]} : vector<16x128xf32> to vector<16x32xf32>
    %220 = arith.negf %219 : vector<16x32xf32>
    %221 = math.exp %220 : vector<16x32xf32>
    %cst_109 = arith.constant 1.000000e+00 : f32
    %222 = vector.broadcast %cst_109 : f32 to vector<16x32xf32>
    %223 = arith.addf %222, %221 : vector<16x32xf32>
    %224 = arith.divf %222, %223 : vector<16x32xf32>
    %225 = vector.extract_strided_slice %185 {offsets = [0, 64], sizes = [16, 32], strides = [1, 1]} : vector<16x128xf32> to vector<16x32xf32>
    %226 = math.tanh %225 : vector<16x32xf32>
    %227 = vector.extract_strided_slice %185 {offsets = [0, 96], sizes = [16, 32], strides = [1, 1]} : vector<16x128xf32> to vector<16x32xf32>
    %228 = arith.negf %227 : vector<16x32xf32>
    %229 = math.exp %228 : vector<16x32xf32>
    %cst_110 = arith.constant 1.000000e+00 : f32
    %230 = vector.broadcast %cst_110 : f32 to vector<16x32xf32>
    %231 = arith.addf %230, %229 : vector<16x32xf32>
    %232 = arith.divf %230, %231 : vector<16x32xf32>
    %233 = arith.mulf %224, %212 : vector<16x32xf32>
    %234 = arith.mulf %218, %226 : vector<16x32xf32>
    %235 = arith.addf %233, %234 : vector<16x32xf32>
    %236 = math.tanh %235 : vector<16x32xf32>
    %237 = arith.mulf %232, %236 : vector<16x32xf32>
    %c0_111 = arith.constant 0 : index
    %c0_112 = arith.constant 0 : index
    %238 = vector.load %arg14[%c0_111, %c0_112] : memref<16x32xf32, #tpu.memory_space<vmem>>, vector<16x32xf32>
    tpu.vector_store %arg14[%c0_111, %c0_112], %211 {strides = array<i32>} : memref<16x32xf32, #tpu.memory_space<vmem>>, vector<16x32xf32>,
    %c0_113 = arith.constant 0 : index
    %c0_114 = arith.constant 0 : index
    %239 = vector.load %arg15[%c0_113, %c0_114] : memref<16x32xf32, #tpu.memory_space<vmem>>, vector<16x32xf32>
    tpu.vector_store %arg15[%c0_113, %c0_114], %209 {strides = array<i32>} : memref<16x32xf32, #tpu.memory_space<vmem>>, vector<16x32xf32>,
    %c0_115 = arith.constant 0 : index
    %c0_116 = arith.constant 0 : index
    %240 = vector.load %arg16[%c0_115, %c0_116] : memref<16x32xf32, #tpu.memory_space<vmem>>, vector<16x32xf32>
    tpu.vector_store %arg16[%c0_115, %c0_116], %237 {strides = array<i32>} : memref<16x32xf32, #tpu.memory_space<vmem>>, vector<16x32xf32>,
    %c0_117 = arith.constant 0 : index
    %c0_118 = arith.constant 0 : index
    %241 = vector.load %arg17[%c0_117, %c0_118] : memref<16x32xf32, #tpu.memory_space<vmem>>, vector<16x32xf32>
    tpu.vector_store %arg17[%c0_117, %c0_118], %235 {strides = array<i32>} : memref<16x32xf32, #tpu.memory_space<vmem>>, vector<16x32xf32>,
    %242 = arith.index_cast %170 : i32 to index
    %c0_119 = arith.constant 0 : index
    %243 = vector.load %arg12[%242, %c0_119] : memref<128x32xf32, #tpu.memory_space<vmem>>, vector<16x32xf32>
    tpu.vector_store %arg12[%242, %c0_119], %211 {strides = array<i32>} : memref<128x32xf32, #tpu.memory_space<vmem>>, vector<16x32xf32>,
    %244 = arith.index_cast %173 : i32 to index
    %c0_120 = arith.constant 0 : index
    %245 = vector.load %arg13[%244, %c0_120] : memref<128x32xf32, #tpu.memory_space<vmem>>, vector<16x32xf32>
    tpu.vector_store %arg13[%244, %c0_120], %237 {strides = array<i32>} : memref<128x32xf32, #tpu.memory_space<vmem>>, vector<16x32xf32>,
    %c3_i32 = arith.constant 3 : i32
    %c16_i32_121 = arith.constant 16 : i32
    %246 = arith.muli %c3_i32, %c16_i32_121 : i32
    %247 = tpu.assume_multiple %246, 16 : i32
    %c7_i32_122 = arith.constant 7 : i32
    %248 = arith.subi %c7_i32_122, %c3_i32 : i32
    %c16_i32_123 = arith.constant 16 : i32
    %249 = arith.muli %248, %c16_i32_123 : i32
    %250 = tpu.assume_multiple %249, 16 : i32
    %251 = arith.index_cast %247 : i32 to index
    %c0_124 = arith.constant 0 : index
    %252 = vector.load %arg11[%251, %c0_124] : memref<128x256xf32, #tpu.memory_space<vmem>>, vector<16x128xf32>
    %c0_125 = arith.constant 0 : index
    %c0_126 = arith.constant 0 : index
    %253 = vector.load %arg14[%c0_125, %c0_126] : memref<16x32xf32, #tpu.memory_space<vmem>>, vector<16x32xf32>
    %c0_127 = arith.constant 0 : index
    %c0_128 = arith.constant 0 : index
    %254 = vector.load %arg2[%c0_127, %c0_128] : memref<32x128xf32, #tpu.memory_space<vmem>>, vector<32x128xf32>
    %cst_129 = arith.constant dense<0.000000e+00> : vector<16x128xf32>
    %255 = tpu.matmul %253, %254, %cst_129 {dimension_numbers = #tpu.dot_dimension_numbers<[1], [0], [0], [1], [0, 0, 1, 1], [], []>} : vector<16x32xf32>, vector<32x128xf32>, vector<16x128xf32> -> vector<16x128xf32>
    %256 = arith.addf %252, %255 : vector<16x128xf32>
    %257 = arith.index_cast %250 : i32 to index
    %c128_130 = arith.constant 128 : index
    %258 = vector.load %arg11[%257, %c128_130] : memref<128x256xf32, #tpu.memory_space<vmem>>, vector<16x128xf32>
    %c0_131 = arith.constant 0 : index
    %c0_132 = arith.constant 0 : index
    %259 = vector.load %arg16[%c0_131, %c0_132] : memref<16x32xf32, #tpu.memory_space<vmem>>, vector<16x32xf32>
    %c0_133 = arith.constant 0 : index
    %c0_134 = arith.constant 0 : index
    %260 = vector.load %arg3[%c0_133, %c0_134] : memref<32x128xf32, #tpu.memory_space<vmem>>, vector<32x128xf32>
    %cst_135 = arith.constant dense<0.000000e+00> : vector<16x128xf32>
    %261 = tpu.matmul %259, %260, %cst_135 {dimension_numbers = #tpu.dot_dimension_numbers<[1], [0], [0], [1], [0, 0, 1, 1], [], []>} : vector<16x32xf32>, vector<32x128xf32>, vector<16x128xf32> -> vector<16x128xf32>
    %262 = arith.addf %258, %261 : vector<16x128xf32>
    %c0_136 = arith.constant 0 : index
    %c0_137 = arith.constant 0 : index
    %263 = vector.load %arg15[%c0_136, %c0_137] : memref<16x32xf32, #tpu.memory_space<vmem>>, vector<16x32xf32>
    %264 = vector.extract_strided_slice %256 {offsets = [0, 0], sizes = [16, 32], strides = [1, 1]} : vector<16x128xf32> to vector<16x32xf32>
    %265 = arith.negf %264 : vector<16x32xf32>
    %266 = math.exp %265 : vector<16x32xf32>
    %cst_138 = arith.constant 1.000000e+00 : f32
    %267 = vector.broadcast %cst_138 : f32 to vector<16x32xf32>
    %268 = arith.addf %267, %266 : vector<16x32xf32>
    %269 = arith.divf %267, %268 : vector<16x32xf32>
    %270 = vector.extract_strided_slice %256 {offsets = [0, 32], sizes = [16, 32], strides = [1, 1]} : vector<16x128xf32> to vector<16x32xf32>
    %271 = arith.negf %270 : vector<16x32xf32>
    %272 = math.exp %271 : vector<16x32xf32>
    %cst_139 = arith.constant 1.000000e+00 : f32
    %273 = vector.broadcast %cst_139 : f32 to vector<16x32xf32>
    %274 = arith.addf %273, %272 : vector<16x32xf32>
    %275 = arith.divf %273, %274 : vector<16x32xf32>
    %276 = vector.extract_strided_slice %256 {offsets = [0, 64], sizes = [16, 32], strides = [1, 1]} : vector<16x128xf32> to vector<16x32xf32>
    %277 = math.tanh %276 : vector<16x32xf32>
    %278 = vector.extract_strided_slice %256 {offsets = [0, 96], sizes = [16, 32], strides = [1, 1]} : vector<16x128xf32> to vector<16x32xf32>
    %279 = arith.negf %278 : vector<16x32xf32>
    %280 = math.exp %279 : vector<16x32xf32>
    %cst_140 = arith.constant 1.000000e+00 : f32
    %281 = vector.broadcast %cst_140 : f32 to vector<16x32xf32>
    %282 = arith.addf %281, %280 : vector<16x32xf32>
    %283 = arith.divf %281, %282 : vector<16x32xf32>
    %284 = arith.mulf %275, %263 : vector<16x32xf32>
    %285 = arith.mulf %269, %277 : vector<16x32xf32>
    %286 = arith.addf %284, %285 : vector<16x32xf32>
    %287 = math.tanh %286 : vector<16x32xf32>
    %288 = arith.mulf %283, %287 : vector<16x32xf32>
    %c0_141 = arith.constant 0 : index
    %c0_142 = arith.constant 0 : index
    %289 = vector.load %arg17[%c0_141, %c0_142] : memref<16x32xf32, #tpu.memory_space<vmem>>, vector<16x32xf32>
    %290 = vector.extract_strided_slice %262 {offsets = [0, 0], sizes = [16, 32], strides = [1, 1]} : vector<16x128xf32> to vector<16x32xf32>
    %291 = arith.negf %290 : vector<16x32xf32>
    %292 = math.exp %291 : vector<16x32xf32>
    %cst_143 = arith.constant 1.000000e+00 : f32
    %293 = vector.broadcast %cst_143 : f32 to vector<16x32xf32>
    %294 = arith.addf %293, %292 : vector<16x32xf32>
    %295 = arith.divf %293, %294 : vector<16x32xf32>
    %296 = vector.extract_strided_slice %262 {offsets = [0, 32], sizes = [16, 32], strides = [1, 1]} : vector<16x128xf32> to vector<16x32xf32>
    %297 = arith.negf %296 : vector<16x32xf32>
    %298 = math.exp %297 : vector<16x32xf32>
    %cst_144 = arith.constant 1.000000e+00 : f32
    %299 = vector.broadcast %cst_144 : f32 to vector<16x32xf32>
    %300 = arith.addf %299, %298 : vector<16x32xf32>
    %301 = arith.divf %299, %300 : vector<16x32xf32>
    %302 = vector.extract_strided_slice %262 {offsets = [0, 64], sizes = [16, 32], strides = [1, 1]} : vector<16x128xf32> to vector<16x32xf32>
    %303 = math.tanh %302 : vector<16x32xf32>
    %304 = vector.extract_strided_slice %262 {offsets = [0, 96], sizes = [16, 32], strides = [1, 1]} : vector<16x128xf32> to vector<16x32xf32>
    %305 = arith.negf %304 : vector<16x32xf32>
    %306 = math.exp %305 : vector<16x32xf32>
    %cst_145 = arith.constant 1.000000e+00 : f32
    %307 = vector.broadcast %cst_145 : f32 to vector<16x32xf32>
    %308 = arith.addf %307, %306 : vector<16x32xf32>
    %309 = arith.divf %307, %308 : vector<16x32xf32>
    %310 = arith.mulf %301, %289 : vector<16x32xf32>
    %311 = arith.mulf %295, %303 : vector<16x32xf32>
    %312 = arith.addf %310, %311 : vector<16x32xf32>
    %313 = math.tanh %312 : vector<16x32xf32>
    %314 = arith.mulf %309, %313 : vector<16x32xf32>
    %c0_146 = arith.constant 0 : index
    %c0_147 = arith.constant 0 : index
    %315 = vector.load %arg14[%c0_146, %c0_147] : memref<16x32xf32, #tpu.memory_space<vmem>>, vector<16x32xf32>
    tpu.vector_store %arg14[%c0_146, %c0_147], %288 {strides = array<i32>} : memref<16x32xf32, #tpu.memory_space<vmem>>, vector<16x32xf32>,
    %c0_148 = arith.constant 0 : index
    %c0_149 = arith.constant 0 : index
    %316 = vector.load %arg15[%c0_148, %c0_149] : memref<16x32xf32, #tpu.memory_space<vmem>>, vector<16x32xf32>
    tpu.vector_store %arg15[%c0_148, %c0_149], %286 {strides = array<i32>} : memref<16x32xf32, #tpu.memory_space<vmem>>, vector<16x32xf32>,
    %c0_150 = arith.constant 0 : index
    %c0_151 = arith.constant 0 : index
    %317 = vector.load %arg16[%c0_150, %c0_151] : memref<16x32xf32, #tpu.memory_space<vmem>>, vector<16x32xf32>
    tpu.vector_store %arg16[%c0_150, %c0_151], %314 {strides = array<i32>} : memref<16x32xf32, #tpu.memory_space<vmem>>, vector<16x32xf32>,
    %c0_152 = arith.constant 0 : index
    %c0_153 = arith.constant 0 : index
    %318 = vector.load %arg17[%c0_152, %c0_153] : memref<16x32xf32, #tpu.memory_space<vmem>>, vector<16x32xf32>
    tpu.vector_store %arg17[%c0_152, %c0_153], %312 {strides = array<i32>} : memref<16x32xf32, #tpu.memory_space<vmem>>, vector<16x32xf32>,
    %319 = arith.index_cast %247 : i32 to index
    %c0_154 = arith.constant 0 : index
    %320 = vector.load %arg12[%319, %c0_154] : memref<128x32xf32, #tpu.memory_space<vmem>>, vector<16x32xf32>
    tpu.vector_store %arg12[%319, %c0_154], %288 {strides = array<i32>} : memref<128x32xf32, #tpu.memory_space<vmem>>, vector<16x32xf32>,
    %321 = arith.index_cast %250 : i32 to index
    %c0_155 = arith.constant 0 : index
    %322 = vector.load %arg13[%321, %c0_155] : memref<128x32xf32, #tpu.memory_space<vmem>>, vector<16x32xf32>
    tpu.vector_store %arg13[%321, %c0_155], %314 {strides = array<i32>} : memref<128x32xf32, #tpu.memory_space<vmem>>, vector<16x32xf32>,
    %c4_i32 = arith.constant 4 : i32
    %c16_i32_156 = arith.constant 16 : i32
    %323 = arith.muli %c4_i32, %c16_i32_156 : i32
    %324 = tpu.assume_multiple %323, 16 : i32
    %c7_i32_157 = arith.constant 7 : i32
    %325 = arith.subi %c7_i32_157, %c4_i32 : i32
    %c16_i32_158 = arith.constant 16 : i32
    %326 = arith.muli %325, %c16_i32_158 : i32
    %327 = tpu.assume_multiple %326, 16 : i32
    %328 = arith.index_cast %324 : i32 to index
    %c0_159 = arith.constant 0 : index
    %329 = vector.load %arg11[%328, %c0_159] : memref<128x256xf32, #tpu.memory_space<vmem>>, vector<16x128xf32>
    %c0_160 = arith.constant 0 : index
    %c0_161 = arith.constant 0 : index
    %330 = vector.load %arg14[%c0_160, %c0_161] : memref<16x32xf32, #tpu.memory_space<vmem>>, vector<16x32xf32>
    %c0_162 = arith.constant 0 : index
    %c0_163 = arith.constant 0 : index
    %331 = vector.load %arg2[%c0_162, %c0_163] : memref<32x128xf32, #tpu.memory_space<vmem>>, vector<32x128xf32>
    %cst_164 = arith.constant dense<0.000000e+00> : vector<16x128xf32>
    %332 = tpu.matmul %330, %331, %cst_164 {dimension_numbers = #tpu.dot_dimension_numbers<[1], [0], [0], [1], [0, 0, 1, 1], [], []>} : vector<16x32xf32>, vector<32x128xf32>, vector<16x128xf32> -> vector<16x128xf32>
    %333 = arith.addf %329, %332 : vector<16x128xf32>
    %334 = arith.index_cast %327 : i32 to index
    %c128_165 = arith.constant 128 : index
    %335 = vector.load %arg11[%334, %c128_165] : memref<128x256xf32, #tpu.memory_space<vmem>>, vector<16x128xf32>
    %c0_166 = arith.constant 0 : index
    %c0_167 = arith.constant 0 : index
    %336 = vector.load %arg16[%c0_166, %c0_167] : memref<16x32xf32, #tpu.memory_space<vmem>>, vector<16x32xf32>
    %c0_168 = arith.constant 0 : index
    %c0_169 = arith.constant 0 : index
    %337 = vector.load %arg3[%c0_168, %c0_169] : memref<32x128xf32, #tpu.memory_space<vmem>>, vector<32x128xf32>
    %cst_170 = arith.constant dense<0.000000e+00> : vector<16x128xf32>
    %338 = tpu.matmul %336, %337, %cst_170 {dimension_numbers = #tpu.dot_dimension_numbers<[1], [0], [0], [1], [0, 0, 1, 1], [], []>} : vector<16x32xf32>, vector<32x128xf32>, vector<16x128xf32> -> vector<16x128xf32>
    %339 = arith.addf %335, %338 : vector<16x128xf32>
    %c0_171 = arith.constant 0 : index
    %c0_172 = arith.constant 0 : index
    %340 = vector.load %arg15[%c0_171, %c0_172] : memref<16x32xf32, #tpu.memory_space<vmem>>, vector<16x32xf32>
    %341 = vector.extract_strided_slice %333 {offsets = [0, 0], sizes = [16, 32], strides = [1, 1]} : vector<16x128xf32> to vector<16x32xf32>
    %342 = arith.negf %341 : vector<16x32xf32>
    %343 = math.exp %342 : vector<16x32xf32>
    %cst_173 = arith.constant 1.000000e+00 : f32
    %344 = vector.broadcast %cst_173 : f32 to vector<16x32xf32>
    %345 = arith.addf %344, %343 : vector<16x32xf32>
    %346 = arith.divf %344, %345 : vector<16x32xf32>
    %347 = vector.extract_strided_slice %333 {offsets = [0, 32], sizes = [16, 32], strides = [1, 1]} : vector<16x128xf32> to vector<16x32xf32>
    %348 = arith.negf %347 : vector<16x32xf32>
    %349 = math.exp %348 : vector<16x32xf32>
    %cst_174 = arith.constant 1.000000e+00 : f32
    %350 = vector.broadcast %cst_174 : f32 to vector<16x32xf32>
    %351 = arith.addf %350, %349 : vector<16x32xf32>
    %352 = arith.divf %350, %351 : vector<16x32xf32>
    %353 = vector.extract_strided_slice %333 {offsets = [0, 64], sizes = [16, 32], strides = [1, 1]} : vector<16x128xf32> to vector<16x32xf32>
    %354 = math.tanh %353 : vector<16x32xf32>
    %355 = vector.extract_strided_slice %333 {offsets = [0, 96], sizes = [16, 32], strides = [1, 1]} : vector<16x128xf32> to vector<16x32xf32>
    %356 = arith.negf %355 : vector<16x32xf32>
    %357 = math.exp %356 : vector<16x32xf32>
    %cst_175 = arith.constant 1.000000e+00 : f32
    %358 = vector.broadcast %cst_175 : f32 to vector<16x32xf32>
    %359 = arith.addf %358, %357 : vector<16x32xf32>
    %360 = arith.divf %358, %359 : vector<16x32xf32>
    %361 = arith.mulf %352, %340 : vector<16x32xf32>
    %362 = arith.mulf %346, %354 : vector<16x32xf32>
    %363 = arith.addf %361, %362 : vector<16x32xf32>
    %364 = math.tanh %363 : vector<16x32xf32>
    %365 = arith.mulf %360, %364 : vector<16x32xf32>
    %c0_176 = arith.constant 0 : index
    %c0_177 = arith.constant 0 : index
    %366 = vector.load %arg17[%c0_176, %c0_177] : memref<16x32xf32, #tpu.memory_space<vmem>>, vector<16x32xf32>
    %367 = vector.extract_strided_slice %339 {offsets = [0, 0], sizes = [16, 32], strides = [1, 1]} : vector<16x128xf32> to vector<16x32xf32>
    %368 = arith.negf %367 : vector<16x32xf32>
    %369 = math.exp %368 : vector<16x32xf32>
    %cst_178 = arith.constant 1.000000e+00 : f32
    %370 = vector.broadcast %cst_178 : f32 to vector<16x32xf32>
    %371 = arith.addf %370, %369 : vector<16x32xf32>
    %372 = arith.divf %370, %371 : vector<16x32xf32>
    %373 = vector.extract_strided_slice %339 {offsets = [0, 32], sizes = [16, 32], strides = [1, 1]} : vector<16x128xf32> to vector<16x32xf32>
    %374 = arith.negf %373 : vector<16x32xf32>
    %375 = math.exp %374 : vector<16x32xf32>
    %cst_179 = arith.constant 1.000000e+00 : f32
    %376 = vector.broadcast %cst_179 : f32 to vector<16x32xf32>
    %377 = arith.addf %376, %375 : vector<16x32xf32>
    %378 = arith.divf %376, %377 : vector<16x32xf32>
    %379 = vector.extract_strided_slice %339 {offsets = [0, 64], sizes = [16, 32], strides = [1, 1]} : vector<16x128xf32> to vector<16x32xf32>
    %380 = math.tanh %379 : vector<16x32xf32>
    %381 = vector.extract_strided_slice %339 {offsets = [0, 96], sizes = [16, 32], strides = [1, 1]} : vector<16x128xf32> to vector<16x32xf32>
    %382 = arith.negf %381 : vector<16x32xf32>
    %383 = math.exp %382 : vector<16x32xf32>
    %cst_180 = arith.constant 1.000000e+00 : f32
    %384 = vector.broadcast %cst_180 : f32 to vector<16x32xf32>
    %385 = arith.addf %384, %383 : vector<16x32xf32>
    %386 = arith.divf %384, %385 : vector<16x32xf32>
    %387 = arith.mulf %378, %366 : vector<16x32xf32>
    %388 = arith.mulf %372, %380 : vector<16x32xf32>
    %389 = arith.addf %387, %388 : vector<16x32xf32>
    %390 = math.tanh %389 : vector<16x32xf32>
    %391 = arith.mulf %386, %390 : vector<16x32xf32>
    %c0_181 = arith.constant 0 : index
    %c0_182 = arith.constant 0 : index
    %392 = vector.load %arg14[%c0_181, %c0_182] : memref<16x32xf32, #tpu.memory_space<vmem>>, vector<16x32xf32>
    tpu.vector_store %arg14[%c0_181, %c0_182], %365 {strides = array<i32>} : memref<16x32xf32, #tpu.memory_space<vmem>>, vector<16x32xf32>,
    %c0_183 = arith.constant 0 : index
    %c0_184 = arith.constant 0 : index
    %393 = vector.load %arg15[%c0_183, %c0_184] : memref<16x32xf32, #tpu.memory_space<vmem>>, vector<16x32xf32>
    tpu.vector_store %arg15[%c0_183, %c0_184], %363 {strides = array<i32>} : memref<16x32xf32, #tpu.memory_space<vmem>>, vector<16x32xf32>,
    %c0_185 = arith.constant 0 : index
    %c0_186 = arith.constant 0 : index
    %394 = vector.load %arg16[%c0_185, %c0_186] : memref<16x32xf32, #tpu.memory_space<vmem>>, vector<16x32xf32>
    tpu.vector_store %arg16[%c0_185, %c0_186], %391 {strides = array<i32>} : memref<16x32xf32, #tpu.memory_space<vmem>>, vector<16x32xf32>,
    %c0_187 = arith.constant 0 : index
    %c0_188 = arith.constant 0 : index
    %395 = vector.load %arg17[%c0_187, %c0_188] : memref<16x32xf32, #tpu.memory_space<vmem>>, vector<16x32xf32>
    tpu.vector_store %arg17[%c0_187, %c0_188], %389 {strides = array<i32>} : memref<16x32xf32, #tpu.memory_space<vmem>>, vector<16x32xf32>,
    %396 = arith.index_cast %324 : i32 to index
    %c0_189 = arith.constant 0 : index
    %397 = vector.load %arg12[%396, %c0_189] : memref<128x32xf32, #tpu.memory_space<vmem>>, vector<16x32xf32>
    tpu.vector_store %arg12[%396, %c0_189], %365 {strides = array<i32>} : memref<128x32xf32, #tpu.memory_space<vmem>>, vector<16x32xf32>,
    %398 = arith.index_cast %327 : i32 to index
    %c0_190 = arith.constant 0 : index
    %399 = vector.load %arg13[%398, %c0_190] : memref<128x32xf32, #tpu.memory_space<vmem>>, vector<16x32xf32>
    tpu.vector_store %arg13[%398, %c0_190], %391 {strides = array<i32>} : memref<128x32xf32, #tpu.memory_space<vmem>>, vector<16x32xf32>,
    %c5_i32 = arith.constant 5 : i32
    %c16_i32_191 = arith.constant 16 : i32
    %400 = arith.muli %c5_i32, %c16_i32_191 : i32
    %401 = tpu.assume_multiple %400, 16 : i32
    %c7_i32_192 = arith.constant 7 : i32
    %402 = arith.subi %c7_i32_192, %c5_i32 : i32
    %c16_i32_193 = arith.constant 16 : i32
    %403 = arith.muli %402, %c16_i32_193 : i32
    %404 = tpu.assume_multiple %403, 16 : i32
    %405 = arith.index_cast %401 : i32 to index
    %c0_194 = arith.constant 0 : index
    %406 = vector.load %arg11[%405, %c0_194] : memref<128x256xf32, #tpu.memory_space<vmem>>, vector<16x128xf32>
    %c0_195 = arith.constant 0 : index
    %c0_196 = arith.constant 0 : index
    %407 = vector.load %arg14[%c0_195, %c0_196] : memref<16x32xf32, #tpu.memory_space<vmem>>, vector<16x32xf32>
    %c0_197 = arith.constant 0 : index
    %c0_198 = arith.constant 0 : index
    %408 = vector.load %arg2[%c0_197, %c0_198] : memref<32x128xf32, #tpu.memory_space<vmem>>, vector<32x128xf32>
    %cst_199 = arith.constant dense<0.000000e+00> : vector<16x128xf32>
    %409 = tpu.matmul %407, %408, %cst_199 {dimension_numbers = #tpu.dot_dimension_numbers<[1], [0], [0], [1], [0, 0, 1, 1], [], []>} : vector<16x32xf32>, vector<32x128xf32>, vector<16x128xf32> -> vector<16x128xf32>
    %410 = arith.addf %406, %409 : vector<16x128xf32>
    %411 = arith.index_cast %404 : i32 to index
    %c128_200 = arith.constant 128 : index
    %412 = vector.load %arg11[%411, %c128_200] : memref<128x256xf32, #tpu.memory_space<vmem>>, vector<16x128xf32>
    %c0_201 = arith.constant 0 : index
    %c0_202 = arith.constant 0 : index
    %413 = vector.load %arg16[%c0_201, %c0_202] : memref<16x32xf32, #tpu.memory_space<vmem>>, vector<16x32xf32>
    %c0_203 = arith.constant 0 : index
    %c0_204 = arith.constant 0 : index
    %414 = vector.load %arg3[%c0_203, %c0_204] : memref<32x128xf32, #tpu.memory_space<vmem>>, vector<32x128xf32>
    %cst_205 = arith.constant dense<0.000000e+00> : vector<16x128xf32>
    %415 = tpu.matmul %413, %414, %cst_205 {dimension_numbers = #tpu.dot_dimension_numbers<[1], [0], [0], [1], [0, 0, 1, 1], [], []>} : vector<16x32xf32>, vector<32x128xf32>, vector<16x128xf32> -> vector<16x128xf32>
    %416 = arith.addf %412, %415 : vector<16x128xf32>
    %c0_206 = arith.constant 0 : index
    %c0_207 = arith.constant 0 : index
    %417 = vector.load %arg15[%c0_206, %c0_207] : memref<16x32xf32, #tpu.memory_space<vmem>>, vector<16x32xf32>
    %418 = vector.extract_strided_slice %410 {offsets = [0, 0], sizes = [16, 32], strides = [1, 1]} : vector<16x128xf32> to vector<16x32xf32>
    %419 = arith.negf %418 : vector<16x32xf32>
    %420 = math.exp %419 : vector<16x32xf32>
    %cst_208 = arith.constant 1.000000e+00 : f32
    %421 = vector.broadcast %cst_208 : f32 to vector<16x32xf32>
    %422 = arith.addf %421, %420 : vector<16x32xf32>
    %423 = arith.divf %421, %422 : vector<16x32xf32>
    %424 = vector.extract_strided_slice %410 {offsets = [0, 32], sizes = [16, 32], strides = [1, 1]} : vector<16x128xf32> to vector<16x32xf32>
    %425 = arith.negf %424 : vector<16x32xf32>
    %426 = math.exp %425 : vector<16x32xf32>
    %cst_209 = arith.constant 1.000000e+00 : f32
    %427 = vector.broadcast %cst_209 : f32 to vector<16x32xf32>
    %428 = arith.addf %427, %426 : vector<16x32xf32>
    %429 = arith.divf %427, %428 : vector<16x32xf32>
    %430 = vector.extract_strided_slice %410 {offsets = [0, 64], sizes = [16, 32], strides = [1, 1]} : vector<16x128xf32> to vector<16x32xf32>
    %431 = math.tanh %430 : vector<16x32xf32>
    %432 = vector.extract_strided_slice %410 {offsets = [0, 96], sizes = [16, 32], strides = [1, 1]} : vector<16x128xf32> to vector<16x32xf32>
    %433 = arith.negf %432 : vector<16x32xf32>
    %434 = math.exp %433 : vector<16x32xf32>
    %cst_210 = arith.constant 1.000000e+00 : f32
    %435 = vector.broadcast %cst_210 : f32 to vector<16x32xf32>
    %436 = arith.addf %435, %434 : vector<16x32xf32>
    %437 = arith.divf %435, %436 : vector<16x32xf32>
    %438 = arith.mulf %429, %417 : vector<16x32xf32>
    %439 = arith.mulf %423, %431 : vector<16x32xf32>
    %440 = arith.addf %438, %439 : vector<16x32xf32>
    %441 = math.tanh %440 : vector<16x32xf32>
    %442 = arith.mulf %437, %441 : vector<16x32xf32>
    %c0_211 = arith.constant 0 : index
    %c0_212 = arith.constant 0 : index
    %443 = vector.load %arg17[%c0_211, %c0_212] : memref<16x32xf32, #tpu.memory_space<vmem>>, vector<16x32xf32>
    %444 = vector.extract_strided_slice %416 {offsets = [0, 0], sizes = [16, 32], strides = [1, 1]} : vector<16x128xf32> to vector<16x32xf32>
    %445 = arith.negf %444 : vector<16x32xf32>
    %446 = math.exp %445 : vector<16x32xf32>
    %cst_213 = arith.constant 1.000000e+00 : f32
    %447 = vector.broadcast %cst_213 : f32 to vector<16x32xf32>
    %448 = arith.addf %447, %446 : vector<16x32xf32>
    %449 = arith.divf %447, %448 : vector<16x32xf32>
    %450 = vector.extract_strided_slice %416 {offsets = [0, 32], sizes = [16, 32], strides = [1, 1]} : vector<16x128xf32> to vector<16x32xf32>
    %451 = arith.negf %450 : vector<16x32xf32>
    %452 = math.exp %451 : vector<16x32xf32>
    %cst_214 = arith.constant 1.000000e+00 : f32
    %453 = vector.broadcast %cst_214 : f32 to vector<16x32xf32>
    %454 = arith.addf %453, %452 : vector<16x32xf32>
    %455 = arith.divf %453, %454 : vector<16x32xf32>
    %456 = vector.extract_strided_slice %416 {offsets = [0, 64], sizes = [16, 32], strides = [1, 1]} : vector<16x128xf32> to vector<16x32xf32>
    %457 = math.tanh %456 : vector<16x32xf32>
    %458 = vector.extract_strided_slice %416 {offsets = [0, 96], sizes = [16, 32], strides = [1, 1]} : vector<16x128xf32> to vector<16x32xf32>
    %459 = arith.negf %458 : vector<16x32xf32>
    %460 = math.exp %459 : vector<16x32xf32>
    %cst_215 = arith.constant 1.000000e+00 : f32
    %461 = vector.broadcast %cst_215 : f32 to vector<16x32xf32>
    %462 = arith.addf %461, %460 : vector<16x32xf32>
    %463 = arith.divf %461, %462 : vector<16x32xf32>
    %464 = arith.mulf %455, %443 : vector<16x32xf32>
    %465 = arith.mulf %449, %457 : vector<16x32xf32>
    %466 = arith.addf %464, %465 : vector<16x32xf32>
    %467 = math.tanh %466 : vector<16x32xf32>
    %468 = arith.mulf %463, %467 : vector<16x32xf32>
    %c0_216 = arith.constant 0 : index
    %c0_217 = arith.constant 0 : index
    %469 = vector.load %arg14[%c0_216, %c0_217] : memref<16x32xf32, #tpu.memory_space<vmem>>, vector<16x32xf32>
    tpu.vector_store %arg14[%c0_216, %c0_217], %442 {strides = array<i32>} : memref<16x32xf32, #tpu.memory_space<vmem>>, vector<16x32xf32>,
    %c0_218 = arith.constant 0 : index
    %c0_219 = arith.constant 0 : index
    %470 = vector.load %arg15[%c0_218, %c0_219] : memref<16x32xf32, #tpu.memory_space<vmem>>, vector<16x32xf32>
    tpu.vector_store %arg15[%c0_218, %c0_219], %440 {strides = array<i32>} : memref<16x32xf32, #tpu.memory_space<vmem>>, vector<16x32xf32>,
    %c0_220 = arith.constant 0 : index
    %c0_221 = arith.constant 0 : index
    %471 = vector.load %arg16[%c0_220, %c0_221] : memref<16x32xf32, #tpu.memory_space<vmem>>, vector<16x32xf32>
    tpu.vector_store %arg16[%c0_220, %c0_221], %468 {strides = array<i32>} : memref<16x32xf32, #tpu.memory_space<vmem>>, vector<16x32xf32>,
    %c0_222 = arith.constant 0 : index
    %c0_223 = arith.constant 0 : index
    %472 = vector.load %arg17[%c0_222, %c0_223] : memref<16x32xf32, #tpu.memory_space<vmem>>, vector<16x32xf32>
    tpu.vector_store %arg17[%c0_222, %c0_223], %466 {strides = array<i32>} : memref<16x32xf32, #tpu.memory_space<vmem>>, vector<16x32xf32>,
    %473 = arith.index_cast %401 : i32 to index
    %c0_224 = arith.constant 0 : index
    %474 = vector.load %arg12[%473, %c0_224] : memref<128x32xf32, #tpu.memory_space<vmem>>, vector<16x32xf32>
    tpu.vector_store %arg12[%473, %c0_224], %442 {strides = array<i32>} : memref<128x32xf32, #tpu.memory_space<vmem>>, vector<16x32xf32>,
    %475 = arith.index_cast %404 : i32 to index
    %c0_225 = arith.constant 0 : index
    %476 = vector.load %arg13[%475, %c0_225] : memref<128x32xf32, #tpu.memory_space<vmem>>, vector<16x32xf32>
    tpu.vector_store %arg13[%475, %c0_225], %468 {strides = array<i32>} : memref<128x32xf32, #tpu.memory_space<vmem>>, vector<16x32xf32>,
    %c6_i32 = arith.constant 6 : i32
    %c16_i32_226 = arith.constant 16 : i32
    %477 = arith.muli %c6_i32, %c16_i32_226 : i32
    %478 = tpu.assume_multiple %477, 16 : i32
    %c7_i32_227 = arith.constant 7 : i32
    %479 = arith.subi %c7_i32_227, %c6_i32 : i32
    %c16_i32_228 = arith.constant 16 : i32
    %480 = arith.muli %479, %c16_i32_228 : i32
    %481 = tpu.assume_multiple %480, 16 : i32
    %482 = arith.index_cast %478 : i32 to index
    %c0_229 = arith.constant 0 : index
    %483 = vector.load %arg11[%482, %c0_229] : memref<128x256xf32, #tpu.memory_space<vmem>>, vector<16x128xf32>
    %c0_230 = arith.constant 0 : index
    %c0_231 = arith.constant 0 : index
    %484 = vector.load %arg14[%c0_230, %c0_231] : memref<16x32xf32, #tpu.memory_space<vmem>>, vector<16x32xf32>
    %c0_232 = arith.constant 0 : index
    %c0_233 = arith.constant 0 : index
    %485 = vector.load %arg2[%c0_232, %c0_233] : memref<32x128xf32, #tpu.memory_space<vmem>>, vector<32x128xf32>
    %cst_234 = arith.constant dense<0.000000e+00> : vector<16x128xf32>
    %486 = tpu.matmul %484, %485, %cst_234 {dimension_numbers = #tpu.dot_dimension_numbers<[1], [0], [0], [1], [0, 0, 1, 1], [], []>} : vector<16x32xf32>, vector<32x128xf32>, vector<16x128xf32> -> vector<16x128xf32>
    %487 = arith.addf %483, %486 : vector<16x128xf32>
    %488 = arith.index_cast %481 : i32 to index
    %c128_235 = arith.constant 128 : index
    %489 = vector.load %arg11[%488, %c128_235] : memref<128x256xf32, #tpu.memory_space<vmem>>, vector<16x128xf32>
    %c0_236 = arith.constant 0 : index
    %c0_237 = arith.constant 0 : index
    %490 = vector.load %arg16[%c0_236, %c0_237] : memref<16x32xf32, #tpu.memory_space<vmem>>, vector<16x32xf32>
    %c0_238 = arith.constant 0 : index
    %c0_239 = arith.constant 0 : index
    %491 = vector.load %arg3[%c0_238, %c0_239] : memref<32x128xf32, #tpu.memory_space<vmem>>, vector<32x128xf32>
    %cst_240 = arith.constant dense<0.000000e+00> : vector<16x128xf32>
    %492 = tpu.matmul %490, %491, %cst_240 {dimension_numbers = #tpu.dot_dimension_numbers<[1], [0], [0], [1], [0, 0, 1, 1], [], []>} : vector<16x32xf32>, vector<32x128xf32>, vector<16x128xf32> -> vector<16x128xf32>
    %493 = arith.addf %489, %492 : vector<16x128xf32>
    %c0_241 = arith.constant 0 : index
    %c0_242 = arith.constant 0 : index
    %494 = vector.load %arg15[%c0_241, %c0_242] : memref<16x32xf32, #tpu.memory_space<vmem>>, vector<16x32xf32>
    %495 = vector.extract_strided_slice %487 {offsets = [0, 0], sizes = [16, 32], strides = [1, 1]} : vector<16x128xf32> to vector<16x32xf32>
    %496 = arith.negf %495 : vector<16x32xf32>
    %497 = math.exp %496 : vector<16x32xf32>
    %cst_243 = arith.constant 1.000000e+00 : f32
    %498 = vector.broadcast %cst_243 : f32 to vector<16x32xf32>
    %499 = arith.addf %498, %497 : vector<16x32xf32>
    %500 = arith.divf %498, %499 : vector<16x32xf32>
    %501 = vector.extract_strided_slice %487 {offsets = [0, 32], sizes = [16, 32], strides = [1, 1]} : vector<16x128xf32> to vector<16x32xf32>
    %502 = arith.negf %501 : vector<16x32xf32>
    %503 = math.exp %502 : vector<16x32xf32>
    %cst_244 = arith.constant 1.000000e+00 : f32
    %504 = vector.broadcast %cst_244 : f32 to vector<16x32xf32>
    %505 = arith.addf %504, %503 : vector<16x32xf32>
    %506 = arith.divf %504, %505 : vector<16x32xf32>
    %507 = vector.extract_strided_slice %487 {offsets = [0, 64], sizes = [16, 32], strides = [1, 1]} : vector<16x128xf32> to vector<16x32xf32>
    %508 = math.tanh %507 : vector<16x32xf32>
    %509 = vector.extract_strided_slice %487 {offsets = [0, 96], sizes = [16, 32], strides = [1, 1]} : vector<16x128xf32> to vector<16x32xf32>
    %510 = arith.negf %509 : vector<16x32xf32>
    %511 = math.exp %510 : vector<16x32xf32>
    %cst_245 = arith.constant 1.000000e+00 : f32
    %512 = vector.broadcast %cst_245 : f32 to vector<16x32xf32>
    %513 = arith.addf %512, %511 : vector<16x32xf32>
    %514 = arith.divf %512, %513 : vector<16x32xf32>
    %515 = arith.mulf %506, %494 : vector<16x32xf32>
    %516 = arith.mulf %500, %508 : vector<16x32xf32>
    %517 = arith.addf %515, %516 : vector<16x32xf32>
    %518 = math.tanh %517 : vector<16x32xf32>
    %519 = arith.mulf %514, %518 : vector<16x32xf32>
    %c0_246 = arith.constant 0 : index
    %c0_247 = arith.constant 0 : index
    %520 = vector.load %arg17[%c0_246, %c0_247] : memref<16x32xf32, #tpu.memory_space<vmem>>, vector<16x32xf32>
    %521 = vector.extract_strided_slice %493 {offsets = [0, 0], sizes = [16, 32], strides = [1, 1]} : vector<16x128xf32> to vector<16x32xf32>
    %522 = arith.negf %521 : vector<16x32xf32>
    %523 = math.exp %522 : vector<16x32xf32>
    %cst_248 = arith.constant 1.000000e+00 : f32
    %524 = vector.broadcast %cst_248 : f32 to vector<16x32xf32>
    %525 = arith.addf %524, %523 : vector<16x32xf32>
    %526 = arith.divf %524, %525 : vector<16x32xf32>
    %527 = vector.extract_strided_slice %493 {offsets = [0, 32], sizes = [16, 32], strides = [1, 1]} : vector<16x128xf32> to vector<16x32xf32>
    %528 = arith.negf %527 : vector<16x32xf32>
    %529 = math.exp %528 : vector<16x32xf32>
    %cst_249 = arith.constant 1.000000e+00 : f32
    %530 = vector.broadcast %cst_249 : f32 to vector<16x32xf32>
    %531 = arith.addf %530, %529 : vector<16x32xf32>
    %532 = arith.divf %530, %531 : vector<16x32xf32>
    %533 = vector.extract_strided_slice %493 {offsets = [0, 64], sizes = [16, 32], strides = [1, 1]} : vector<16x128xf32> to vector<16x32xf32>
    %534 = math.tanh %533 : vector<16x32xf32>
    %535 = vector.extract_strided_slice %493 {offsets = [0, 96], sizes = [16, 32], strides = [1, 1]} : vector<16x128xf32> to vector<16x32xf32>
    %536 = arith.negf %535 : vector<16x32xf32>
    %537 = math.exp %536 : vector<16x32xf32>
    %cst_250 = arith.constant 1.000000e+00 : f32
    %538 = vector.broadcast %cst_250 : f32 to vector<16x32xf32>
    %539 = arith.addf %538, %537 : vector<16x32xf32>
    %540 = arith.divf %538, %539 : vector<16x32xf32>
    %541 = arith.mulf %532, %520 : vector<16x32xf32>
    %542 = arith.mulf %526, %534 : vector<16x32xf32>
    %543 = arith.addf %541, %542 : vector<16x32xf32>
    %544 = math.tanh %543 : vector<16x32xf32>
    %545 = arith.mulf %540, %544 : vector<16x32xf32>
    %c0_251 = arith.constant 0 : index
    %c0_252 = arith.constant 0 : index
    %546 = vector.load %arg14[%c0_251, %c0_252] : memref<16x32xf32, #tpu.memory_space<vmem>>, vector<16x32xf32>
    tpu.vector_store %arg14[%c0_251, %c0_252], %519 {strides = array<i32>} : memref<16x32xf32, #tpu.memory_space<vmem>>, vector<16x32xf32>,
    %c0_253 = arith.constant 0 : index
    %c0_254 = arith.constant 0 : index
    %547 = vector.load %arg15[%c0_253, %c0_254] : memref<16x32xf32, #tpu.memory_space<vmem>>, vector<16x32xf32>
    tpu.vector_store %arg15[%c0_253, %c0_254], %517 {strides = array<i32>} : memref<16x32xf32, #tpu.memory_space<vmem>>, vector<16x32xf32>,
    %c0_255 = arith.constant 0 : index
    %c0_256 = arith.constant 0 : index
    %548 = vector.load %arg16[%c0_255, %c0_256] : memref<16x32xf32, #tpu.memory_space<vmem>>, vector<16x32xf32>
    tpu.vector_store %arg16[%c0_255, %c0_256], %545 {strides = array<i32>} : memref<16x32xf32, #tpu.memory_space<vmem>>, vector<16x32xf32>,
    %c0_257 = arith.constant 0 : index
    %c0_258 = arith.constant 0 : index
    %549 = vector.load %arg17[%c0_257, %c0_258] : memref<16x32xf32, #tpu.memory_space<vmem>>, vector<16x32xf32>
    tpu.vector_store %arg17[%c0_257, %c0_258], %543 {strides = array<i32>} : memref<16x32xf32, #tpu.memory_space<vmem>>, vector<16x32xf32>,
    %550 = arith.index_cast %478 : i32 to index
    %c0_259 = arith.constant 0 : index
    %551 = vector.load %arg12[%550, %c0_259] : memref<128x32xf32, #tpu.memory_space<vmem>>, vector<16x32xf32>
    tpu.vector_store %arg12[%550, %c0_259], %519 {strides = array<i32>} : memref<128x32xf32, #tpu.memory_space<vmem>>, vector<16x32xf32>,
    %552 = arith.index_cast %481 : i32 to index
    %c0_260 = arith.constant 0 : index
    %553 = vector.load %arg13[%552, %c0_260] : memref<128x32xf32, #tpu.memory_space<vmem>>, vector<16x32xf32>
    tpu.vector_store %arg13[%552, %c0_260], %545 {strides = array<i32>} : memref<128x32xf32, #tpu.memory_space<vmem>>, vector<16x32xf32>,
    %c7_i32_261 = arith.constant 7 : i32
    %c16_i32_262 = arith.constant 16 : i32
    %554 = arith.muli %c7_i32_261, %c16_i32_262 : i32
    %555 = tpu.assume_multiple %554, 16 : i32
    %c7_i32_263 = arith.constant 7 : i32
    %556 = arith.subi %c7_i32_263, %c7_i32_261 : i32
    %c16_i32_264 = arith.constant 16 : i32
    %557 = arith.muli %556, %c16_i32_264 : i32
    %558 = tpu.assume_multiple %557, 16 : i32
    %559 = arith.index_cast %555 : i32 to index
    %c0_265 = arith.constant 0 : index
    %560 = vector.load %arg11[%559, %c0_265] : memref<128x256xf32, #tpu.memory_space<vmem>>, vector<16x128xf32>
    %c0_266 = arith.constant 0 : index
    %c0_267 = arith.constant 0 : index
    %561 = vector.load %arg14[%c0_266, %c0_267] : memref<16x32xf32, #tpu.memory_space<vmem>>, vector<16x32xf32>
    %c0_268 = arith.constant 0 : index
    %c0_269 = arith.constant 0 : index
    %562 = vector.load %arg2[%c0_268, %c0_269] : memref<32x128xf32, #tpu.memory_space<vmem>>, vector<32x128xf32>
    %cst_270 = arith.constant dense<0.000000e+00> : vector<16x128xf32>
    %563 = tpu.matmul %561, %562, %cst_270 {dimension_numbers = #tpu.dot_dimension_numbers<[1], [0], [0], [1], [0, 0, 1, 1], [], []>} : vector<16x32xf32>, vector<32x128xf32>, vector<16x128xf32> -> vector<16x128xf32>
    %564 = arith.addf %560, %563 : vector<16x128xf32>
    %565 = arith.index_cast %558 : i32 to index
    %c128_271 = arith.constant 128 : index
    %566 = vector.load %arg11[%565, %c128_271] : memref<128x256xf32, #tpu.memory_space<vmem>>, vector<16x128xf32>
    %c0_272 = arith.constant 0 : index
    %c0_273 = arith.constant 0 : index
    %567 = vector.load %arg16[%c0_272, %c0_273] : memref<16x32xf32, #tpu.memory_space<vmem>>, vector<16x32xf32>
    %c0_274 = arith.constant 0 : index
    %c0_275 = arith.constant 0 : index
    %568 = vector.load %arg3[%c0_274, %c0_275] : memref<32x128xf32, #tpu.memory_space<vmem>>, vector<32x128xf32>
    %cst_276 = arith.constant dense<0.000000e+00> : vector<16x128xf32>
    %569 = tpu.matmul %567, %568, %cst_276 {dimension_numbers = #tpu.dot_dimension_numbers<[1], [0], [0], [1], [0, 0, 1, 1], [], []>} : vector<16x32xf32>, vector<32x128xf32>, vector<16x128xf32> -> vector<16x128xf32>
    %570 = arith.addf %566, %569 : vector<16x128xf32>
    %c0_277 = arith.constant 0 : index
    %c0_278 = arith.constant 0 : index
    %571 = vector.load %arg15[%c0_277, %c0_278] : memref<16x32xf32, #tpu.memory_space<vmem>>, vector<16x32xf32>
    %572 = vector.extract_strided_slice %564 {offsets = [0, 0], sizes = [16, 32], strides = [1, 1]} : vector<16x128xf32> to vector<16x32xf32>
    %573 = arith.negf %572 : vector<16x32xf32>
    %574 = math.exp %573 : vector<16x32xf32>
    %cst_279 = arith.constant 1.000000e+00 : f32
    %575 = vector.broadcast %cst_279 : f32 to vector<16x32xf32>
    %576 = arith.addf %575, %574 : vector<16x32xf32>
    %577 = arith.divf %575, %576 : vector<16x32xf32>
    %578 = vector.extract_strided_slice %564 {offsets = [0, 32], sizes = [16, 32], strides = [1, 1]} : vector<16x128xf32> to vector<16x32xf32>
    %579 = arith.negf %578 : vector<16x32xf32>
    %580 = math.exp %579 : vector<16x32xf32>
    %cst_280 = arith.constant 1.000000e+00 : f32
    %581 = vector.broadcast %cst_280 : f32 to vector<16x32xf32>
    %582 = arith.addf %581, %580 : vector<16x32xf32>
    %583 = arith.divf %581, %582 : vector<16x32xf32>
    %584 = vector.extract_strided_slice %564 {offsets = [0, 64], sizes = [16, 32], strides = [1, 1]} : vector<16x128xf32> to vector<16x32xf32>
    %585 = math.tanh %584 : vector<16x32xf32>
    %586 = vector.extract_strided_slice %564 {offsets = [0, 96], sizes = [16, 32], strides = [1, 1]} : vector<16x128xf32> to vector<16x32xf32>
    %587 = arith.negf %586 : vector<16x32xf32>
    %588 = math.exp %587 : vector<16x32xf32>
    %cst_281 = arith.constant 1.000000e+00 : f32
    %589 = vector.broadcast %cst_281 : f32 to vector<16x32xf32>
    %590 = arith.addf %589, %588 : vector<16x32xf32>
    %591 = arith.divf %589, %590 : vector<16x32xf32>
    %592 = arith.mulf %583, %571 : vector<16x32xf32>
    %593 = arith.mulf %577, %585 : vector<16x32xf32>
    %594 = arith.addf %592, %593 : vector<16x32xf32>
    %595 = math.tanh %594 : vector<16x32xf32>
    %596 = arith.mulf %591, %595 : vector<16x32xf32>
    %c0_282 = arith.constant 0 : index
    %c0_283 = arith.constant 0 : index
    %597 = vector.load %arg17[%c0_282, %c0_283] : memref<16x32xf32, #tpu.memory_space<vmem>>, vector<16x32xf32>
    %598 = vector.extract_strided_slice %570 {offsets = [0, 0], sizes = [16, 32], strides = [1, 1]} : vector<16x128xf32> to vector<16x32xf32>
    %599 = arith.negf %598 : vector<16x32xf32>
    %600 = math.exp %599 : vector<16x32xf32>
    %cst_284 = arith.constant 1.000000e+00 : f32
    %601 = vector.broadcast %cst_284 : f32 to vector<16x32xf32>
    %602 = arith.addf %601, %600 : vector<16x32xf32>
    %603 = arith.divf %601, %602 : vector<16x32xf32>
    %604 = vector.extract_strided_slice %570 {offsets = [0, 32], sizes = [16, 32], strides = [1, 1]} : vector<16x128xf32> to vector<16x32xf32>
    %605 = arith.negf %604 : vector<16x32xf32>
    %606 = math.exp %605 : vector<16x32xf32>
    %cst_285 = arith.constant 1.000000e+00 : f32
    %607 = vector.broadcast %cst_285 : f32 to vector<16x32xf32>
    %608 = arith.addf %607, %606 : vector<16x32xf32>
    %609 = arith.divf %607, %608 : vector<16x32xf32>
    %610 = vector.extract_strided_slice %570 {offsets = [0, 64], sizes = [16, 32], strides = [1, 1]} : vector<16x128xf32> to vector<16x32xf32>
    %611 = math.tanh %610 : vector<16x32xf32>
    %612 = vector.extract_strided_slice %570 {offsets = [0, 96], sizes = [16, 32], strides = [1, 1]} : vector<16x128xf32> to vector<16x32xf32>
    %613 = arith.negf %612 : vector<16x32xf32>
    %614 = math.exp %613 : vector<16x32xf32>
    %cst_286 = arith.constant 1.000000e+00 : f32
    %615 = vector.broadcast %cst_286 : f32 to vector<16x32xf32>
    %616 = arith.addf %615, %614 : vector<16x32xf32>
    %617 = arith.divf %615, %616 : vector<16x32xf32>
    %618 = arith.mulf %609, %597 : vector<16x32xf32>
    %619 = arith.mulf %603, %611 : vector<16x32xf32>
    %620 = arith.addf %618, %619 : vector<16x32xf32>
    %621 = math.tanh %620 : vector<16x32xf32>
    %622 = arith.mulf %617, %621 : vector<16x32xf32>
    %c0_287 = arith.constant 0 : index
    %c0_288 = arith.constant 0 : index
    %623 = vector.load %arg14[%c0_287, %c0_288] : memref<16x32xf32, #tpu.memory_space<vmem>>, vector<16x32xf32>
    tpu.vector_store %arg14[%c0_287, %c0_288], %596 {strides = array<i32>} : memref<16x32xf32, #tpu.memory_space<vmem>>, vector<16x32xf32>,
    %c0_289 = arith.constant 0 : index
    %c0_290 = arith.constant 0 : index
    %624 = vector.load %arg15[%c0_289, %c0_290] : memref<16x32xf32, #tpu.memory_space<vmem>>, vector<16x32xf32>
    tpu.vector_store %arg15[%c0_289, %c0_290], %594 {strides = array<i32>} : memref<16x32xf32, #tpu.memory_space<vmem>>, vector<16x32xf32>,
    %c0_291 = arith.constant 0 : index
    %c0_292 = arith.constant 0 : index
    %625 = vector.load %arg16[%c0_291, %c0_292] : memref<16x32xf32, #tpu.memory_space<vmem>>, vector<16x32xf32>
    tpu.vector_store %arg16[%c0_291, %c0_292], %622 {strides = array<i32>} : memref<16x32xf32, #tpu.memory_space<vmem>>, vector<16x32xf32>,
    %c0_293 = arith.constant 0 : index
    %c0_294 = arith.constant 0 : index
    %626 = vector.load %arg17[%c0_293, %c0_294] : memref<16x32xf32, #tpu.memory_space<vmem>>, vector<16x32xf32>
    tpu.vector_store %arg17[%c0_293, %c0_294], %620 {strides = array<i32>} : memref<16x32xf32, #tpu.memory_space<vmem>>, vector<16x32xf32>,
    %627 = arith.index_cast %555 : i32 to index
    %c0_295 = arith.constant 0 : index
    %628 = vector.load %arg12[%627, %c0_295] : memref<128x32xf32, #tpu.memory_space<vmem>>, vector<16x32xf32>
    tpu.vector_store %arg12[%627, %c0_295], %596 {strides = array<i32>} : memref<128x32xf32, #tpu.memory_space<vmem>>, vector<16x32xf32>,
    %629 = arith.index_cast %558 : i32 to index
    %c0_296 = arith.constant 0 : index
    %630 = vector.load %arg13[%629, %c0_296] : memref<128x32xf32, #tpu.memory_space<vmem>>, vector<16x32xf32>
    tpu.vector_store %arg13[%629, %c0_296], %622 {strides = array<i32>} : memref<128x32xf32, #tpu.memory_space<vmem>>, vector<16x32xf32>,
    %c8_i32 = arith.constant 8 : i32
    %c0_297 = arith.constant 0 : index
    %c0_298 = arith.constant 0 : index
    %631 = vector.load %arg14[%c0_297, %c0_298] : memref<16x32xf32, #tpu.memory_space<vmem>>, vector<16x32xf32>
    %c0_299 = arith.constant 0 : index
    %c0_300 = arith.constant 0 : index
    %c0_301 = arith.constant 0 : index
    %632 = vector.load %arg9[%c0_299, %c0_300, %c0_301] : memref<4x16x32xf32, #tpu.memory_space<vmem>>, vector<1x16x32xf32>
    %633 = vector.shape_cast %632 : vector<1x16x32xf32> to vector<16x32xf32>
    %634 = vector.shape_cast %631 : vector<16x32xf32> to vector<1x16x32xf32>
    tpu.vector_store %arg9[%c0_299, %c0_300, %c0_301], %634 {strides = array<i32>} : memref<4x16x32xf32, #tpu.memory_space<vmem>>, vector<1x16x32xf32>,
    %c0_302 = arith.constant 0 : index
    %c0_303 = arith.constant 0 : index
    %635 = vector.load %arg16[%c0_302, %c0_303] : memref<16x32xf32, #tpu.memory_space<vmem>>, vector<16x32xf32>
    %c1 = arith.constant 1 : index
    %c0_304 = arith.constant 0 : index
    %c0_305 = arith.constant 0 : index
    %636 = vector.load %arg9[%c1, %c0_304, %c0_305] : memref<4x16x32xf32, #tpu.memory_space<vmem>>, vector<1x16x32xf32>
    %637 = vector.shape_cast %636 : vector<1x16x32xf32> to vector<16x32xf32>
    %638 = vector.shape_cast %635 : vector<16x32xf32> to vector<1x16x32xf32>
    tpu.vector_store %arg9[%c1, %c0_304, %c0_305], %638 {strides = array<i32>} : memref<4x16x32xf32, #tpu.memory_space<vmem>>, vector<1x16x32xf32>,
    %c0_306 = arith.constant 0 : index
    %c0_307 = arith.constant 0 : index
    %639 = vector.load %arg15[%c0_306, %c0_307] : memref<16x32xf32, #tpu.memory_space<vmem>>, vector<16x32xf32>
    %c0_308 = arith.constant 0 : index
    %c0_309 = arith.constant 0 : index
    %c0_310 = arith.constant 0 : index
    %640 = vector.load %arg10[%c0_308, %c0_309, %c0_310] : memref<4x16x32xf32, #tpu.memory_space<vmem>>, vector<1x16x32xf32>
    %641 = vector.shape_cast %640 : vector<1x16x32xf32> to vector<16x32xf32>
    %642 = vector.shape_cast %639 : vector<16x32xf32> to vector<1x16x32xf32>
    tpu.vector_store %arg10[%c0_308, %c0_309, %c0_310], %642 {strides = array<i32>} : memref<4x16x32xf32, #tpu.memory_space<vmem>>, vector<1x16x32xf32>,
    %c0_311 = arith.constant 0 : index
    %c0_312 = arith.constant 0 : index
    %643 = vector.load %arg17[%c0_311, %c0_312] : memref<16x32xf32, #tpu.memory_space<vmem>>, vector<16x32xf32>
    %c1_313 = arith.constant 1 : index
    %c0_314 = arith.constant 0 : index
    %c0_315 = arith.constant 0 : index
    %644 = vector.load %arg10[%c1_313, %c0_314, %c0_315] : memref<4x16x32xf32, #tpu.memory_space<vmem>>, vector<1x16x32xf32>
    %645 = vector.shape_cast %644 : vector<1x16x32xf32> to vector<16x32xf32>
    %646 = vector.shape_cast %643 : vector<16x32xf32> to vector<1x16x32xf32>
    tpu.vector_store %arg10[%c1_313, %c0_314, %c0_315], %646 {strides = array<i32>} : memref<4x16x32xf32, #tpu.memory_space<vmem>>, vector<1x16x32xf32>,
    %c0_316 = arith.constant 0 : index
    %c0_317 = arith.constant 0 : index
    %647 = vector.load %arg12[%c0_316, %c0_317] : memref<128x32xf32, #tpu.memory_space<vmem>>, vector<128x32xf32>
    %c0_318 = arith.constant 0 : index
    %c0_319 = arith.constant 0 : index
    %648 = vector.load %arg5[%c0_318, %c0_319] : memref<64x256xf32, #tpu.memory_space<vmem>>, vector<32x256xf32>
    %cst_320 = arith.constant dense<0.000000e+00> : vector<128x256xf32>
    %649 = tpu.matmul %647, %648, %cst_320 {dimension_numbers = #tpu.dot_dimension_numbers<[1], [0], [0], [1], [0, 0, 1, 1], [], []>} : vector<128x32xf32>, vector<32x256xf32>, vector<128x256xf32> -> vector<128x256xf32>
    %c0_321 = arith.constant 0 : index
    %c0_322 = arith.constant 0 : index
    %650 = vector.load %arg13[%c0_321, %c0_322] : memref<128x32xf32, #tpu.memory_space<vmem>>, vector<128x32xf32>
    %c32 = arith.constant 32 : index
    %c0_323 = arith.constant 0 : index
    %651 = vector.load %arg5[%c32, %c0_323] : memref<64x256xf32, #tpu.memory_space<vmem>>, vector<32x256xf32>
    %cst_324 = arith.constant dense<0.000000e+00> : vector<128x256xf32>
    %652 = tpu.matmul %650, %651, %cst_324 {dimension_numbers = #tpu.dot_dimension_numbers<[1], [0], [0], [1], [0, 0, 1, 1], [], []>} : vector<128x32xf32>, vector<32x256xf32>, vector<128x256xf32> -> vector<128x256xf32>
    %653 = arith.addf %649, %652 : vector<128x256xf32>
    %c0_325 = arith.constant 0 : index
    %c0_326 = arith.constant 0 : index
    %654 = vector.load %arg8[%c0_325, %c0_326] : memref<1x256xf32, #tpu.memory_space<vmem>>, vector<1x256xf32>
    %655 = vector.broadcast %654 : vector<1x256xf32> to vector<128x256xf32>
    %656 = arith.addf %653, %655 : vector<128x256xf32>
    %c0_327 = arith.constant 0 : index
    %c0_328 = arith.constant 0 : index
    %657 = vector.load %arg11[%c0_327, %c0_328] : memref<128x256xf32, #tpu.memory_space<vmem>>, vector<128x256xf32>
    tpu.vector_store %arg11[%c0_327, %c0_328], %656 {strides = array<i32>} : memref<128x256xf32, #tpu.memory_space<vmem>>, vector<128x256xf32>,
    %cst_329 = arith.constant 0.000000e+00 : f32
    %658 = vector.broadcast %cst_329 : f32 to vector<16x32xf32>
    %c0_330 = arith.constant 0 : index
    %c0_331 = arith.constant 0 : index
    %659 = vector.load %arg14[%c0_330, %c0_331] : memref<16x32xf32, #tpu.memory_space<vmem>>, vector<16x32xf32>
    tpu.vector_store %arg14[%c0_330, %c0_331], %658 {strides = array<i32>} : memref<16x32xf32, #tpu.memory_space<vmem>>, vector<16x32xf32>,
    %cst_332 = arith.constant 0.000000e+00 : f32
    %660 = vector.broadcast %cst_332 : f32 to vector<16x32xf32>
    %c0_333 = arith.constant 0 : index
    %c0_334 = arith.constant 0 : index
    %661 = vector.load %arg15[%c0_333, %c0_334] : memref<16x32xf32, #tpu.memory_space<vmem>>, vector<16x32xf32>
    tpu.vector_store %arg15[%c0_333, %c0_334], %660 {strides = array<i32>} : memref<16x32xf32, #tpu.memory_space<vmem>>, vector<16x32xf32>,
    %cst_335 = arith.constant 0.000000e+00 : f32
    %662 = vector.broadcast %cst_335 : f32 to vector<16x32xf32>
    %c0_336 = arith.constant 0 : index
    %c0_337 = arith.constant 0 : index
    %663 = vector.load %arg16[%c0_336, %c0_337] : memref<16x32xf32, #tpu.memory_space<vmem>>, vector<16x32xf32>
    tpu.vector_store %arg16[%c0_336, %c0_337], %662 {strides = array<i32>} : memref<16x32xf32, #tpu.memory_space<vmem>>, vector<16x32xf32>,
    %cst_338 = arith.constant 0.000000e+00 : f32
    %664 = vector.broadcast %cst_338 : f32 to vector<16x32xf32>
    %c0_339 = arith.constant 0 : index
    %c0_340 = arith.constant 0 : index
    %665 = vector.load %arg17[%c0_339, %c0_340] : memref<16x32xf32, #tpu.memory_space<vmem>>, vector<16x32xf32>
    tpu.vector_store %arg17[%c0_339, %c0_340], %664 {strides = array<i32>} : memref<16x32xf32, #tpu.memory_space<vmem>>, vector<16x32xf32>,
    %c0_i32_341 = arith.constant 0 : i32
    %c16_i32_342 = arith.constant 16 : i32
    %666 = arith.muli %c0_i32_341, %c16_i32_342 : i32
    %667 = tpu.assume_multiple %666, 16 : i32
    %c7_i32_343 = arith.constant 7 : i32
    %668 = arith.subi %c7_i32_343, %c0_i32_341 : i32
    %c16_i32_344 = arith.constant 16 : i32
    %669 = arith.muli %668, %c16_i32_344 : i32
    %670 = tpu.assume_multiple %669, 16 : i32
    %671 = arith.index_cast %667 : i32 to index
    %c0_345 = arith.constant 0 : index
    %672 = vector.load %arg11[%671, %c0_345] : memref<128x256xf32, #tpu.memory_space<vmem>>, vector<16x128xf32>
    %c0_346 = arith.constant 0 : index
    %c0_347 = arith.constant 0 : index
    %673 = vector.load %arg14[%c0_346, %c0_347] : memref<16x32xf32, #tpu.memory_space<vmem>>, vector<16x32xf32>
    %c0_348 = arith.constant 0 : index
    %c0_349 = arith.constant 0 : index
    %674 = vector.load %arg6[%c0_348, %c0_349] : memref<32x128xf32, #tpu.memory_space<vmem>>, vector<32x128xf32>
    %cst_350 = arith.constant dense<0.000000e+00> : vector<16x128xf32>
    %675 = tpu.matmul %673, %674, %cst_350 {dimension_numbers = #tpu.dot_dimension_numbers<[1], [0], [0], [1], [0, 0, 1, 1], [], []>} : vector<16x32xf32>, vector<32x128xf32>, vector<16x128xf32> -> vector<16x128xf32>
    %676 = arith.addf %672, %675 : vector<16x128xf32>
    %677 = arith.index_cast %670 : i32 to index
    %c128_351 = arith.constant 128 : index
    %678 = vector.load %arg11[%677, %c128_351] : memref<128x256xf32, #tpu.memory_space<vmem>>, vector<16x128xf32>
    %c0_352 = arith.constant 0 : index
    %c0_353 = arith.constant 0 : index
    %679 = vector.load %arg16[%c0_352, %c0_353] : memref<16x32xf32, #tpu.memory_space<vmem>>, vector<16x32xf32>
    %c0_354 = arith.constant 0 : index
    %c0_355 = arith.constant 0 : index
    %680 = vector.load %arg7[%c0_354, %c0_355] : memref<32x128xf32, #tpu.memory_space<vmem>>, vector<32x128xf32>
    %cst_356 = arith.constant dense<0.000000e+00> : vector<16x128xf32>
    %681 = tpu.matmul %679, %680, %cst_356 {dimension_numbers = #tpu.dot_dimension_numbers<[1], [0], [0], [1], [0, 0, 1, 1], [], []>} : vector<16x32xf32>, vector<32x128xf32>, vector<16x128xf32> -> vector<16x128xf32>
    %682 = arith.addf %678, %681 : vector<16x128xf32>
    %c0_357 = arith.constant 0 : index
    %c0_358 = arith.constant 0 : index
    %683 = vector.load %arg15[%c0_357, %c0_358] : memref<16x32xf32, #tpu.memory_space<vmem>>, vector<16x32xf32>
    %684 = vector.extract_strided_slice %676 {offsets = [0, 0], sizes = [16, 32], strides = [1, 1]} : vector<16x128xf32> to vector<16x32xf32>
    %685 = arith.negf %684 : vector<16x32xf32>
    %686 = math.exp %685 : vector<16x32xf32>
    %cst_359 = arith.constant 1.000000e+00 : f32
    %687 = vector.broadcast %cst_359 : f32 to vector<16x32xf32>
    %688 = arith.addf %687, %686 : vector<16x32xf32>
    %689 = arith.divf %687, %688 : vector<16x32xf32>
    %690 = vector.extract_strided_slice %676 {offsets = [0, 32], sizes = [16, 32], strides = [1, 1]} : vector<16x128xf32> to vector<16x32xf32>
    %691 = arith.negf %690 : vector<16x32xf32>
    %692 = math.exp %691 : vector<16x32xf32>
    %cst_360 = arith.constant 1.000000e+00 : f32
    %693 = vector.broadcast %cst_360 : f32 to vector<16x32xf32>
    %694 = arith.addf %693, %692 : vector<16x32xf32>
    %695 = arith.divf %693, %694 : vector<16x32xf32>
    %696 = vector.extract_strided_slice %676 {offsets = [0, 64], sizes = [16, 32], strides = [1, 1]} : vector<16x128xf32> to vector<16x32xf32>
    %697 = math.tanh %696 : vector<16x32xf32>
    %698 = vector.extract_strided_slice %676 {offsets = [0, 96], sizes = [16, 32], strides = [1, 1]} : vector<16x128xf32> to vector<16x32xf32>
    %699 = arith.negf %698 : vector<16x32xf32>
    %700 = math.exp %699 : vector<16x32xf32>
    %cst_361 = arith.constant 1.000000e+00 : f32
    %701 = vector.broadcast %cst_361 : f32 to vector<16x32xf32>
    %702 = arith.addf %701, %700 : vector<16x32xf32>
    %703 = arith.divf %701, %702 : vector<16x32xf32>
    %704 = arith.mulf %695, %683 : vector<16x32xf32>
    %705 = arith.mulf %689, %697 : vector<16x32xf32>
    %706 = arith.addf %704, %705 : vector<16x32xf32>
    %707 = math.tanh %706 : vector<16x32xf32>
    %708 = arith.mulf %703, %707 : vector<16x32xf32>
    %c0_362 = arith.constant 0 : index
    %c0_363 = arith.constant 0 : index
    %709 = vector.load %arg17[%c0_362, %c0_363] : memref<16x32xf32, #tpu.memory_space<vmem>>, vector<16x32xf32>
    %710 = vector.extract_strided_slice %682 {offsets = [0, 0], sizes = [16, 32], strides = [1, 1]} : vector<16x128xf32> to vector<16x32xf32>
    %711 = arith.negf %710 : vector<16x32xf32>
    %712 = math.exp %711 : vector<16x32xf32>
    %cst_364 = arith.constant 1.000000e+00 : f32
    %713 = vector.broadcast %cst_364 : f32 to vector<16x32xf32>
    %714 = arith.addf %713, %712 : vector<16x32xf32>
    %715 = arith.divf %713, %714 : vector<16x32xf32>
    %716 = vector.extract_strided_slice %682 {offsets = [0, 32], sizes = [16, 32], strides = [1, 1]} : vector<16x128xf32> to vector<16x32xf32>
    %717 = arith.negf %716 : vector<16x32xf32>
    %718 = math.exp %717 : vector<16x32xf32>
    %cst_365 = arith.constant 1.000000e+00 : f32
    %719 = vector.broadcast %cst_365 : f32 to vector<16x32xf32>
    %720 = arith.addf %719, %718 : vector<16x32xf32>
    %721 = arith.divf %719, %720 : vector<16x32xf32>
    %722 = vector.extract_strided_slice %682 {offsets = [0, 64], sizes = [16, 32], strides = [1, 1]} : vector<16x128xf32> to vector<16x32xf32>
    %723 = math.tanh %722 : vector<16x32xf32>
    %724 = vector.extract_strided_slice %682 {offsets = [0, 96], sizes = [16, 32], strides = [1, 1]} : vector<16x128xf32> to vector<16x32xf32>
    %725 = arith.negf %724 : vector<16x32xf32>
    %726 = math.exp %725 : vector<16x32xf32>
    %cst_366 = arith.constant 1.000000e+00 : f32
    %727 = vector.broadcast %cst_366 : f32 to vector<16x32xf32>
    %728 = arith.addf %727, %726 : vector<16x32xf32>
    %729 = arith.divf %727, %728 : vector<16x32xf32>
    %730 = arith.mulf %721, %709 : vector<16x32xf32>
    %731 = arith.mulf %715, %723 : vector<16x32xf32>
    %732 = arith.addf %730, %731 : vector<16x32xf32>
    %733 = math.tanh %732 : vector<16x32xf32>
    %734 = arith.mulf %729, %733 : vector<16x32xf32>
    %c0_367 = arith.constant 0 : index
    %c0_368 = arith.constant 0 : index
    %735 = vector.load %arg14[%c0_367, %c0_368] : memref<16x32xf32, #tpu.memory_space<vmem>>, vector<16x32xf32>
    tpu.vector_store %arg14[%c0_367, %c0_368], %708 {strides = array<i32>} : memref<16x32xf32, #tpu.memory_space<vmem>>, vector<16x32xf32>,
    %c0_369 = arith.constant 0 : index
    %c0_370 = arith.constant 0 : index
    %736 = vector.load %arg15[%c0_369, %c0_370] : memref<16x32xf32, #tpu.memory_space<vmem>>, vector<16x32xf32>
    tpu.vector_store %arg15[%c0_369, %c0_370], %706 {strides = array<i32>} : memref<16x32xf32, #tpu.memory_space<vmem>>, vector<16x32xf32>,
    %c0_371 = arith.constant 0 : index
    %c0_372 = arith.constant 0 : index
    %737 = vector.load %arg16[%c0_371, %c0_372] : memref<16x32xf32, #tpu.memory_space<vmem>>, vector<16x32xf32>
    tpu.vector_store %arg16[%c0_371, %c0_372], %734 {strides = array<i32>} : memref<16x32xf32, #tpu.memory_space<vmem>>, vector<16x32xf32>,
    %c0_373 = arith.constant 0 : index
    %c0_374 = arith.constant 0 : index
    %738 = vector.load %arg17[%c0_373, %c0_374] : memref<16x32xf32, #tpu.memory_space<vmem>>, vector<16x32xf32>
    tpu.vector_store %arg17[%c0_373, %c0_374], %732 {strides = array<i32>} : memref<16x32xf32, #tpu.memory_space<vmem>>, vector<16x32xf32>,
    %c1_i32_375 = arith.constant 1 : i32
    %c16_i32_376 = arith.constant 16 : i32
    %739 = arith.muli %c1_i32_375, %c16_i32_376 : i32
    %740 = tpu.assume_multiple %739, 16 : i32
    %c7_i32_377 = arith.constant 7 : i32
    %741 = arith.subi %c7_i32_377, %c1_i32_375 : i32
    %c16_i32_378 = arith.constant 16 : i32
    %742 = arith.muli %741, %c16_i32_378 : i32
    %743 = tpu.assume_multiple %742, 16 : i32
    %744 = arith.index_cast %740 : i32 to index
    %c0_379 = arith.constant 0 : index
    %745 = vector.load %arg11[%744, %c0_379] : memref<128x256xf32, #tpu.memory_space<vmem>>, vector<16x128xf32>
    %c0_380 = arith.constant 0 : index
    %c0_381 = arith.constant 0 : index
    %746 = vector.load %arg14[%c0_380, %c0_381] : memref<16x32xf32, #tpu.memory_space<vmem>>, vector<16x32xf32>
    %c0_382 = arith.constant 0 : index
    %c0_383 = arith.constant 0 : index
    %747 = vector.load %arg6[%c0_382, %c0_383] : memref<32x128xf32, #tpu.memory_space<vmem>>, vector<32x128xf32>
    %cst_384 = arith.constant dense<0.000000e+00> : vector<16x128xf32>
    %748 = tpu.matmul %746, %747, %cst_384 {dimension_numbers = #tpu.dot_dimension_numbers<[1], [0], [0], [1], [0, 0, 1, 1], [], []>} : vector<16x32xf32>, vector<32x128xf32>, vector<16x128xf32> -> vector<16x128xf32>
    %749 = arith.addf %745, %748 : vector<16x128xf32>
    %750 = arith.index_cast %743 : i32 to index
    %c128_385 = arith.constant 128 : index
    %751 = vector.load %arg11[%750, %c128_385] : memref<128x256xf32, #tpu.memory_space<vmem>>, vector<16x128xf32>
    %c0_386 = arith.constant 0 : index
    %c0_387 = arith.constant 0 : index
    %752 = vector.load %arg16[%c0_386, %c0_387] : memref<16x32xf32, #tpu.memory_space<vmem>>, vector<16x32xf32>
    %c0_388 = arith.constant 0 : index
    %c0_389 = arith.constant 0 : index
    %753 = vector.load %arg7[%c0_388, %c0_389] : memref<32x128xf32, #tpu.memory_space<vmem>>, vector<32x128xf32>
    %cst_390 = arith.constant dense<0.000000e+00> : vector<16x128xf32>
    %754 = tpu.matmul %752, %753, %cst_390 {dimension_numbers = #tpu.dot_dimension_numbers<[1], [0], [0], [1], [0, 0, 1, 1], [], []>} : vector<16x32xf32>, vector<32x128xf32>, vector<16x128xf32> -> vector<16x128xf32>
    %755 = arith.addf %751, %754 : vector<16x128xf32>
    %c0_391 = arith.constant 0 : index
    %c0_392 = arith.constant 0 : index
    %756 = vector.load %arg15[%c0_391, %c0_392] : memref<16x32xf32, #tpu.memory_space<vmem>>, vector<16x32xf32>
    %757 = vector.extract_strided_slice %749 {offsets = [0, 0], sizes = [16, 32], strides = [1, 1]} : vector<16x128xf32> to vector<16x32xf32>
    %758 = arith.negf %757 : vector<16x32xf32>
    %759 = math.exp %758 : vector<16x32xf32>
    %cst_393 = arith.constant 1.000000e+00 : f32
    %760 = vector.broadcast %cst_393 : f32 to vector<16x32xf32>
    %761 = arith.addf %760, %759 : vector<16x32xf32>
    %762 = arith.divf %760, %761 : vector<16x32xf32>
    %763 = vector.extract_strided_slice %749 {offsets = [0, 32], sizes = [16, 32], strides = [1, 1]} : vector<16x128xf32> to vector<16x32xf32>
    %764 = arith.negf %763 : vector<16x32xf32>
    %765 = math.exp %764 : vector<16x32xf32>
    %cst_394 = arith.constant 1.000000e+00 : f32
    %766 = vector.broadcast %cst_394 : f32 to vector<16x32xf32>
    %767 = arith.addf %766, %765 : vector<16x32xf32>
    %768 = arith.divf %766, %767 : vector<16x32xf32>
    %769 = vector.extract_strided_slice %749 {offsets = [0, 64], sizes = [16, 32], strides = [1, 1]} : vector<16x128xf32> to vector<16x32xf32>
    %770 = math.tanh %769 : vector<16x32xf32>
    %771 = vector.extract_strided_slice %749 {offsets = [0, 96], sizes = [16, 32], strides = [1, 1]} : vector<16x128xf32> to vector<16x32xf32>
    %772 = arith.negf %771 : vector<16x32xf32>
    %773 = math.exp %772 : vector<16x32xf32>
    %cst_395 = arith.constant 1.000000e+00 : f32
    %774 = vector.broadcast %cst_395 : f32 to vector<16x32xf32>
    %775 = arith.addf %774, %773 : vector<16x32xf32>
    %776 = arith.divf %774, %775 : vector<16x32xf32>
    %777 = arith.mulf %768, %756 : vector<16x32xf32>
    %778 = arith.mulf %762, %770 : vector<16x32xf32>
    %779 = arith.addf %777, %778 : vector<16x32xf32>
    %780 = math.tanh %779 : vector<16x32xf32>
    %781 = arith.mulf %776, %780 : vector<16x32xf32>
    %c0_396 = arith.constant 0 : index
    %c0_397 = arith.constant 0 : index
    %782 = vector.load %arg17[%c0_396, %c0_397] : memref<16x32xf32, #tpu.memory_space<vmem>>, vector<16x32xf32>
    %783 = vector.extract_strided_slice %755 {offsets = [0, 0], sizes = [16, 32], strides = [1, 1]} : vector<16x128xf32> to vector<16x32xf32>
    %784 = arith.negf %783 : vector<16x32xf32>
    %785 = math.exp %784 : vector<16x32xf32>
    %cst_398 = arith.constant 1.000000e+00 : f32
    %786 = vector.broadcast %cst_398 : f32 to vector<16x32xf32>
    %787 = arith.addf %786, %785 : vector<16x32xf32>
    %788 = arith.divf %786, %787 : vector<16x32xf32>
    %789 = vector.extract_strided_slice %755 {offsets = [0, 32], sizes = [16, 32], strides = [1, 1]} : vector<16x128xf32> to vector<16x32xf32>
    %790 = arith.negf %789 : vector<16x32xf32>
    %791 = math.exp %790 : vector<16x32xf32>
    %cst_399 = arith.constant 1.000000e+00 : f32
    %792 = vector.broadcast %cst_399 : f32 to vector<16x32xf32>
    %793 = arith.addf %792, %791 : vector<16x32xf32>
    %794 = arith.divf %792, %793 : vector<16x32xf32>
    %795 = vector.extract_strided_slice %755 {offsets = [0, 64], sizes = [16, 32], strides = [1, 1]} : vector<16x128xf32> to vector<16x32xf32>
    %796 = math.tanh %795 : vector<16x32xf32>
    %797 = vector.extract_strided_slice %755 {offsets = [0, 96], sizes = [16, 32], strides = [1, 1]} : vector<16x128xf32> to vector<16x32xf32>
    %798 = arith.negf %797 : vector<16x32xf32>
    %799 = math.exp %798 : vector<16x32xf32>
    %cst_400 = arith.constant 1.000000e+00 : f32
    %800 = vector.broadcast %cst_400 : f32 to vector<16x32xf32>
    %801 = arith.addf %800, %799 : vector<16x32xf32>
    %802 = arith.divf %800, %801 : vector<16x32xf32>
    %803 = arith.mulf %794, %782 : vector<16x32xf32>
    %804 = arith.mulf %788, %796 : vector<16x32xf32>
    %805 = arith.addf %803, %804 : vector<16x32xf32>
    %806 = math.tanh %805 : vector<16x32xf32>
    %807 = arith.mulf %802, %806 : vector<16x32xf32>
    %c0_401 = arith.constant 0 : index
    %c0_402 = arith.constant 0 : index
    %808 = vector.load %arg14[%c0_401, %c0_402] : memref<16x32xf32, #tpu.memory_space<vmem>>, vector<16x32xf32>
    tpu.vector_store %arg14[%c0_401, %c0_402], %781 {strides = array<i32>} : memref<16x32xf32, #tpu.memory_space<vmem>>, vector<16x32xf32>,
    %c0_403 = arith.constant 0 : index
    %c0_404 = arith.constant 0 : index
    %809 = vector.load %arg15[%c0_403, %c0_404] : memref<16x32xf32, #tpu.memory_space<vmem>>, vector<16x32xf32>
    tpu.vector_store %arg15[%c0_403, %c0_404], %779 {strides = array<i32>} : memref<16x32xf32, #tpu.memory_space<vmem>>, vector<16x32xf32>,
    %c0_405 = arith.constant 0 : index
    %c0_406 = arith.constant 0 : index
    %810 = vector.load %arg16[%c0_405, %c0_406] : memref<16x32xf32, #tpu.memory_space<vmem>>, vector<16x32xf32>
    tpu.vector_store %arg16[%c0_405, %c0_406], %807 {strides = array<i32>} : memref<16x32xf32, #tpu.memory_space<vmem>>, vector<16x32xf32>,
    %c0_407 = arith.constant 0 : index
    %c0_408 = arith.constant 0 : index
    %811 = vector.load %arg17[%c0_407, %c0_408] : memref<16x32xf32, #tpu.memory_space<vmem>>, vector<16x32xf32>
    tpu.vector_store %arg17[%c0_407, %c0_408], %805 {strides = array<i32>} : memref<16x32xf32, #tpu.memory_space<vmem>>, vector<16x32xf32>,
    %c2_i32_409 = arith.constant 2 : i32
    %c16_i32_410 = arith.constant 16 : i32
    %812 = arith.muli %c2_i32_409, %c16_i32_410 : i32
    %813 = tpu.assume_multiple %812, 16 : i32
    %c7_i32_411 = arith.constant 7 : i32
    %814 = arith.subi %c7_i32_411, %c2_i32_409 : i32
    %c16_i32_412 = arith.constant 16 : i32
    %815 = arith.muli %814, %c16_i32_412 : i32
    %816 = tpu.assume_multiple %815, 16 : i32
    %817 = arith.index_cast %813 : i32 to index
    %c0_413 = arith.constant 0 : index
    %818 = vector.load %arg11[%817, %c0_413] : memref<128x256xf32, #tpu.memory_space<vmem>>, vector<16x128xf32>
    %c0_414 = arith.constant 0 : index
    %c0_415 = arith.constant 0 : index
    %819 = vector.load %arg14[%c0_414, %c0_415] : memref<16x32xf32, #tpu.memory_space<vmem>>, vector<16x32xf32>
    %c0_416 = arith.constant 0 : index
    %c0_417 = arith.constant 0 : index
    %820 = vector.load %arg6[%c0_416, %c0_417] : memref<32x128xf32, #tpu.memory_space<vmem>>, vector<32x128xf32>
    %cst_418 = arith.constant dense<0.000000e+00> : vector<16x128xf32>
    %821 = tpu.matmul %819, %820, %cst_418 {dimension_numbers = #tpu.dot_dimension_numbers<[1], [0], [0], [1], [0, 0, 1, 1], [], []>} : vector<16x32xf32>, vector<32x128xf32>, vector<16x128xf32> -> vector<16x128xf32>
    %822 = arith.addf %818, %821 : vector<16x128xf32>
    %823 = arith.index_cast %816 : i32 to index
    %c128_419 = arith.constant 128 : index
    %824 = vector.load %arg11[%823, %c128_419] : memref<128x256xf32, #tpu.memory_space<vmem>>, vector<16x128xf32>
    %c0_420 = arith.constant 0 : index
    %c0_421 = arith.constant 0 : index
    %825 = vector.load %arg16[%c0_420, %c0_421] : memref<16x32xf32, #tpu.memory_space<vmem>>, vector<16x32xf32>
    %c0_422 = arith.constant 0 : index
    %c0_423 = arith.constant 0 : index
    %826 = vector.load %arg7[%c0_422, %c0_423] : memref<32x128xf32, #tpu.memory_space<vmem>>, vector<32x128xf32>
    %cst_424 = arith.constant dense<0.000000e+00> : vector<16x128xf32>
    %827 = tpu.matmul %825, %826, %cst_424 {dimension_numbers = #tpu.dot_dimension_numbers<[1], [0], [0], [1], [0, 0, 1, 1], [], []>} : vector<16x32xf32>, vector<32x128xf32>, vector<16x128xf32> -> vector<16x128xf32>
    %828 = arith.addf %824, %827 : vector<16x128xf32>
    %c0_425 = arith.constant 0 : index
    %c0_426 = arith.constant 0 : index
    %829 = vector.load %arg15[%c0_425, %c0_426] : memref<16x32xf32, #tpu.memory_space<vmem>>, vector<16x32xf32>
    %830 = vector.extract_strided_slice %822 {offsets = [0, 0], sizes = [16, 32], strides = [1, 1]} : vector<16x128xf32> to vector<16x32xf32>
    %831 = arith.negf %830 : vector<16x32xf32>
    %832 = math.exp %831 : vector<16x32xf32>
    %cst_427 = arith.constant 1.000000e+00 : f32
    %833 = vector.broadcast %cst_427 : f32 to vector<16x32xf32>
    %834 = arith.addf %833, %832 : vector<16x32xf32>
    %835 = arith.divf %833, %834 : vector<16x32xf32>
    %836 = vector.extract_strided_slice %822 {offsets = [0, 32], sizes = [16, 32], strides = [1, 1]} : vector<16x128xf32> to vector<16x32xf32>
    %837 = arith.negf %836 : vector<16x32xf32>
    %838 = math.exp %837 : vector<16x32xf32>
    %cst_428 = arith.constant 1.000000e+00 : f32
    %839 = vector.broadcast %cst_428 : f32 to vector<16x32xf32>
    %840 = arith.addf %839, %838 : vector<16x32xf32>
    %841 = arith.divf %839, %840 : vector<16x32xf32>
    %842 = vector.extract_strided_slice %822 {offsets = [0, 64], sizes = [16, 32], strides = [1, 1]} : vector<16x128xf32> to vector<16x32xf32>
    %843 = math.tanh %842 : vector<16x32xf32>
    %844 = vector.extract_strided_slice %822 {offsets = [0, 96], sizes = [16, 32], strides = [1, 1]} : vector<16x128xf32> to vector<16x32xf32>
    %845 = arith.negf %844 : vector<16x32xf32>
    %846 = math.exp %845 : vector<16x32xf32>
    %cst_429 = arith.constant 1.000000e+00 : f32
    %847 = vector.broadcast %cst_429 : f32 to vector<16x32xf32>
    %848 = arith.addf %847, %846 : vector<16x32xf32>
    %849 = arith.divf %847, %848 : vector<16x32xf32>
    %850 = arith.mulf %841, %829 : vector<16x32xf32>
    %851 = arith.mulf %835, %843 : vector<16x32xf32>
    %852 = arith.addf %850, %851 : vector<16x32xf32>
    %853 = math.tanh %852 : vector<16x32xf32>
    %854 = arith.mulf %849, %853 : vector<16x32xf32>
    %c0_430 = arith.constant 0 : index
    %c0_431 = arith.constant 0 : index
    %855 = vector.load %arg17[%c0_430, %c0_431] : memref<16x32xf32, #tpu.memory_space<vmem>>, vector<16x32xf32>
    %856 = vector.extract_strided_slice %828 {offsets = [0, 0], sizes = [16, 32], strides = [1, 1]} : vector<16x128xf32> to vector<16x32xf32>
    %857 = arith.negf %856 : vector<16x32xf32>
    %858 = math.exp %857 : vector<16x32xf32>
    %cst_432 = arith.constant 1.000000e+00 : f32
    %859 = vector.broadcast %cst_432 : f32 to vector<16x32xf32>
    %860 = arith.addf %859, %858 : vector<16x32xf32>
    %861 = arith.divf %859, %860 : vector<16x32xf32>
    %862 = vector.extract_strided_slice %828 {offsets = [0, 32], sizes = [16, 32], strides = [1, 1]} : vector<16x128xf32> to vector<16x32xf32>
    %863 = arith.negf %862 : vector<16x32xf32>
    %864 = math.exp %863 : vector<16x32xf32>
    %cst_433 = arith.constant 1.000000e+00 : f32
    %865 = vector.broadcast %cst_433 : f32 to vector<16x32xf32>
    %866 = arith.addf %865, %864 : vector<16x32xf32>
    %867 = arith.divf %865, %866 : vector<16x32xf32>
    %868 = vector.extract_strided_slice %828 {offsets = [0, 64], sizes = [16, 32], strides = [1, 1]} : vector<16x128xf32> to vector<16x32xf32>
    %869 = math.tanh %868 : vector<16x32xf32>
    %870 = vector.extract_strided_slice %828 {offsets = [0, 96], sizes = [16, 32], strides = [1, 1]} : vector<16x128xf32> to vector<16x32xf32>
    %871 = arith.negf %870 : vector<16x32xf32>
    %872 = math.exp %871 : vector<16x32xf32>
    %cst_434 = arith.constant 1.000000e+00 : f32
    %873 = vector.broadcast %cst_434 : f32 to vector<16x32xf32>
    %874 = arith.addf %873, %872 : vector<16x32xf32>
    %875 = arith.divf %873, %874 : vector<16x32xf32>
    %876 = arith.mulf %867, %855 : vector<16x32xf32>
    %877 = arith.mulf %861, %869 : vector<16x32xf32>
    %878 = arith.addf %876, %877 : vector<16x32xf32>
    %879 = math.tanh %878 : vector<16x32xf32>
    %880 = arith.mulf %875, %879 : vector<16x32xf32>
    %c0_435 = arith.constant 0 : index
    %c0_436 = arith.constant 0 : index
    %881 = vector.load %arg14[%c0_435, %c0_436] : memref<16x32xf32, #tpu.memory_space<vmem>>, vector<16x32xf32>
    tpu.vector_store %arg14[%c0_435, %c0_436], %854 {strides = array<i32>} : memref<16x32xf32, #tpu.memory_space<vmem>>, vector<16x32xf32>,
    %c0_437 = arith.constant 0 : index
    %c0_438 = arith.constant 0 : index
    %882 = vector.load %arg15[%c0_437, %c0_438] : memref<16x32xf32, #tpu.memory_space<vmem>>, vector<16x32xf32>
    tpu.vector_store %arg15[%c0_437, %c0_438], %852 {strides = array<i32>} : memref<16x32xf32, #tpu.memory_space<vmem>>, vector<16x32xf32>,
    %c0_439 = arith.constant 0 : index
    %c0_440 = arith.constant 0 : index
    %883 = vector.load %arg16[%c0_439, %c0_440] : memref<16x32xf32, #tpu.memory_space<vmem>>, vector<16x32xf32>
    tpu.vector_store %arg16[%c0_439, %c0_440], %880 {strides = array<i32>} : memref<16x32xf32, #tpu.memory_space<vmem>>, vector<16x32xf32>,
    %c0_441 = arith.constant 0 : index
    %c0_442 = arith.constant 0 : index
    %884 = vector.load %arg17[%c0_441, %c0_442] : memref<16x32xf32, #tpu.memory_space<vmem>>, vector<16x32xf32>
    tpu.vector_store %arg17[%c0_441, %c0_442], %878 {strides = array<i32>} : memref<16x32xf32, #tpu.memory_space<vmem>>, vector<16x32xf32>,
    %c3_i32_443 = arith.constant 3 : i32
    %c16_i32_444 = arith.constant 16 : i32
    %885 = arith.muli %c3_i32_443, %c16_i32_444 : i32
    %886 = tpu.assume_multiple %885, 16 : i32
    %c7_i32_445 = arith.constant 7 : i32
    %887 = arith.subi %c7_i32_445, %c3_i32_443 : i32
    %c16_i32_446 = arith.constant 16 : i32
    %888 = arith.muli %887, %c16_i32_446 : i32
    %889 = tpu.assume_multiple %888, 16 : i32
    %890 = arith.index_cast %886 : i32 to index
    %c0_447 = arith.constant 0 : index
    %891 = vector.load %arg11[%890, %c0_447] : memref<128x256xf32, #tpu.memory_space<vmem>>, vector<16x128xf32>
    %c0_448 = arith.constant 0 : index
    %c0_449 = arith.constant 0 : index
    %892 = vector.load %arg14[%c0_448, %c0_449] : memref<16x32xf32, #tpu.memory_space<vmem>>, vector<16x32xf32>
    %c0_450 = arith.constant 0 : index
    %c0_451 = arith.constant 0 : index
    %893 = vector.load %arg6[%c0_450, %c0_451] : memref<32x128xf32, #tpu.memory_space<vmem>>, vector<32x128xf32>
    %cst_452 = arith.constant dense<0.000000e+00> : vector<16x128xf32>
    %894 = tpu.matmul %892, %893, %cst_452 {dimension_numbers = #tpu.dot_dimension_numbers<[1], [0], [0], [1], [0, 0, 1, 1], [], []>} : vector<16x32xf32>, vector<32x128xf32>, vector<16x128xf32> -> vector<16x128xf32>
    %895 = arith.addf %891, %894 : vector<16x128xf32>
    %896 = arith.index_cast %889 : i32 to index
    %c128_453 = arith.constant 128 : index
    %897 = vector.load %arg11[%896, %c128_453] : memref<128x256xf32, #tpu.memory_space<vmem>>, vector<16x128xf32>
    %c0_454 = arith.constant 0 : index
    %c0_455 = arith.constant 0 : index
    %898 = vector.load %arg16[%c0_454, %c0_455] : memref<16x32xf32, #tpu.memory_space<vmem>>, vector<16x32xf32>
    %c0_456 = arith.constant 0 : index
    %c0_457 = arith.constant 0 : index
    %899 = vector.load %arg7[%c0_456, %c0_457] : memref<32x128xf32, #tpu.memory_space<vmem>>, vector<32x128xf32>
    %cst_458 = arith.constant dense<0.000000e+00> : vector<16x128xf32>
    %900 = tpu.matmul %898, %899, %cst_458 {dimension_numbers = #tpu.dot_dimension_numbers<[1], [0], [0], [1], [0, 0, 1, 1], [], []>} : vector<16x32xf32>, vector<32x128xf32>, vector<16x128xf32> -> vector<16x128xf32>
    %901 = arith.addf %897, %900 : vector<16x128xf32>
    %c0_459 = arith.constant 0 : index
    %c0_460 = arith.constant 0 : index
    %902 = vector.load %arg15[%c0_459, %c0_460] : memref<16x32xf32, #tpu.memory_space<vmem>>, vector<16x32xf32>
    %903 = vector.extract_strided_slice %895 {offsets = [0, 0], sizes = [16, 32], strides = [1, 1]} : vector<16x128xf32> to vector<16x32xf32>
    %904 = arith.negf %903 : vector<16x32xf32>
    %905 = math.exp %904 : vector<16x32xf32>
    %cst_461 = arith.constant 1.000000e+00 : f32
    %906 = vector.broadcast %cst_461 : f32 to vector<16x32xf32>
    %907 = arith.addf %906, %905 : vector<16x32xf32>
    %908 = arith.divf %906, %907 : vector<16x32xf32>
    %909 = vector.extract_strided_slice %895 {offsets = [0, 32], sizes = [16, 32], strides = [1, 1]} : vector<16x128xf32> to vector<16x32xf32>
    %910 = arith.negf %909 : vector<16x32xf32>
    %911 = math.exp %910 : vector<16x32xf32>
    %cst_462 = arith.constant 1.000000e+00 : f32
    %912 = vector.broadcast %cst_462 : f32 to vector<16x32xf32>
    %913 = arith.addf %912, %911 : vector<16x32xf32>
    %914 = arith.divf %912, %913 : vector<16x32xf32>
    %915 = vector.extract_strided_slice %895 {offsets = [0, 64], sizes = [16, 32], strides = [1, 1]} : vector<16x128xf32> to vector<16x32xf32>
    %916 = math.tanh %915 : vector<16x32xf32>
    %917 = vector.extract_strided_slice %895 {offsets = [0, 96], sizes = [16, 32], strides = [1, 1]} : vector<16x128xf32> to vector<16x32xf32>
    %918 = arith.negf %917 : vector<16x32xf32>
    %919 = math.exp %918 : vector<16x32xf32>
    %cst_463 = arith.constant 1.000000e+00 : f32
    %920 = vector.broadcast %cst_463 : f32 to vector<16x32xf32>
    %921 = arith.addf %920, %919 : vector<16x32xf32>
    %922 = arith.divf %920, %921 : vector<16x32xf32>
    %923 = arith.mulf %914, %902 : vector<16x32xf32>
    %924 = arith.mulf %908, %916 : vector<16x32xf32>
    %925 = arith.addf %923, %924 : vector<16x32xf32>
    %926 = math.tanh %925 : vector<16x32xf32>
    %927 = arith.mulf %922, %926 : vector<16x32xf32>
    %c0_464 = arith.constant 0 : index
    %c0_465 = arith.constant 0 : index
    %928 = vector.load %arg17[%c0_464, %c0_465] : memref<16x32xf32, #tpu.memory_space<vmem>>, vector<16x32xf32>
    %929 = vector.extract_strided_slice %901 {offsets = [0, 0], sizes = [16, 32], strides = [1, 1]} : vector<16x128xf32> to vector<16x32xf32>
    %930 = arith.negf %929 : vector<16x32xf32>
    %931 = math.exp %930 : vector<16x32xf32>
    %cst_466 = arith.constant 1.000000e+00 : f32
    %932 = vector.broadcast %cst_466 : f32 to vector<16x32xf32>
    %933 = arith.addf %932, %931 : vector<16x32xf32>
    %934 = arith.divf %932, %933 : vector<16x32xf32>
    %935 = vector.extract_strided_slice %901 {offsets = [0, 32], sizes = [16, 32], strides = [1, 1]} : vector<16x128xf32> to vector<16x32xf32>
    %936 = arith.negf %935 : vector<16x32xf32>
    %937 = math.exp %936 : vector<16x32xf32>
    %cst_467 = arith.constant 1.000000e+00 : f32
    %938 = vector.broadcast %cst_467 : f32 to vector<16x32xf32>
    %939 = arith.addf %938, %937 : vector<16x32xf32>
    %940 = arith.divf %938, %939 : vector<16x32xf32>
    %941 = vector.extract_strided_slice %901 {offsets = [0, 64], sizes = [16, 32], strides = [1, 1]} : vector<16x128xf32> to vector<16x32xf32>
    %942 = math.tanh %941 : vector<16x32xf32>
    %943 = vector.extract_strided_slice %901 {offsets = [0, 96], sizes = [16, 32], strides = [1, 1]} : vector<16x128xf32> to vector<16x32xf32>
    %944 = arith.negf %943 : vector<16x32xf32>
    %945 = math.exp %944 : vector<16x32xf32>
    %cst_468 = arith.constant 1.000000e+00 : f32
    %946 = vector.broadcast %cst_468 : f32 to vector<16x32xf32>
    %947 = arith.addf %946, %945 : vector<16x32xf32>
    %948 = arith.divf %946, %947 : vector<16x32xf32>
    %949 = arith.mulf %940, %928 : vector<16x32xf32>
    %950 = arith.mulf %934, %942 : vector<16x32xf32>
    %951 = arith.addf %949, %950 : vector<16x32xf32>
    %952 = math.tanh %951 : vector<16x32xf32>
    %953 = arith.mulf %948, %952 : vector<16x32xf32>
    %c0_469 = arith.constant 0 : index
    %c0_470 = arith.constant 0 : index
    %954 = vector.load %arg14[%c0_469, %c0_470] : memref<16x32xf32, #tpu.memory_space<vmem>>, vector<16x32xf32>
    tpu.vector_store %arg14[%c0_469, %c0_470], %927 {strides = array<i32>} : memref<16x32xf32, #tpu.memory_space<vmem>>, vector<16x32xf32>,
    %c0_471 = arith.constant 0 : index
    %c0_472 = arith.constant 0 : index
    %955 = vector.load %arg15[%c0_471, %c0_472] : memref<16x32xf32, #tpu.memory_space<vmem>>, vector<16x32xf32>
    tpu.vector_store %arg15[%c0_471, %c0_472], %925 {strides = array<i32>} : memref<16x32xf32, #tpu.memory_space<vmem>>, vector<16x32xf32>,
    %c0_473 = arith.constant 0 : index
    %c0_474 = arith.constant 0 : index
    %956 = vector.load %arg16[%c0_473, %c0_474] : memref<16x32xf32, #tpu.memory_space<vmem>>, vector<16x32xf32>
    tpu.vector_store %arg16[%c0_473, %c0_474], %953 {strides = array<i32>} : memref<16x32xf32, #tpu.memory_space<vmem>>, vector<16x32xf32>,
    %c0_475 = arith.constant 0 : index
    %c0_476 = arith.constant 0 : index
    %957 = vector.load %arg17[%c0_475, %c0_476] : memref<16x32xf32, #tpu.memory_space<vmem>>, vector<16x32xf32>
    tpu.vector_store %arg17[%c0_475, %c0_476], %951 {strides = array<i32>} : memref<16x32xf32, #tpu.memory_space<vmem>>, vector<16x32xf32>,
    %c4_i32_477 = arith.constant 4 : i32
    %c16_i32_478 = arith.constant 16 : i32
    %958 = arith.muli %c4_i32_477, %c16_i32_478 : i32
    %959 = tpu.assume_multiple %958, 16 : i32
    %c7_i32_479 = arith.constant 7 : i32
    %960 = arith.subi %c7_i32_479, %c4_i32_477 : i32
    %c16_i32_480 = arith.constant 16 : i32
    %961 = arith.muli %960, %c16_i32_480 : i32
    %962 = tpu.assume_multiple %961, 16 : i32
    %963 = arith.index_cast %959 : i32 to index
    %c0_481 = arith.constant 0 : index
    %964 = vector.load %arg11[%963, %c0_481] : memref<128x256xf32, #tpu.memory_space<vmem>>, vector<16x128xf32>
    %c0_482 = arith.constant 0 : index
    %c0_483 = arith.constant 0 : index
    %965 = vector.load %arg14[%c0_482, %c0_483] : memref<16x32xf32, #tpu.memory_space<vmem>>, vector<16x32xf32>
    %c0_484 = arith.constant 0 : index
    %c0_485 = arith.constant 0 : index
    %966 = vector.load %arg6[%c0_484, %c0_485] : memref<32x128xf32, #tpu.memory_space<vmem>>, vector<32x128xf32>
    %cst_486 = arith.constant dense<0.000000e+00> : vector<16x128xf32>
    %967 = tpu.matmul %965, %966, %cst_486 {dimension_numbers = #tpu.dot_dimension_numbers<[1], [0], [0], [1], [0, 0, 1, 1], [], []>} : vector<16x32xf32>, vector<32x128xf32>, vector<16x128xf32> -> vector<16x128xf32>
    %968 = arith.addf %964, %967 : vector<16x128xf32>
    %969 = arith.index_cast %962 : i32 to index
    %c128_487 = arith.constant 128 : index
    %970 = vector.load %arg11[%969, %c128_487] : memref<128x256xf32, #tpu.memory_space<vmem>>, vector<16x128xf32>
    %c0_488 = arith.constant 0 : index
    %c0_489 = arith.constant 0 : index
    %971 = vector.load %arg16[%c0_488, %c0_489] : memref<16x32xf32, #tpu.memory_space<vmem>>, vector<16x32xf32>
    %c0_490 = arith.constant 0 : index
    %c0_491 = arith.constant 0 : index
    %972 = vector.load %arg7[%c0_490, %c0_491] : memref<32x128xf32, #tpu.memory_space<vmem>>, vector<32x128xf32>
    %cst_492 = arith.constant dense<0.000000e+00> : vector<16x128xf32>
    %973 = tpu.matmul %971, %972, %cst_492 {dimension_numbers = #tpu.dot_dimension_numbers<[1], [0], [0], [1], [0, 0, 1, 1], [], []>} : vector<16x32xf32>, vector<32x128xf32>, vector<16x128xf32> -> vector<16x128xf32>
    %974 = arith.addf %970, %973 : vector<16x128xf32>
    %c0_493 = arith.constant 0 : index
    %c0_494 = arith.constant 0 : index
    %975 = vector.load %arg15[%c0_493, %c0_494] : memref<16x32xf32, #tpu.memory_space<vmem>>, vector<16x32xf32>
    %976 = vector.extract_strided_slice %968 {offsets = [0, 0], sizes = [16, 32], strides = [1, 1]} : vector<16x128xf32> to vector<16x32xf32>
    %977 = arith.negf %976 : vector<16x32xf32>
    %978 = math.exp %977 : vector<16x32xf32>
    %cst_495 = arith.constant 1.000000e+00 : f32
    %979 = vector.broadcast %cst_495 : f32 to vector<16x32xf32>
    %980 = arith.addf %979, %978 : vector<16x32xf32>
    %981 = arith.divf %979, %980 : vector<16x32xf32>
    %982 = vector.extract_strided_slice %968 {offsets = [0, 32], sizes = [16, 32], strides = [1, 1]} : vector<16x128xf32> to vector<16x32xf32>
    %983 = arith.negf %982 : vector<16x32xf32>
    %984 = math.exp %983 : vector<16x32xf32>
    %cst_496 = arith.constant 1.000000e+00 : f32
    %985 = vector.broadcast %cst_496 : f32 to vector<16x32xf32>
    %986 = arith.addf %985, %984 : vector<16x32xf32>
    %987 = arith.divf %985, %986 : vector<16x32xf32>
    %988 = vector.extract_strided_slice %968 {offsets = [0, 64], sizes = [16, 32], strides = [1, 1]} : vector<16x128xf32> to vector<16x32xf32>
    %989 = math.tanh %988 : vector<16x32xf32>
    %990 = vector.extract_strided_slice %968 {offsets = [0, 96], sizes = [16, 32], strides = [1, 1]} : vector<16x128xf32> to vector<16x32xf32>
    %991 = arith.negf %990 : vector<16x32xf32>
    %992 = math.exp %991 : vector<16x32xf32>
    %cst_497 = arith.constant 1.000000e+00 : f32
    %993 = vector.broadcast %cst_497 : f32 to vector<16x32xf32>
    %994 = arith.addf %993, %992 : vector<16x32xf32>
    %995 = arith.divf %993, %994 : vector<16x32xf32>
    %996 = arith.mulf %987, %975 : vector<16x32xf32>
    %997 = arith.mulf %981, %989 : vector<16x32xf32>
    %998 = arith.addf %996, %997 : vector<16x32xf32>
    %999 = math.tanh %998 : vector<16x32xf32>
    %1000 = arith.mulf %995, %999 : vector<16x32xf32>
    %c0_498 = arith.constant 0 : index
    %c0_499 = arith.constant 0 : index
    %1001 = vector.load %arg17[%c0_498, %c0_499] : memref<16x32xf32, #tpu.memory_space<vmem>>, vector<16x32xf32>
    %1002 = vector.extract_strided_slice %974 {offsets = [0, 0], sizes = [16, 32], strides = [1, 1]} : vector<16x128xf32> to vector<16x32xf32>
    %1003 = arith.negf %1002 : vector<16x32xf32>
    %1004 = math.exp %1003 : vector<16x32xf32>
    %cst_500 = arith.constant 1.000000e+00 : f32
    %1005 = vector.broadcast %cst_500 : f32 to vector<16x32xf32>
    %1006 = arith.addf %1005, %1004 : vector<16x32xf32>
    %1007 = arith.divf %1005, %1006 : vector<16x32xf32>
    %1008 = vector.extract_strided_slice %974 {offsets = [0, 32], sizes = [16, 32], strides = [1, 1]} : vector<16x128xf32> to vector<16x32xf32>
    %1009 = arith.negf %1008 : vector<16x32xf32>
    %1010 = math.exp %1009 : vector<16x32xf32>
    %cst_501 = arith.constant 1.000000e+00 : f32
    %1011 = vector.broadcast %cst_501 : f32 to vector<16x32xf32>
    %1012 = arith.addf %1011, %1010 : vector<16x32xf32>
    %1013 = arith.divf %1011, %1012 : vector<16x32xf32>
    %1014 = vector.extract_strided_slice %974 {offsets = [0, 64], sizes = [16, 32], strides = [1, 1]} : vector<16x128xf32> to vector<16x32xf32>
    %1015 = math.tanh %1014 : vector<16x32xf32>
    %1016 = vector.extract_strided_slice %974 {offsets = [0, 96], sizes = [16, 32], strides = [1, 1]} : vector<16x128xf32> to vector<16x32xf32>
    %1017 = arith.negf %1016 : vector<16x32xf32>
    %1018 = math.exp %1017 : vector<16x32xf32>
    %cst_502 = arith.constant 1.000000e+00 : f32
    %1019 = vector.broadcast %cst_502 : f32 to vector<16x32xf32>
    %1020 = arith.addf %1019, %1018 : vector<16x32xf32>
    %1021 = arith.divf %1019, %1020 : vector<16x32xf32>
    %1022 = arith.mulf %1013, %1001 : vector<16x32xf32>
    %1023 = arith.mulf %1007, %1015 : vector<16x32xf32>
    %1024 = arith.addf %1022, %1023 : vector<16x32xf32>
    %1025 = math.tanh %1024 : vector<16x32xf32>
    %1026 = arith.mulf %1021, %1025 : vector<16x32xf32>
    %c0_503 = arith.constant 0 : index
    %c0_504 = arith.constant 0 : index
    %1027 = vector.load %arg14[%c0_503, %c0_504] : memref<16x32xf32, #tpu.memory_space<vmem>>, vector<16x32xf32>
    tpu.vector_store %arg14[%c0_503, %c0_504], %1000 {strides = array<i32>} : memref<16x32xf32, #tpu.memory_space<vmem>>, vector<16x32xf32>,
    %c0_505 = arith.constant 0 : index
    %c0_506 = arith.constant 0 : index
    %1028 = vector.load %arg15[%c0_505, %c0_506] : memref<16x32xf32, #tpu.memory_space<vmem>>, vector<16x32xf32>
    tpu.vector_store %arg15[%c0_505, %c0_506], %998 {strides = array<i32>} : memref<16x32xf32, #tpu.memory_space<vmem>>, vector<16x32xf32>,
    %c0_507 = arith.constant 0 : index
    %c0_508 = arith.constant 0 : index
    %1029 = vector.load %arg16[%c0_507, %c0_508] : memref<16x32xf32, #tpu.memory_space<vmem>>, vector<16x32xf32>
    tpu.vector_store %arg16[%c0_507, %c0_508], %1026 {strides = array<i32>} : memref<16x32xf32, #tpu.memory_space<vmem>>, vector<16x32xf32>,
    %c0_509 = arith.constant 0 : index
    %c0_510 = arith.constant 0 : index
    %1030 = vector.load %arg17[%c0_509, %c0_510] : memref<16x32xf32, #tpu.memory_space<vmem>>, vector<16x32xf32>
    tpu.vector_store %arg17[%c0_509, %c0_510], %1024 {strides = array<i32>} : memref<16x32xf32, #tpu.memory_space<vmem>>, vector<16x32xf32>,
    %c5_i32_511 = arith.constant 5 : i32
    %c16_i32_512 = arith.constant 16 : i32
    %1031 = arith.muli %c5_i32_511, %c16_i32_512 : i32
    %1032 = tpu.assume_multiple %1031, 16 : i32
    %c7_i32_513 = arith.constant 7 : i32
    %1033 = arith.subi %c7_i32_513, %c5_i32_511 : i32
    %c16_i32_514 = arith.constant 16 : i32
    %1034 = arith.muli %1033, %c16_i32_514 : i32
    %1035 = tpu.assume_multiple %1034, 16 : i32
    %1036 = arith.index_cast %1032 : i32 to index
    %c0_515 = arith.constant 0 : index
    %1037 = vector.load %arg11[%1036, %c0_515] : memref<128x256xf32, #tpu.memory_space<vmem>>, vector<16x128xf32>
    %c0_516 = arith.constant 0 : index
    %c0_517 = arith.constant 0 : index
    %1038 = vector.load %arg14[%c0_516, %c0_517] : memref<16x32xf32, #tpu.memory_space<vmem>>, vector<16x32xf32>
    %c0_518 = arith.constant 0 : index
    %c0_519 = arith.constant 0 : index
    %1039 = vector.load %arg6[%c0_518, %c0_519] : memref<32x128xf32, #tpu.memory_space<vmem>>, vector<32x128xf32>
    %cst_520 = arith.constant dense<0.000000e+00> : vector<16x128xf32>
    %1040 = tpu.matmul %1038, %1039, %cst_520 {dimension_numbers = #tpu.dot_dimension_numbers<[1], [0], [0], [1], [0, 0, 1, 1], [], []>} : vector<16x32xf32>, vector<32x128xf32>, vector<16x128xf32> -> vector<16x128xf32>
    %1041 = arith.addf %1037, %1040 : vector<16x128xf32>
    %1042 = arith.index_cast %1035 : i32 to index
    %c128_521 = arith.constant 128 : index
    %1043 = vector.load %arg11[%1042, %c128_521] : memref<128x256xf32, #tpu.memory_space<vmem>>, vector<16x128xf32>
    %c0_522 = arith.constant 0 : index
    %c0_523 = arith.constant 0 : index
    %1044 = vector.load %arg16[%c0_522, %c0_523] : memref<16x32xf32, #tpu.memory_space<vmem>>, vector<16x32xf32>
    %c0_524 = arith.constant 0 : index
    %c0_525 = arith.constant 0 : index
    %1045 = vector.load %arg7[%c0_524, %c0_525] : memref<32x128xf32, #tpu.memory_space<vmem>>, vector<32x128xf32>
    %cst_526 = arith.constant dense<0.000000e+00> : vector<16x128xf32>
    %1046 = tpu.matmul %1044, %1045, %cst_526 {dimension_numbers = #tpu.dot_dimension_numbers<[1], [0], [0], [1], [0, 0, 1, 1], [], []>} : vector<16x32xf32>, vector<32x128xf32>, vector<16x128xf32> -> vector<16x128xf32>
    %1047 = arith.addf %1043, %1046 : vector<16x128xf32>
    %c0_527 = arith.constant 0 : index
    %c0_528 = arith.constant 0 : index
    %1048 = vector.load %arg15[%c0_527, %c0_528] : memref<16x32xf32, #tpu.memory_space<vmem>>, vector<16x32xf32>
    %1049 = vector.extract_strided_slice %1041 {offsets = [0, 0], sizes = [16, 32], strides = [1, 1]} : vector<16x128xf32> to vector<16x32xf32>
    %1050 = arith.negf %1049 : vector<16x32xf32>
    %1051 = math.exp %1050 : vector<16x32xf32>
    %cst_529 = arith.constant 1.000000e+00 : f32
    %1052 = vector.broadcast %cst_529 : f32 to vector<16x32xf32>
    %1053 = arith.addf %1052, %1051 : vector<16x32xf32>
    %1054 = arith.divf %1052, %1053 : vector<16x32xf32>
    %1055 = vector.extract_strided_slice %1041 {offsets = [0, 32], sizes = [16, 32], strides = [1, 1]} : vector<16x128xf32> to vector<16x32xf32>
    %1056 = arith.negf %1055 : vector<16x32xf32>
    %1057 = math.exp %1056 : vector<16x32xf32>
    %cst_530 = arith.constant 1.000000e+00 : f32
    %1058 = vector.broadcast %cst_530 : f32 to vector<16x32xf32>
    %1059 = arith.addf %1058, %1057 : vector<16x32xf32>
    %1060 = arith.divf %1058, %1059 : vector<16x32xf32>
    %1061 = vector.extract_strided_slice %1041 {offsets = [0, 64], sizes = [16, 32], strides = [1, 1]} : vector<16x128xf32> to vector<16x32xf32>
    %1062 = math.tanh %1061 : vector<16x32xf32>
    %1063 = vector.extract_strided_slice %1041 {offsets = [0, 96], sizes = [16, 32], strides = [1, 1]} : vector<16x128xf32> to vector<16x32xf32>
    %1064 = arith.negf %1063 : vector<16x32xf32>
    %1065 = math.exp %1064 : vector<16x32xf32>
    %cst_531 = arith.constant 1.000000e+00 : f32
    %1066 = vector.broadcast %cst_531 : f32 to vector<16x32xf32>
    %1067 = arith.addf %1066, %1065 : vector<16x32xf32>
    %1068 = arith.divf %1066, %1067 : vector<16x32xf32>
    %1069 = arith.mulf %1060, %1048 : vector<16x32xf32>
    %1070 = arith.mulf %1054, %1062 : vector<16x32xf32>
    %1071 = arith.addf %1069, %1070 : vector<16x32xf32>
    %1072 = math.tanh %1071 : vector<16x32xf32>
    %1073 = arith.mulf %1068, %1072 : vector<16x32xf32>
    %c0_532 = arith.constant 0 : index
    %c0_533 = arith.constant 0 : index
    %1074 = vector.load %arg17[%c0_532, %c0_533] : memref<16x32xf32, #tpu.memory_space<vmem>>, vector<16x32xf32>
    %1075 = vector.extract_strided_slice %1047 {offsets = [0, 0], sizes = [16, 32], strides = [1, 1]} : vector<16x128xf32> to vector<16x32xf32>
    %1076 = arith.negf %1075 : vector<16x32xf32>
    %1077 = math.exp %1076 : vector<16x32xf32>
    %cst_534 = arith.constant 1.000000e+00 : f32
    %1078 = vector.broadcast %cst_534 : f32 to vector<16x32xf32>
    %1079 = arith.addf %1078, %1077 : vector<16x32xf32>
    %1080 = arith.divf %1078, %1079 : vector<16x32xf32>
    %1081 = vector.extract_strided_slice %1047 {offsets = [0, 32], sizes = [16, 32], strides = [1, 1]} : vector<16x128xf32> to vector<16x32xf32>
    %1082 = arith.negf %1081 : vector<16x32xf32>
    %1083 = math.exp %1082 : vector<16x32xf32>
    %cst_535 = arith.constant 1.000000e+00 : f32
    %1084 = vector.broadcast %cst_535 : f32 to vector<16x32xf32>
    %1085 = arith.addf %1084, %1083 : vector<16x32xf32>
    %1086 = arith.divf %1084, %1085 : vector<16x32xf32>
    %1087 = vector.extract_strided_slice %1047 {offsets = [0, 64], sizes = [16, 32], strides = [1, 1]} : vector<16x128xf32> to vector<16x32xf32>
    %1088 = math.tanh %1087 : vector<16x32xf32>
    %1089 = vector.extract_strided_slice %1047 {offsets = [0, 96], sizes = [16, 32], strides = [1, 1]} : vector<16x128xf32> to vector<16x32xf32>
    %1090 = arith.negf %1089 : vector<16x32xf32>
    %1091 = math.exp %1090 : vector<16x32xf32>
    %cst_536 = arith.constant 1.000000e+00 : f32
    %1092 = vector.broadcast %cst_536 : f32 to vector<16x32xf32>
    %1093 = arith.addf %1092, %1091 : vector<16x32xf32>
    %1094 = arith.divf %1092, %1093 : vector<16x32xf32>
    %1095 = arith.mulf %1086, %1074 : vector<16x32xf32>
    %1096 = arith.mulf %1080, %1088 : vector<16x32xf32>
    %1097 = arith.addf %1095, %1096 : vector<16x32xf32>
    %1098 = math.tanh %1097 : vector<16x32xf32>
    %1099 = arith.mulf %1094, %1098 : vector<16x32xf32>
    %c0_537 = arith.constant 0 : index
    %c0_538 = arith.constant 0 : index
    %1100 = vector.load %arg14[%c0_537, %c0_538] : memref<16x32xf32, #tpu.memory_space<vmem>>, vector<16x32xf32>
    tpu.vector_store %arg14[%c0_537, %c0_538], %1073 {strides = array<i32>} : memref<16x32xf32, #tpu.memory_space<vmem>>, vector<16x32xf32>,
    %c0_539 = arith.constant 0 : index
    %c0_540 = arith.constant 0 : index
    %1101 = vector.load %arg15[%c0_539, %c0_540] : memref<16x32xf32, #tpu.memory_space<vmem>>, vector<16x32xf32>
    tpu.vector_store %arg15[%c0_539, %c0_540], %1071 {strides = array<i32>} : memref<16x32xf32, #tpu.memory_space<vmem>>, vector<16x32xf32>,
    %c0_541 = arith.constant 0 : index
    %c0_542 = arith.constant 0 : index
    %1102 = vector.load %arg16[%c0_541, %c0_542] : memref<16x32xf32, #tpu.memory_space<vmem>>, vector<16x32xf32>
    tpu.vector_store %arg16[%c0_541, %c0_542], %1099 {strides = array<i32>} : memref<16x32xf32, #tpu.memory_space<vmem>>, vector<16x32xf32>,
    %c0_543 = arith.constant 0 : index
    %c0_544 = arith.constant 0 : index
    %1103 = vector.load %arg17[%c0_543, %c0_544] : memref<16x32xf32, #tpu.memory_space<vmem>>, vector<16x32xf32>
    tpu.vector_store %arg17[%c0_543, %c0_544], %1097 {strides = array<i32>} : memref<16x32xf32, #tpu.memory_space<vmem>>, vector<16x32xf32>,
    %c6_i32_545 = arith.constant 6 : i32
    %c16_i32_546 = arith.constant 16 : i32
    %1104 = arith.muli %c6_i32_545, %c16_i32_546 : i32
    %1105 = tpu.assume_multiple %1104, 16 : i32
    %c7_i32_547 = arith.constant 7 : i32
    %1106 = arith.subi %c7_i32_547, %c6_i32_545 : i32
    %c16_i32_548 = arith.constant 16 : i32
    %1107 = arith.muli %1106, %c16_i32_548 : i32
    %1108 = tpu.assume_multiple %1107, 16 : i32
    %1109 = arith.index_cast %1105 : i32 to index
    %c0_549 = arith.constant 0 : index
    %1110 = vector.load %arg11[%1109, %c0_549] : memref<128x256xf32, #tpu.memory_space<vmem>>, vector<16x128xf32>
    %c0_550 = arith.constant 0 : index
    %c0_551 = arith.constant 0 : index
    %1111 = vector.load %arg14[%c0_550, %c0_551] : memref<16x32xf32, #tpu.memory_space<vmem>>, vector<16x32xf32>
    %c0_552 = arith.constant 0 : index
    %c0_553 = arith.constant 0 : index
    %1112 = vector.load %arg6[%c0_552, %c0_553] : memref<32x128xf32, #tpu.memory_space<vmem>>, vector<32x128xf32>
    %cst_554 = arith.constant dense<0.000000e+00> : vector<16x128xf32>
    %1113 = tpu.matmul %1111, %1112, %cst_554 {dimension_numbers = #tpu.dot_dimension_numbers<[1], [0], [0], [1], [0, 0, 1, 1], [], []>} : vector<16x32xf32>, vector<32x128xf32>, vector<16x128xf32> -> vector<16x128xf32>
    %1114 = arith.addf %1110, %1113 : vector<16x128xf32>
    %1115 = arith.index_cast %1108 : i32 to index
    %c128_555 = arith.constant 128 : index
    %1116 = vector.load %arg11[%1115, %c128_555] : memref<128x256xf32, #tpu.memory_space<vmem>>, vector<16x128xf32>
    %c0_556 = arith.constant 0 : index
    %c0_557 = arith.constant 0 : index
    %1117 = vector.load %arg16[%c0_556, %c0_557] : memref<16x32xf32, #tpu.memory_space<vmem>>, vector<16x32xf32>
    %c0_558 = arith.constant 0 : index
    %c0_559 = arith.constant 0 : index
    %1118 = vector.load %arg7[%c0_558, %c0_559] : memref<32x128xf32, #tpu.memory_space<vmem>>, vector<32x128xf32>
    %cst_560 = arith.constant dense<0.000000e+00> : vector<16x128xf32>
    %1119 = tpu.matmul %1117, %1118, %cst_560 {dimension_numbers = #tpu.dot_dimension_numbers<[1], [0], [0], [1], [0, 0, 1, 1], [], []>} : vector<16x32xf32>, vector<32x128xf32>, vector<16x128xf32> -> vector<16x128xf32>
    %1120 = arith.addf %1116, %1119 : vector<16x128xf32>
    %c0_561 = arith.constant 0 : index
    %c0_562 = arith.constant 0 : index
    %1121 = vector.load %arg15[%c0_561, %c0_562] : memref<16x32xf32, #tpu.memory_space<vmem>>, vector<16x32xf32>
    %1122 = vector.extract_strided_slice %1114 {offsets = [0, 0], sizes = [16, 32], strides = [1, 1]} : vector<16x128xf32> to vector<16x32xf32>
    %1123 = arith.negf %1122 : vector<16x32xf32>
    %1124 = math.exp %1123 : vector<16x32xf32>
    %cst_563 = arith.constant 1.000000e+00 : f32
    %1125 = vector.broadcast %cst_563 : f32 to vector<16x32xf32>
    %1126 = arith.addf %1125, %1124 : vector<16x32xf32>
    %1127 = arith.divf %1125, %1126 : vector<16x32xf32>
    %1128 = vector.extract_strided_slice %1114 {offsets = [0, 32], sizes = [16, 32], strides = [1, 1]} : vector<16x128xf32> to vector<16x32xf32>
    %1129 = arith.negf %1128 : vector<16x32xf32>
    %1130 = math.exp %1129 : vector<16x32xf32>
    %cst_564 = arith.constant 1.000000e+00 : f32
    %1131 = vector.broadcast %cst_564 : f32 to vector<16x32xf32>
    %1132 = arith.addf %1131, %1130 : vector<16x32xf32>
    %1133 = arith.divf %1131, %1132 : vector<16x32xf32>
    %1134 = vector.extract_strided_slice %1114 {offsets = [0, 64], sizes = [16, 32], strides = [1, 1]} : vector<16x128xf32> to vector<16x32xf32>
    %1135 = math.tanh %1134 : vector<16x32xf32>
    %1136 = vector.extract_strided_slice %1114 {offsets = [0, 96], sizes = [16, 32], strides = [1, 1]} : vector<16x128xf32> to vector<16x32xf32>
    %1137 = arith.negf %1136 : vector<16x32xf32>
    %1138 = math.exp %1137 : vector<16x32xf32>
    %cst_565 = arith.constant 1.000000e+00 : f32
    %1139 = vector.broadcast %cst_565 : f32 to vector<16x32xf32>
    %1140 = arith.addf %1139, %1138 : vector<16x32xf32>
    %1141 = arith.divf %1139, %1140 : vector<16x32xf32>
    %1142 = arith.mulf %1133, %1121 : vector<16x32xf32>
    %1143 = arith.mulf %1127, %1135 : vector<16x32xf32>
    %1144 = arith.addf %1142, %1143 : vector<16x32xf32>
    %1145 = math.tanh %1144 : vector<16x32xf32>
    %1146 = arith.mulf %1141, %1145 : vector<16x32xf32>
    %c0_566 = arith.constant 0 : index
    %c0_567 = arith.constant 0 : index
    %1147 = vector.load %arg17[%c0_566, %c0_567] : memref<16x32xf32, #tpu.memory_space<vmem>>, vector<16x32xf32>
    %1148 = vector.extract_strided_slice %1120 {offsets = [0, 0], sizes = [16, 32], strides = [1, 1]} : vector<16x128xf32> to vector<16x32xf32>
    %1149 = arith.negf %1148 : vector<16x32xf32>
    %1150 = math.exp %1149 : vector<16x32xf32>
    %cst_568 = arith.constant 1.000000e+00 : f32
    %1151 = vector.broadcast %cst_568 : f32 to vector<16x32xf32>
    %1152 = arith.addf %1151, %1150 : vector<16x32xf32>
    %1153 = arith.divf %1151, %1152 : vector<16x32xf32>
    %1154 = vector.extract_strided_slice %1120 {offsets = [0, 32], sizes = [16, 32], strides = [1, 1]} : vector<16x128xf32> to vector<16x32xf32>
    %1155 = arith.negf %1154 : vector<16x32xf32>
    %1156 = math.exp %1155 : vector<16x32xf32>
    %cst_569 = arith.constant 1.000000e+00 : f32
    %1157 = vector.broadcast %cst_569 : f32 to vector<16x32xf32>
    %1158 = arith.addf %1157, %1156 : vector<16x32xf32>
    %1159 = arith.divf %1157, %1158 : vector<16x32xf32>
    %1160 = vector.extract_strided_slice %1120 {offsets = [0, 64], sizes = [16, 32], strides = [1, 1]} : vector<16x128xf32> to vector<16x32xf32>
    %1161 = math.tanh %1160 : vector<16x32xf32>
    %1162 = vector.extract_strided_slice %1120 {offsets = [0, 96], sizes = [16, 32], strides = [1, 1]} : vector<16x128xf32> to vector<16x32xf32>
    %1163 = arith.negf %1162 : vector<16x32xf32>
    %1164 = math.exp %1163 : vector<16x32xf32>
    %cst_570 = arith.constant 1.000000e+00 : f32
    %1165 = vector.broadcast %cst_570 : f32 to vector<16x32xf32>
    %1166 = arith.addf %1165, %1164 : vector<16x32xf32>
    %1167 = arith.divf %1165, %1166 : vector<16x32xf32>
    %1168 = arith.mulf %1159, %1147 : vector<16x32xf32>
    %1169 = arith.mulf %1153, %1161 : vector<16x32xf32>
    %1170 = arith.addf %1168, %1169 : vector<16x32xf32>
    %1171 = math.tanh %1170 : vector<16x32xf32>
    %1172 = arith.mulf %1167, %1171 : vector<16x32xf32>
    %c0_571 = arith.constant 0 : index
    %c0_572 = arith.constant 0 : index
    %1173 = vector.load %arg14[%c0_571, %c0_572] : memref<16x32xf32, #tpu.memory_space<vmem>>, vector<16x32xf32>
    tpu.vector_store %arg14[%c0_571, %c0_572], %1146 {strides = array<i32>} : memref<16x32xf32, #tpu.memory_space<vmem>>, vector<16x32xf32>,
    %c0_573 = arith.constant 0 : index
    %c0_574 = arith.constant 0 : index
    %1174 = vector.load %arg15[%c0_573, %c0_574] : memref<16x32xf32, #tpu.memory_space<vmem>>, vector<16x32xf32>
    tpu.vector_store %arg15[%c0_573, %c0_574], %1144 {strides = array<i32>} : memref<16x32xf32, #tpu.memory_space<vmem>>, vector<16x32xf32>,
    %c0_575 = arith.constant 0 : index
    %c0_576 = arith.constant 0 : index
    %1175 = vector.load %arg16[%c0_575, %c0_576] : memref<16x32xf32, #tpu.memory_space<vmem>>, vector<16x32xf32>
    tpu.vector_store %arg16[%c0_575, %c0_576], %1172 {strides = array<i32>} : memref<16x32xf32, #tpu.memory_space<vmem>>, vector<16x32xf32>,
    %c0_577 = arith.constant 0 : index
    %c0_578 = arith.constant 0 : index
    %1176 = vector.load %arg17[%c0_577, %c0_578] : memref<16x32xf32, #tpu.memory_space<vmem>>, vector<16x32xf32>
    tpu.vector_store %arg17[%c0_577, %c0_578], %1170 {strides = array<i32>} : memref<16x32xf32, #tpu.memory_space<vmem>>, vector<16x32xf32>,
    %c7_i32_579 = arith.constant 7 : i32
    %c16_i32_580 = arith.constant 16 : i32
    %1177 = arith.muli %c7_i32_579, %c16_i32_580 : i32
    %1178 = tpu.assume_multiple %1177, 16 : i32
    %c7_i32_581 = arith.constant 7 : i32
    %1179 = arith.subi %c7_i32_581, %c7_i32_579 : i32
    %c16_i32_582 = arith.constant 16 : i32
    %1180 = arith.muli %1179, %c16_i32_582 : i32
    %1181 = tpu.assume_multiple %1180, 16 : i32
    %1182 = arith.index_cast %1178 : i32 to index
    %c0_583 = arith.constant 0 : index
    %1183 = vector.load %arg11[%1182, %c0_583] : memref<128x256xf32, #tpu.memory_space<vmem>>, vector<16x128xf32>
    %c0_584 = arith.constant 0 : index
    %c0_585 = arith.constant 0 : index
    %1184 = vector.load %arg14[%c0_584, %c0_585] : memref<16x32xf32, #tpu.memory_space<vmem>>, vector<16x32xf32>
    %c0_586 = arith.constant 0 : index
    %c0_587 = arith.constant 0 : index
    %1185 = vector.load %arg6[%c0_586, %c0_587] : memref<32x128xf32, #tpu.memory_space<vmem>>, vector<32x128xf32>
    %cst_588 = arith.constant dense<0.000000e+00> : vector<16x128xf32>
    %1186 = tpu.matmul %1184, %1185, %cst_588 {dimension_numbers = #tpu.dot_dimension_numbers<[1], [0], [0], [1], [0, 0, 1, 1], [], []>} : vector<16x32xf32>, vector<32x128xf32>, vector<16x128xf32> -> vector<16x128xf32>
    %1187 = arith.addf %1183, %1186 : vector<16x128xf32>
    %1188 = arith.index_cast %1181 : i32 to index
    %c128_589 = arith.constant 128 : index
    %1189 = vector.load %arg11[%1188, %c128_589] : memref<128x256xf32, #tpu.memory_space<vmem>>, vector<16x128xf32>
    %c0_590 = arith.constant 0 : index
    %c0_591 = arith.constant 0 : index
    %1190 = vector.load %arg16[%c0_590, %c0_591] : memref<16x32xf32, #tpu.memory_space<vmem>>, vector<16x32xf32>
    %c0_592 = arith.constant 0 : index
    %c0_593 = arith.constant 0 : index
    %1191 = vector.load %arg7[%c0_592, %c0_593] : memref<32x128xf32, #tpu.memory_space<vmem>>, vector<32x128xf32>
    %cst_594 = arith.constant dense<0.000000e+00> : vector<16x128xf32>
    %1192 = tpu.matmul %1190, %1191, %cst_594 {dimension_numbers = #tpu.dot_dimension_numbers<[1], [0], [0], [1], [0, 0, 1, 1], [], []>} : vector<16x32xf32>, vector<32x128xf32>, vector<16x128xf32> -> vector<16x128xf32>
    %1193 = arith.addf %1189, %1192 : vector<16x128xf32>
    %c0_595 = arith.constant 0 : index
    %c0_596 = arith.constant 0 : index
    %1194 = vector.load %arg15[%c0_595, %c0_596] : memref<16x32xf32, #tpu.memory_space<vmem>>, vector<16x32xf32>
    %1195 = vector.extract_strided_slice %1187 {offsets = [0, 0], sizes = [16, 32], strides = [1, 1]} : vector<16x128xf32> to vector<16x32xf32>
    %1196 = arith.negf %1195 : vector<16x32xf32>
    %1197 = math.exp %1196 : vector<16x32xf32>
    %cst_597 = arith.constant 1.000000e+00 : f32
    %1198 = vector.broadcast %cst_597 : f32 to vector<16x32xf32>
    %1199 = arith.addf %1198, %1197 : vector<16x32xf32>
    %1200 = arith.divf %1198, %1199 : vector<16x32xf32>
    %1201 = vector.extract_strided_slice %1187 {offsets = [0, 32], sizes = [16, 32], strides = [1, 1]} : vector<16x128xf32> to vector<16x32xf32>
    %1202 = arith.negf %1201 : vector<16x32xf32>
    %1203 = math.exp %1202 : vector<16x32xf32>
    %cst_598 = arith.constant 1.000000e+00 : f32
    %1204 = vector.broadcast %cst_598 : f32 to vector<16x32xf32>
    %1205 = arith.addf %1204, %1203 : vector<16x32xf32>
    %1206 = arith.divf %1204, %1205 : vector<16x32xf32>
    %1207 = vector.extract_strided_slice %1187 {offsets = [0, 64], sizes = [16, 32], strides = [1, 1]} : vector<16x128xf32> to vector<16x32xf32>
    %1208 = math.tanh %1207 : vector<16x32xf32>
    %1209 = vector.extract_strided_slice %1187 {offsets = [0, 96], sizes = [16, 32], strides = [1, 1]} : vector<16x128xf32> to vector<16x32xf32>
    %1210 = arith.negf %1209 : vector<16x32xf32>
    %1211 = math.exp %1210 : vector<16x32xf32>
    %cst_599 = arith.constant 1.000000e+00 : f32
    %1212 = vector.broadcast %cst_599 : f32 to vector<16x32xf32>
    %1213 = arith.addf %1212, %1211 : vector<16x32xf32>
    %1214 = arith.divf %1212, %1213 : vector<16x32xf32>
    %1215 = arith.mulf %1206, %1194 : vector<16x32xf32>
    %1216 = arith.mulf %1200, %1208 : vector<16x32xf32>
    %1217 = arith.addf %1215, %1216 : vector<16x32xf32>
    %1218 = math.tanh %1217 : vector<16x32xf32>
    %1219 = arith.mulf %1214, %1218 : vector<16x32xf32>
    %c0_600 = arith.constant 0 : index
    %c0_601 = arith.constant 0 : index
    %1220 = vector.load %arg17[%c0_600, %c0_601] : memref<16x32xf32, #tpu.memory_space<vmem>>, vector<16x32xf32>
    %1221 = vector.extract_strided_slice %1193 {offsets = [0, 0], sizes = [16, 32], strides = [1, 1]} : vector<16x128xf32> to vector<16x32xf32>
    %1222 = arith.negf %1221 : vector<16x32xf32>
    %1223 = math.exp %1222 : vector<16x32xf32>
    %cst_602 = arith.constant 1.000000e+00 : f32
    %1224 = vector.broadcast %cst_602 : f32 to vector<16x32xf32>
    %1225 = arith.addf %1224, %1223 : vector<16x32xf32>
    %1226 = arith.divf %1224, %1225 : vector<16x32xf32>
    %1227 = vector.extract_strided_slice %1193 {offsets = [0, 32], sizes = [16, 32], strides = [1, 1]} : vector<16x128xf32> to vector<16x32xf32>
    %1228 = arith.negf %1227 : vector<16x32xf32>
    %1229 = math.exp %1228 : vector<16x32xf32>
    %cst_603 = arith.constant 1.000000e+00 : f32
    %1230 = vector.broadcast %cst_603 : f32 to vector<16x32xf32>
    %1231 = arith.addf %1230, %1229 : vector<16x32xf32>
    %1232 = arith.divf %1230, %1231 : vector<16x32xf32>
    %1233 = vector.extract_strided_slice %1193 {offsets = [0, 64], sizes = [16, 32], strides = [1, 1]} : vector<16x128xf32> to vector<16x32xf32>
    %1234 = math.tanh %1233 : vector<16x32xf32>
    %1235 = vector.extract_strided_slice %1193 {offsets = [0, 96], sizes = [16, 32], strides = [1, 1]} : vector<16x128xf32> to vector<16x32xf32>
    %1236 = arith.negf %1235 : vector<16x32xf32>
    %1237 = math.exp %1236 : vector<16x32xf32>
    %cst_604 = arith.constant 1.000000e+00 : f32
    %1238 = vector.broadcast %cst_604 : f32 to vector<16x32xf32>
    %1239 = arith.addf %1238, %1237 : vector<16x32xf32>
    %1240 = arith.divf %1238, %1239 : vector<16x32xf32>
    %1241 = arith.mulf %1232, %1220 : vector<16x32xf32>
    %1242 = arith.mulf %1226, %1234 : vector<16x32xf32>
    %1243 = arith.addf %1241, %1242 : vector<16x32xf32>
    %1244 = math.tanh %1243 : vector<16x32xf32>
    %1245 = arith.mulf %1240, %1244 : vector<16x32xf32>
    %c0_605 = arith.constant 0 : index
    %c0_606 = arith.constant 0 : index
    %1246 = vector.load %arg14[%c0_605, %c0_606] : memref<16x32xf32, #tpu.memory_space<vmem>>, vector<16x32xf32>
    tpu.vector_store %arg14[%c0_605, %c0_606], %1219 {strides = array<i32>} : memref<16x32xf32, #tpu.memory_space<vmem>>, vector<16x32xf32>,
    %c0_607 = arith.constant 0 : index
    %c0_608 = arith.constant 0 : index
    %1247 = vector.load %arg15[%c0_607, %c0_608] : memref<16x32xf32, #tpu.memory_space<vmem>>, vector<16x32xf32>
    tpu.vector_store %arg15[%c0_607, %c0_608], %1217 {strides = array<i32>} : memref<16x32xf32, #tpu.memory_space<vmem>>, vector<16x32xf32>,
    %c0_609 = arith.constant 0 : index
    %c0_610 = arith.constant 0 : index
    %1248 = vector.load %arg16[%c0_609, %c0_610] : memref<16x32xf32, #tpu.memory_space<vmem>>, vector<16x32xf32>
    tpu.vector_store %arg16[%c0_609, %c0_610], %1245 {strides = array<i32>} : memref<16x32xf32, #tpu.memory_space<vmem>>, vector<16x32xf32>,
    %c0_611 = arith.constant 0 : index
    %c0_612 = arith.constant 0 : index
    %1249 = vector.load %arg17[%c0_611, %c0_612] : memref<16x32xf32, #tpu.memory_space<vmem>>, vector<16x32xf32>
    tpu.vector_store %arg17[%c0_611, %c0_612], %1243 {strides = array<i32>} : memref<16x32xf32, #tpu.memory_space<vmem>>, vector<16x32xf32>,
    %c8_i32_613 = arith.constant 8 : i32
    %c0_614 = arith.constant 0 : index
    %c0_615 = arith.constant 0 : index
    %1250 = vector.load %arg14[%c0_614, %c0_615] : memref<16x32xf32, #tpu.memory_space<vmem>>, vector<16x32xf32>
    %c2 = arith.constant 2 : index
    %c0_616 = arith.constant 0 : index
    %c0_617 = arith.constant 0 : index
    %1251 = vector.load %arg9[%c2, %c0_616, %c0_617] : memref<4x16x32xf32, #tpu.memory_space<vmem>>, vector<1x16x32xf32>
    %1252 = vector.shape_cast %1251 : vector<1x16x32xf32> to vector<16x32xf32>
    %1253 = vector.shape_cast %1250 : vector<16x32xf32> to vector<1x16x32xf32>
    tpu.vector_store %arg9[%c2, %c0_616, %c0_617], %1253 {strides = array<i32>} : memref<4x16x32xf32, #tpu.memory_space<vmem>>, vector<1x16x32xf32>,
    %c0_618 = arith.constant 0 : index
    %c0_619 = arith.constant 0 : index
    %1254 = vector.load %arg16[%c0_618, %c0_619] : memref<16x32xf32, #tpu.memory_space<vmem>>, vector<16x32xf32>
    %c3 = arith.constant 3 : index
    %c0_620 = arith.constant 0 : index
    %c0_621 = arith.constant 0 : index
    %1255 = vector.load %arg9[%c3, %c0_620, %c0_621] : memref<4x16x32xf32, #tpu.memory_space<vmem>>, vector<1x16x32xf32>
    %1256 = vector.shape_cast %1255 : vector<1x16x32xf32> to vector<16x32xf32>
    %1257 = vector.shape_cast %1254 : vector<16x32xf32> to vector<1x16x32xf32>
    tpu.vector_store %arg9[%c3, %c0_620, %c0_621], %1257 {strides = array<i32>} : memref<4x16x32xf32, #tpu.memory_space<vmem>>, vector<1x16x32xf32>,
    %c0_622 = arith.constant 0 : index
    %c0_623 = arith.constant 0 : index
    %1258 = vector.load %arg15[%c0_622, %c0_623] : memref<16x32xf32, #tpu.memory_space<vmem>>, vector<16x32xf32>
    %c2_624 = arith.constant 2 : index
    %c0_625 = arith.constant 0 : index
    %c0_626 = arith.constant 0 : index
    %1259 = vector.load %arg10[%c2_624, %c0_625, %c0_626] : memref<4x16x32xf32, #tpu.memory_space<vmem>>, vector<1x16x32xf32>
    %1260 = vector.shape_cast %1259 : vector<1x16x32xf32> to vector<16x32xf32>
    %1261 = vector.shape_cast %1258 : vector<16x32xf32> to vector<1x16x32xf32>
    tpu.vector_store %arg10[%c2_624, %c0_625, %c0_626], %1261 {strides = array<i32>} : memref<4x16x32xf32, #tpu.memory_space<vmem>>, vector<1x16x32xf32>,
    %c0_627 = arith.constant 0 : index
    %c0_628 = arith.constant 0 : index
    %1262 = vector.load %arg17[%c0_627, %c0_628] : memref<16x32xf32, #tpu.memory_space<vmem>>, vector<16x32xf32>
    %c3_629 = arith.constant 3 : index
    %c0_630 = arith.constant 0 : index
    %c0_631 = arith.constant 0 : index
    %1263 = vector.load %arg10[%c3_629, %c0_630, %c0_631] : memref<4x16x32xf32, #tpu.memory_space<vmem>>, vector<1x16x32xf32>
    %1264 = vector.shape_cast %1263 : vector<1x16x32xf32> to vector<16x32xf32>
    %1265 = vector.shape_cast %1262 : vector<16x32xf32> to vector<1x16x32xf32>
    tpu.vector_store %arg10[%c3_629, %c0_630, %c0_631], %1265 {strides = array<i32>} : memref<4x16x32xf32, #tpu.memory_space<vmem>>, vector<1x16x32xf32>,
    return
  }
}

module attributes {stable_mosaic.version = 11 : i64} {
  func.func @kernel(%arg0: memref<8x32xf32, #tpu.memory_space<vmem>>, %arg1: memref<8x32xf32, #tpu.memory_space<vmem>>, %arg2: memref<8x32xf32, #tpu.memory_space<vmem>>, %arg3: memref<8x32xf32, #tpu.memory_space<vmem>>, %arg4: memref<32x512xf32, #tpu.memory_space<vmem>>, %arg5: memref<32x512xf32, #tpu.memory_space<vmem>>, %arg6: memref<1x512xf32, #tpu.memory_space<vmem>>, %arg7: memref<512x512xf32, #tpu.memory_space<vmem>>, %arg8: memref<1x512xf32, #tpu.memory_space<vmem>>, %arg9: memref<512x128xf32, #tpu.memory_space<vmem>>, %arg10: memref<1x128xf32, #tpu.memory_space<vmem>>, %arg11: memref<8x128xf32, #tpu.memory_space<vmem>>) attributes {dimension_semantics = [], scalar_prefetch = 0 : i64, scratch_operands = 0 : i64, tpu.core_type = #tpu.core_type<tc>} {
    %c0 = arith.constant 0 : index
    %c0_0 = arith.constant 0 : index
    %0 = vector.load %arg0[%c0, %c0_0] : memref<8x32xf32, #tpu.memory_space<vmem>>, vector<8x32xf32>
    %c0_1 = arith.constant 0 : index
    %c0_2 = arith.constant 0 : index
    %1 = vector.load %arg1[%c0_1, %c0_2] : memref<8x32xf32, #tpu.memory_space<vmem>>, vector<8x32xf32>
    %2 = arith.maximumf %0, %1 : vector<8x32xf32>
    %c0_3 = arith.constant 0 : index
    %c0_4 = arith.constant 0 : index
    %3 = vector.load %arg2[%c0_3, %c0_4] : memref<8x32xf32, #tpu.memory_space<vmem>>, vector<8x32xf32>
    %c0_5 = arith.constant 0 : index
    %c0_6 = arith.constant 0 : index
    %4 = vector.load %arg3[%c0_5, %c0_6] : memref<8x32xf32, #tpu.memory_space<vmem>>, vector<8x32xf32>
    %5 = arith.maximumf %3, %4 : vector<8x32xf32>
    %c0_7 = arith.constant 0 : index
    %c0_8 = arith.constant 0 : index
    %6 = vector.load %arg4[%c0_7, %c0_8] : memref<32x512xf32, #tpu.memory_space<vmem>>, vector<32x512xf32>
    %cst = arith.constant dense<0.000000e+00> : vector<8x512xf32>
    %7 = tpu.matmul %2, %6, %cst {dimension_numbers = #tpu.dot_dimension_numbers<[1], [0], [0], [1], [0, 0, 1, 1], [], []>} : vector<8x32xf32>, vector<32x512xf32>, vector<8x512xf32> -> vector<8x512xf32>
    %c0_9 = arith.constant 0 : index
    %c0_10 = arith.constant 0 : index
    %8 = vector.load %arg5[%c0_9, %c0_10] : memref<32x512xf32, #tpu.memory_space<vmem>>, vector<32x512xf32>
    %cst_11 = arith.constant dense<0.000000e+00> : vector<8x512xf32>
    %9 = tpu.matmul %5, %8, %cst_11 {dimension_numbers = #tpu.dot_dimension_numbers<[1], [0], [0], [1], [0, 0, 1, 1], [], []>} : vector<8x32xf32>, vector<32x512xf32>, vector<8x512xf32> -> vector<8x512xf32>
    %10 = arith.addf %7, %9 : vector<8x512xf32>
    %c0_12 = arith.constant 0 : index
    %c0_13 = arith.constant 0 : index
    %11 = vector.load %arg6[%c0_12, %c0_13] : memref<1x512xf32, #tpu.memory_space<vmem>>, vector<1x512xf32>
    %12 = vector.broadcast %11 : vector<1x512xf32> to vector<8x512xf32>
    %13 = arith.addf %10, %12 : vector<8x512xf32>
    %c0_14 = arith.constant 0 : index
    %c0_15 = arith.constant 0 : index
    %14 = vector.load %arg7[%c0_14, %c0_15] : memref<512x512xf32, #tpu.memory_space<vmem>>, vector<512x512xf32>
    %cst_16 = arith.constant dense<0.000000e+00> : vector<8x512xf32>
    %15 = tpu.matmul %13, %14, %cst_16 {dimension_numbers = #tpu.dot_dimension_numbers<[1], [0], [0], [1], [0, 0, 1, 1], [], []>} : vector<8x512xf32>, vector<512x512xf32>, vector<8x512xf32> -> vector<8x512xf32>
    %c0_17 = arith.constant 0 : index
    %c0_18 = arith.constant 0 : index
    %16 = vector.load %arg8[%c0_17, %c0_18] : memref<1x512xf32, #tpu.memory_space<vmem>>, vector<1x512xf32>
    %17 = vector.broadcast %16 : vector<1x512xf32> to vector<8x512xf32>
    %18 = arith.addf %15, %17 : vector<8x512xf32>
    %c0_19 = arith.constant 0 : index
    %c0_20 = arith.constant 0 : index
    %19 = vector.load %arg9[%c0_19, %c0_20] : memref<512x128xf32, #tpu.memory_space<vmem>>, vector<512x128xf32>
    %cst_21 = arith.constant dense<0.000000e+00> : vector<8x128xf32>
    %20 = tpu.matmul %18, %19, %cst_21 {dimension_numbers = #tpu.dot_dimension_numbers<[1], [0], [0], [1], [0, 0, 1, 1], [], []>} : vector<8x512xf32>, vector<512x128xf32>, vector<8x128xf32> -> vector<8x128xf32>
    %c0_22 = arith.constant 0 : index
    %c0_23 = arith.constant 0 : index
    %21 = vector.load %arg10[%c0_22, %c0_23] : memref<1x128xf32, #tpu.memory_space<vmem>>, vector<1x128xf32>
    %22 = vector.broadcast %21 : vector<1x128xf32> to vector<8x128xf32>
    %23 = arith.addf %20, %22 : vector<8x128xf32>
    %c0_24 = arith.constant 0 : index
    %c0_25 = arith.constant 0 : index
    %24 = vector.load %arg11[%c0_24, %c0_25] : memref<8x128xf32, #tpu.memory_space<vmem>>, vector<8x128xf32>
    tpu.vector_store %arg11[%c0_24, %c0_25], %23 {strides = array<i32>} : memref<8x128xf32, #tpu.memory_space<vmem>>, vector<8x128xf32>,
    return
  }
}

</mosaic_0001>

<bundles_post_ra>
// kernel: run.3
= control target key start
LH: loop header
LB: loop body
LE: loop exit
PB: predicated region body
PF: predicated region fallthrough
CT: control target
= control target key end

     0   :  { %16 = vsyncpa [#allocation3], 0  ;;  %s1327_s0 = inlined_call_operand.vmem [shape: f32[8,32], index: 0, kind: input, shape index: {}]   ;;  %s1328_s1 = inlined_call_operand.vmem [shape: f32[8,32], index: 1, kind: input, shape index: {}]   ;;  %s1329_s2 = inlined_call_operand.vmem [shape: f32[8,32], index: 2, kind: input, shape index: {}]   ;;  %s1330_s3 = inlined_call_operand.vmem [shape: f32[8,32], index: 3, kind: input, shape index: {}]   ;;  %s1331_s4 = inlined_call_operand.vmem [shape: f32[32,512], index: 4, kind: input, shape index: {}]   ;;  %s1332_s5 = inlined_call_operand.vmem [shape: f32[32,512], index: 5, kind: input, shape index: {}]   ;;  %s1333_s6 = inlined_call_operand.vmem [shape: f32[1,512], index: 6, kind: input, shape index: {}]   ;;  %s1334_s7 = inlined_call_operand.hbm [shape: f32[512,512], index: 7, kind: input, shape index: {}]   ;;  %s1335_s8 = inlined_call_operand.vmem [shape: f32[1,512], index: 8, kind: input, shape index: {}]   ;;  %s1336_s9 = inlined_call_operand.hbm [shape: f32[512,128], index: 9, kind: input, shape index: {}]   ;;  %s1337_s10 = inlined_call_operand.vmem [shape: f32[1,128], index: 10, kind: input, shape index: {}]   ;;  %s1338_s11 = inlined_call_operand.vmem [shape: f32[8,128], index: 11, kind: output, shape index: {}]  }
   0x1   :  { %s36_s19 = sshll.u32 %s1334_s7, 4  ;;  %s37_s19 = int_to_ptr.hbm [resolvable:$true] %s36_s19 }
   0x2   :  { %17 = vsyncpa [#allocation5], 0  ;;  %s1097_s20 = smov [#allocation2]   ;;  %s51_s24 = sshll.u32 %s1336_s9, 4  ;;  %s52_s24 = int_to_ptr.hbm [resolvable:$true] %s51_s24 }
   0x3   :  { %s38_s21 = sshll.u32 %s1097_s20, 4  ;;  %s1098_s25 = smov 512   ;;  %s39_s21 = int_to_ptr.vmem [resolvable:$true] %s38_s21 }
   0x4   :  { %s1099_s26 = smov 32   ;;  %s1100_s27 = smov [#allocation4]  }
   0x5   :  { %44 = dma.hbm_to_vmem [thread:$0]  %s37_s19, 32768, %s39_s21, [#allocation3], %s1098_s25, %s1098_s25, %s1099_s26  }
   0x6   :  { %s53_s28 = sshll.u32 %s1100_s27, 4  ;;  %s1101_s29 = smov 128   ;;  %s54_s28 = int_to_ptr.vmem [resolvable:$true] %s53_s28 }
   0x7   :  { %s1102_s30 = smov 8  }
   0x8   :  { %59 = dma.hbm_to_vmem [thread:$0]  %s52_s24, 8192, %s54_s28, [#allocation5], %s1101_s29, %s1101_s29, %s1102_s30  }
   0x9   :  { %1093 = dma.done.wait [#allocation3], 32768  }
   0xa   :  { %1094 = vsyncadd [#allocation3], 4294934528 }
   0xb   :  { %1095 = dma.done.wait [#allocation5], 8192  }
   0xc   :  { %1096 = vsyncadd [#allocation5], 4294959104  ;;  %v104_v0 = vld [vmem:[%s1332_s5 + $0x60] sm:$0xff]  ;;  %v105_v1 = vld [vmem:[%s1332_s5 + $0x68] sm:$0xff]  ;;  %vm108_vm0 = vcmask 261120  }
   0xd   :  { %v106_v2 = vld [vmem:[%s1332_s5 + $0x70] sm:$0xff]  ;;  %124 = vmatpush.msra.mxu0 %v104_v0  ;;  %144 = vmatpush.msra.mxu1 %v105_v1  ;;  %v107_v3 = vld [vmem:[%s1332_s5 + $0x78] sm:$0xff]  ;;  %v100_v4 = vld [vmem:[%s1332_s5 + $0x40] sm:$0xff] }
   0xe   :  { %v101_v5 = vld [vmem:[%s1332_s5 + $0x48] sm:$0xff]  ;;  %164 = vmatpush.msra.mxu2 %v106_v2  ;;  %184 = vmatpush.msra.mxu3 %v107_v3  ;;  %v102_v6 = vld [vmem:[%s1332_s5 + $0x50] sm:$0xff]  ;;  %v103_v7 = vld [vmem:[%s1332_s5 + $0x58] sm:$0xff] }
   0xf   :  { %v96_v8 = vld [vmem:[%s1332_s5 + $0x20] sm:$0xff]  ;;  %125 = vmatpush.msra.mxu0 %v100_v4  ;;  %145 = vmatpush.msra.mxu1 %v101_v5  ;;  %v97_v9 = vld [vmem:[%s1332_s5 + $0x28] sm:$0xff]  ;;  %v98_v10 = vld [vmem:[%s1332_s5 + $0x30] sm:$0xff] }
  0x10   :  { %v99_v11 = vld [vmem:[%s1332_s5 + $0x38] sm:$0xff]  ;;  %165 = vmatpush.msra.mxu2 %v102_v6  ;;  %185 = vmatpush.msra.mxu3 %v103_v7  ;;  %v92_v12 = vld [vmem:[%s1332_s5] sm:$0xff]  ;;  %v93_v13 = vld [vmem:[%s1332_s5 + $0x8] sm:$0xff] }
  0x11   :  { %v94_v14 = vld [vmem:[%s1332_s5 + $0x10] sm:$0xff]  ;;  %126 = vmatpush.msra.mxu0 %v96_v8  ;;  %146 = vmatpush.msra.mxu1 %v97_v9  ;;  %v95_v15 = vld [vmem:[%s1332_s5 + $0x18] sm:$0xff]  ;;  %v73_v16 = vld [vmem:[%s1329_s2] sm:$0xff] }
  0x12   :  { %v74_v17 = vld [vmem:[%s1330_s3] sm:$0xff]  ;;  %166 = vmatpush.msra.mxu2 %v98_v10  ;;  %186 = vmatpush.msra.mxu3 %v99_v11  ;;  %v89_v20 = vld [vmem:[%s1331_s4 + $0x68] sm:$0xff]  ;;  %v90_v21 = vld [vmem:[%s1331_s4 + $0x70] sm:$0xff] }
  0x13   :  { %v75_v18 = vmax.f32 %v73_v16, %v74_v17  ;;  %127 = vmatpush.msra.mxu0 %v92_v12  ;;  %147 = vmatpush.msra.mxu1 %v93_v13  ;;  %v88_v19 = vld [vmem:[%s1331_s4 + $0x60] sm:$0xff]  ;;  %v91_v22 = vld [vmem:[%s1331_s4 + $0x78] sm:$0xff]  ;;  %v85_v24 = vld [vmem:[%s1331_s4 + $0x48] sm:$0xff] }
  0x14   :  { %167 = vmatpush.msra.mxu2 %v94_v14  ;;  %187 = vmatpush.msra.mxu3 %v95_v15  ;;  %v84_v23 = vld [vmem:[%s1331_s4 + $0x40] sm:$0xff]  ;;  %v86_v25 = vld [vmem:[%s1331_s4 + $0x50] sm:$0xff]  ;;  %v87_v26 = vld [vmem:[%s1331_s4 + $0x58] sm:$0xff] }
  0x15   :  { %1030 = vmatmul.msk.f32.vlgmr.msra.gmra.mxu0 %vm108_vm0, %v75_v18  ;;  %1031 = vmatmul.msk.f32.vlgmr.msra.gmra.mxu1 %vm108_vm0, %v75_v18  ;;  %v80_v27 = vld [vmem:[%s1331_s4 + $0x20] sm:$0xff]  ;;  %v81_v28 = vld [vmem:[%s1331_s4 + $0x28] sm:$0xff]  ;;  %v82_v31 = vld [vmem:[%s1331_s4 + $0x30] sm:$0xff] }
  0x16   :  { %1032 = vmatmul.msk.f32.vlgmr.msra.gmra.mxu2 %vm108_vm0, %v75_v18  ;;  %1033 = vmatmul.msk.f32.vlgmr.msra.gmra.mxu3 %vm108_vm0, %v75_v18  ;;  %v70_v29 = vld [vmem:[%s1327_s0] sm:$0xff]  ;;  %v83_v32 = vld [vmem:[%s1331_s4 + $0x38] sm:$0xff]  ;;  %v77_v34 = vld [vmem:[%s1331_s4 + $0x8] sm:$0xff] }
  0x17   :  { %207 = vmatpush.msrb.mxu0 %v88_v19  ;;  %227 = vmatpush.msrb.mxu1 %v89_v20  ;;  %v71_v30 = vld [vmem:[%s1328_s1] sm:$0xff]  ;;  %v78_v35 = vld [vmem:[%s1331_s4 + $0x10] sm:$0xff]  ;;  %v79_v36 = vld [vmem:[%s1331_s4 + $0x18] sm:$0xff] }
  0x18   :  { %247 = vmatpush.msrb.mxu2 %v90_v21  ;;  %267 = vmatpush.msrb.mxu3 %v91_v22  ;;  %v76_v33 = vld [vmem:[%s1331_s4] sm:$0xff]  ;;  %v72_v37 = vmax.f32 %v70_v29, %v71_v30 }
  0x19   :  { %208 = vmatpush.msrb.mxu0 %v84_v23  ;;  %228 = vmatpush.msrb.mxu1 %v85_v24  ;;  %v349_v38 = vld [vmem:[#allocation2 + $0x1e0] sm:$0xff] }
  0x1a   :  { %248 = vmatpush.msrb.mxu2 %v86_v25  ;;  %268 = vmatpush.msrb.mxu3 %v87_v26  ;;  %v413_v39 = vld [vmem:[#allocation2 + $0x3e0] sm:$0xff] }
  0x1b   :  { %209 = vmatpush.msrb.mxu0 %v80_v27  ;;  %229 = vmatpush.msrb.mxu1 %v81_v28  ;;  %v477_v40 = vld [vmem:[#allocation2 + $0x5e0] sm:$0xff] }
  0x1c   :  { %249 = vmatpush.msrb.mxu2 %v82_v31  ;;  %269 = vmatpush.msrb.mxu3 %v83_v32  ;;  %v541_v41 = vld [vmem:[#allocation2 + $0x7e0] sm:$0xff] }
  0x1d   :  { %210 = vmatpush.msrb.mxu0 %v76_v33  ;;  %230 = vmatpush.msrb.mxu1 %v77_v34  ;;  %v345_v42 = vld [vmem:[#allocation2 + $0x1c0] sm:$0xff] }
  0x1e   :  { %250 = vmatpush.msrb.mxu2 %v78_v35  ;;  %270 = vmatpush.msrb.mxu3 %v79_v36  ;;  %v409_v43 = vld [vmem:[#allocation2 + $0x3c0] sm:$0xff]  ;;  %v350_v36 = vld [vmem:[#allocation2 + $0x1e8] sm:$0xff] }
  0x1f   :  { %1034 = vmatmul.msk.f32.vlgmr.msrb.gmra.mxu0 %vm108_vm0, %v72_v37  ;;  %1035 = vmatmul.msk.f32.vlgmr.msrb.gmra.mxu1 %vm108_vm0, %v72_v37  ;;  %v473_v44 = vld [vmem:[#allocation2 + $0x5c0] sm:$0xff] }
  0x20   :  { %1036 = vmatmul.msk.f32.vlgmr.msrb.gmra.mxu2 %vm108_vm0, %v72_v37  ;;  %1037 = vmatmul.msk.f32.vlgmr.msrb.gmra.mxu3 %vm108_vm0, %v72_v37  ;;  %v537_v45 = vld [vmem:[#allocation2 + $0x7c0] sm:$0xff]  ;;  %v414_v37 = vld [vmem:[#allocation2 + $0x3e8] sm:$0xff] }
  0x21   :  { %555 = vmatpush.msra.mxu0 %v349_v38  ;;  %575 = vmatpush.msra.mxu1 %v413_v39  ;;  %v341_v46 = vld [vmem:[#allocation2 + $0x1a0] sm:$0xff] }
  0x22   :  { %v405_v47 = vld [vmem:[#allocation2 + $0x3a0] sm:$0xff]  ;;  %595 = vmatpush.msra.mxu2 %v477_v40  ;;  %615 = vmatpush.msra.mxu3 %v541_v41  ;;  %v346_v40 = vld [vmem:[#allocation2 + $0x1c8] sm:$0xff] }
  0x23   :  { %556 = vmatpush.msra.mxu0 %v345_v42  ;;  %576 = vmatpush.msra.mxu1 %v409_v43  ;;  %v469_v48 = vld [vmem:[#allocation2 + $0x5a0] sm:$0xff]  ;;  %v410_v41 = vld [vmem:[#allocation2 + $0x3c8] sm:$0xff] }
  0x24   :  { %v533_v49 = vld [vmem:[#allocation2 + $0x7a0] sm:$0xff]  ;;  %596 = vmatpush.msra.mxu2 %v473_v44  ;;  %616 = vmatpush.msra.mxu3 %v537_v45  ;;  %v478_v42 = vld [vmem:[#allocation2 + $0x5e8] sm:$0xff] }
  0x25   :  { %v337_v50 = vld [vmem:[#allocation2 + $0x180] sm:$0xff]  ;;  %557 = vmatpush.msra.mxu0 %v341_v46  ;;  %577 = vmatpush.msra.mxu1 %v405_v47  ;;  %v542_v43 = vld [vmem:[#allocation2 + $0x7e8] sm:$0xff] }
  0x26   :  { %v401_v51 = vld [vmem:[#allocation2 + $0x380] sm:$0xff]  ;;  %597 = vmatpush.msra.mxu2 %v469_v48  ;;  %617 = vmatpush.msra.mxu3 %v533_v49  ;;  %v342_v44 = vld [vmem:[#allocation2 + $0x1a8] sm:$0xff] }
  0x27   :  { %v465_v52 = vld [vmem:[#allocation2 + $0x580] sm:$0xff]  ;;  %558 = vmatpush.msra.mxu0 %v337_v50  ;;  %578 = vmatpush.msra.mxu1 %v401_v51  ;;  %v406_v45 = vld [vmem:[#allocation2 + $0x3a8] sm:$0xff] }
  0x28   :  { %v529_v53 = vld [vmem:[#allocation2 + $0x780] sm:$0xff]  ;;  %598 = vmatpush.msra.mxu2 %v465_v52  ;;  %v474_v46 = vld [vmem:[#allocation2 + $0x5c8] sm:$0xff] }
  0x29   :  { %v333_v54 = vld [vmem:[#allocation2 + $0x160] sm:$0xff]  ;;  %618 = vmatpush.msra.mxu3 %v529_v53  ;;  %v538_v47 = vld [vmem:[#allocation2 + $0x7c8] sm:$0xff] }
  0x2a   :  { %v397_v55 = vld [vmem:[#allocation2 + $0x360] sm:$0xff]  ;;  %559 = vmatpush.msra.mxu0 %v333_v54  ;;  %v338_v48 = vld [vmem:[#allocation2 + $0x188] sm:$0xff] }
  0x2b   :  { %v461_v56 = vld [vmem:[#allocation2 + $0x560] sm:$0xff]  ;;  %579 = vmatpush.msra.mxu1 %v397_v55  ;;  %v402_v49 = vld [vmem:[#allocation2 + $0x388] sm:$0xff] }
  0x2c   :  { %v525_v57 = vld [vmem:[#allocation2 + $0x760] sm:$0xff]  ;;  %599 = vmatpush.msra.mxu2 %v461_v56  ;;  %v470_v50 = vld [vmem:[#allocation2 + $0x5a8] sm:$0xff] }
  0x2d   :  { %v329_v58 = vld [vmem:[#allocation2 + $0x140] sm:$0xff]  ;;  %619 = vmatpush.msra.mxu3 %v525_v57  ;;  %v534_v51 = vld [vmem:[#allocation2 + $0x7a8] sm:$0xff] }
  0x2e   :  { %v393_v59 = vld [vmem:[#allocation2 + $0x340] sm:$0xff]  ;;  %560 = vmatpush.msra.mxu0 %v329_v58  ;;  %v334_v52 = vld [vmem:[#allocation2 + $0x168] sm:$0xff] }
  0x2f   :  { %v457_v60 = vld [vmem:[#allocation2 + $0x540] sm:$0xff]  ;;  %580 = vmatpush.msra.mxu1 %v393_v59  ;;  %v398_v53 = vld [vmem:[#allocation2 + $0x368] sm:$0xff] }
  0x30   :  { %v521_v61 = vld [vmem:[#allocation2 + $0x740] sm:$0xff]  ;;  %600 = vmatpush.msra.mxu2 %v457_v60  ;;  %v466_v54 = vld [vmem:[#allocation2 + $0x588] sm:$0xff] }
  0x31   :  { %v325_v62 = vld [vmem:[#allocation2 + $0x120] sm:$0xff]  ;;  %620 = vmatpush.msra.mxu3 %v521_v61  ;;  %v530_v55 = vld [vmem:[#allocation2 + $0x788] sm:$0xff] }
  0x32   :  { %v389_v63 = vld [vmem:[#allocation2 + $0x320] sm:$0xff]  ;;  %561 = vmatpush.msra.mxu0 %v325_v62  ;;  %v330_v56 = vld [vmem:[#allocation2 + $0x148] sm:$0xff] }
  0x33   :  { %v453_v0 = vld [vmem:[#allocation2 + $0x520] sm:$0xff]  ;;  %581 = vmatpush.msra.mxu1 %v389_v63  ;;  %v394_v57 = vld [vmem:[#allocation2 + $0x348] sm:$0xff] }
  0x34   :  { %v517_v1 = vld [vmem:[#allocation2 + $0x720] sm:$0xff]  ;;  %601 = vmatpush.msra.mxu2 %v453_v0  ;;  %v462_v58 = vld [vmem:[#allocation2 + $0x568] sm:$0xff] }
  0x35   :  { %v321_v2 = vld [vmem:[#allocation2 + $0x100] sm:$0xff]  ;;  %621 = vmatpush.msra.mxu3 %v517_v1  ;;  %v526_v59 = vld [vmem:[#allocation2 + $0x768] sm:$0xff] }
  0x36   :  { %v385_v3 = vld [vmem:[#allocation2 + $0x300] sm:$0xff]  ;;  %562 = vmatpush.msra.mxu0 %v321_v2  ;;  %v326_v60 = vld [vmem:[#allocation2 + $0x128] sm:$0xff] }
  0x37   :  { %v449_v4 = vld [vmem:[#allocation2 + $0x500] sm:$0xff]  ;;  %582 = vmatpush.msra.mxu1 %v385_v3  ;;  %v390_v61 = vld [vmem:[#allocation2 + $0x328] sm:$0xff] }
  0x38   :  { %v513_v5 = vld [vmem:[#allocation2 + $0x700] sm:$0xff]  ;;  %602 = vmatpush.msra.mxu2 %v449_v4  ;;  %v458_v62 = vld [vmem:[#allocation2 + $0x548] sm:$0xff] }
  0x39   :  { %v317_v6 = vld [vmem:[#allocation2 + $0xe0] sm:$0xff]  ;;  %622 = vmatpush.msra.mxu3 %v513_v5  ;;  %v522_v63 = vld [vmem:[#allocation2 + $0x748] sm:$0xff] }
  0x3a   :  { %v381_v7 = vld [vmem:[#allocation2 + $0x2e0] sm:$0xff]  ;;  %563 = vmatpush.msra.mxu0 %v317_v6  ;;  %v322_v0 = vld [vmem:[#allocation2 + $0x108] sm:$0xff] }
  0x3b   :  { %v445_v8 = vld [vmem:[#allocation2 + $0x4e0] sm:$0xff]  ;;  %583 = vmatpush.msra.mxu1 %v381_v7  ;;  %v386_v1 = vld [vmem:[#allocation2 + $0x308] sm:$0xff] }
  0x3c   :  { %v509_v9 = vld [vmem:[#allocation2 + $0x6e0] sm:$0xff]  ;;  %603 = vmatpush.msra.mxu2 %v445_v8  ;;  %v318_v2 = vld [vmem:[#allocation2 + $0xe8] sm:$0xff] }
  0x3d   :  { %v313_v10 = vld [vmem:[#allocation2 + $0xc0] sm:$0xff]  ;;  %623 = vmatpush.msra.mxu3 %v509_v9  ;;  %v382_v3 = vld [vmem:[#allocation2 + $0x2e8] sm:$0xff] }
  0x3e   :  { %v377_v11 = vld [vmem:[#allocation2 + $0x2c0] sm:$0xff]  ;;  %564 = vmatpush.msra.mxu0 %v313_v10  ;;  %v314_v4 = vld [vmem:[#allocation2 + $0xc8] sm:$0xff] }
  0x3f   :  { %v441_v12 = vld [vmem:[#allocation2 + $0x4c0] sm:$0xff]  ;;  %584 = vmatpush.msra.mxu1 %v377_v11  ;;  %v378_v5 = vld [vmem:[#allocation2 + $0x2c8] sm:$0xff] }
  0x40   :  { %v505_v13 = vld [vmem:[#allocation2 + $0x6c0] sm:$0xff]  ;;  %604 = vmatpush.msra.mxu2 %v441_v12  ;;  %v454_v6 = vld [vmem:[#allocation2 + $0x528] sm:$0xff] }
  0x41   :  { %v309_v14 = vld [vmem:[#allocation2 + $0xa0] sm:$0xff]  ;;  %624 = vmatpush.msra.mxu3 %v505_v13  ;;  %v518_v7 = vld [vmem:[#allocation2 + $0x728] sm:$0xff] }
  0x42   :  { %v373_v15 = vld [vmem:[#allocation2 + $0x2a0] sm:$0xff]  ;;  %565 = vmatpush.msra.mxu0 %v309_v14  ;;  %v310_v8 = vld [vmem:[#allocation2 + $0xa8] sm:$0xff] }
  0x43   :  { %v437_v16 = vld [vmem:[#allocation2 + $0x4a0] sm:$0xff]  ;;  %585 = vmatpush.msra.mxu1 %v373_v15  ;;  %v374_v9 = vld [vmem:[#allocation2 + $0x2a8] sm:$0xff] }
  0x44   :  { %v501_v17 = vld [vmem:[#allocation2 + $0x6a0] sm:$0xff]  ;;  %605 = vmatpush.msra.mxu2 %v437_v16  ;;  %v450_v10 = vld [vmem:[#allocation2 + $0x508] sm:$0xff] }
  0x45   :  { %v305_v18 = vld [vmem:[#allocation2 + $0x80] sm:$0xff]  ;;  %625 = vmatpush.msra.mxu3 %v501_v17  ;;  %v514_v11 = vld [vmem:[#allocation2 + $0x708] sm:$0xff] }
  0x46   :  { %v369_v19 = vld [vmem:[#allocation2 + $0x280] sm:$0xff]  ;;  %566 = vmatpush.msra.mxu0 %v305_v18  ;;  %v306_v12 = vld [vmem:[#allocation2 + $0x88] sm:$0xff] }
  0x47   :  { %v433_v20 = vld [vmem:[#allocation2 + $0x480] sm:$0xff]  ;;  %586 = vmatpush.msra.mxu1 %v369_v19  ;;  %v370_v13 = vld [vmem:[#allocation2 + $0x288] sm:$0xff] }
  0x48   :  { %v497_v21 = vld [vmem:[#allocation2 + $0x680] sm:$0xff]  ;;  %606 = vmatpush.msra.mxu2 %v433_v20  ;;  %v446_v14 = vld [vmem:[#allocation2 + $0x4e8] sm:$0xff] }
  0x49   :  { %v301_v22 = vld [vmem:[#allocation2 + $0x60] sm:$0xff]  ;;  %626 = vmatpush.msra.mxu3 %v497_v21  ;;  %v510_v15 = vld [vmem:[#allocation2 + $0x6e8] sm:$0xff] }
  0x4a   :  { %v365_v23 = vld [vmem:[#allocation2 + $0x260] sm:$0xff]  ;;  %567 = vmatpush.msra.mxu0 %v301_v22  ;;  %v302_v16 = vld [vmem:[#allocation2 + $0x68] sm:$0xff] }
  0x4b   :  { %v429_v24 = vld [vmem:[#allocation2 + $0x460] sm:$0xff]  ;;  %587 = vmatpush.msra.mxu1 %v365_v23  ;;  %v366_v17 = vld [vmem:[#allocation2 + $0x268] sm:$0xff] }
  0x4c   :  { %v493_v25 = vld [vmem:[#allocation2 + $0x660] sm:$0xff]  ;;  %607 = vmatpush.msra.mxu2 %v429_v24  ;;  %v442_v18 = vld [vmem:[#allocation2 + $0x4c8] sm:$0xff] }
  0x4d   :  { %v297_v26 = vld [vmem:[#allocation2 + $0x40] sm:$0xff]  ;;  %627 = vmatpush.msra.mxu3 %v493_v25  ;;  %v506_v19 = vld [vmem:[#allocation2 + $0x6c8] sm:$0xff] }
  0x4e   :  { %v361_v27 = vld [vmem:[#allocation2 + $0x240] sm:$0xff]  ;;  %568 = vmatpush.msra.mxu0 %v297_v26  ;;  %v298_v20 = vld [vmem:[#allocation2 + $0x48] sm:$0xff] }
  0x4f   :  { %v425_v28 = vld [vmem:[#allocation2 + $0x440] sm:$0xff]  ;;  %588 = vmatpush.msra.mxu1 %v361_v27  ;;  %v362_v21 = vld [vmem:[#allocation2 + $0x248] sm:$0xff] }
  0x50   :  { %v489_v29 = vld [vmem:[#allocation2 + $0x640] sm:$0xff]  ;;  %608 = vmatpush.msra.mxu2 %v425_v28  ;;  %v438_v22 = vld [vmem:[#allocation2 + $0x4a8] sm:$0xff] }
  0x51   :  { %v293_v30 = vld [vmem:[#allocation2 + $0x20] sm:$0xff]  ;;  %628 = vmatpush.msra.mxu3 %v489_v29  ;;  %v502_v23 = vld [vmem:[#allocation2 + $0x6a8] sm:$0xff] }
  0x52   :  { %v357_v31 = vld [vmem:[#allocation2 + $0x220] sm:$0xff]  ;;  %569 = vmatpush.msra.mxu0 %v293_v30  ;;  %v294_v24 = vld [vmem:[#allocation2 + $0x28] sm:$0xff] }
  0x53   :  { %v421_v32 = vld [vmem:[#allocation2 + $0x420] sm:$0xff]  ;;  %589 = vmatpush.msra.mxu1 %v357_v31  ;;  %v358_v25 = vld [vmem:[#allocation2 + $0x228] sm:$0xff] }
  0x54   :  { %v485_v33 = vld [vmem:[#allocation2 + $0x620] sm:$0xff]  ;;  %609 = vmatpush.msra.mxu2 %v421_v32  ;;  %v434_v26 = vld [vmem:[#allocation2 + $0x488] sm:$0xff] }
  0x55   :  { %v289_v34 = vld [vmem:[#allocation2] sm:$0xff]  ;;  %629 = vmatpush.msra.mxu3 %v485_v33  ;;  %v498_v27 = vld [vmem:[#allocation2 + $0x688] sm:$0xff] }
  0x56   :  { %v353_v35 = vld [vmem:[#allocation2 + $0x200] sm:$0xff]  ;;  %570 = vmatpush.msra.mxu0 %v289_v34  ;;  %v290_v28 = vld [vmem:[#allocation2 + $0x8] sm:$0xff] }
  0x57   :  { %v417_v38 = vld [vmem:[#allocation2 + $0x400] sm:$0xff]  ;;  %590 = vmatpush.msra.mxu1 %v353_v35  ;;  %v354_v29 = vld [vmem:[#allocation2 + $0x208] sm:$0xff] }
  0x58   :  { %v481_v39 = vld [vmem:[#allocation2 + $0x600] sm:$0xff]  ;;  %635 = vmatpush.msrb.mxu0 %v350_v36  ;;  %610 = vmatpush.msra.mxu2 %v417_v38  ;;  %v430_v30 = vld [vmem:[#allocation2 + $0x468] sm:$0xff] }
  0x59   :  { %655 = vmatpush.msrb.mxu1 %v414_v37  ;;  %630 = vmatpush.msra.mxu3 %v481_v39  ;;  %v494_v31 = vld [vmem:[#allocation2 + $0x668] sm:$0xff] }
  0x5a   :  { %636 = vmatpush.msrb.mxu0 %v346_v40  ;;  %675 = vmatpush.msrb.mxu2 %v478_v42  ;;  %v426_v32 = vld [vmem:[#allocation2 + $0x448] sm:$0xff]  ;;  %v275_v40 = vld [vmem:[%s1333_s6] sm:$0xf] }
  0x5b   :  { %656 = vmatpush.msrb.mxu1 %v410_v41  ;;  %695 = vmatpush.msrb.mxu3 %v542_v43  ;;  %v490_v33 = vld [vmem:[#allocation2 + $0x648] sm:$0xff]  ;;  %v277_v43 = vperm.slane %v275_v40, 0 }
  0x5c   :  { %637 = vmatpush.msrb.mxu0 %v342_v44  ;;  %676 = vmatpush.msrb.mxu2 %v474_v46  ;;  %v422_v34 = vld [vmem:[#allocation2 + $0x428] sm:$0xff]  ;;  %v278_v44 = vperm.slane %v275_v40, 1 }
  0x5d   :  { %657 = vmatpush.msrb.mxu1 %v406_v45  ;;  %696 = vmatpush.msrb.mxu3 %v538_v47  ;;  %v486_v35 = vld [vmem:[#allocation2 + $0x628] sm:$0xff] }
  0x5e   :  { %638 = vmatpush.msrb.mxu0 %v338_v48  ;;  %677 = vmatpush.msrb.mxu2 %v470_v50  ;;  %v418_v36 = vld [vmem:[#allocation2 + $0x408] sm:$0xff] }
  0x5f   :  { %658 = vmatpush.msrb.mxu1 %v402_v49  ;;  %697 = vmatpush.msrb.mxu3 %v534_v51  ;;  %v482_v37 = vld [vmem:[#allocation2 + $0x608] sm:$0xff]  ;;  %v351_v51 = vld [vmem:[#allocation2 + $0x1f0] sm:$0xff] }
  0x60   :  { %639 = vmatpush.msrb.mxu0 %v334_v52  ;;  %678 = vmatpush.msrb.mxu2 %v466_v54  ;;  %v415_v52 = vld [vmem:[#allocation2 + $0x3f0] sm:$0xff] }
  0x61   :  { %659 = vmatpush.msrb.mxu1 %v398_v53  ;;  %698 = vmatpush.msrb.mxu3 %v530_v55  ;;  %v347_v53 = vld [vmem:[#allocation2 + $0x1d0] sm:$0xff]  ;;  %v279_v55 = vperm.slane %v275_v40, 2 }
  0x62   :  { %640 = vmatpush.msrb.mxu0 %v330_v56  ;;  %679 = vmatpush.msrb.mxu2 %v462_v58  ;;  %v411_v54 = vld [vmem:[#allocation2 + $0x3d0] sm:$0xff]  ;;  %v280_v56 = vperm.slane %v275_v40, 3 }
  0x63   :  { %660 = vmatpush.msrb.mxu1 %v394_v57  ;;  %699 = vmatpush.msrb.mxu3 %v526_v59  ;;  %v343_v59 = vld [vmem:[#allocation2 + $0x1b0] sm:$0xff] }
  0x64   :  { %641 = vmatpush.msrb.mxu0 %v326_v60  ;;  %680 = vmatpush.msrb.mxu2 %v458_v62  ;;  %v407_v60 = vld [vmem:[#allocation2 + $0x3b0] sm:$0xff] }
  0x65   :  { %661 = vmatpush.msrb.mxu1 %v390_v61  ;;  %700 = vmatpush.msrb.mxu3 %v522_v63  ;;  %v507_v40 = vld [vmem:[#allocation2 + $0x6d0] sm:$0xff] }
  0x66   :  { %642 = vmatpush.msrb.mxu0 %v322_v0  ;;  %681 = vmatpush.msrb.mxu2 %v454_v6  ;;  %v399_v6 = vld [vmem:[#allocation2 + $0x370] sm:$0xff] }
  0x67   :  { %662 = vmatpush.msrb.mxu1 %v386_v1  ;;  %701 = vmatpush.msrb.mxu3 %v518_v7  ;;  %v339_v1 = vld [vmem:[#allocation2 + $0x190] sm:$0xff] }
  0x68   :  { %643 = vmatpush.msrb.mxu0 %v318_v2  ;;  %682 = vmatpush.msrb.mxu2 %v450_v10  ;;  %v403_v2 = vld [vmem:[#allocation2 + $0x390] sm:$0xff] }
  0x69   :  { %663 = vmatpush.msrb.mxu1 %v382_v3  ;;  %702 = vmatpush.msrb.mxu3 %v514_v11  ;;  %v479_v3 = vld [vmem:[#allocation2 + $0x5f0] sm:$0xff] }
  0x6a   :  { %644 = vmatpush.msrb.mxu0 %v314_v4  ;;  %683 = vmatpush.msrb.mxu2 %v446_v14  ;;  %v543_v4 = vld [vmem:[#allocation2 + $0x7f0] sm:$0xff] }
  0x6b   :  { %664 = vmatpush.msrb.mxu1 %v378_v5  ;;  %703 = vmatpush.msrb.mxu3 %v510_v15  ;;  %v335_v5 = vld [vmem:[#allocation2 + $0x170] sm:$0xff] }
  0x6c   :  { %645 = vmatpush.msrb.mxu0 %v310_v8  ;;  %684 = vmatpush.msrb.mxu2 %v442_v18  ;;  %v475_v7 = vld [vmem:[#allocation2 + $0x5d0] sm:$0xff] }
  0x6d   :  { %665 = vmatpush.msrb.mxu1 %v374_v9  ;;  %704 = vmatpush.msrb.mxu3 %v506_v19  ;;  %v539_v8 = vld [vmem:[#allocation2 + $0x7d0] sm:$0xff] }
  0x6e   :  { %646 = vmatpush.msrb.mxu0 %v306_v12  ;;  %685 = vmatpush.msrb.mxu2 %v438_v22  ;;  %v331_v9 = vld [vmem:[#allocation2 + $0x150] sm:$0xff] }
  0x6f   :  { %666 = vmatpush.msrb.mxu1 %v370_v13  ;;  %705 = vmatpush.msrb.mxu3 %v502_v23  ;;  %v395_v10 = vld [vmem:[#allocation2 + $0x350] sm:$0xff] }
  0x70   :  { %647 = vmatpush.msrb.mxu0 %v302_v16  ;;  %686 = vmatpush.msrb.mxu2 %v434_v26  ;;  %v471_v11 = vld [vmem:[#allocation2 + $0x5b0] sm:$0xff] }
  0x71   :  { %667 = vmatpush.msrb.mxu1 %v366_v17  ;;  %706 = vmatpush.msrb.mxu3 %v498_v27  ;;  %v535_v12 = vld [vmem:[#allocation2 + $0x7b0] sm:$0xff] }
  0x72   :  { %648 = vmatpush.msrb.mxu0 %v298_v20  ;;  %687 = vmatpush.msrb.mxu2 %v430_v30  ;;  %v327_v13 = vld [vmem:[#allocation2 + $0x130] sm:$0xff] }
  0x73   :  { %668 = vmatpush.msrb.mxu1 %v362_v21  ;;  %707 = vmatpush.msrb.mxu3 %v494_v31  ;;  %v391_v14 = vld [vmem:[#allocation2 + $0x330] sm:$0xff] }
  0x74   :  { %649 = vmatpush.msrb.mxu0 %v294_v24  ;;  %688 = vmatpush.msrb.mxu2 %v426_v32  ;;  %v467_v15 = vld [vmem:[#allocation2 + $0x590] sm:$0xff] }
  0x75   :  { %669 = vmatpush.msrb.mxu1 %v358_v25  ;;  %708 = vmatpush.msrb.mxu3 %v490_v33  ;;  %v531_v16 = vld [vmem:[#allocation2 + $0x790] sm:$0xff] }
  0x76   :  { %650 = vmatpush.msrb.mxu0 %v290_v28  ;;  %689 = vmatpush.msrb.mxu2 %v422_v34  ;;  %v323_v17 = vld [vmem:[#allocation2 + $0x110] sm:$0xff] }
  0x77   :  { %670 = vmatpush.msrb.mxu1 %v354_v29  ;;  %709 = vmatpush.msrb.mxu3 %v486_v35  ;;  %v387_v18 = vld [vmem:[#allocation2 + $0x310] sm:$0xff] }
  0x78   :  { %690 = vmatpush.msrb.mxu2 %v418_v36  ;;  %v463_v19 = vld [vmem:[#allocation2 + $0x570] sm:$0xff] }
  0x79   :  { %710 = vmatpush.msrb.mxu3 %v482_v37  ;;  %v527_v20 = vld [vmem:[#allocation2 + $0x770] sm:$0xff] }
  0x7a   :  { %v319_v21 = vld [vmem:[#allocation2 + $0xf0] sm:$0xff] }
  0x7b   :  { %v383_v22 = vld [vmem:[#allocation2 + $0x2f0] sm:$0xff] }
  0x7c   :  { %v459_v23 = vld [vmem:[#allocation2 + $0x550] sm:$0xff] }
  0x7d   :  { %v523_v24 = vld [vmem:[#allocation2 + $0x750] sm:$0xff] }
  0x7e   :  { %v315_v25 = vld [vmem:[#allocation2 + $0xd0] sm:$0xff] }
  0x7f   :  { %v379_v26 = vld [vmem:[#allocation2 + $0x2d0] sm:$0xff] }
  0x80   :  { %v455_v27 = vld [vmem:[#allocation2 + $0x530] sm:$0xff] }
  0x81   :  { %v519_v28 = vld [vmem:[#allocation2 + $0x730] sm:$0xff] }
  0x82   :  { %v311_v29 = vld [vmem:[#allocation2 + $0xb0] sm:$0xff] }
  0x83   :  { %v375_v30 = vld [vmem:[#allocation2 + $0x2b0] sm:$0xff] }
  0x84   :  { %v451_v31 = vld [vmem:[#allocation2 + $0x510] sm:$0xff] }
  0x85   :  { %v515_v32 = vld [vmem:[#allocation2 + $0x710] sm:$0xff] }
  0x86   :  { %v307_v33 = vld [vmem:[#allocation2 + $0x90] sm:$0xff] }
  0x87   :  { %v371_v34 = vld [vmem:[#allocation2 + $0x290] sm:$0xff] }
  0x88   :  { %v447_v35 = vld [vmem:[#allocation2 + $0x4f0] sm:$0xff] }
  0x89   :  { %v511_v36 = vld [vmem:[#allocation2 + $0x6f0] sm:$0xff] }
  0x8a   :  { %v303_v37 = vld [vmem:[#allocation2 + $0x70] sm:$0xff] }
  0x92   :  { %v129_v38 = vpop.f32.mrf.mxu0  ;;  %v149_v39 = vpop.f32.mrf.mxu1 }
  0x99   :  { %v169_v41 = vpop.f32.mrf.mxu2  ;;  %v189_v42 = vpop.f32.mrf.mxu3 }
  0x9c   :  { %v212_v45 = vpop.f32.mrf.mxu0  ;;  %v232_v46 = vpop.f32.mrf.mxu1 }
  0x9d   :  { %v213_v47 = vadd.f32 %v212_v45, %v129_v38  ;;  %v233_v48 = vadd.f32 %v232_v46, %v149_v39  ;;  %v367_v38 = vld [vmem:[#allocation2 + $0x270] sm:$0xff] }
  0x9e   :  { %v443_v39 = vld [vmem:[#allocation2 + $0x4d0] sm:$0xff] }
  0x9f   :  { %v1288_v49 = vadd.f32 %v277_v43, %v213_v47  ;;  %v1290_v50 = vadd.f32 %v278_v44, %v233_v48  ;;  %v439_v43 = vld [vmem:[#allocation2 + $0x4b0] sm:$0xff] }
  0xa0   :  { %v503_v44 = vld [vmem:[#allocation2 + $0x6b0] sm:$0xff] }
  0xa1   :  { %571 = vmatmul.f32.vlgmr.msra.gmra.mxu0 %v1288_v49  ;;  %591 = vmatmul.f32.vlgmr.msra.gmra.mxu1 %v1290_v50  ;;  %v295_v45 = vld [vmem:[#allocation2 + $0x30] sm:$0xff] }
  0xa2   :  { %715 = vmatpush.msra.mxu0 %v351_v51  ;;  %735 = vmatpush.msra.mxu1 %v415_v52  ;;  %v359_v46 = vld [vmem:[#allocation2 + $0x230] sm:$0xff] }
  0xa3   :  { %v252_v57 = vpop.f32.mrf.mxu2  ;;  %v272_v58 = vpop.f32.mrf.mxu3  ;;  %v435_v47 = vld [vmem:[#allocation2 + $0x490] sm:$0xff] }
  0xa4   :  { %v253_v61 = vadd.f32 %v252_v57, %v169_v41  ;;  %v273_v62 = vadd.f32 %v272_v58, %v189_v42  ;;  %716 = vmatpush.msra.mxu0 %v347_v53  ;;  %736 = vmatpush.msra.mxu1 %v411_v54  ;;  %v299_v41 = vld [vmem:[#allocation2 + $0x50] sm:$0xff] }
  0xa5   :  { %v363_v42 = vld [vmem:[#allocation2 + $0x250] sm:$0xff] }
  0xa6   :  { %v1294_v63 = vadd.f32 %v279_v55, %v253_v61  ;;  %v1296_v0 = vadd.f32 %v280_v56, %v273_v62  ;;  %717 = vmatpush.msra.mxu0 %v343_v59  ;;  %737 = vmatpush.msra.mxu1 %v407_v60  ;;  %v499_v48 = vld [vmem:[#allocation2 + $0x690] sm:$0xff]  ;;  %v352_v55 = vld [vmem:[#allocation2 + $0x1f8] sm:$0xff] }
  0xa7   :  { %v291_v51 = vld [vmem:[#allocation2 + $0x10] sm:$0xff]  ;;  %v416_v56 = vld [vmem:[#allocation2 + $0x3f8] sm:$0xff] }
  0xa8   :  { %611 = vmatmul.f32.vlgmr.msra.gmra.mxu2 %v1294_v63  ;;  %631 = vmatmul.f32.vlgmr.msra.gmra.mxu3 %v1296_v0  ;;  %v355_v52 = vld [vmem:[#allocation2 + $0x210] sm:$0xff]  ;;  %v348_v59 = vld [vmem:[#allocation2 + $0x1d8] sm:$0xff] }
  0xa9   :  { %718 = vmatpush.msra.mxu0 %v339_v1  ;;  %738 = vmatpush.msra.mxu1 %v403_v2  ;;  %v431_v53 = vld [vmem:[#allocation2 + $0x470] sm:$0xff]  ;;  %v412_v60 = vld [vmem:[#allocation2 + $0x3d8] sm:$0xff] }
  0xaa   :  { %755 = vmatpush.msra.mxu2 %v479_v3  ;;  %775 = vmatpush.msra.mxu3 %v543_v4  ;;  %v495_v54 = vld [vmem:[#allocation2 + $0x670] sm:$0xff]  ;;  %v344_v1 = vld [vmem:[#allocation2 + $0x1b8] sm:$0xff] }
  0xab   :  { %651 = vmatmul.f32.vlgmr.msrb.gmra.mxu0 %v1288_v49  ;;  %671 = vmatmul.f32.vlgmr.msrb.gmra.mxu1 %v1290_v50  ;;  %v427_v57 = vld [vmem:[#allocation2 + $0x450] sm:$0xff]  ;;  %v408_v2 = vld [vmem:[#allocation2 + $0x3b8] sm:$0xff] }
  0xac   :  { %719 = vmatpush.msra.mxu0 %v335_v5  ;;  %739 = vmatpush.msra.mxu1 %v399_v6  ;;  %v491_v58 = vld [vmem:[#allocation2 + $0x650] sm:$0xff]  ;;  %v340_v5 = vld [vmem:[#allocation2 + $0x198] sm:$0xff] }
  0xad   :  { %756 = vmatpush.msra.mxu2 %v475_v7  ;;  %776 = vmatpush.msra.mxu3 %v539_v8  ;;  %v423_v61 = vld [vmem:[#allocation2 + $0x430] sm:$0xff]  ;;  %v404_v6 = vld [vmem:[#allocation2 + $0x398] sm:$0xff] }
  0xae   :  { %720 = vmatpush.msra.mxu0 %v331_v9  ;;  %740 = vmatpush.msra.mxu1 %v395_v10  ;;  %v487_v62 = vld [vmem:[#allocation2 + $0x630] sm:$0xff]  ;;  %v480_v7 = vld [vmem:[#allocation2 + $0x5f8] sm:$0xff] }
  0xaf   :  { %757 = vmatpush.msra.mxu2 %v471_v11  ;;  %777 = vmatpush.msra.mxu3 %v535_v12  ;;  %v419_v3 = vld [vmem:[#allocation2 + $0x410] sm:$0xff]  ;;  %v544_v8 = vld [vmem:[#allocation2 + $0x7f8] sm:$0xff] }
  0xb0   :  { %721 = vmatpush.msra.mxu0 %v327_v13  ;;  %741 = vmatpush.msra.mxu1 %v391_v14  ;;  %v483_v4 = vld [vmem:[#allocation2 + $0x610] sm:$0xff]  ;;  %v336_v9 = vld [vmem:[#allocation2 + $0x178] sm:$0xff] }
  0xb1   :  { %758 = vmatpush.msra.mxu2 %v467_v15  ;;  %778 = vmatpush.msra.mxu3 %v531_v16  ;;  %v400_v10 = vld [vmem:[#allocation2 + $0x378] sm:$0xff] }
  0xb2   :  { %691 = vmatmul.f32.vlgmr.msrb.gmra.mxu2 %v1294_v63  ;;  %711 = vmatmul.f32.vlgmr.msrb.gmra.mxu3 %v1296_v0  ;;  %v476_v11 = vld [vmem:[#allocation2 + $0x5d8] sm:$0xff] }
  0xb3   :  { %722 = vmatpush.msra.mxu0 %v323_v17  ;;  %742 = vmatpush.msra.mxu1 %v387_v18  ;;  %v540_v12 = vld [vmem:[#allocation2 + $0x7d8] sm:$0xff] }
  0xb4   :  { %759 = vmatpush.msra.mxu2 %v463_v19  ;;  %779 = vmatpush.msra.mxu3 %v527_v20  ;;  %v332_v13 = vld [vmem:[#allocation2 + $0x158] sm:$0xff] }
  0xb5   :  { %723 = vmatpush.msra.mxu0 %v319_v21  ;;  %743 = vmatpush.msra.mxu1 %v383_v22  ;;  %v396_v14 = vld [vmem:[#allocation2 + $0x358] sm:$0xff] }
  0xb6   :  { %760 = vmatpush.msra.mxu2 %v459_v23  ;;  %780 = vmatpush.msra.mxu3 %v523_v24  ;;  %v472_v15 = vld [vmem:[#allocation2 + $0x5b8] sm:$0xff] }
  0xb7   :  { %724 = vmatpush.msra.mxu0 %v315_v25  ;;  %744 = vmatpush.msra.mxu1 %v379_v26  ;;  %v536_v16 = vld [vmem:[#allocation2 + $0x7b8] sm:$0xff] }
  0xb8   :  { %761 = vmatpush.msra.mxu2 %v455_v27  ;;  %781 = vmatpush.msra.mxu3 %v519_v28  ;;  %v328_v17 = vld [vmem:[#allocation2 + $0x138] sm:$0xff] }
  0xb9   :  { %725 = vmatpush.msra.mxu0 %v311_v29  ;;  %745 = vmatpush.msra.mxu1 %v375_v30  ;;  %v392_v18 = vld [vmem:[#allocation2 + $0x338] sm:$0xff] }
  0xba   :  { %762 = vmatpush.msra.mxu2 %v451_v31  ;;  %782 = vmatpush.msra.mxu3 %v515_v32  ;;  %v468_v19 = vld [vmem:[#allocation2 + $0x598] sm:$0xff] }
  0xbb   :  { %726 = vmatpush.msra.mxu0 %v307_v33  ;;  %746 = vmatpush.msra.mxu1 %v371_v34  ;;  %v532_v20 = vld [vmem:[#allocation2 + $0x798] sm:$0xff] }
  0xbc   :  { %763 = vmatpush.msra.mxu2 %v447_v35  ;;  %783 = vmatpush.msra.mxu3 %v511_v36  ;;  %v324_v21 = vld [vmem:[#allocation2 + $0x118] sm:$0xff] }
  0xbd   :  { %727 = vmatpush.msra.mxu0 %v303_v37  ;;  %747 = vmatpush.msra.mxu1 %v367_v38  ;;  %v388_v22 = vld [vmem:[#allocation2 + $0x318] sm:$0xff] }
  0xbe   :  { %764 = vmatpush.msra.mxu2 %v443_v39  ;;  %784 = vmatpush.msra.mxu3 %v507_v40  ;;  %v464_v23 = vld [vmem:[#allocation2 + $0x578] sm:$0xff] }
  0xbf   :  { %728 = vmatpush.msra.mxu0 %v299_v41  ;;  %748 = vmatpush.msra.mxu1 %v363_v42  ;;  %v528_v24 = vld [vmem:[#allocation2 + $0x778] sm:$0xff] }
  0xc0   :  { %765 = vmatpush.msra.mxu2 %v439_v43  ;;  %785 = vmatpush.msra.mxu3 %v503_v44  ;;  %v320_v25 = vld [vmem:[#allocation2 + $0xf8] sm:$0xff] }
  0xc1   :  { %729 = vmatpush.msra.mxu0 %v295_v45  ;;  %749 = vmatpush.msra.mxu1 %v359_v46  ;;  %v384_v26 = vld [vmem:[#allocation2 + $0x2f8] sm:$0xff] }
  0xc2   :  { %766 = vmatpush.msra.mxu2 %v435_v47  ;;  %786 = vmatpush.msra.mxu3 %v499_v48  ;;  %v460_v27 = vld [vmem:[#allocation2 + $0x558] sm:$0xff] }
  0xc3   :  { %730 = vmatpush.msra.mxu0 %v291_v51  ;;  %750 = vmatpush.msra.mxu1 %v355_v52  ;;  %v524_v28 = vld [vmem:[#allocation2 + $0x758] sm:$0xff] }
  0xc4   :  { %767 = vmatpush.msra.mxu2 %v431_v53  ;;  %787 = vmatpush.msra.mxu3 %v495_v54  ;;  %v316_v29 = vld [vmem:[#allocation2 + $0xd8] sm:$0xff] }
  0xc5   :  { %731 = vmatmul.f32.vlgmr.msra.gmra.mxu0 %v1288_v49  ;;  %751 = vmatmul.f32.vlgmr.msra.gmra.mxu1 %v1290_v50  ;;  %v380_v30 = vld [vmem:[#allocation2 + $0x2d8] sm:$0xff] }
  0xc6   :  { %795 = vmatpush.msrb.mxu0 %v352_v55  ;;  %815 = vmatpush.msrb.mxu1 %v416_v56  ;;  %v456_v31 = vld [vmem:[#allocation2 + $0x538] sm:$0xff] }
  0xc7   :  { %768 = vmatpush.msra.mxu2 %v427_v57  ;;  %788 = vmatpush.msra.mxu3 %v491_v58  ;;  %v520_v32 = vld [vmem:[#allocation2 + $0x738] sm:$0xff] }
  0xc8   :  { %796 = vmatpush.msrb.mxu0 %v348_v59  ;;  %816 = vmatpush.msrb.mxu1 %v412_v60  ;;  %v312_v33 = vld [vmem:[#allocation2 + $0xb8] sm:$0xff] }
  0xc9   :  { %769 = vmatpush.msra.mxu2 %v423_v61  ;;  %789 = vmatpush.msra.mxu3 %v487_v62  ;;  %v376_v34 = vld [vmem:[#allocation2 + $0x2b8] sm:$0xff] }
  0xca   :  { %797 = vmatpush.msrb.mxu0 %v344_v1  ;;  %817 = vmatpush.msrb.mxu1 %v408_v2  ;;  %v452_v35 = vld [vmem:[#allocation2 + $0x518] sm:$0xff] }
  0xcb   :  { %770 = vmatpush.msra.mxu2 %v419_v3  ;;  %790 = vmatpush.msra.mxu3 %v483_v4  ;;  %v516_v36 = vld [vmem:[#allocation2 + $0x718] sm:$0xff]  ;;  %v889_v3 = vld [vmem:[#allocation4 + $0x70] sm:$0xff] }
  0xcc   :  { %771 = vmatmul.f32.vlgmr.msra.gmra.mxu2 %v1294_v63  ;;  %791 = vmatmul.f32.vlgmr.msra.gmra.mxu3 %v1296_v0  ;;  %v308_v37 = vld [vmem:[#allocation2 + $0x98] sm:$0xff]  ;;  %v905_v4 = vld [vmem:[#allocation4 + $0xf0] sm:$0xff] }
  0xcd   :  { %798 = vmatpush.msrb.mxu0 %v340_v5  ;;  %818 = vmatpush.msrb.mxu1 %v404_v6  ;;  %v372_v38 = vld [vmem:[#allocation2 + $0x298] sm:$0xff] }
  0xce   :  { %835 = vmatpush.msrb.mxu2 %v480_v7  ;;  %855 = vmatpush.msrb.mxu3 %v544_v8  ;;  %v448_v39 = vld [vmem:[#allocation2 + $0x4f8] sm:$0xff]  ;;  %v888_v7 = vld [vmem:[#allocation4 + $0x68] sm:$0xff] }
  0xcf   :  { %799 = vmatpush.msrb.mxu0 %v336_v9  ;;  %819 = vmatpush.msrb.mxu1 %v400_v10  ;;  %v512_v40 = vld [vmem:[#allocation2 + $0x6f8] sm:$0xff]  ;;  %v904_v8 = vld [vmem:[#allocation4 + $0xe8] sm:$0xff]  ;;  %v885_v9 = vld [vmem:[#allocation4 + $0x50] sm:$0xff] }
  0xd0   :  { %836 = vmatpush.msrb.mxu2 %v476_v11  ;;  %856 = vmatpush.msrb.mxu3 %v540_v12  ;;  %v304_v41 = vld [vmem:[#allocation2 + $0x78] sm:$0xff]  ;;  %v884_v10 = vld [vmem:[#allocation4 + $0x48] sm:$0xff]  ;;  %v883_v11 = vld [vmem:[#allocation4 + $0x40] sm:$0xff] }
  0xd1   :  { %800 = vmatpush.msrb.mxu0 %v332_v13  ;;  %820 = vmatpush.msrb.mxu1 %v396_v14  ;;  %v368_v42 = vld [vmem:[#allocation2 + $0x278] sm:$0xff]  ;;  %v903_v12 = vld [vmem:[#allocation4 + $0xe0] sm:$0xff] }
  0xd2   :  { %837 = vmatpush.msrb.mxu2 %v472_v15  ;;  %857 = vmatpush.msrb.mxu3 %v536_v16  ;;  %v444_v43 = vld [vmem:[#allocation2 + $0x4d8] sm:$0xff]  ;;  %v881_v15 = vld [vmem:[#allocation4 + $0x30] sm:$0xff]  ;;  %v900_v16 = vld [vmem:[#allocation4 + $0xc8] sm:$0xff] }
  0xd3   :  { %801 = vmatpush.msrb.mxu0 %v328_v17  ;;  %821 = vmatpush.msrb.mxu1 %v392_v18  ;;  %v508_v44 = vld [vmem:[#allocation2 + $0x6d8] sm:$0xff]  ;;  %v879_v17 = vld [vmem:[#allocation4 + $0x20] sm:$0xff] }
  0xd4   :  { %838 = vmatpush.msrb.mxu2 %v468_v19  ;;  %858 = vmatpush.msrb.mxu3 %v532_v20  ;;  %v300_v45 = vld [vmem:[#allocation2 + $0x58] sm:$0xff]  ;;  %v899_v18 = vld [vmem:[#allocation4 + $0xc0] sm:$0xff] }
  0xd5   :  { %802 = vmatpush.msrb.mxu0 %v324_v21  ;;  %822 = vmatpush.msrb.mxu1 %v388_v22  ;;  %v364_v46 = vld [vmem:[#allocation2 + $0x258] sm:$0xff]  ;;  %v877_v21 = vld [vmem:[#allocation4 + $0x10] sm:$0xff] }
  0xd6   :  { %839 = vmatpush.msrb.mxu2 %v464_v23  ;;  %859 = vmatpush.msrb.mxu3 %v528_v24  ;;  %v440_v47 = vld [vmem:[#allocation2 + $0x4b8] sm:$0xff]  ;;  %v897_v22 = vld [vmem:[#allocation4 + $0xb0] sm:$0xff]  ;;  %v876_v23 = vld [vmem:[#allocation4 + $0x8] sm:$0xff] }
  0xd7   :  { %803 = vmatpush.msrb.mxu0 %v320_v25  ;;  %823 = vmatpush.msrb.mxu1 %v384_v26  ;;  %v504_v48 = vld [vmem:[#allocation2 + $0x6b8] sm:$0xff]  ;;  %v896_v24 = vld [vmem:[#allocation4 + $0xa8] sm:$0xff]  ;;  %v921_v26 = vld [vmem:[#allocation4 + $0x170] sm:$0xff] }
  0xd8   :  { %840 = vmatpush.msrb.mxu2 %v460_v27  ;;  %860 = vmatpush.msrb.mxu3 %v524_v28  ;;  %v296_v51 = vld [vmem:[#allocation2 + $0x38] sm:$0xff]  ;;  %v875_v27 = vld [vmem:[#allocation4] sm:$0xff] }
  0xd9   :  { %804 = vmatpush.msrb.mxu0 %v316_v29  ;;  %824 = vmatpush.msrb.mxu1 %v380_v30  ;;  %v360_v52 = vld [vmem:[#allocation2 + $0x238] sm:$0xff]  ;;  %v895_v28 = vld [vmem:[#allocation4 + $0xa0] sm:$0xff]  ;;  %v893_v30 = vld [vmem:[#allocation4 + $0x90] sm:$0xff] }
  0xda   :  { %841 = vmatpush.msrb.mxu2 %v456_v31  ;;  %861 = vmatpush.msrb.mxu3 %v520_v32  ;;  %v436_v53 = vld [vmem:[#allocation2 + $0x498] sm:$0xff]  ;;  %v920_v31 = vld [vmem:[#allocation4 + $0x168] sm:$0xff] }
  0xdb   :  { %805 = vmatpush.msrb.mxu0 %v312_v33  ;;  %825 = vmatpush.msrb.mxu1 %v376_v34  ;;  %v500_v54 = vld [vmem:[#allocation2 + $0x698] sm:$0xff]  ;;  %v892_v32 = vld [vmem:[#allocation4 + $0x88] sm:$0xff]  ;;  %v919_v33 = vld [vmem:[#allocation4 + $0x160] sm:$0xff] }
  0xdc   :  { %842 = vmatpush.msrb.mxu2 %v452_v35  ;;  %862 = vmatpush.msrb.mxu3 %v516_v36  ;;  %v292_v55 = vld [vmem:[#allocation2 + $0x18] sm:$0xff]  ;;  %v891_v34 = vld [vmem:[#allocation4 + $0x80] sm:$0xff]  ;;  %v917_v36 = vld [vmem:[#allocation4 + $0x150] sm:$0xff] }
  0xdd   :  { %806 = vmatpush.msrb.mxu0 %v308_v37  ;;  %826 = vmatpush.msrb.mxu1 %v372_v38  ;;  %v356_v56 = vld [vmem:[#allocation2 + $0x218] sm:$0xff]  ;;  %v916_v37 = vld [vmem:[#allocation4 + $0x148] sm:$0xff]  ;;  %v1315_v38 = vld [vmem:[%s1335_s8] sm:$0xf] }
  0xde   :  { %843 = vmatpush.msrb.mxu2 %v448_v39  ;;  %863 = vmatpush.msrb.mxu3 %v512_v40  ;;  %v432_v57 = vld [vmem:[#allocation2 + $0x478] sm:$0xff]  ;;  %v547_v39 = vperm.slane %v1315_v38, 0 }
  0xdf   :  { %807 = vmatpush.msrb.mxu0 %v304_v41  ;;  %827 = vmatpush.msrb.mxu1 %v368_v42  ;;  %v496_v58 = vld [vmem:[#allocation2 + $0x678] sm:$0xff]  ;;  %v915_v41 = vld [vmem:[#allocation4 + $0x140] sm:$0xff] }
  0xe0   :  { %844 = vmatpush.msrb.mxu2 %v444_v43  ;;  %864 = vmatpush.msrb.mxu3 %v508_v44  ;;  %v428_v59 = vld [vmem:[#allocation2 + $0x458] sm:$0xff]  ;;  %v913_v44 = vld [vmem:[#allocation4 + $0x130] sm:$0xff] }
  0xe1   :  { %808 = vmatpush.msrb.mxu0 %v300_v45  ;;  %828 = vmatpush.msrb.mxu1 %v364_v46  ;;  %v492_v60 = vld [vmem:[#allocation2 + $0x658] sm:$0xff]  ;;  %v912_v45 = vld [vmem:[#allocation4 + $0x128] sm:$0xff] }
  0xe2   :  { %845 = vmatpush.msrb.mxu2 %v440_v47  ;;  %865 = vmatpush.msrb.mxu3 %v504_v48  ;;  %v890_v61 = vld [vmem:[#allocation4 + $0x78] sm:$0xff]  ;;  %v911_v48 = vld [vmem:[#allocation4 + $0x120] sm:$0xff] }
  0xe3   :  { %809 = vmatpush.msrb.mxu0 %v296_v51  ;;  %829 = vmatpush.msrb.mxu1 %v360_v52  ;;  %v906_v62 = vld [vmem:[#allocation4 + $0xf8] sm:$0xff]  ;;  %v548_v52 = vperm.slane %v1315_v38, 1 }
  0xe4   :  { %846 = vmatpush.msrb.mxu2 %v436_v53  ;;  %866 = vmatpush.msrb.mxu3 %v500_v54  ;;  %v424_v1 = vld [vmem:[#allocation2 + $0x438] sm:$0xff] }
  0xe5   :  { %810 = vmatpush.msrb.mxu0 %v292_v55  ;;  %830 = vmatpush.msrb.mxu1 %v356_v56  ;;  %v488_v2 = vld [vmem:[#allocation2 + $0x638] sm:$0xff] }
  0xe6   :  { %847 = vmatpush.msrb.mxu2 %v432_v57  ;;  %867 = vmatpush.msrb.mxu3 %v496_v58  ;;  %v420_v5 = vld [vmem:[#allocation2 + $0x418] sm:$0xff] }
  0xe7   :  { %811 = vmatmul.f32.vlgmr.msrb.gmra.mxu0 %v1288_v49  ;;  %831 = vmatmul.f32.vlgmr.msrb.gmra.mxu1 %v1290_v50  ;;  %v484_v6 = vld [vmem:[#allocation2 + $0x618] sm:$0xff]  ;;  %v887_v49 = vld [vmem:[#allocation4 + $0x60] sm:$0xff] }
  0xe8   :  { %848 = vmatpush.msrb.mxu2 %v428_v59  ;;  %868 = vmatpush.msrb.mxu3 %v492_v60  ;;  %v886_v50 = vld [vmem:[#allocation4 + $0x58] sm:$0xff]  ;;  %v909_v59 = vld [vmem:[#allocation4 + $0x110] sm:$0xff]  ;;  %v908_v60 = vld [vmem:[#allocation4 + $0x108] sm:$0xff] }
  0xe9   :  { %943 = vmatpush.msra.mxu0 %v890_v61  ;;  %963 = vmatpush.msra.mxu1 %v906_v62  ;;  %v882_v13 = vld [vmem:[#allocation4 + $0x38] sm:$0xff]  ;;  %v907_v61 = vld [vmem:[#allocation4 + $0x100] sm:$0xff] }
  0xea   :  { %849 = vmatpush.msrb.mxu2 %v424_v1  ;;  %869 = vmatpush.msrb.mxu3 %v488_v2  ;;  %v902_v14 = vld [vmem:[#allocation4 + $0xd8] sm:$0xff] }
  0xeb   :  { %944 = vmatpush.msra.mxu0 %v889_v3  ;;  %964 = vmatpush.msra.mxu1 %v905_v4  ;;  %v878_v19 = vld [vmem:[#allocation4 + $0x18] sm:$0xff]  ;;  %v937_v3 = vld [vmem:[#allocation4 + $0x1f0] sm:$0xff] }
  0xec   :  { %850 = vmatpush.msrb.mxu2 %v420_v5  ;;  %870 = vmatpush.msrb.mxu3 %v484_v6  ;;  %v898_v20 = vld [vmem:[#allocation4 + $0xb8] sm:$0xff]  ;;  %v936_v6 = vld [vmem:[#allocation4 + $0x1e8] sm:$0xff] }
  0xed   :  { %851 = vmatmul.f32.vlgmr.msrb.gmra.mxu2 %v1294_v63  ;;  %871 = vmatmul.f32.vlgmr.msrb.gmra.mxu3 %v1296_v0  ;;  %v901_v63 = vld [vmem:[#allocation4 + $0xd0] sm:$0xff]  ;;  %v880_v0 = vld [vmem:[#allocation4 + $0x28] sm:$0xff]  ;;  %v922_v25 = vld [vmem:[#allocation4 + $0x178] sm:$0xff] }
  0xee   :  { %945 = vmatpush.msra.mxu0 %v888_v7  ;;  %965 = vmatpush.msra.mxu1 %v904_v8  ;;  %v894_v29 = vld [vmem:[#allocation4 + $0x98] sm:$0xff] }
  0xef   :  { %983 = vmatpush.msra.mxu2 %v922_v25  ;;  %v918_v35 = vld [vmem:[#allocation4 + $0x158] sm:$0xff] }
  0xf0   :  { %946 = vmatpush.msra.mxu0 %v887_v49  ;;  %966 = vmatpush.msra.mxu1 %v903_v12  ;;  %v914_v42 = vld [vmem:[#allocation4 + $0x138] sm:$0xff]  ;;  %v935_v49 = vld [vmem:[#allocation4 + $0x1e0] sm:$0xff] }
  0xf1   :  { %984 = vmatpush.msra.mxu2 %v921_v26  ;;  %v910_v54 = vld [vmem:[#allocation4 + $0x118] sm:$0xff]  ;;  %v923_v26 = vld [vmem:[#allocation4 + $0x180] sm:$0xff] }
  0xf2   :  { %947 = vmatpush.msra.mxu0 %v886_v50  ;;  %967 = vmatpush.msra.mxu1 %v902_v14  ;;  %v938_v2 = vld [vmem:[#allocation4 + $0x1f8] sm:$0xff] }
  0xf3   :  { %985 = vmatpush.msra.mxu2 %v920_v31  ;;  %1003 = vmatpush.msra.mxu3 %v938_v2  ;;  %v934_v50 = vld [vmem:[#allocation4 + $0x1d8] sm:$0xff] }
  0xf4   :  { %948 = vmatpush.msra.mxu0 %v885_v9  ;;  %968 = vmatpush.msra.mxu1 %v901_v63  ;;  %v933_v9 = vld [vmem:[#allocation4 + $0x1d0] sm:$0xff]  ;;  %v930_v12 = vld [vmem:[#allocation4 + $0x1b8] sm:$0xff]  ;;  %v928_v63 = vld [vmem:[#allocation4 + $0x1a8] sm:$0xff] }
  0xf5   :  { %986 = vmatpush.msra.mxu2 %v919_v33  ;;  %1004 = vmatpush.msra.mxu3 %v937_v3 }
  0xf6   :  { %949 = vmatpush.msra.mxu0 %v884_v10  ;;  %969 = vmatpush.msra.mxu1 %v900_v16  ;;  %v932_v10 = vld [vmem:[#allocation4 + $0x1c8] sm:$0xff] }
  0xf7   :  { %987 = vmatpush.msra.mxu2 %v918_v35  ;;  %1005 = vmatpush.msra.mxu3 %v936_v6 }
  0xf8   :  { %950 = vmatpush.msra.mxu0 %v883_v11  ;;  %970 = vmatpush.msra.mxu1 %v899_v18  ;;  %v931_v11 = vld [vmem:[#allocation4 + $0x1c0] sm:$0xff] }
  0xf9   :  { %988 = vmatpush.msra.mxu2 %v917_v36  ;;  %1006 = vmatpush.msra.mxu3 %v935_v49  ;;  %v1044_v36 = vld [vmem:[%s1337_s10] ss:$0 sm:$0xff] }
  0xfa   :  { %951 = vmatpush.msra.mxu0 %v882_v13  ;;  %971 = vmatpush.msra.mxu1 %v898_v20  ;;  %v549_v13 = vperm.slane %v1315_v38, 2 }
  0xfb   :  { %989 = vmatpush.msra.mxu2 %v916_v37  ;;  %1007 = vmatpush.msra.mxu3 %v934_v50 }
  0xfc   :  { %952 = vmatpush.msra.mxu0 %v881_v15  ;;  %972 = vmatpush.msra.mxu1 %v897_v22  ;;  %v929_v15 = vld [vmem:[#allocation4 + $0x1b0] sm:$0xff] }
  0xfd   :  { %990 = vmatpush.msra.mxu2 %v915_v41  ;;  %1008 = vmatpush.msra.mxu3 %v933_v9 }
  0xfe   :  { %953 = vmatpush.msra.mxu0 %v880_v0  ;;  %973 = vmatpush.msra.mxu1 %v896_v24  ;;  %v927_v0 = vld [vmem:[#allocation4 + $0x1a0] sm:$0xff]  ;;  %v924_v24 = vld [vmem:[#allocation4 + $0x188] sm:$0xff] }
  0xff   :  { %991 = vmatpush.msra.mxu2 %v914_v42  ;;  %1009 = vmatpush.msra.mxu3 %v932_v10 }
 0x100   :  { %954 = vmatpush.msra.mxu0 %v879_v17  ;;  %974 = vmatpush.msra.mxu1 %v895_v28  ;;  %v926_v17 = vld [vmem:[#allocation4 + $0x198] sm:$0xff] }
 0x101   :  { %992 = vmatpush.msra.mxu2 %v913_v44  ;;  %1010 = vmatpush.msra.mxu3 %v931_v11 }
 0x102   :  { %955 = vmatpush.msra.mxu0 %v878_v19  ;;  %975 = vmatpush.msra.mxu1 %v894_v29 }
 0x103   :  { %993 = vmatpush.msra.mxu2 %v912_v45  ;;  %1011 = vmatpush.msra.mxu3 %v930_v12 }
 0x104   :  { %956 = vmatpush.msra.mxu0 %v877_v21  ;;  %976 = vmatpush.msra.mxu1 %v893_v30  ;;  %v925_v21 = vld [vmem:[#allocation4 + $0x190] sm:$0xff] }
 0x105   :  { %994 = vmatpush.msra.mxu2 %v911_v48  ;;  %1012 = vmatpush.msra.mxu3 %v929_v15 }
 0x106   :  { %957 = vmatpush.msra.mxu0 %v876_v23  ;;  %977 = vmatpush.msra.mxu1 %v892_v32 }
 0x107   :  { %995 = vmatpush.msra.mxu2 %v910_v54  ;;  %1013 = vmatpush.msra.mxu3 %v928_v63 }
 0x108   :  { %958 = vmatpush.msra.mxu0 %v875_v27  ;;  %978 = vmatpush.msra.mxu1 %v891_v34  ;;  %v550_v27 = vperm.slane %v1315_v38, 3 }
 0x109   :  { %996 = vmatpush.msra.mxu2 %v909_v59  ;;  %1014 = vmatpush.msra.mxu3 %v927_v0 }
 0x10b   :  { %997 = vmatpush.msra.mxu2 %v908_v60  ;;  %1015 = vmatpush.msra.mxu3 %v926_v17 }
 0x10d   :  { %998 = vmatpush.msra.mxu2 %v907_v61  ;;  %1016 = vmatpush.msra.mxu3 %v925_v21 }
 0x10f   :  { %1017 = vmatpush.msra.mxu3 %v924_v24 }
 0x111   :  { %1018 = vmatpush.msra.mxu3 %v923_v26 }
 0x11e   :  { %v572_v40 = vpop.f32.mrf.mxu0  ;;  %v592_v46 = vpop.f32.mrf.mxu1 }
 0x11f   :  { %v573_v43 = vadd.f32 %v572_v40, %v547_v39 }
 0x121   :  { %v593_v47 = vadd.f32 %v592_v46, %v573_v43 }
 0x128   :  { %v652_v55 = vpop.f32.mrf.mxu0  ;;  %v672_v62 = vpop.f32.mrf.mxu1 }
 0x129   :  { %v653_v58 = vadd.f32 %v652_v55, %v548_v52 }
 0x12b   :  { %v612_v51 = vpop.f32.mrf.mxu2  ;;  %v632_v56 = vpop.f32.mrf.mxu3  ;;  %v673_v1 = vadd.f32 %v672_v62, %v653_v58 }
 0x12c   :  { %v613_v53 = vadd.f32 %v612_v51, %v593_v47 }
 0x12e   :  { %v633_v57 = vadd.f32 %v632_v56, %v613_v53 }
 0x130   :  { %959 = vmatmul.f32.vlgmr.msra.gmra.mxu0 %v633_v57 }
 0x135   :  { %v692_v4 = vpop.f32.mrf.mxu2  ;;  %v712_v7 = vpop.f32.mrf.mxu3 }
 0x136   :  { %v693_v5 = vadd.f32 %v692_v4, %v673_v1 }
 0x138   :  { %v713_v8 = vadd.f32 %v712_v7, %v693_v5 }
 0x13a   :  { %979 = vmatmul.f32.vlgmr.msra.gmra.mxu1 %v713_v8 }
 0x142   :  { %v732_v14 = vpop.f32.mrf.mxu0  ;;  %v752_v18 = vpop.f32.mrf.mxu1 }
 0x143   :  { %v733_v16 = vadd.f32 %v732_v14, %v549_v13 }
 0x145   :  { %v753_v19 = vadd.f32 %v752_v18, %v733_v16 }
 0x14f   :  { %v772_v20 = vpop.f32.mrf.mxu2  ;;  %v792_v23 = vpop.f32.mrf.mxu3 }
 0x150   :  { %v773_v22 = vadd.f32 %v772_v20, %v753_v19 }
 0x152   :  { %v793_v25 = vadd.f32 %v792_v23, %v773_v22 }
 0x154   :  { %999 = vmatmul.f32.vlgmr.msra.gmra.mxu2 %v793_v25 }
 0x164   :  { %v812_v28 = vpop.f32.mrf.mxu0  ;;  %v832_v30 = vpop.f32.mrf.mxu1 }
 0x165   :  { %v813_v29 = vadd.f32 %v812_v28, %v550_v27 }
 0x167   :  { %v833_v31 = vadd.f32 %v832_v30, %v813_v29 }
 0x170   :  { %v852_v32 = vpop.f32.mrf.mxu2  ;;  %v872_v34 = vpop.f32.mrf.mxu3 }
 0x171   :  { %v853_v33 = vadd.f32 %v852_v32, %v833_v31 }
 0x173   :  { %v873_v35 = vadd.f32 %v872_v34, %v853_v33 }
 0x175   :  { %1019 = vmatmul.f32.vlgmr.msra.gmra.mxu3 %v873_v35 }
 0x1ad   :  { %v960_v37 = vpop.f32.mrf.mxu0 }
 0x1ae   :  { %v961_v40 = vadd.f32 %v1044_v36, %v960_v37 }
 0x1b7   :  { %v980_v39 = vpop.f32.mrf.mxu1 }
 0x1b8   :  { %v981_v42 = vadd.f32 %v980_v39, %v961_v40 }
 0x1d7   :  { %v1000_v41 = vpop.f32.mrf.mxu2 }
 0x1d8   :  { %v1001_v43 = vadd.f32 %v1000_v41, %v981_v42 }
 0x1f8   :  { %v1020_v38 = vpop.f32.mrf.mxu3 }
 0x1f9   :  { %v1021_v44 = vadd.f32 %v1020_v38, %v1001_v43 }
 0x1fb   :  { %1023 = vst [vmem:[%s1338_s11] sm:$0xff] %v1021_v44 }
 0x1fc   :  { %1028 = vsyncpa [#allocation3], 1 }
 0x1fd   :  { %1029 = vsyncpa [#allocation5], 1 }

// kernel: run.2
= control target key start
LH: loop header
LB: loop body
LE: loop exit
PB: predicated region body
PF: predicated region fallthrough
CT: control target
= control target key end

     0   :  { %16 = vsyncpa [#allocation10], 0  ;;  %s8152_s0 = inlined_call_operand.vmem [shape: f32[128,16], index: 0, kind: input, shape index: {}]   ;;  %s8153_s1 = inlined_call_operand.hbm [shape: f32[16,256], index: 1, kind: input, shape index: {}]   ;;  %s8154_s2 = inlined_call_operand.hbm [shape: f32[32,128], index: 2, kind: input, shape index: {}]   ;;  %s8155_s3 = inlined_call_operand.hbm [shape: f32[32,128], index: 3, kind: input, shape index: {}]   ;;  %s8156_s4 = inlined_call_operand.vmem [shape: f32[1,256], index: 4, kind: input, shape index: {}]   ;;  %s8157_s5 = inlined_call_operand.hbm [shape: f32[64,256], index: 5, kind: input, shape index: {}]   ;;  %s8158_s6 = inlined_call_operand.hbm [shape: f32[32,128], index: 6, kind: input, shape index: {}]   ;;  %s8159_s7 = inlined_call_operand.vmem [shape: f32[32,128], index: 7, kind: input, shape index: {}]   ;;  %s8160_s8 = inlined_call_operand.vmem [shape: f32[1,256], index: 8, kind: input, shape index: {}]   ;;  %s8161_s9 = inlined_call_operand.vmem [shape: f32[4,16,32], index: 9, kind: output, shape index: {0}]   ;;  %s8162_s10 = inlined_call_operand.vmem [shape: f32[4,16,32], index: 10, kind: output, shape index: {1}]  }
   0x1   :  { %17 = vsyncpa [#allocation12], 0  ;;  %s38_s15 = sshll.u32 %s8154_s2, 4  ;;  %s39_s15 = int_to_ptr.hbm [resolvable:$true] %s38_s15 }
   0x2   :  { %18 = vsyncpa [#allocation15], 0  ;;  %s6429_s16 = smov [#allocation11]   ;;  %s6430_s18 = smov 128  }
   0x3   :  { %s40_s17 = sshll.u32 %s6429_s16, 4  ;;  %s6431_s19 = smov 8   ;;  %s41_s17 = int_to_ptr.vmem [resolvable:$true] %s40_s17 }
   0x4   :  { %46 = dma.hbm_to_vmem [thread:$0]  %s39_s15, 512, %s41_s17, [#allocation12], %s6430_s18, %s6430_s18, %s6431_s19  }
   0x5   :  { %s66_s22 = sshll.u32 %s8157_s5, 4  ;;  %s6432_s23 = smov [#allocation14]   ;;  %s67_s22 = int_to_ptr.hbm [resolvable:$true] %s66_s22 }
   0x6   :  { %s68_s24 = sshll.u32 %s6432_s23, 4  ;;  %s25_s26 = sshll.u32 %s8153_s1, 4  ;;  %s69_s24 = int_to_ptr.vmem [resolvable:$true] %s68_s24  ;;  %s26_s26 = int_to_ptr.hbm [resolvable:$true] %s25_s26 }
   0x7   :  { %s6433_s27 = smov 256   ;;  %s6434_s28 = smov 16  }
   0x8   :  { %74 = dma.hbm_to_vmem [thread:$0]  %s67_s22, 2048, %s69_s24, [#allocation15], %s6433_s27, %s6433_s27, %s6434_s28  }
   0x9   :  { %s51_s11 = sshll.u32 %s8155_s3, 4  ;;  %s6435_s12 = smov [#allocation9]   ;;  %s52_s11 = int_to_ptr.hbm [resolvable:$true] %s51_s11 }
   0xa   :  { %s27_s13 = sshll.u32 %s6435_s12, 4  ;;  %s6436_s5 = smov [#allocation13]   ;;  %s28_s13 = int_to_ptr.vmem [resolvable:$true] %s27_s13 }
   0xb   :  { %33 = dma.hbm_to_vmem [thread:$0]  %s26_s26, 512, %s28_s13, [#allocation10], %s6433_s27, %s6433_s27, %s6434_s28  }
   0xc   :  { %s53_s14 = sshll.u32 %s6436_s5, 4  ;;  %s79_s1 = sshll.u32 %s8158_s6, 4  ;;  %s54_s14 = int_to_ptr.vmem [resolvable:$true] %s53_s14  ;;  %s80_s1 = int_to_ptr.hbm [resolvable:$true] %s79_s1 }
   0xd   :  { %59 = dma.hbm_to_vmem [thread:$0]  %s52_s11, 512, %s54_s14, [#allocation12], %s6430_s18, %s6430_s18, %s6431_s19  }
   0xe   :  { %s6437_s17 = smov [#allocation16]  }
   0xf   :  { %s81_s20 = sshll.u32 %s6437_s17, 4  ;;  %s82_s20 = int_to_ptr.vmem [resolvable:$true] %s81_s20 }
  0x10   :  { %87 = dma.hbm_to_vmem [thread:$0]  %s80_s1, 512, %s82_s20, [#allocation15], %s6430_s18, %s6430_s18, %s6431_s19  }
  0x11   :  { %6423 = dma.done.wait [#allocation10], 512  }
  0x12   :  { %6424 = vsyncadd [#allocation10], 4294966784 }
  0x13   :  { %6425 = dma.done.wait [#allocation12], 1024  }
  0x14   :  { %6426 = vsyncadd [#allocation12], 4294966272 }
  0x15   :  { %6427 = dma.done.wait [#allocation15], 2560  }
  0x16   :  { %6428 = vsyncadd [#allocation15], 4294964736  ;;  %v131_v0 = vld [vmem:[#allocation9 + $0x18] sm:$0xff]  ;;  %v129_v1 = vld [vmem:[#allocation9 + $0x8] sm:$0xff]  ;;  %vm138_vm0 = vcmask 130048   ;;  %vm349_vm1 = vcmask 261120  }
  0x17   :  { %266 = vmatpush.msra.mxu1 %v131_v0  ;;  %v6524_v2 = vld [vmem:[%s8152_s0] sm:$0xff]  ;;  %v6531_v3 = vld [vmem:[%s8152_s0 + $0x8] sm:$0xff]  ;;  %v6538_v4 = vld [vmem:[%s8152_s0 + $0x10] sm:$0xff]  ;;  %v6438_v13 = vmov 0.0   ;;  %s6439_s24 = smov 32   ;;  %s6441_s2 = smov 96  }
  0x18   :  { %v6545_v5 = vld [vmem:[%s8152_s0 + $0x18] sm:$0xff]  ;;  %v6552_v6 = vld [vmem:[%s8152_s0 + $0x20] sm:$0xff]  ;;  %v6559_v7 = vld [vmem:[%s8152_s0 + $0x28] sm:$0xff]  ;;  %354 = vst.msk [vmem:[#allocation7] sm:$0xff] %vm349_vm1, %v6438_v13 }
  0x19   :  { %267 = vmatpush.msra.mxu1 %v129_v1  ;;  %v6566_v8 = vld [vmem:[%s8152_s0 + $0x30] sm:$0xff]  ;;  %v6573_v9 = vld [vmem:[%s8152_s0 + $0x38] sm:$0xff]  ;;  %v6580_v10 = vld [vmem:[%s8152_s0 + $0x40] sm:$0xff]  ;;  %350 = vst.msk [vmem:[#allocation5] sm:$0xff] %vm349_vm1, %v6438_v13 }
  0x1a   :  { %5558 = vmatmul.msk.f32.vlgmr.msra.gmra.mxu1 %vm138_vm0, %v6524_v2  ;;  %v410_v11 = vld [vmem:[#allocation13 + $0x18] sm:$0xff]  ;;  %v409_v12 = vld [vmem:[#allocation13 + $0x10] sm:$0xff]  ;;  %v6589_v14 = vld [vmem:[%s8152_s0 + $0x48] sm:$0xff]  ;;  %351 = vst.msk [vmem:[#allocation5 + $0x8] sm:$0xff] %vm349_vm1, %v6438_v13 }
  0x1b   :  { %429 = vmatpush.msra.mxu3 %v410_v11  ;;  %352 = vst.msk [vmem:[#allocation6] sm:$0xff] %vm349_vm1, %v6438_v13  ;;  %v408_v15 = vld [vmem:[#allocation13 + $0x8] sm:$0xff]  ;;  %v407_v16 = vld [vmem:[#allocation13] sm:$0xff]  ;;  %v6611_v18 = vld [vmem:[%s8152_s0 + $0x50] sm:$0xff] }
  0x1c   :  { %353 = vst.msk [vmem:[#allocation6 + $0x8] sm:$0xff] %vm349_vm1, %v6438_v13  ;;  %v6619_v20 = vld [vmem:[%s8152_s0 + $0x58] sm:$0xff]  ;;  %v6626_v21 = vld [vmem:[%s8152_s0 + $0x60] sm:$0xff]  ;;  %v6633_v22 = vld [vmem:[%s8152_s0 + $0x68] sm:$0xff] }
  0x1d   :  { %430 = vmatpush.msra.mxu3 %v409_v12  ;;  %355 = vst.msk [vmem:[#allocation7 + $0x8] sm:$0xff] %vm349_vm1, %v6438_v13  ;;  %v6640_v23 = vld [vmem:[%s8152_s0 + $0x70] sm:$0xff]  ;;  %v6647_v24 = vld [vmem:[%s8152_s0 + $0x78] sm:$0xff]  ;;  %v6684_v41 = vld [vmem:[%s8156_s4] sm:$0x3]  ;;  %s6440_s4 = smov 64  }
  0x1e   :  { %356 = vst.msk [vmem:[#allocation8] sm:$0xff] %vm349_vm1, %v6438_v13  ;;  %v6687_v43 = vperm.slane %v6684_v41, 1  ;;  %v368_v46 = vld [vmem:[#allocation11 + $0x18] sm:$0xff]  ;;  %v367_v47 = vld [vmem:[#allocation11 + $0x10] sm:$0xff]  ;;  %v366_v50 = vld [vmem:[#allocation11 + $0x8] sm:$0xff] }
  0x1f   :  { %431 = vmatpush.msra.mxu3 %v408_v15  ;;  %v405_v17 = vld [vmem:[#allocation7] sm:$0xff]  ;;  %357 = vst.msk [vmem:[#allocation8 + $0x8] sm:$0xff] %vm349_vm1, %v6438_v13  ;;  %387 = vmatpush.msra.mxu2 %v368_v46  ;;  %v130_v48 = vld [vmem:[#allocation9 + $0x10] sm:$0xff] }
  0x20   :  { %201 = vmatpush.msra.mxu0 %v130_v48  ;;  %v128_v51 = vld [vmem:[#allocation9] sm:$0xff] }
  0x21   :  { %432 = vmatpush.msra.mxu3 %v407_v16  ;;  %388 = vmatpush.msra.mxu2 %v367_v47  ;;  %v365_v52 = vld [vmem:[#allocation11] sm:$0xff]  ;;  %v364_v60 = vld [vmem:[#allocation5 + $0x8] sm:$0xff] }
  0x22   :  { %5559 = vmatmul.msk.f32.gmra.mxu1 %vm138_vm0, %v6531_v3  ;;  %5576 = vmatmul.msk.f32.vlgmr.msra.gmra.mxu3 %vm349_vm1, %v405_v17  ;;  %v363_v53 = vld [vmem:[#allocation5] sm:$0xff] }
  0x23   :  { %726 = vmatpush.msrb.mxu3 %v410_v11  ;;  %202 = vmatpush.msra.mxu0 %v128_v51 }
  0x24   :  { %v406_v19 = vld [vmem:[#allocation7 + $0x8] sm:$0xff]  ;;  %389 = vmatpush.msra.mxu2 %v366_v50  ;;  %5542 = vmatmul.msk.f32.vlgmr.msra.gmra.mxu0 %vm138_vm0, %v6524_v2 }
  0x25   :  { %727 = vmatpush.msrb.mxu3 %v409_v12  ;;  %v526_v25 = vld [vmem:[#allocation8] sm:$0xff] }
  0x26   :  { %570 = vrot.lane.b32.xlu1 %v526_v25, %s6439_s24  ;;  %v527_v37 = vld [vmem:[#allocation8 + $0x8] sm:$0xff]  ;;  %390 = vmatpush.msra.mxu2 %v365_v52 }
  0x27   :  { %728 = vmatpush.msrb.mxu3 %v408_v15  ;;  %572 = vrot.lane.b32.xlu2 %v527_v37, %s6439_s24  ;;  %v6732_v37 = vperm.slane %v6684_v41, 0 }
  0x28   :  { %5574 = vmatmul.msk.f32.vlgmr.msra.gmra.mxu2 %vm349_vm1, %v363_v53 }
  0x29   :  { %729 = vmatpush.msrb.mxu3 %v407_v16  ;;  %684 = vmatpush.msrb.mxu2 %v368_v46 }
  0x2a   :  { %5560 = vmatmul.msk.f32.gmra.mxu1 %vm138_vm0, %v6538_v4  ;;  %5577 = vmatmul.msk.f32.gmra.mxu3 %vm349_vm1, %v406_v19 }
  0x2b   :  { %1024 = vmatpush.msra.mxu3 %v410_v11  ;;  %685 = vmatpush.msrb.mxu2 %v367_v47 }
  0x2c   :  { %5543 = vmatmul.msk.f32.gmra.mxu0 %vm138_vm0, %v6531_v3 }
  0x2d   :  { %1025 = vmatpush.msra.mxu3 %v409_v12  ;;  %686 = vmatpush.msrb.mxu2 %v366_v50 }
  0x2f   :  { %1026 = vmatpush.msra.mxu3 %v408_v15  ;;  %687 = vmatpush.msrb.mxu2 %v365_v52 }
  0x30   :  { %5575 = vmatmul.msk.f32.gmra.mxu2 %vm349_vm1, %v364_v60 }
  0x31   :  { %1027 = vmatpush.msra.mxu3 %v407_v16  ;;  %982 = vmatpush.msra.mxu2 %v368_v46 }
  0x32   :  { %5561 = vmatmul.msk.f32.gmra.mxu1 %vm138_vm0, %v6545_v5 }
  0x33   :  { %983 = vmatpush.msra.mxu2 %v367_v47 }
  0x34   :  { %5544 = vmatmul.msk.f32.gmra.mxu0 %vm138_vm0, %v6538_v4 }
  0x35   :  { %984 = vmatpush.msra.mxu2 %v366_v50 }
  0x37   :  { %985 = vmatpush.msra.mxu2 %v365_v52 }
  0x3a   :  { %5562 = vmatmul.msk.f32.gmra.mxu1 %vm138_vm0, %v6552_v6 }
  0x3c   :  { %5545 = vmatmul.msk.f32.gmra.mxu0 %vm138_vm0, %v6545_v5 }
  0x42   :  { %5563 = vmatmul.msk.f32.gmra.mxu1 %vm138_vm0, %v6559_v7 }
  0x44   :  { %5546 = vmatmul.msk.f32.gmra.mxu0 %vm138_vm0, %v6552_v6 }
  0x4a   :  { %5564 = vmatmul.msk.f32.gmra.mxu1 %vm138_vm0, %v6566_v8 }
  0x4c   :  { %5547 = vmatmul.msk.f32.gmra.mxu0 %vm138_vm0, %v6559_v7 }
  0x52   :  { %5565 = vmatmul.msk.f32.gmra.mxu1 %vm138_vm0, %v6573_v9 }
  0x54   :  { %5548 = vmatmul.msk.f32.gmra.mxu0 %vm138_vm0, %v6566_v8 }
  0x5a   :  { %5566 = vmatmul.msk.f32.gmra.mxu1 %vm138_vm0, %v6580_v10 }
  0x5c   :  { %5549 = vmatmul.msk.f32.gmra.mxu0 %vm138_vm0, %v6573_v9 }
  0x62   :  { %5567 = vmatmul.msk.f32.gmra.mxu1 %vm138_vm0, %v6589_v14 }
  0x64   :  { %5550 = vmatmul.msk.f32.gmra.mxu0 %vm138_vm0, %v6580_v10 }
  0x6a   :  { %5568 = vmatmul.msk.f32.gmra.mxu1 %vm138_vm0, %v6611_v18 }
  0x6c   :  { %5551 = vmatmul.msk.f32.gmra.mxu0 %vm138_vm0, %v6589_v14 }
  0x72   :  { %5569 = vmatmul.msk.f32.gmra.mxu1 %vm138_vm0, %v6619_v20 }
  0x74   :  { %5552 = vmatmul.msk.f32.gmra.mxu0 %vm138_vm0, %v6611_v18 }
  0x7a   :  { %5570 = vmatmul.msk.f32.gmra.mxu1 %vm138_vm0, %v6626_v21 }
  0x7c   :  { %5553 = vmatmul.msk.f32.gmra.mxu0 %vm138_vm0, %v6619_v20 }
  0x81   :  { %v573_v50 = vpop.permute.xlu2 %572 }
  0x82   :  { %5571 = vmatmul.msk.f32.gmra.mxu1 %vm138_vm0, %v6633_v22 }
  0x84   :  { %5554 = vmatmul.msk.f32.gmra.mxu0 %vm138_vm0, %v6626_v21 }
  0x8a   :  { %5572 = vmatmul.msk.f32.gmra.mxu1 %vm138_vm0, %v6640_v23 }
  0x8c   :  { %5555 = vmatmul.msk.f32.gmra.mxu0 %vm138_vm0, %v6633_v22 }
  0x92   :  { %5573 = vmatmul.msk.f32.gmra.mxu1 %vm138_vm0, %v6647_v24 }
  0x94   :  { %5556 = vmatmul.msk.f32.gmra.mxu0 %vm138_vm0, %v6640_v23 }
  0x97   :  { %v6652_v26 = vpop.f32.mrf.mxu1 }
  0x98   :  { %v571_v41 = vpop.permute.xlu1 %570 }
  0x9c   :  { %5557 = vmatmul.msk.f32.gmra.mxu0 %vm138_vm0, %v6647_v24 }
  0x9f   :  { %v6654_v27 = vpop.f32.mrf.mxu1 }
  0xa5   :  { %v434_v42 = vpop.f32.mrf.mxu3 }
  0xa7   :  { %v6656_v28 = vpop.f32.mrf.mxu1 }
  0xab   :  { %v392_v47 = vpop.f32.mrf.mxu2 }
  0xad   :  { %v437_v55 = vpop.f32.mrf.mxu3 }
  0xaf   :  { %v6658_v29 = vpop.f32.mrf.mxu1 }
  0xb3   :  { %v395_v60 = vpop.f32.mrf.mxu2 }
  0xb7   :  { %v6660_v30 = vpop.f32.mrf.mxu1 }
  0xbf   :  { %v6662_v31 = vpop.f32.mrf.mxu1 }
  0xc7   :  { %v6664_v32 = vpop.f32.mrf.mxu1 }
  0xcf   :  { %v6666_v33 = vpop.f32.mrf.mxu1 }
  0xd7   :  { %v6668_v34 = vpop.f32.mrf.mxu1 }
  0xdf   :  { %v6670_v35 = vpop.f32.mrf.mxu1 }
  0xe7   :  { %v6672_v36 = vpop.f32.mrf.mxu1 }
  0xef   :  { %v6675_v38 = vpop.f32.mrf.mxu1 }
  0xf7   :  { %v6677_v39 = vpop.f32.mrf.mxu1 }
  0xff   :  { %v6679_v40 = vpop.f32.mrf.mxu1 }
 0x107   :  { %v311_v44 = vpop.f32.mrf.mxu1 }
 0x108   :  { %v312_v45 = vadd.f32 %v311_v44, %v6687_v43 }
 0x10a   :  { %v440_v49 = vadd.f32 %v434_v42, %v312_v45  ;;  %v204_v45 = vpop.f32.mrf.mxu0 }
 0x10b   :  { %v205_v24 = vadd.f32 %v204_v45, %v6732_v37 }
 0x10c   :  { %5791 = vtanh.f32 %v440_v49  ;;  %v5580_v61 = vmul.f32 -1.442695, %v440_v49 }
 0x10d   :  { %v398_v48 = vadd.f32 %v392_v47, %v205_v24 }
 0x10f   :  { %v314_v54 = vpop.f32.mrf.mxu1 }
 0x110   :  { %v315_v56 = vadd.f32 %v314_v54, %v6687_v43 }
 0x112   :  { %v5792_v57 = vpop.eup %5791  ;;  %v441_v58 = vadd.f32 %v437_v55, %v315_v56  ;;  %v207_v55 = vpop.f32.mrf.mxu0 }
 0x113   :  { %580 = vrot.lane.b32.xlu0 %v5792_v57, %s6440_s4 }
 0x114   :  { %5793 = vtanh.f32 %v441_v58  ;;  %v5581_v62 = vmul.f32 -1.442695, %v441_v58 }
 0x115   :  { %5795 = vpow2.f32 %v5580_v61 }
 0x116   :  { %5797 = vpow2.f32 %v5581_v62 }
 0x11a   :  { %v5794_v59 = vpop.eup %5793 }
 0x11b   :  { %582 = vrot.lane.b32.xlu0 %v5794_v59, %s6440_s4  ;;  %v5796_v63 = vpop.eup %5795  ;;  %v208_v59 = vadd.f32 %v207_v55, %v6732_v37 }
 0x11c   :  { %v534_v0 = vadd.f32 1.0, %v5796_v63  ;;  %v5798_v1 = vpop.eup %5797 }
 0x11d   :  { %v535_v2 = vadd.f32 1.0, %v5798_v1  ;;  %v399_v61 = vadd.f32 %v395_v60, %v208_v59  ;;  %v5578_v1 = vmul.f32 -1.442695, %v398_v48 }
 0x11e   :  { %5799 = vrcp.f32 %v534_v0  ;;  %v547_v11 = vand.u32 2147483648, %v534_v0  ;;  %vm541_vm3 = vweird.f32 %v534_v0  ;;  %v545_v12 = vand.u32 2147483647, %v534_v0 }
 0x11f   :  { %5801 = vrcp.f32 %v535_v2  ;;  %vm556_vm6 = vweird.f32 %v535_v2  ;;  %v562_v18 = vand.u32 2147483648, %v535_v2  ;;  %v560_v21 = vand.u32 2147483647, %v535_v2 }
 0x120   :  { %v548_v16 = vor.u32 1.1754944e-38, %v547_v11  ;;  %vm546_vm5 = vcmp.eq.f32.partialorder %v545_v12, 8.507059e+37  ;;  %5803 = vtanh.f32 %v398_v48 }
 0x121   :  { %v563_v23 = vor.u32 1.1754944e-38, %v562_v18  ;;  %vm561_vm9 = vcmp.eq.f32.partialorder %v560_v21, 8.507059e+37 }
 0x124   :  { %v5800_v3 = vpop.eup %5799 }
 0x125   :  { %v537_v4 = vmul.f32 %v5800_v3, %v534_v0  ;;  %v5802_v6 = vpop.eup %5801  ;;  %vm542_vm2 = vweird.f32 %v5800_v3  ;;  %v442_v0 = vld [vmem:[#allocation6] sm:$0xff] }
 0x126   :  { %v552_v8 = vmul.f32 %v5802_v6, %v535_v2  ;;  %vm543_vm4 = vmor %vm541_vm3, %vm542_vm2  ;;  %vm557_vm7 = vweird.f32 %v5802_v6  ;;  %v5804_v49 = vpop.eup %5803  ;;  %v5579_v2 = vmul.f32 -1.442695, %v399_v61 }
 0x127   :  { %v538_v5 = vsub.f32 1.0, %v537_v4  ;;  %vm558_vm8 = vmor %vm556_vm6, %vm557_vm7 }
 0x128   :  { %v553_v10 = vsub.f32 1.0, %v552_v8 }
 0x129   :  { %v539_v7 = vmul.f32 %v5800_v3, %v538_v5 }
 0x12a   :  { %v554_v15 = vmul.f32 %v5802_v6, %v553_v10 }
 0x12b   :  { %v540_v9 = vadd.f32 %v5800_v3, %v539_v7 }
 0x12c   :  { %v555_v20 = vadd.f32 %v5802_v6, %v554_v15  ;;  %v443_v15 = vld [vmem:[#allocation6 + $0x8] sm:$0xff] }
 0x12d   :  { %v544_v14 = vsel %vm543_vm4, %v5800_v3, %v540_v9 }
 0x12e   :  { %v6725_v17 = vsel %vm546_vm5, %v548_v16, %v544_v14  ;;  %v559_v25 = vsel %vm558_vm8, %v5802_v6, %v555_v20 }
 0x12f   :  { %v564_v42 = vsel %vm561_vm9, %v563_v23, %v559_v25  ;;  %v576_v56 = vmul.f32 %v571_v41, %v6725_v17 }
 0x130   :  { %v577_v51 = vmul.f32 %v573_v50, %v564_v42 }
 0x185   :  { %v581_v19 = vpop.permute.xlu0 %580 }
 0x186   :  { %v586_v22 = vmul.f32 %v581_v19, %v6725_v17 }
 0x188   :  { %590 = vrot.lane.b32.xlu1 %v586_v22, %s6439_s24 }
 0x18d   :  { %v583_v44 = vpop.permute.xlu0 %582 }
 0x18e   :  { %v587_v46 = vmul.f32 %v583_v44, %v564_v42 }
 0x190   :  { %592 = vrot.lane.b32.xlu2 %v587_v46, %s6439_s24 }
 0x198   :  { %496 = vrot.lane.b32.xlu2 %v5804_v49, %s6440_s4 }
 0x1ea   :  { %v593_v52 = vpop.permute.xlu2 %592 }
 0x1eb   :  { %v6737_v53 = vadd.f32 %v593_v52, %v577_v51 }
 0x1ed   :  { %5805 = vtanh.f32 %v6737_v53 }
 0x1f2   :  { %v497_v50 = vpop.permute.xlu2 %496 }
 0x1f3   :  { %v5806_v54 = vpop.eup %5805 }
 0x1f4   :  { %604 = vrot.lane.b32.xlu1 %v5806_v54, %s6440_s4 }
 0x1fa   :  { %v591_v57 = vpop.permute.xlu1 %590 }
 0x1fb   :  { %v6742_v58 = vadd.f32 %v591_v57, %v576_v56 }
 0x1fd   :  { %5807 = vtanh.f32 %v6742_v58 }
 0x1fe   :  { %5809 = vtanh.f32 %v399_v61 }
 0x1ff   :  { %5811 = vpow2.f32 %v5578_v1 }
 0x200   :  { %5813 = vpow2.f32 %v5579_v2 }
 0x203   :  { %v5808_v62 = vpop.eup %5807 }
 0x204   :  { %602 = vrot.lane.b32.xlu0 %v5808_v62, %s6440_s4  ;;  %v5810_v63 = vpop.eup %5809 }
 0x205   :  { %v5812_v3 = vpop.eup %5811 }
 0x206   :  { %v5814_v4 = vpop.eup %5813  ;;  %v450_v5 = vadd.f32 1.0, %v5812_v3 }
 0x207   :  { %v451_v6 = vadd.f32 1.0, %v5814_v4 }
 0x208   :  { %5815 = vrcp.f32 %v450_v5  ;;  %vm457_vm10 = vweird.f32 %v450_v5  ;;  %v463_v20 = vand.u32 2147483648, %v450_v5  ;;  %v461_v22 = vand.u32 2147483647, %v450_v5 }
 0x209   :  { %5817 = vrcp.f32 %v451_v6  ;;  %vm472_vm12 = vweird.f32 %v451_v6  ;;  %v476_v46 = vand.u32 2147483647, %v451_v6 }
 0x20a   :  { %v464_v24 = vor.u32 1.1754944e-38, %v463_v20  ;;  %vm462_vm0 = vcmp.eq.f32.partialorder %v461_v22, 8.507059e+37 }
 0x20b   :  { %vm477_vm2 = vcmp.eq.f32.partialorder %v476_v46, 8.507059e+37 }
 0x20c   :  { %498 = vrot.lane.b32.xlu0 %v5810_v63, %s6440_s4 }
 0x20e   :  { %v5816_v7 = vpop.eup %5815 }
 0x20f   :  { %v5818_v10 = vpop.eup %5817  ;;  %v453_v11 = vmul.f32 %v5816_v7, %v450_v5  ;;  %vm458_vm11 = vweird.f32 %v5816_v7 }
 0x210   :  { %v468_v12 = vmul.f32 %v5818_v10, %v451_v6  ;;  %vm473_vm13 = vweird.f32 %v5818_v10  ;;  %vm6751_vm14 = vmor %vm457_vm10, %vm458_vm11 }
 0x211   :  { %v454_v14 = vsub.f32 1.0, %v453_v11  ;;  %vm474_vm15 = vmor %vm472_vm12, %vm473_vm13  ;;  %v306_v11 = vadd.f32 %v6677_v39, %v6687_v43 }
 0x212   :  { %v469_v16 = vsub.f32 1.0, %v468_v12 }
 0x213   :  { %v455_v18 = vmul.f32 %v5816_v7, %v454_v14 }
 0x214   :  { %486 = vrot.lane.b32.xlu0 %v442_v0, %s6439_s24  ;;  %v470_v19 = vmul.f32 %v5818_v10, %v469_v16 }
 0x215   :  { %v456_v21 = vadd.f32 %v5816_v7, %v455_v18 }
 0x216   :  { %v471_v45 = vadd.f32 %v5818_v10, %v470_v19 }
 0x217   :  { %v460_v47 = vsel %vm6751_vm14, %v5816_v7, %v456_v21 }
 0x218   :  { %v475_v49 = vsel %vm474_vm15, %v5818_v10, %v471_v45  ;;  %v465_v51 = vsel %vm462_vm0, %v464_v24, %v460_v47 }
 0x219   :  { %v502_v54 = vmul.f32 %v497_v50, %v465_v51 }
 0x266   :  { %v605_v8 = vpop.permute.xlu1 %604 }
 0x267   :  { %v609_v9 = vmul.f32 %v605_v8, %v564_v42  ;;  %v478_v42 = vand.u32 2147483648, %v451_v6 }
 0x269   :  { %634 = vrot.lane.b32.xlu2 %v609_v9, %s6439_s24  ;;  %v479_v48 = vor.u32 1.1754944e-38, %v478_v42 }
 0x26b   :  { %v480_v41 = vsel %vm477_vm2, %v479_v48, %v475_v49 }
 0x271   :  { %488 = vrot.lane.b32.xlu2 %v443_v15, %s6439_s24 }
 0x276   :  { %v603_v25 = vpop.permute.xlu0 %602 }
 0x277   :  { %v608_v44 = vmul.f32 %v603_v25, %v6725_v17 }
 0x279   :  { %632 = vrot.lane.b32.xlu1 %v608_v44, %s6439_s24 }
 0x27e   :  { %v499_v52 = vpop.permute.xlu0 %498 }
 0x27f   :  { %v503_v55 = vmul.f32 %v499_v52, %v480_v41 }
 0x281   :  { %508 = vrot.lane.b32.xlu0 %v503_v55, %s6439_s24  ;;  %506 = vrot.lane.b32.xlu1 %v502_v54, %s6439_s24 }
 0x286   :  { %v487_v56 = vpop.permute.xlu0 %486 }
 0x287   :  { %v492_v60 = vmul.f32 %v487_v56, %v465_v51 }
 0x2c3   :  { %v635_v17 = vpop.permute.xlu2 %634 }
 0x2c4   :  { %639 = vst.msk [vmem:[#allocation7 + $0x8] sm:$0xff] %vm349_vm1, %v635_v17 }
 0x2c5   :  { %654 = vst.msk [vmem:[#allocation4 + $0x78] sm:$0xff] %vm349_vm1, %v635_v17 }
 0x2cb   :  { %v489_v59 = vpop.permute.xlu2 %488  ;;  %v703_v3 = vld [vmem:[#allocation7 + $0x8] sm:$0xff] }
 0x2cc   :  { %v493_v61 = vmul.f32 %v489_v59, %v480_v41 }
 0x2eb   :  { %v633_v57 = vpop.permute.xlu1 %632 }
 0x2ec   :  { %638 = vst.msk [vmem:[#allocation7] sm:$0xff] %vm349_vm1, %v633_v57 }
 0x2ed   :  { %653 = vst.msk [vmem:[#allocation4 + $0x70] sm:$0xff] %vm349_vm1, %v633_v57 }
 0x2f3   :  { %v509_v62 = vpop.permute.xlu0 %508  ;;  %v507_v63 = vpop.permute.xlu1 %506  ;;  %v702_v0 = vld [vmem:[#allocation7] sm:$0xff] }
 0x2f4   :  { %v6765_v1 = vadd.f32 %v509_v62, %v493_v61  ;;  %v6767_v2 = vadd.f32 %v507_v63, %v492_v60  ;;  %5584 = vmatmul.msk.f32.vlgmr.msrb.gmra.mxu3 %vm349_vm1, %v702_v0 }
 0x2f6   :  { %5819 = vtanh.f32 %v6765_v1 }
 0x2f7   :  { %5821 = vtanh.f32 %v6767_v2 }
 0x2fc   :  { %v5820_v4 = vpop.eup %5819  ;;  %5585 = vmatmul.msk.f32.gmra.mxu3 %vm349_vm1, %v703_v3 }
 0x2fd   :  { %v5822_v5 = vpop.eup %5821  ;;  %520 = vrot.lane.b32.xlu2 %v5820_v4, %s6440_s4 }
 0x2fe   :  { %518 = vrot.lane.b32.xlu1 %v5822_v5, %s6440_s4 }
 0x305   :  { %642 = vrot.lane.b32.xlu2 %v6742_v58, %s6441_s2  ;;  %v309_v58 = vadd.f32 %v6679_v40, %v6687_v43 }
 0x357   :  { %v521_v6 = vpop.permute.xlu2 %520 }
 0x358   :  { %v525_v7 = vmul.f32 %v521_v6, %v480_v41 }
 0x35a   :  { %614 = vrot.lane.b32.xlu1 %v525_v7, %s6439_s24 }
 0x35f   :  { %v643_v8 = vpop.permute.xlu2 %642 }
 0x360   :  { %648 = vst.msk [vmem:[#allocation8] sm:$0xff] %vm349_vm1, %v643_v8 }
 0x367   :  { %v823_v19 = vld [vmem:[#allocation8] sm:$0xff] }
 0x370   :  { %v519_v9 = vpop.permute.xlu1 %518 }
 0x371   :  { %v524_v10 = vmul.f32 %v519_v9, %v465_v51 }
 0x373   :  { %612 = vrot.lane.b32.xlu0 %v524_v10, %s6439_s24 }
 0x377   :  { %v731_v12 = vpop.f32.mrf.mxu3 }
 0x378   :  { %v737_v14 = vadd.f32 %v731_v12, %v306_v11 }
 0x37a   :  { %5823 = vtanh.f32 %v737_v14 }
 0x37b   :  { %644 = vrot.lane.b32.xlu0 %v6737_v53, %s6441_s2  ;;  %v5588_v53 = vmul.f32 -1.442695, %v737_v14 }
 0x37f   :  { %v734_v15 = vpop.f32.mrf.mxu3 }
 0x380   :  { %v5824_v16 = vpop.eup %5823  ;;  %v738_v18 = vadd.f32 %v734_v15, %v309_v58 }
 0x381   :  { %877 = vrot.lane.b32.xlu1 %v5824_v16, %s6440_s4 }
 0x382   :  { %5825 = vtanh.f32 %v738_v18  ;;  %v5589_v39 = vmul.f32 -1.442695, %v738_v18  ;;  %v210_v18 = vpop.f32.mrf.mxu0 }
 0x383   :  { %867 = vrot.lane.b32.xlu0 %v823_v19, %s6439_s24 }
 0x384   :  { %5827 = vpow2.f32 %v5589_v39 }
 0x388   :  { %v5826_v20 = vpop.eup %5825 }
 0x389   :  { %879 = vrot.lane.b32.xlu2 %v5826_v20, %s6440_s4  ;;  %v211_v20 = vadd.f32 %v210_v18, %v6732_v37 }
 0x38a   :  { %v5828_v21 = vpop.eup %5827 }
 0x38b   :  { %v832_v22 = vadd.f32 1.0, %v5828_v21 }
 0x38d   :  { %5829 = vrcp.f32 %v832_v22  ;;  %v859_v48 = vand.u32 2147483648, %v832_v22  ;;  %vm853_vm4 = vweird.f32 %v832_v22  ;;  %v857_v49 = vand.u32 2147483647, %v832_v22 }
 0x38e   :  { %5831 = vpow2.f32 %v5588_v53  ;;  %v213_v53 = vpop.f32.mrf.mxu0 }
 0x38f   :  { %v860_v52 = vor.u32 1.1754944e-38, %v859_v48  ;;  %vm858_vm6 = vcmp.eq.f32.partialorder %v857_v49, 8.507059e+37 }
 0x393   :  { %v5830_v23 = vpop.eup %5829 }
 0x394   :  { %v5832_v25 = vpop.eup %5831  ;;  %v849_v42 = vmul.f32 %v5830_v23, %v832_v22  ;;  %vm854_vm3 = vweird.f32 %v5830_v23 }
 0x395   :  { %v831_v44 = vadd.f32 1.0, %v5832_v25  ;;  %vm855_vm5 = vmor %vm853_vm4, %vm854_vm3 }
 0x396   :  { %v850_v45 = vsub.f32 1.0, %v849_v42 }
 0x397   :  { %5833 = vrcp.f32 %v831_v44  ;;  %v844_v62 = vand.u32 2147483648, %v831_v44  ;;  %vm838_vm8 = vweird.f32 %v831_v44  ;;  %v842_v63 = vand.u32 2147483647, %v831_v44 }
 0x398   :  { %v851_v46 = vmul.f32 %v5830_v23, %v850_v45 }
 0x399   :  { %v845_v3 = vor.u32 1.1754944e-38, %v844_v62  ;;  %vm843_vm10 = vcmp.eq.f32.partialorder %v842_v63, 8.507059e+37 }
 0x39a   :  { %v852_v24 = vadd.f32 %v5830_v23, %v851_v46 }
 0x39c   :  { %v856_v50 = vsel %vm855_vm5, %v5830_v23, %v852_v24 }
 0x39d   :  { %v5834_v47 = vpop.eup %5833  ;;  %v6791_v41 = vsel %vm858_vm6, %v860_v52, %v856_v50 }
 0x39e   :  { %v834_v51 = vmul.f32 %v5834_v47, %v831_v44  ;;  %vm839_vm7 = vweird.f32 %v5834_v47 }
 0x39f   :  { %vm840_vm9 = vmor %vm838_vm8, %vm839_vm7 }
 0x3a0   :  { %v835_v17 = vsub.f32 1.0, %v834_v51 }
 0x3a2   :  { %v836_v57 = vmul.f32 %v5834_v47, %v835_v17 }
 0x3a4   :  { %v837_v59 = vadd.f32 %v5834_v47, %v836_v57 }
 0x3a6   :  { %v841_v0 = vsel %vm840_vm9, %v5834_v47, %v837_v59 }
 0x3a7   :  { %v6801_v4 = vsel %vm843_vm10, %v845_v3, %v841_v0 }
 0x3cc   :  { %v615_v40 = vpop.permute.xlu1 %614 }
 0x3cd   :  { %619 = vst.msk [vmem:[#allocation5 + $0x8] sm:$0xff] %vm349_vm1, %v615_v40 }
 0x3ce   :  { %651 = vst.msk [vmem:[#allocation3 + $0x8] sm:$0xff] %vm349_vm1, %v615_v40  ;;  %v214_v40 = vadd.f32 %v213_v53, %v6732_v37 }
 0x3d4   :  { %v661_v8 = vld [vmem:[#allocation5 + $0x8] sm:$0xff] }
 0x3e3   :  { %v880_v54 = vpop.permute.xlu2 %879 }
 0x3e4   :  { %v884_v55 = vmul.f32 %v880_v54, %v6791_v41 }
 0x3e5   :  { %v613_v56 = vpop.permute.xlu0 %612 }
 0x3e6   :  { %618 = vst.msk [vmem:[#allocation5] sm:$0xff] %vm349_vm1, %v613_v56  ;;  %889 = vrot.lane.b32.xlu0 %v884_v55, %s6439_s24 }
 0x3e7   :  { %650 = vst.msk [vmem:[#allocation3] sm:$0xff] %vm349_vm1, %v613_v56 }
 0x3ed   :  { %v645_v60 = vpop.permute.xlu0 %644  ;;  %v660_v61 = vld [vmem:[#allocation5] sm:$0xff] }
 0x3ee   :  { %649 = vst.msk [vmem:[#allocation8 + $0x8] sm:$0xff] %vm349_vm1, %v645_v60  ;;  %5582 = vmatmul.msk.f32.vlgmr.msrb.gmra.mxu2 %vm349_vm1, %v660_v61  ;;  %622 = vrot.lane.b32.xlu0 %v6767_v2, %s6441_s2 }
 0x3f3   :  { %v878_v5 = vpop.permute.xlu1 %877 }
 0x3f4   :  { %v883_v6 = vmul.f32 %v878_v5, %v6801_v4 }
 0x3f5   :  { %v824_v7 = vld [vmem:[#allocation8 + $0x8] sm:$0xff]  ;;  %v868_v2 = vpop.permute.xlu0 %867 }
 0x3f6   :  { %869 = vrot.lane.b32.xlu2 %v824_v7, %s6439_s24  ;;  %5583 = vmatmul.msk.f32.gmra.mxu2 %vm349_vm1, %v661_v8  ;;  %v873_v15 = vmul.f32 %v868_v2, %v6801_v4 }
 0x3f7   :  { %887 = vrot.lane.b32.xlu1 %v883_v6, %s6439_s24 }
 0x450   :  { %v870_v9 = vpop.permute.xlu2 %869 }
 0x451   :  { %v874_v10 = vmul.f32 %v870_v9, %v6791_v41 }
 0x458   :  { %v890_v11 = vpop.permute.xlu0 %889 }
 0x459   :  { %v6808_v12 = vadd.f32 %v890_v11, %v874_v10 }
 0x45b   :  { %5835 = vtanh.f32 %v6808_v12 }
 0x460   :  { %v623_v14 = vpop.permute.xlu0 %622 }
 0x461   :  { %v5836_v58 = vpop.eup %5835  ;;  %628 = vst.msk [vmem:[#allocation6] sm:$0xff] %vm349_vm1, %v623_v14 }
 0x462   :  { %901 = vrot.lane.b32.xlu2 %v5836_v58, %s6440_s4 }
 0x468   :  { %v739_v45 = vld [vmem:[#allocation6] sm:$0xff] }
 0x469   :  { %v888_v16 = vpop.permute.xlu1 %887 }
 0x46a   :  { %v6814_v19 = vadd.f32 %v888_v16, %v873_v15 }
 0x46c   :  { %5837 = vtanh.f32 %v6814_v19 }
 0x471   :  { %v689_v39 = vpop.f32.mrf.mxu2 }
 0x472   :  { %v5838_v21 = vpop.eup %5837  ;;  %v695_v22 = vadd.f32 %v689_v39, %v211_v20 }
 0x473   :  { %899 = vrot.lane.b32.xlu1 %v5838_v21, %s6440_s4 }
 0x474   :  { %5839 = vtanh.f32 %v695_v22  ;;  %v5586_v47 = vmul.f32 -1.442695, %v695_v22 }
 0x479   :  { %v692_v23 = vpop.f32.mrf.mxu2 }
 0x47a   :  { %v5840_v25 = vpop.eup %5839  ;;  %v696_v42 = vadd.f32 %v692_v23, %v214_v40 }
 0x47b   :  { %793 = vrot.lane.b32.xlu2 %v5840_v25, %s6440_s4  ;;  %624 = vrot.lane.b32.xlu1 %v6765_v1, %s6441_s2 }
 0x47c   :  { %5841 = vtanh.f32 %v696_v42  ;;  %v5587_v48 = vmul.f32 -1.442695, %v696_v42 }
 0x47d   :  { %5843 = vpow2.f32 %v5586_v47 }
 0x47e   :  { %5845 = vpow2.f32 %v5587_v48 }
 0x482   :  { %v5842_v44 = vpop.eup %5841 }
 0x483   :  { %795 = vrot.lane.b32.xlu0 %v5842_v44, %s6440_s4  ;;  %v5844_v49 = vpop.eup %5843 }
 0x484   :  { %v747_v50 = vadd.f32 1.0, %v5844_v49  ;;  %v5846_v1 = vpop.eup %5845 }
 0x485   :  { %v748_v51 = vadd.f32 1.0, %v5846_v1 }
 0x486   :  { %5847 = vrcp.f32 %v747_v50  ;;  %v760_v62 = vand.u32 2147483648, %v747_v50  ;;  %vm754_vm12 = vweird.f32 %v747_v50  ;;  %v758_v63 = vand.u32 2147483647, %v747_v50 }
 0x487   :  { %5849 = vrcp.f32 %v748_v51  ;;  %vm769_vm0 = vweird.f32 %v748_v51  ;;  %v773_v10 = vand.u32 2147483647, %v748_v51 }
 0x488   :  { %v761_v5 = vor.u32 1.1754944e-38, %v760_v62  ;;  %vm759_vm14 = vcmp.eq.f32.partialorder %v758_v63, 8.507059e+37 }
 0x489   :  { %vm774_vm3 = vcmp.eq.f32.partialorder %v773_v10, 8.507059e+37 }
 0x48b   :  { %783 = vrot.lane.b32.xlu0 %v739_v45, %s6439_s24 }
 0x48c   :  { %v5848_v52 = vpop.eup %5847 }
 0x48d   :  { %v750_v54 = vmul.f32 %v5848_v52, %v747_v50  ;;  %v5850_v17 = vpop.eup %5849  ;;  %vm755_vm11 = vweird.f32 %v5848_v52 }
 0x48e   :  { %v765_v57 = vmul.f32 %v5850_v17, %v748_v51  ;;  %vm756_vm13 = vmor %vm754_vm12, %vm755_vm11  ;;  %vm770_vm15 = vweird.f32 %v5850_v17 }
 0x48f   :  { %v751_v55 = vsub.f32 1.0, %v750_v54  ;;  %vm771_vm2 = vmor %vm769_vm0, %vm770_vm15 }
 0x490   :  { %v766_v61 = vsub.f32 1.0, %v765_v57 }
 0x491   :  { %v752_v56 = vmul.f32 %v5848_v52, %v751_v55 }
 0x492   :  { %v767_v3 = vmul.f32 %v5850_v17, %v766_v61 }
 0x494   :  { %v768_v9 = vadd.f32 %v5850_v17, %v767_v3 }
 0x496   :  { %v772_v11 = vsel %vm771_vm2, %v5850_v17, %v768_v9 }
 0x4bc   :  { %v902_v46 = vpop.permute.xlu2 %901 }
 0x4bd   :  { %v906_v24 = vmul.f32 %v902_v46, %v6791_v41  ;;  %v753_v41 = vadd.f32 %v5848_v52, %v752_v56 }
 0x4bf   :  { %931 = vrot.lane.b32.xlu2 %v906_v24, %s6439_s24  ;;  %v757_v0 = vsel %vm756_vm13, %v5848_v52, %v753_v41  ;;  %v300_v52 = vadd.f32 %v6672_v36, %v6687_v43 }
 0x4c0   :  { %v762_v7 = vsel %vm759_vm14, %v761_v5, %v757_v0 }
 0x4d5   :  { %v794_v6 = vpop.permute.xlu2 %793 }
 0x4d6   :  { %v799_v2 = vmul.f32 %v794_v6, %v762_v7 }
 0x4e5   :  { %v900_v59 = vpop.permute.xlu1 %899 }
 0x4e6   :  { %v905_v60 = vmul.f32 %v900_v59, %v6801_v4  ;;  %v775_v4 = vand.u32 2147483648, %v748_v51 }
 0x4e8   :  { %929 = vrot.lane.b32.xlu1 %v905_v60, %s6439_s24  ;;  %v776_v14 = vor.u32 1.1754944e-38, %v775_v4 }
 0x4ea   :  { %v777_v15 = vsel %vm774_vm3, %v776_v14, %v772_v11 }
 0x4ed   :  { %v625_v8 = vpop.permute.xlu1 %624 }
 0x4ee   :  { %629 = vst.msk [vmem:[#allocation6 + $0x8] sm:$0xff] %vm349_vm1, %v625_v8 }
 0x4f0   :  { %803 = vrot.lane.b32.xlu1 %v799_v2, %s6439_s24 }
 0x4f5   :  { %v796_v58 = vpop.permute.xlu0 %795  ;;  %v740_v16 = vld [vmem:[#allocation6 + $0x8] sm:$0xff] }
 0x4f6   :  { %v800_v18 = vmul.f32 %v796_v58, %v777_v15  ;;  %785 = vrot.lane.b32.xlu2 %v740_v16, %s6439_s24 }
 0x4f8   :  { %805 = vrot.lane.b32.xlu0 %v800_v18, %s6439_s24 }
 0x4fd   :  { %v784_v21 = vpop.permute.xlu0 %783 }
 0x4fe   :  { %v789_v22 = vmul.f32 %v784_v21, %v762_v7 }
 0x519   :  { %v932_v20 = vpop.permute.xlu2 %931 }
 0x51a   :  { %936 = vst.msk [vmem:[#allocation7 + $0x8] sm:$0xff] %vm349_vm1, %v932_v20 }
 0x51b   :  { %952 = vst.msk [vmem:[#allocation4 + $0x68] sm:$0xff] %vm349_vm1, %v932_v20 }
 0x521   :  { %v1001_v45 = vld [vmem:[#allocation7 + $0x8] sm:$0xff] }
 0x550   :  { %v786_v25 = vpop.permute.xlu2 %785 }
 0x551   :  { %v790_v42 = vmul.f32 %v786_v25, %v777_v15 }
 0x55a   :  { %v930_v39 = vpop.permute.xlu1 %929 }
 0x55b   :  { %935 = vst.msk [vmem:[#allocation7] sm:$0xff] %vm349_vm1, %v930_v39 }
 0x55c   :  { %951 = vst.msk [vmem:[#allocation4 + $0x60] sm:$0xff] %vm349_vm1, %v930_v39 }
 0x562   :  { %v804_v53 = vpop.permute.xlu1 %803  ;;  %v1000_v40 = vld [vmem:[#allocation7] sm:$0xff] }
 0x563   :  { %v6837_v23 = vadd.f32 %v804_v53, %v789_v22  ;;  %5592 = vmatmul.msk.f32.vlgmr.msra.gmra.mxu3 %vm349_vm1, %v1000_v40 }
 0x565   :  { %5851 = vtanh.f32 %v6837_v23 }
 0x56a   :  { %v806_v44 = vpop.permute.xlu0 %805 }
 0x56b   :  { %v5852_v46 = vpop.eup %5851  ;;  %v6841_v24 = vadd.f32 %v806_v44, %v790_v42  ;;  %5593 = vmatmul.msk.f32.gmra.mxu3 %vm349_vm1, %v1001_v45 }
 0x56c   :  { %815 = vrot.lane.b32.xlu1 %v5852_v46, %s6440_s4 }
 0x56d   :  { %5853 = vtanh.f32 %v6841_v24 }
 0x573   :  { %v5854_v47 = vpop.eup %5853 }
 0x574   :  { %817 = vrot.lane.b32.xlu2 %v5854_v47, %s6440_s4 }
 0x57c   :  { %939 = vrot.lane.b32.xlu2 %v6814_v19, %s6441_s2  ;;  %v303_v19 = vadd.f32 %v6675_v38, %v6687_v43 }
 0x5ce   :  { %v818_v48 = vpop.permute.xlu2 %817 }
 0x5cf   :  { %v822_v49 = vmul.f32 %v818_v48, %v777_v15 }
 0x5d1   :  { %911 = vrot.lane.b32.xlu1 %v822_v49, %s6439_s24 }
 0x5d6   :  { %v940_v50 = vpop.permute.xlu2 %939 }
 0x5d7   :  { %945 = vst.msk [vmem:[#allocation8] sm:$0xff] %vm349_vm1, %v940_v50 }
 0x5de   :  { %v816_v1 = vpop.permute.xlu1 %815  ;;  %v1121_v59 = vld [vmem:[#allocation8] sm:$0xff] }
 0x5df   :  { %v821_v51 = vmul.f32 %v816_v1, %v762_v7 }
 0x5e1   :  { %909 = vrot.lane.b32.xlu0 %v821_v51, %s6439_s24 }
 0x5e6   :  { %v1029_v54 = vpop.f32.mrf.mxu3 }
 0x5e7   :  { %v1035_v55 = vadd.f32 %v1029_v54, %v300_v52 }
 0x5e9   :  { %5855 = vtanh.f32 %v1035_v55  ;;  %941 = vrot.lane.b32.xlu0 %v6808_v12, %s6441_s2  ;;  %v5596_v12 = vmul.f32 -1.442695, %v1035_v55 }
 0x5ee   :  { %v1032_v17 = vpop.f32.mrf.mxu3 }
 0x5ef   :  { %v5856_v56 = vpop.eup %5855  ;;  %v1036_v57 = vadd.f32 %v1032_v17, %v303_v19  ;;  %v216_v17 = vpop.f32.mrf.mxu0 }
 0x5f0   :  { %1175 = vrot.lane.b32.xlu1 %v5856_v56, %s6440_s4 }
 0x5f1   :  { %5857 = vtanh.f32 %v1036_v57  ;;  %1165 = vrot.lane.b32.xlu0 %v1121_v59, %s6439_s24  ;;  %v5597_v36 = vmul.f32 -1.442695, %v1036_v57  ;;  %v217_v57 = vadd.f32 %v216_v17, %v6732_v37  ;;  %v1303_v17 = vld [vmem:[#allocation13 + $0x18] sm:$0xff] }
 0x5f2   :  { %1322 = vmatpush.msrb.mxu3 %v1303_v17 }
 0x5f3   :  { %5859 = vpow2.f32 %v5597_v36 }
 0x5f7   :  { %v5858_v41 = vpop.eup %5857 }
 0x5f8   :  { %1177 = vrot.lane.b32.xlu2 %v5858_v41, %s6440_s4 }
 0x5f9   :  { %v5860_v60 = vpop.eup %5859 }
 0x5fa   :  { %v1130_v61 = vadd.f32 1.0, %v5860_v60  ;;  %v219_v60 = vpop.f32.mrf.mxu0 }
 0x5fc   :  { %5861 = vrcp.f32 %v1130_v61  ;;  %v1157_v2 = vand.u32 2147483648, %v1130_v61  ;;  %vm1151_vm5 = vweird.f32 %v1130_v61  ;;  %v1155_v9 = vand.u32 2147483647, %v1130_v61 }
 0x5fd   :  { %5863 = vpow2.f32 %v5596_v12 }
 0x5fe   :  { %v1158_v11 = vor.u32 1.1754944e-38, %v1157_v2  ;;  %vm1156_vm7 = vcmp.eq.f32.partialorder %v1155_v9, 8.507059e+37 }
 0x602   :  { %v5862_v38 = vpop.eup %5861 }
 0x603   :  { %v5864_v62 = vpop.eup %5863  ;;  %v1147_v63 = vmul.f32 %v5862_v38, %v1130_v61  ;;  %vm1152_vm4 = vweird.f32 %v5862_v38  ;;  %v220_v61 = vadd.f32 %v219_v60, %v6732_v37 }
 0x604   :  { %v1129_v0 = vadd.f32 1.0, %v5864_v62  ;;  %vm1153_vm6 = vmor %vm1151_vm5, %vm1152_vm4 }
 0x605   :  { %v1148_v5 = vsub.f32 1.0, %v1147_v63 }
 0x606   :  { %5865 = vrcp.f32 %v1129_v0  ;;  %v1142_v53 = vand.u32 2147483648, %v1129_v0  ;;  %vm1136_vm9 = vweird.f32 %v1129_v0  ;;  %v1140_v40 = vand.u32 2147483647, %v1129_v0 }
 0x607   :  { %v1149_v6 = vmul.f32 %v5862_v38, %v1148_v5 }
 0x608   :  { %v1143_v42 = vor.u32 1.1754944e-38, %v1142_v53  ;;  %vm1141_vm11 = vcmp.eq.f32.partialorder %v1140_v40, 8.507059e+37 }
 0x609   :  { %v1150_v7 = vadd.f32 %v5862_v38, %v1149_v6 }
 0x60b   :  { %v1154_v4 = vsel %vm1153_vm6, %v5862_v38, %v1150_v7 }
 0x60c   :  { %v5866_v8 = vpop.eup %5865  ;;  %v6863_v58 = vsel %vm1156_vm7, %v1158_v11, %v1154_v4 }
 0x60d   :  { %v1132_v10 = vmul.f32 %v5866_v8, %v1129_v0  ;;  %vm1137_vm8 = vweird.f32 %v5866_v8 }
 0x60e   :  { %vm1138_vm10 = vmor %vm1136_vm9, %vm1137_vm8 }
 0x60f   :  { %v1133_v18 = vsub.f32 1.0, %v1132_v10 }
 0x611   :  { %v1134_v20 = vmul.f32 %v5866_v8, %v1133_v18 }
 0x613   :  { %v1135_v22 = vadd.f32 %v5866_v8, %v1134_v20 }
 0x615   :  { %v1139_v25 = vsel %vm1138_vm10, %v5866_v8, %v1135_v22 }
 0x616   :  { %v6873_v44 = vsel %vm1141_vm11, %v1143_v42, %v1139_v25 }
 0x643   :  { %v912_v3 = vpop.permute.xlu1 %911 }
 0x644   :  { %916 = vst.msk [vmem:[#allocation5 + $0x8] sm:$0xff] %vm349_vm1, %v912_v3 }
 0x645   :  { %949 = vst.msk [vmem:[#allocation3 + $0x18] sm:$0xff] %vm349_vm1, %v912_v3 }
 0x64b   :  { %v959_v48 = vld [vmem:[#allocation5 + $0x8] sm:$0xff] }
 0x652   :  { %v1178_v14 = vpop.permute.xlu2 %1177 }
 0x653   :  { %v1182_v15 = vmul.f32 %v1178_v14, %v6863_v58  ;;  %v910_v16 = vpop.permute.xlu0 %909 }
 0x654   :  { %915 = vst.msk [vmem:[#allocation5] sm:$0xff] %vm349_vm1, %v910_v16 }
 0x655   :  { %948 = vst.msk [vmem:[#allocation3 + $0x10] sm:$0xff] %vm349_vm1, %v910_v16  ;;  %1187 = vrot.lane.b32.xlu0 %v1182_v15, %s6439_s24 }
 0x65b   :  { %v942_v39 = vpop.permute.xlu0 %941  ;;  %v958_v21 = vld [vmem:[#allocation5] sm:$0xff] }
 0x65c   :  { %946 = vst.msk [vmem:[#allocation8 + $0x8] sm:$0xff] %vm349_vm1, %v942_v39  ;;  %5590 = vmatmul.msk.f32.vlgmr.msra.gmra.mxu2 %vm349_vm1, %v958_v21 }
 0x65d   :  { %919 = vrot.lane.b32.xlu0 %v6837_v23, %s6441_s2 }
 0x662   :  { %v1176_v45 = vpop.permute.xlu1 %1175 }
 0x663   :  { %v1181_v46 = vmul.f32 %v1176_v45, %v6873_v44  ;;  %v1122_v47 = vld [vmem:[#allocation8 + $0x8] sm:$0xff]  ;;  %v1166_v23 = vpop.permute.xlu0 %1165 }
 0x664   :  { %1167 = vrot.lane.b32.xlu2 %v1122_v47, %s6439_s24  ;;  %5591 = vmatmul.msk.f32.gmra.mxu2 %vm349_vm1, %v959_v48  ;;  %v1171_v55 = vmul.f32 %v1166_v23, %v6873_v44 }
 0x665   :  { %1185 = vrot.lane.b32.xlu1 %v1181_v46, %s6439_s24 }
 0x6be   :  { %v1168_v49 = vpop.permute.xlu2 %1167 }
 0x6bf   :  { %v1172_v50 = vmul.f32 %v1168_v49, %v6863_v58 }
 0x6c7   :  { %v1188_v1 = vpop.permute.xlu0 %1187 }
 0x6c8   :  { %v6880_v51 = vadd.f32 %v1188_v1, %v1172_v50 }
 0x6ca   :  { %5867 = vtanh.f32 %v6880_v51 }
 0x6cf   :  { %v920_v52 = vpop.permute.xlu0 %919 }
 0x6d0   :  { %v5868_v54 = vpop.eup %5867  ;;  %925 = vst.msk [vmem:[#allocation6] sm:$0xff] %vm349_vm1, %v920_v52 }
 0x6d1   :  { %1199 = vrot.lane.b32.xlu2 %v5868_v54, %s6440_s4 }
 0x6d7   :  { %v1186_v19 = vpop.permute.xlu1 %1185  ;;  %v1037_v0 = vld [vmem:[#allocation6] sm:$0xff] }
 0x6d8   :  { %v6886_v56 = vadd.f32 %v1186_v19, %v1171_v55 }
 0x6da   :  { %5869 = vtanh.f32 %v6886_v56 }
 0x6df   :  { %v987_v59 = vpop.f32.mrf.mxu2 }
 0x6e0   :  { %v5870_v41 = vpop.eup %5869  ;;  %v993_v36 = vadd.f32 %v987_v59, %v217_v57  ;;  %v1302_v57 = vld [vmem:[#allocation13 + $0x10] sm:$0xff]  ;;  %v1301_v59 = vld [vmem:[#allocation13 + $0x8] sm:$0xff] }
 0x6e1   :  { %1197 = vrot.lane.b32.xlu1 %v5870_v41, %s6440_s4  ;;  %1323 = vmatpush.msrb.mxu3 %v1302_v57  ;;  %v1300_v41 = vld [vmem:[#allocation13] sm:$0xff] }
 0x6e2   :  { %5871 = vtanh.f32 %v993_v36  ;;  %v5594_v6 = vmul.f32 -1.442695, %v993_v36 }
 0x6e3   :  { %1324 = vmatpush.msrb.mxu3 %v1301_v59 }
 0x6e5   :  { %1325 = vmatpush.msrb.mxu3 %v1300_v41 }
 0x6e7   :  { %v990_v12 = vpop.f32.mrf.mxu2  ;;  %1614 = vmatpush.msra.mxu3 %v1303_v17 }
 0x6e8   :  { %v5872_v38 = vpop.eup %5871  ;;  %v994_v62 = vadd.f32 %v990_v12, %v220_v61 }
 0x6e9   :  { %1091 = vrot.lane.b32.xlu2 %v5872_v38, %s6440_s4  ;;  %921 = vrot.lane.b32.xlu1 %v6841_v24, %s6441_s2 }
 0x6ea   :  { %5873 = vtanh.f32 %v994_v62  ;;  %v5595_v7 = vmul.f32 -1.442695, %v994_v62  ;;  %1615 = vmatpush.msra.mxu3 %v1302_v57 }
 0x6eb   :  { %5875 = vpow2.f32 %v5594_v6 }
 0x6ec   :  { %5877 = vpow2.f32 %v5595_v7  ;;  %1616 = vmatpush.msra.mxu3 %v1301_v59 }
 0x6ee   :  { %1617 = vmatpush.msra.mxu3 %v1300_v41 }
 0x6f0   :  { %v5874_v63 = vpop.eup %5873 }
 0x6f1   :  { %1093 = vrot.lane.b32.xlu0 %v5874_v63, %s6440_s4  ;;  %v5876_v8 = vpop.eup %5875 }
 0x6f2   :  { %v1045_v2 = vadd.f32 1.0, %v5876_v8  ;;  %v5878_v24 = vpop.eup %5877 }
 0x6f3   :  { %v1046_v9 = vadd.f32 1.0, %v5878_v24 }
 0x6f4   :  { %5879 = vrcp.f32 %v1045_v2  ;;  %v1058_v21 = vand.u32 2147483648, %v1045_v2  ;;  %vm1052_vm13 = vweird.f32 %v1045_v2  ;;  %v1056_v22 = vand.u32 2147483647, %v1045_v2 }
 0x6f5   :  { %5881 = vrcp.f32 %v1046_v9  ;;  %v1073_v48 = vand.u32 2147483648, %v1046_v9  ;;  %vm1067_vm2 = vweird.f32 %v1046_v9  ;;  %v1071_v23 = vand.u32 2147483647, %v1046_v9 }
 0x6f6   :  { %v1059_v25 = vor.u32 1.1754944e-38, %v1058_v21  ;;  %vm1057_vm15 = vcmp.eq.f32.partialorder %v1056_v22, 8.507059e+37 }
 0x6f7   :  { %v1074_v50 = vor.u32 1.1754944e-38, %v1073_v48  ;;  %vm1072_vm4 = vcmp.eq.f32.partialorder %v1071_v23, 8.507059e+37 }
 0x6f9   :  { %1081 = vrot.lane.b32.xlu0 %v1037_v0, %s6439_s24 }
 0x6fa   :  { %v5880_v4 = vpop.eup %5879 }
 0x6fb   :  { %v1048_v10 = vmul.f32 %v5880_v4, %v1045_v2  ;;  %v5882_v14 = vpop.eup %5881  ;;  %vm1053_vm12 = vweird.f32 %v5880_v4 }
 0x6fc   :  { %v1063_v16 = vmul.f32 %v5882_v14, %v1046_v9  ;;  %vm1054_vm14 = vmor %vm1052_vm13, %vm1053_vm12  ;;  %vm1068_vm0 = vweird.f32 %v5882_v14 }
 0x6fd   :  { %v1049_v11 = vsub.f32 1.0, %v1048_v10  ;;  %vm1069_vm3 = vmor %vm1067_vm2, %vm1068_vm0 }
 0x6fe   :  { %v1064_v39 = vsub.f32 1.0, %v1063_v16 }
 0x6ff   :  { %v1050_v15 = vmul.f32 %v5880_v4, %v1049_v11  ;;  %v294_v11 = vadd.f32 %v6668_v34, %v6687_v43 }
 0x700   :  { %v1065_v40 = vmul.f32 %v5882_v14, %v1064_v39 }
 0x72b   :  { %v1200_v3 = vpop.permute.xlu2 %1199 }
 0x72c   :  { %v1204_v5 = vmul.f32 %v1200_v3, %v6863_v58  ;;  %v1051_v58 = vadd.f32 %v5880_v4, %v1050_v15 }
 0x72e   :  { %1229 = vrot.lane.b32.xlu2 %v1204_v5, %s6439_s24  ;;  %v1055_v53 = vsel %vm1054_vm14, %v5880_v4, %v1051_v58 }
 0x72f   :  { %v6901_v45 = vsel %vm1057_vm15, %v1059_v25, %v1055_v53  ;;  %v1261_v53 = vld [vmem:[#allocation11 + $0x18] sm:$0xff]  ;;  %v1258_v25 = vld [vmem:[#allocation11] sm:$0xff] }
 0x730   :  { %1280 = vmatpush.msrb.mxu2 %v1261_v53 }
 0x743   :  { %v1092_v42 = vpop.permute.xlu2 %1091 }
 0x744   :  { %v1097_v47 = vmul.f32 %v1092_v42, %v6901_v45 }
 0x753   :  { %v1198_v18 = vpop.permute.xlu1 %1197 }
 0x754   :  { %v1203_v20 = vmul.f32 %v1198_v18, %v6873_v44  ;;  %v1066_v44 = vadd.f32 %v5882_v14, %v1065_v40  ;;  %v1260_v40 = vld [vmem:[#allocation11 + $0x10] sm:$0xff] }
 0x755   :  { %1281 = vmatpush.msrb.mxu2 %v1260_v40 }
 0x756   :  { %1227 = vrot.lane.b32.xlu1 %v1203_v20, %s6439_s24  ;;  %v1070_v49 = vsel %vm1069_vm3, %v5882_v14, %v1066_v44 }
 0x757   :  { %v1075_v52 = vsel %vm1072_vm4, %v1074_v50, %v1070_v49 }
 0x75b   :  { %v922_v46 = vpop.permute.xlu1 %921 }
 0x75c   :  { %926 = vst.msk [vmem:[#allocation6 + $0x8] sm:$0xff] %vm349_vm1, %v922_v46 }
 0x75e   :  { %1101 = vrot.lane.b32.xlu1 %v1097_v47, %s6439_s24 }
 0x763   :  { %v1094_v1 = vpop.permute.xlu0 %1093  ;;  %v1038_v54 = vld [vmem:[#allocation6 + $0x8] sm:$0xff] }
 0x764   :  { %v1098_v55 = vmul.f32 %v1094_v1, %v1075_v52  ;;  %1083 = vrot.lane.b32.xlu2 %v1038_v54, %s6439_s24 }
 0x766   :  { %1103 = vrot.lane.b32.xlu0 %v1098_v55, %s6439_s24 }
 0x76b   :  { %v1082_v60 = vpop.permute.xlu0 %1081 }
 0x76c   :  { %v1087_v61 = vmul.f32 %v1082_v60, %v6901_v45 }
 0x788   :  { %v1230_v19 = vpop.permute.xlu2 %1229 }
 0x789   :  { %1234 = vst.msk [vmem:[#allocation7 + $0x8] sm:$0xff] %vm349_vm1, %v1230_v19 }
 0x78a   :  { %1250 = vst.msk [vmem:[#allocation4 + $0x58] sm:$0xff] %vm349_vm1, %v1230_v19 }
 0x790   :  { %v1299_v5 = vld [vmem:[#allocation7 + $0x8] sm:$0xff] }
 0x7be   :  { %v1084_v63 = vpop.permute.xlu2 %1083 }
 0x7bf   :  { %v1088_v0 = vmul.f32 %v1084_v63, %v1075_v52 }
 0x7c8   :  { %v1228_v36 = vpop.permute.xlu1 %1227 }
 0x7c9   :  { %1233 = vst.msk [vmem:[#allocation7] sm:$0xff] %vm349_vm1, %v1228_v36 }
 0x7ca   :  { %1249 = vst.msk [vmem:[#allocation4 + $0x50] sm:$0xff] %vm349_vm1, %v1228_v36 }
 0x7d0   :  { %v1102_v12 = vpop.permute.xlu1 %1101  ;;  %v1298_v38 = vld [vmem:[#allocation7] sm:$0xff] }
 0x7d1   :  { %v6913_v62 = vadd.f32 %v1102_v12, %v1087_v61  ;;  %5600 = vmatmul.msk.f32.vlgmr.msrb.gmra.mxu3 %vm349_vm1, %v1298_v38 }
 0x7d2   :  { %1906 = vmatpush.msrb.mxu3 %v1303_v17 }
 0x7d3   :  { %5883 = vtanh.f32 %v6913_v62 }
 0x7d4   :  { %1907 = vmatpush.msrb.mxu3 %v1302_v57 }
 0x7d6   :  { %1908 = vmatpush.msrb.mxu3 %v1301_v59 }
 0x7d8   :  { %v1104_v3 = vpop.permute.xlu0 %1103  ;;  %1909 = vmatpush.msrb.mxu3 %v1300_v41 }
 0x7d9   :  { %v5884_v6 = vpop.eup %5883  ;;  %v6917_v7 = vadd.f32 %v1104_v3, %v1088_v0  ;;  %5601 = vmatmul.msk.f32.gmra.mxu3 %vm349_vm1, %v1299_v5 }
 0x7da   :  { %1113 = vrot.lane.b32.xlu1 %v5884_v6, %s6440_s4 }
 0x7db   :  { %5885 = vtanh.f32 %v6917_v7 }
 0x7e1   :  { %v5886_v8 = vpop.eup %5885 }
 0x7e2   :  { %1115 = vrot.lane.b32.xlu2 %v5886_v8, %s6440_s4 }
 0x7ea   :  { %1237 = vrot.lane.b32.xlu2 %v6886_v56, %s6441_s2  ;;  %v297_v56 = vadd.f32 %v6670_v35, %v6687_v43  ;;  %v1259_v35 = vld [vmem:[#allocation11 + $0x8] sm:$0xff] }
 0x7eb   :  { %1282 = vmatpush.msrb.mxu2 %v1259_v35 }
 0x7ed   :  { %1283 = vmatpush.msrb.mxu2 %v1258_v25 }
 0x7ef   :  { %1575 = vmatpush.msra.mxu2 %v1261_v53 }
 0x7f1   :  { %1576 = vmatpush.msra.mxu2 %v1260_v40 }
 0x7f3   :  { %1577 = vmatpush.msra.mxu2 %v1259_v35 }
 0x7f5   :  { %1578 = vmatpush.msra.mxu2 %v1258_v25 }
 0x83c   :  { %v1116_v2 = vpop.permute.xlu2 %1115 }
 0x83d   :  { %v1120_v24 = vmul.f32 %v1116_v2, %v1075_v52 }
 0x83f   :  { %1209 = vrot.lane.b32.xlu1 %v1120_v24, %s6439_s24 }
 0x844   :  { %v1238_v9 = vpop.permute.xlu2 %1237 }
 0x845   :  { %1243 = vst.msk [vmem:[#allocation8] sm:$0xff] %vm349_vm1, %v1238_v9 }
 0x84c   :  { %v1114_v4 = vpop.permute.xlu1 %1113  ;;  %v1419_v20 = vld [vmem:[#allocation8] sm:$0xff] }
 0x84d   :  { %v1119_v10 = vmul.f32 %v1114_v4, %v6901_v45 }
 0x84f   :  { %1207 = vrot.lane.b32.xlu0 %v1119_v10, %s6439_s24 }
 0x854   :  { %v1327_v14 = vpop.f32.mrf.mxu3 }
 0x855   :  { %v1333_v15 = vadd.f32 %v1327_v14, %v294_v11 }
 0x857   :  { %5887 = vtanh.f32 %v1333_v15  ;;  %1239 = vrot.lane.b32.xlu0 %v6880_v51, %s6441_s2  ;;  %v5604_v51 = vmul.f32 -1.442695, %v1333_v15 }
 0x85c   :  { %v1330_v16 = vpop.f32.mrf.mxu3 }
 0x85d   :  { %v5888_v18 = vpop.eup %5887  ;;  %v1334_v58 = vadd.f32 %v1330_v16, %v297_v56 }
 0x85e   :  { %1473 = vrot.lane.b32.xlu1 %v5888_v18, %s6440_s4 }
 0x85f   :  { %5889 = vtanh.f32 %v1334_v58  ;;  %1463 = vrot.lane.b32.xlu0 %v1419_v20, %s6439_s24  ;;  %v5605_v34 = vmul.f32 -1.442695, %v1334_v58  ;;  %v222_v58 = vpop.f32.mrf.mxu0 }
 0x861   :  { %5891 = vpow2.f32 %v5605_v34 }
 0x865   :  { %v5890_v39 = vpop.eup %5889 }
 0x866   :  { %1475 = vrot.lane.b32.xlu2 %v5890_v39, %s6440_s4  ;;  %v223_v39 = vadd.f32 %v222_v58, %v6732_v37 }
 0x867   :  { %v5892_v21 = vpop.eup %5891 }
 0x868   :  { %v1428_v22 = vadd.f32 1.0, %v5892_v21 }
 0x86a   :  { %5893 = vrcp.f32 %v1428_v22  ;;  %v1455_v1 = vand.u32 2147483648, %v1428_v22  ;;  %vm1449_vm6 = vweird.f32 %v1428_v22  ;;  %v1453_v52 = vand.u32 2147483647, %v1428_v22 }
 0x86b   :  { %5895 = vpow2.f32 %v5604_v51  ;;  %v225_v51 = vpop.f32.mrf.mxu0 }
 0x86c   :  { %v1456_v19 = vor.u32 1.1754944e-38, %v1455_v1  ;;  %vm1454_vm8 = vcmp.eq.f32.partialorder %v1453_v52, 8.507059e+37 }
 0x870   :  { %v5894_v42 = vpop.eup %5893 }
 0x871   :  { %v5896_v45 = vpop.eup %5895  ;;  %v1445_v46 = vmul.f32 %v5894_v42, %v1428_v22  ;;  %vm1450_vm5 = vweird.f32 %v5894_v42 }
 0x872   :  { %v1427_v47 = vadd.f32 1.0, %v5896_v45  ;;  %vm1451_vm7 = vmor %vm1449_vm6, %vm1450_vm5 }
 0x873   :  { %v1446_v48 = vsub.f32 1.0, %v1445_v46 }
 0x874   :  { %5897 = vrcp.f32 %v1427_v47  ;;  %v1440_v63 = vand.u32 2147483648, %v1427_v47  ;;  %vm1434_vm10 = vweird.f32 %v1427_v47  ;;  %v1438_v0 = vand.u32 2147483647, %v1427_v47 }
 0x875   :  { %v1447_v23 = vmul.f32 %v5894_v42, %v1446_v48 }
 0x876   :  { %v1441_v5 = vor.u32 1.1754944e-38, %v1440_v63  ;;  %vm1439_vm12 = vcmp.eq.f32.partialorder %v1438_v0, 8.507059e+37 }
 0x877   :  { %v1448_v49 = vadd.f32 %v5894_v42, %v1447_v23 }
 0x879   :  { %v1452_v54 = vsel %vm1451_vm7, %v5894_v42, %v1448_v49 }
 0x87a   :  { %v5898_v50 = vpop.eup %5897  ;;  %v6940_v57 = vsel %vm1454_vm8, %v1456_v19, %v1452_v54 }
 0x87b   :  { %v1430_v55 = vmul.f32 %v5898_v50, %v1427_v47  ;;  %vm1435_vm9 = vweird.f32 %v5898_v50 }
 0x87c   :  { %vm1436_vm11 = vmor %vm1434_vm10, %vm1435_vm9 }
 0x87d   :  { %v1431_v36 = vsub.f32 1.0, %v1430_v55 }
 0x87f   :  { %v1432_v60 = vmul.f32 %v5898_v50, %v1431_v36 }
 0x881   :  { %v1433_v38 = vadd.f32 %v5898_v50, %v1432_v60 }
 0x883   :  { %v1437_v3 = vsel %vm1436_vm11, %v5898_v50, %v1433_v38 }
 0x884   :  { %v6950_v6 = vsel %vm1439_vm12, %v1441_v5, %v1437_v3 }
 0x8b1   :  { %v1210_v44 = vpop.permute.xlu1 %1209 }
 0x8b2   :  { %1214 = vst.msk [vmem:[#allocation5 + $0x8] sm:$0xff] %vm349_vm1, %v1210_v44 }
 0x8b3   :  { %1247 = vst.msk [vmem:[#allocation3 + $0x28] sm:$0xff] %vm349_vm1, %v1210_v44 }
 0x8b9   :  { %v1257_v9 = vld [vmem:[#allocation5 + $0x8] sm:$0xff] }
 0x8c0   :  { %v1476_v17 = vpop.permute.xlu2 %1475 }
 0x8c1   :  { %v1480_v59 = vmul.f32 %v1476_v17, %v6940_v57  ;;  %v1208_v41 = vpop.permute.xlu0 %1207 }
 0x8c2   :  { %1213 = vst.msk [vmem:[#allocation5] sm:$0xff] %vm349_vm1, %v1208_v41 }
 0x8c3   :  { %1246 = vst.msk [vmem:[#allocation3 + $0x20] sm:$0xff] %vm349_vm1, %v1208_v41  ;;  %1485 = vrot.lane.b32.xlu0 %v1480_v59, %s6439_s24 }
 0x8c9   :  { %v1240_v61 = vpop.permute.xlu0 %1239  ;;  %v1256_v12 = vld [vmem:[#allocation5] sm:$0xff] }
 0x8ca   :  { %1244 = vst.msk [vmem:[#allocation8 + $0x8] sm:$0xff] %vm349_vm1, %v1240_v61  ;;  %5598 = vmatmul.msk.f32.vlgmr.msrb.gmra.mxu2 %vm349_vm1, %v1256_v12 }
 0x8cb   :  { %1217 = vrot.lane.b32.xlu0 %v6913_v62, %s6441_s2  ;;  %1867 = vmatpush.msrb.mxu2 %v1261_v53  ;;  %v226_v53 = vadd.f32 %v225_v51, %v6732_v37 }
 0x8cd   :  { %1868 = vmatpush.msrb.mxu2 %v1260_v40 }
 0x8cf   :  { %1869 = vmatpush.msrb.mxu2 %v1259_v35 }
 0x8d0   :  { %v1474_v8 = vpop.permute.xlu1 %1473 }
 0x8d1   :  { %v1479_v2 = vmul.f32 %v1474_v8, %v6950_v6  ;;  %v1420_v24 = vld [vmem:[#allocation8 + $0x8] sm:$0xff]  ;;  %1870 = vmatpush.msrb.mxu2 %v1258_v25  ;;  %v1464_v62 = vpop.permute.xlu0 %1463 }
 0x8d2   :  { %1465 = vrot.lane.b32.xlu2 %v1420_v24, %s6439_s24  ;;  %5599 = vmatmul.msk.f32.gmra.mxu2 %vm349_vm1, %v1257_v9  ;;  %v1469_v16 = vmul.f32 %v1464_v62, %v6950_v6 }
 0x8d3   :  { %1483 = vrot.lane.b32.xlu1 %v1479_v2, %s6439_s24 }
 0x92c   :  { %v1466_v4 = vpop.permute.xlu2 %1465 }
 0x92d   :  { %v1470_v10 = vmul.f32 %v1466_v4, %v6940_v57 }
 0x935   :  { %v1486_v11 = vpop.permute.xlu0 %1485 }
 0x936   :  { %v6957_v14 = vadd.f32 %v1486_v11, %v1470_v10 }
 0x938   :  { %5899 = vtanh.f32 %v6957_v14 }
 0x93d   :  { %v1218_v15 = vpop.permute.xlu0 %1217 }
 0x93e   :  { %v5900_v56 = vpop.eup %5899  ;;  %1223 = vst.msk [vmem:[#allocation6] sm:$0xff] %vm349_vm1, %v1218_v15 }
 0x93f   :  { %1497 = vrot.lane.b32.xlu2 %v5900_v56, %s6440_s4 }
 0x945   :  { %v1484_v18 = vpop.permute.xlu1 %1483  ;;  %v1335_v45 = vld [vmem:[#allocation6] sm:$0xff] }
 0x946   :  { %v6963_v20 = vadd.f32 %v1484_v18, %v1469_v16 }
 0x948   :  { %5901 = vtanh.f32 %v6963_v20 }
 0x94d   :  { %v1285_v34 = vpop.f32.mrf.mxu2 }
 0x94e   :  { %v5902_v21 = vpop.eup %5901  ;;  %v1291_v22 = vadd.f32 %v1285_v34, %v223_v39 }
 0x94f   :  { %1495 = vrot.lane.b32.xlu1 %v5902_v21, %s6440_s4 }
 0x950   :  { %5903 = vtanh.f32 %v1291_v22  ;;  %v5602_v44 = vmul.f32 -1.442695, %v1291_v22 }
 0x955   :  { %v1288_v40 = vpop.f32.mrf.mxu2 }
 0x956   :  { %v5904_v35 = vpop.eup %5903  ;;  %v1292_v25 = vadd.f32 %v1288_v40, %v226_v53 }
 0x957   :  { %1389 = vrot.lane.b32.xlu2 %v5904_v35, %s6440_s4  ;;  %1219 = vrot.lane.b32.xlu1 %v6917_v7, %s6441_s2 }
 0x958   :  { %5905 = vtanh.f32 %v1292_v25  ;;  %v5603_v48 = vmul.f32 -1.442695, %v1292_v25 }
 0x959   :  { %5907 = vpow2.f32 %v5602_v44 }
 0x95a   :  { %5909 = vpow2.f32 %v5603_v48 }
 0x95e   :  { %v5906_v42 = vpop.eup %5905 }
 0x95f   :  { %1391 = vrot.lane.b32.xlu0 %v5906_v42, %s6440_s4  ;;  %v5908_v23 = vpop.eup %5907 }
 0x960   :  { %v1343_v49 = vadd.f32 1.0, %v5908_v23  ;;  %v5910_v7 = vpop.eup %5909  ;;  %v288_v23 = vadd.f32 %v6664_v32, %v6687_v43 }
 0x961   :  { %v1344_v50 = vadd.f32 1.0, %v5910_v7 }
 0x962   :  { %5911 = vrcp.f32 %v1343_v49  ;;  %v1356_v60 = vand.u32 2147483648, %v1343_v49  ;;  %vm1350_vm14 = vweird.f32 %v1343_v49  ;;  %v1354_v61 = vand.u32 2147483647, %v1343_v49 }
 0x963   :  { %5913 = vrcp.f32 %v1344_v50  ;;  %vm1365_vm3 = vweird.f32 %v1344_v50  ;;  %v1369_v24 = vand.u32 2147483647, %v1344_v50 }
 0x964   :  { %v1357_v63 = vor.u32 1.1754944e-38, %v1356_v60  ;;  %vm1355_vm0 = vcmp.eq.f32.partialorder %v1354_v61, 8.507059e+37 }
 0x965   :  { %vm1370_vm5 = vcmp.eq.f32.partialorder %v1369_v24, 8.507059e+37 }
 0x967   :  { %1379 = vrot.lane.b32.xlu0 %v1335_v45, %s6439_s24 }
 0x968   :  { %v5912_v1 = vpop.eup %5911 }
 0x969   :  { %v1346_v52 = vmul.f32 %v5912_v1, %v1343_v49  ;;  %v5914_v55 = vpop.eup %5913  ;;  %vm1351_vm13 = vweird.f32 %v5912_v1 }
 0x96a   :  { %v1361_v17 = vmul.f32 %v5914_v55, %v1344_v50  ;;  %vm1352_vm15 = vmor %vm1350_vm14, %vm1351_vm13  ;;  %vm1366_vm2 = vweird.f32 %v5914_v55 }
 0x96b   :  { %v1347_v54 = vsub.f32 1.0, %v1346_v52  ;;  %vm1367_vm4 = vmor %vm1365_vm3, %vm1366_vm2 }
 0x96c   :  { %v1362_v36 = vsub.f32 1.0, %v1361_v17 }
 0x96d   :  { %v1348_v19 = vmul.f32 %v5912_v1, %v1347_v54 }
 0x96e   :  { %v1363_v38 = vmul.f32 %v5914_v55, %v1362_v36 }
 0x970   :  { %v1364_v2 = vadd.f32 %v5914_v55, %v1363_v38 }
 0x972   :  { %v1368_v9 = vsel %vm1367_vm4, %v5914_v55, %v1364_v2 }
 0x999   :  { %v1498_v46 = vpop.permute.xlu2 %1497 }
 0x99a   :  { %v1502_v47 = vmul.f32 %v1498_v46, %v6940_v57  ;;  %v1349_v57 = vadd.f32 %v5912_v1, %v1348_v19 }
 0x99c   :  { %1527 = vrot.lane.b32.xlu2 %v1502_v47, %s6439_s24  ;;  %v1353_v12 = vsel %vm1352_vm15, %v5912_v1, %v1349_v57 }
 0x99d   :  { %v1358_v3 = vsel %vm1355_vm0, %v1357_v63, %v1353_v12 }
 0x9b1   :  { %v1390_v0 = vpop.permute.xlu2 %1389 }
 0x9b2   :  { %v1395_v8 = vmul.f32 %v1390_v0, %v1358_v3 }
 0x9c1   :  { %v1496_v59 = vpop.permute.xlu1 %1495 }
 0x9c2   :  { %v1501_v41 = vmul.f32 %v1496_v59, %v6950_v6  ;;  %v1371_v6 = vand.u32 2147483648, %v1344_v50 }
 0x9c4   :  { %1525 = vrot.lane.b32.xlu1 %v1501_v41, %s6439_s24  ;;  %v1372_v62 = vor.u32 1.1754944e-38, %v1371_v6 }
 0x9c6   :  { %v1373_v10 = vsel %vm1370_vm5, %v1372_v62, %v1368_v9 }
 0x9c9   :  { %v1220_v5 = vpop.permute.xlu1 %1219 }
 0x9ca   :  { %1224 = vst.msk [vmem:[#allocation6 + $0x8] sm:$0xff] %vm349_vm1, %v1220_v5 }
 0x9cc   :  { %1399 = vrot.lane.b32.xlu1 %v1395_v8, %s6439_s24 }
 0x9d1   :  { %v1392_v4 = vpop.permute.xlu0 %1391  ;;  %v1336_v11 = vld [vmem:[#allocation6 + $0x8] sm:$0xff] }
 0x9d2   :  { %v1396_v15 = vmul.f32 %v1392_v4, %v1373_v10  ;;  %1381 = vrot.lane.b32.xlu2 %v1336_v11, %s6439_s24 }
 0x9d4   :  { %1401 = vrot.lane.b32.xlu0 %v1396_v15, %s6439_s24 }
 0x9d9   :  { %v1380_v18 = vpop.permute.xlu0 %1379 }
 0x9da   :  { %v1385_v58 = vmul.f32 %v1380_v18, %v1358_v3 }
 0x9f6   :  { %v1528_v56 = vpop.permute.xlu2 %1527 }
 0x9f7   :  { %1532 = vst.msk [vmem:[#allocation7 + $0x8] sm:$0xff] %vm349_vm1, %v1528_v56 }
 0x9f8   :  { %1548 = vst.msk [vmem:[#allocation4 + $0x48] sm:$0xff] %vm349_vm1, %v1528_v56 }
 0x9fe   :  { %v1591_v40 = vld [vmem:[#allocation7 + $0x8] sm:$0xff] }
 0xa2c   :  { %v1382_v22 = vpop.permute.xlu2 %1381 }
 0xa2d   :  { %v1386_v51 = vmul.f32 %v1382_v22, %v1373_v10 }
 0xa36   :  { %v1526_v16 = vpop.permute.xlu1 %1525 }
 0xa37   :  { %1531 = vst.msk [vmem:[#allocation7] sm:$0xff] %vm349_vm1, %v1526_v16 }
 0xa38   :  { %1547 = vst.msk [vmem:[#allocation4 + $0x40] sm:$0xff] %vm349_vm1, %v1526_v16 }
 0xa3e   :  { %v1400_v39 = vpop.permute.xlu1 %1399  ;;  %v1590_v34 = vld [vmem:[#allocation7] sm:$0xff] }
 0xa3f   :  { %v6986_v21 = vadd.f32 %v1400_v39, %v1385_v58  ;;  %5608 = vmatmul.msk.f32.vlgmr.msra.gmra.mxu3 %vm349_vm1, %v1590_v34 }
 0xa41   :  { %5915 = vtanh.f32 %v6986_v21 }
 0xa46   :  { %v1402_v53 = vpop.permute.xlu0 %1401 }
 0xa47   :  { %v5916_v35 = vpop.eup %5915  ;;  %v6990_v25 = vadd.f32 %v1402_v53, %v1386_v51  ;;  %5609 = vmatmul.msk.f32.gmra.mxu3 %vm349_vm1, %v1591_v40 }
 0xa48   :  { %1411 = vrot.lane.b32.xlu1 %v5916_v35, %s6440_s4 }
 0xa49   :  { %5917 = vtanh.f32 %v6990_v25 }
 0xa4f   :  { %v5918_v42 = vpop.eup %5917 }
 0xa50   :  { %1413 = vrot.lane.b32.xlu2 %v5918_v42, %s6440_s4 }
 0xa58   :  { %1535 = vrot.lane.b32.xlu2 %v6963_v20, %s6441_s2  ;;  %v291_v20 = vadd.f32 %v6666_v33, %v6687_v43 }
 0xaaa   :  { %v1414_v45 = vpop.permute.xlu2 %1413 }
 0xaab   :  { %v1418_v46 = vmul.f32 %v1414_v45, %v1373_v10 }
 0xaad   :  { %1507 = vrot.lane.b32.xlu1 %v1418_v46, %s6439_s24 }
 0xab2   :  { %v1536_v47 = vpop.permute.xlu2 %1535 }
 0xab3   :  { %1541 = vst.msk [vmem:[#allocation8] sm:$0xff] %vm349_vm1, %v1536_v47 }
 0xaba   :  { %v1412_v44 = vpop.permute.xlu1 %1411  ;;  %v1711_v54 = vld [vmem:[#allocation8] sm:$0xff] }
 0xabb   :  { %v1417_v48 = vmul.f32 %v1412_v44, %v1358_v3 }
 0xabd   :  { %1505 = vrot.lane.b32.xlu0 %v1417_v48, %s6439_s24 }
 0xac2   :  { %v1619_v49 = vpop.f32.mrf.mxu3 }
 0xac3   :  { %v1625_v7 = vadd.f32 %v1619_v49, %v288_v23  ;;  %v228_v23 = vpop.f32.mrf.mxu0 }
 0xac5   :  { %5919 = vtanh.f32 %v1625_v7  ;;  %1537 = vrot.lane.b32.xlu0 %v6957_v14, %s6441_s2  ;;  %v5612_v14 = vmul.f32 -1.442695, %v1625_v7  ;;  %v229_v7 = vadd.f32 %v228_v23, %v6732_v37 }
 0xaca   :  { %v1622_v50 = vpop.f32.mrf.mxu3 }
 0xacb   :  { %v5920_v1 = vpop.eup %5919  ;;  %v1626_v52 = vadd.f32 %v1622_v50, %v291_v20 }
 0xacc   :  { %1765 = vrot.lane.b32.xlu1 %v5920_v1, %s6440_s4 }
 0xacd   :  { %5921 = vtanh.f32 %v1626_v52  ;;  %1755 = vrot.lane.b32.xlu0 %v1711_v54, %s6439_s24  ;;  %v5613_v32 = vmul.f32 -1.442695, %v1626_v52  ;;  %v231_v52 = vpop.f32.mrf.mxu0 }
 0xace   :  { %v232_v54 = vadd.f32 %v231_v52, %v6732_v37 }
 0xacf   :  { %5923 = vpow2.f32 %v5613_v32 }
 0xad3   :  { %v5922_v55 = vpop.eup %5921 }
 0xad4   :  { %1767 = vrot.lane.b32.xlu2 %v5922_v55, %s6440_s4 }
 0xad5   :  { %v5924_v19 = vpop.eup %5923 }
 0xad6   :  { %v1720_v17 = vadd.f32 1.0, %v5924_v19 }
 0xad8   :  { %5925 = vrcp.f32 %v1720_v17  ;;  %v1747_v63 = vand.u32 2147483648, %v1720_v17  ;;  %vm1741_vm7 = vweird.f32 %v1720_v17  ;;  %v1745_v0 = vand.u32 2147483647, %v1720_v17 }
 0xad9   :  { %5927 = vpow2.f32 %v5612_v14 }
 0xada   :  { %v1748_v8 = vor.u32 1.1754944e-38, %v1747_v63  ;;  %vm1746_vm9 = vcmp.eq.f32.partialorder %v1745_v0, 8.507059e+37 }
 0xade   :  { %v5926_v33 = vpop.eup %5925 }
 0xadf   :  { %v5928_v59 = vpop.eup %5927  ;;  %v1737_v57 = vmul.f32 %v5926_v33, %v1720_v17  ;;  %vm1742_vm6 = vweird.f32 %v5926_v33 }
 0xae0   :  { %v1719_v41 = vadd.f32 1.0, %v5928_v59  ;;  %vm1743_vm8 = vmor %vm1741_vm7, %vm1742_vm6 }
 0xae1   :  { %v1738_v60 = vsub.f32 1.0, %v1737_v57 }
 0xae2   :  { %5929 = vrcp.f32 %v1719_v41  ;;  %v1732_v56 = vand.u32 2147483648, %v1719_v41  ;;  %vm1726_vm11 = vweird.f32 %v1719_v41  ;;  %v1730_v16 = vand.u32 2147483647, %v1719_v41 }
 0xae3   :  { %v1739_v61 = vmul.f32 %v5926_v33, %v1738_v60 }
 0xae4   :  { %v1733_v58 = vor.u32 1.1754944e-38, %v1732_v56  ;;  %vm1731_vm13 = vcmp.eq.f32.partialorder %v1730_v16, 8.507059e+37 }
 0xae5   :  { %v1740_v12 = vadd.f32 %v5926_v33, %v1739_v61 }
 0xae7   :  { %v1744_v3 = vsel %vm1743_vm8, %v5926_v33, %v1740_v12 }
 0xae8   :  { %v5930_v38 = vpop.eup %5929  ;;  %v7012_v6 = vsel %vm1746_vm9, %v1748_v8, %v1744_v3 }
 0xae9   :  { %v1722_v5 = vmul.f32 %v5930_v38, %v1719_v41  ;;  %vm1727_vm10 = vweird.f32 %v5930_v38 }
 0xaea   :  { %vm1728_vm12 = vmor %vm1726_vm11, %vm1727_vm10 }
 0xaeb   :  { %v1723_v62 = vsub.f32 1.0, %v1722_v5 }
 0xaed   :  { %v1724_v4 = vmul.f32 %v5930_v38, %v1723_v62 }
 0xaef   :  { %v1725_v15 = vadd.f32 %v5930_v38, %v1724_v4 }
 0xaf1   :  { %v1729_v18 = vsel %vm1728_vm12, %v5930_v38, %v1725_v15 }
 0xaf2   :  { %v7022_v39 = vsel %vm1731_vm13, %v1733_v58, %v1729_v18 }
 0xb1f   :  { %v1508_v36 = vpop.permute.xlu1 %1507 }
 0xb20   :  { %1512 = vst.msk [vmem:[#allocation5 + $0x8] sm:$0xff] %vm349_vm1, %v1508_v36 }
 0xb21   :  { %1545 = vst.msk [vmem:[#allocation3 + $0x38] sm:$0xff] %vm349_vm1, %v1508_v36 }
 0xb27   :  { %v1552_v53 = vld [vmem:[#allocation5 + $0x8] sm:$0xff] }
 0xb2e   :  { %v1768_v2 = vpop.permute.xlu2 %1767 }
 0xb2f   :  { %v1772_v24 = vmul.f32 %v1768_v2, %v7012_v6  ;;  %v1506_v9 = vpop.permute.xlu0 %1505 }
 0xb30   :  { %1511 = vst.msk [vmem:[#allocation5] sm:$0xff] %vm349_vm1, %v1506_v9 }
 0xb31   :  { %1544 = vst.msk [vmem:[#allocation3 + $0x30] sm:$0xff] %vm349_vm1, %v1506_v9  ;;  %1777 = vrot.lane.b32.xlu0 %v1772_v24, %s6439_s24 }
 0xb37   :  { %v1538_v10 = vpop.permute.xlu0 %1537  ;;  %v1551_v11 = vld [vmem:[#allocation5] sm:$0xff] }
 0xb38   :  { %1542 = vst.msk [vmem:[#allocation8 + $0x8] sm:$0xff] %vm349_vm1, %v1538_v10  ;;  %5606 = vmatmul.msk.f32.vlgmr.msra.gmra.mxu2 %vm349_vm1, %v1551_v11 }
 0xb39   :  { %1515 = vrot.lane.b32.xlu0 %v6986_v21, %s6441_s2 }
 0xb3e   :  { %v1766_v34 = vpop.permute.xlu1 %1765 }
 0xb3f   :  { %v1771_v22 = vmul.f32 %v1766_v34, %v7022_v39  ;;  %v1712_v51 = vld [vmem:[#allocation8 + $0x8] sm:$0xff]  ;;  %v1756_v21 = vpop.permute.xlu0 %1755 }
 0xb40   :  { %1757 = vrot.lane.b32.xlu2 %v1712_v51, %s6439_s24  ;;  %5607 = vmatmul.msk.f32.gmra.mxu2 %vm349_vm1, %v1552_v53  ;;  %v1761_v44 = vmul.f32 %v1756_v21, %v7022_v39 }
 0xb41   :  { %1775 = vrot.lane.b32.xlu1 %v1771_v22, %s6439_s24 }
 0xb9a   :  { %v1758_v40 = vpop.permute.xlu2 %1757 }
 0xb9b   :  { %v1762_v35 = vmul.f32 %v1758_v40, %v7012_v6 }
 0xba3   :  { %v1778_v42 = vpop.permute.xlu0 %1777 }
 0xba4   :  { %v7029_v45 = vadd.f32 %v1778_v42, %v1762_v35 }
 0xba6   :  { %5931 = vtanh.f32 %v7029_v45 }
 0xbab   :  { %v1516_v46 = vpop.permute.xlu0 %1515 }
 0xbac   :  { %v5932_v47 = vpop.eup %5931  ;;  %1521 = vst.msk [vmem:[#allocation6] sm:$0xff] %vm349_vm1, %v1516_v46 }
 0xbad   :  { %1789 = vrot.lane.b32.xlu2 %v5932_v47, %s6440_s4 }
 0xbb3   :  { %v1776_v48 = vpop.permute.xlu1 %1775  ;;  %v1627_v14 = vld [vmem:[#allocation6] sm:$0xff] }
 0xbb4   :  { %v7035_v49 = vadd.f32 %v1776_v48, %v1761_v44 }
 0xbb6   :  { %5933 = vtanh.f32 %v7035_v49 }
 0xbbb   :  { %v1580_v20 = vpop.f32.mrf.mxu2 }
 0xbbc   :  { %v5934_v50 = vpop.eup %5933  ;;  %v1586_v1 = vadd.f32 %v1580_v20, %v229_v7 }
 0xbbd   :  { %1787 = vrot.lane.b32.xlu1 %v5934_v50, %s6440_s4 }
 0xbbe   :  { %5935 = vtanh.f32 %v1586_v1  ;;  %v5610_v57 = vmul.f32 -1.442695, %v1586_v1 }
 0xbc3   :  { %v1583_v55 = vpop.f32.mrf.mxu2 }
 0xbc4   :  { %v5936_v32 = vpop.eup %5935  ;;  %v1587_v19 = vadd.f32 %v1583_v55, %v232_v54 }
 0xbc5   :  { %1681 = vrot.lane.b32.xlu2 %v5936_v32, %s6440_s4  ;;  %1517 = vrot.lane.b32.xlu1 %v6990_v25, %s6441_s2 }
 0xbc6   :  { %5937 = vtanh.f32 %v1587_v19  ;;  %v5611_v41 = vmul.f32 -1.442695, %v1587_v19 }
 0xbc7   :  { %5939 = vpow2.f32 %v5610_v57  ;;  %v282_v57 = vadd.f32 %v6660_v30, %v6687_v43 }
 0xbc8   :  { %5941 = vpow2.f32 %v5611_v41 }
 0xbcc   :  { %v5938_v17 = vpop.eup %5937 }
 0xbcd   :  { %1683 = vrot.lane.b32.xlu0 %v5938_v17, %s6440_s4  ;;  %v5940_v36 = vpop.eup %5939 }
 0xbce   :  { %v1635_v60 = vadd.f32 1.0, %v5940_v36  ;;  %v5942_v25 = vpop.eup %5941 }
 0xbcf   :  { %v1636_v61 = vadd.f32 1.0, %v5942_v25 }
 0xbd0   :  { %5943 = vrcp.f32 %v1635_v60  ;;  %v1648_v9 = vand.u32 2147483648, %v1635_v60  ;;  %vm1642_vm15 = vweird.f32 %v1635_v60  ;;  %v1646_v62 = vand.u32 2147483647, %v1635_v60 }
 0xbd1   :  { %5945 = vrcp.f32 %v1636_v61  ;;  %vm1657_vm4 = vweird.f32 %v1636_v61  ;;  %v1661_v34 = vand.u32 2147483647, %v1636_v61 }
 0xbd2   :  { %v1649_v11 = vor.u32 1.1754944e-38, %v1648_v9  ;;  %vm1647_vm2 = vcmp.eq.f32.partialorder %v1646_v62, 8.507059e+37 }
 0xbd3   :  { %vm1662_vm6 = vcmp.eq.f32.partialorder %v1661_v34, 8.507059e+37 }
 0xbd5   :  { %1671 = vrot.lane.b32.xlu0 %v1627_v14, %s6439_s24 }
 0xbd6   :  { %v5944_v12 = vpop.eup %5943 }
 0xbd7   :  { %v1638_v38 = vmul.f32 %v5944_v12, %v1635_v60  ;;  %v5946_v0 = vpop.eup %5945  ;;  %vm1643_vm14 = vweird.f32 %v5944_v12 }
 0xbd8   :  { %v1653_v5 = vmul.f32 %v5946_v0, %v1636_v61  ;;  %vm1644_vm0 = vmor %vm1642_vm15, %vm1643_vm14  ;;  %vm1658_vm3 = vweird.f32 %v5946_v0 }
 0xbd9   :  { %v1639_v63 = vsub.f32 1.0, %v1638_v38  ;;  %vm1659_vm5 = vmor %vm1657_vm4, %vm1658_vm3 }
 0xbda   :  { %v1654_v24 = vsub.f32 1.0, %v1653_v5 }
 0xbdb   :  { %v1640_v3 = vmul.f32 %v5944_v12, %v1639_v63 }
 0xbdc   :  { %v1655_v10 = vmul.f32 %v5946_v0, %v1654_v24 }
 0xbdd   :  { %v1641_v2 = vadd.f32 %v5944_v12, %v1640_v3 }
 0xbde   :  { %v1656_v58 = vadd.f32 %v5946_v0, %v1655_v10 }
 0xbdf   :  { %v1645_v4 = vsel %vm1644_vm0, %v5944_v12, %v1641_v2 }
 0xbe0   :  { %v1650_v56 = vsel %vm1647_vm2, %v1649_v11, %v1645_v4  ;;  %v1660_v22 = vsel %vm1659_vm5, %v5946_v0, %v1656_v58 }
 0xc07   :  { %v1790_v33 = vpop.permute.xlu2 %1789 }
 0xc08   :  { %v1794_v59 = vmul.f32 %v1790_v33, %v7012_v6 }
 0xc0a   :  { %1819 = vrot.lane.b32.xlu2 %v1794_v59, %s6439_s24 }
 0xc1f   :  { %v1682_v15 = vpop.permute.xlu2 %1681 }
 0xc20   :  { %v1687_v18 = vmul.f32 %v1682_v15, %v1650_v56 }
 0xc2f   :  { %v1788_v8 = vpop.permute.xlu1 %1787 }
 0xc30   :  { %v1793_v6 = vmul.f32 %v1788_v8, %v7022_v39  ;;  %v1663_v39 = vand.u32 2147483648, %v1636_v61 }
 0xc32   :  { %1817 = vrot.lane.b32.xlu1 %v1793_v6, %s6439_s24  ;;  %v1664_v51 = vor.u32 1.1754944e-38, %v1663_v39 }
 0xc34   :  { %v1665_v21 = vsel %vm1662_vm6, %v1664_v51, %v1660_v22 }
 0xc37   :  { %v1518_v16 = vpop.permute.xlu1 %1517 }
 0xc38   :  { %1522 = vst.msk [vmem:[#allocation6 + $0x8] sm:$0xff] %vm349_vm1, %v1518_v16 }
 0xc3a   :  { %1691 = vrot.lane.b32.xlu1 %v1687_v18, %s6439_s24 }
 0xc3f   :  { %v1684_v53 = vpop.permute.xlu0 %1683  ;;  %v1628_v40 = vld [vmem:[#allocation6 + $0x8] sm:$0xff] }
 0xc40   :  { %v1688_v35 = vmul.f32 %v1684_v53, %v1665_v21  ;;  %1673 = vrot.lane.b32.xlu2 %v1628_v40, %s6439_s24 }
 0xc42   :  { %1693 = vrot.lane.b32.xlu0 %v1688_v35, %s6439_s24 }
 0xc47   :  { %v1672_v47 = vpop.permute.xlu0 %1671 }
 0xc48   :  { %v1677_v44 = vmul.f32 %v1672_v47, %v1650_v56 }
 0xc64   :  { %v1820_v42 = vpop.permute.xlu2 %1819 }
 0xc65   :  { %1824 = vst.msk [vmem:[#allocation7 + $0x8] sm:$0xff] %vm349_vm1, %v1820_v42 }
 0xc66   :  { %1840 = vst.msk [vmem:[#allocation4 + $0x38] sm:$0xff] %vm349_vm1, %v1820_v42 }
 0xc6c   :  { %v1883_v52 = vld [vmem:[#allocation7 + $0x8] sm:$0xff] }
 0xc9a   :  { %v1674_v20 = vpop.permute.xlu2 %1673 }
 0xc9b   :  { %v1678_v50 = vmul.f32 %v1674_v20, %v1665_v21 }
 0xca4   :  { %v1818_v46 = vpop.permute.xlu1 %1817 }
 0xca5   :  { %1823 = vst.msk [vmem:[#allocation7] sm:$0xff] %vm349_vm1, %v1818_v46 }
 0xca6   :  { %1839 = vst.msk [vmem:[#allocation4 + $0x30] sm:$0xff] %vm349_vm1, %v1818_v46 }
 0xcac   :  { %v1692_v48 = vpop.permute.xlu1 %1691  ;;  %v1882_v23 = vld [vmem:[#allocation7] sm:$0xff] }
 0xcad   :  { %v7058_v7 = vadd.f32 %v1692_v48, %v1677_v44  ;;  %5616 = vmatmul.msk.f32.vlgmr.msrb.gmra.mxu3 %vm349_vm1, %v1882_v23 }
 0xcaf   :  { %5947 = vtanh.f32 %v7058_v7 }
 0xcb4   :  { %v1694_v1 = vpop.permute.xlu0 %1693 }
 0xcb5   :  { %v5948_v54 = vpop.eup %5947  ;;  %v7062_v55 = vadd.f32 %v1694_v1, %v1678_v50  ;;  %5617 = vmatmul.msk.f32.gmra.mxu3 %vm349_vm1, %v1883_v52 }
 0xcb6   :  { %1703 = vrot.lane.b32.xlu1 %v5948_v54, %s6440_s4 }
 0xcb7   :  { %5949 = vtanh.f32 %v7062_v55 }
 0xcbd   :  { %v5950_v32 = vpop.eup %5949 }
 0xcbe   :  { %1705 = vrot.lane.b32.xlu2 %v5950_v32, %s6440_s4 }
 0xcc6   :  { %1827 = vrot.lane.b32.xlu2 %v7035_v49, %s6441_s2  ;;  %v285_v49 = vadd.f32 %v6662_v31, %v6687_v43 }
 0xd18   :  { %v1706_v19 = vpop.permute.xlu2 %1705 }
 0xd19   :  { %v1710_v17 = vmul.f32 %v1706_v19, %v1665_v21 }
 0xd1b   :  { %1799 = vrot.lane.b32.xlu1 %v1710_v17, %s6439_s24 }
 0xd20   :  { %v1828_v14 = vpop.permute.xlu2 %1827 }
 0xd21   :  { %1833 = vst.msk [vmem:[#allocation8] sm:$0xff] %vm349_vm1, %v1828_v14 }
 0xd28   :  { %v1704_v33 = vpop.permute.xlu1 %1703  ;;  %v2003_v12 = vld [vmem:[#allocation8] sm:$0xff] }
 0xd29   :  { %v1709_v59 = vmul.f32 %v1704_v33, %v1650_v56  ;;  %v234_v33 = vpop.f32.mrf.mxu0 }
 0xd2b   :  { %1797 = vrot.lane.b32.xlu0 %v1709_v59, %s6439_s24 }
 0xd30   :  { %v1911_v41 = vpop.f32.mrf.mxu3 }
 0xd31   :  { %v1917_v36 = vadd.f32 %v1911_v41, %v282_v57  ;;  %v235_v57 = vadd.f32 %v234_v33, %v6732_v37 }
 0xd33   :  { %5951 = vtanh.f32 %v1917_v36  ;;  %1829 = vrot.lane.b32.xlu0 %v7029_v45, %s6441_s2  ;;  %v5620_v45 = vmul.f32 -1.442695, %v1917_v36 }
 0xd38   :  { %v1914_v60 = vpop.f32.mrf.mxu3 }
 0xd39   :  { %v5952_v25 = vpop.eup %5951  ;;  %v1918_v61 = vadd.f32 %v1914_v60, %v285_v49  ;;  %v237_v60 = vpop.f32.mrf.mxu0 }
 0xd3a   :  { %2057 = vrot.lane.b32.xlu1 %v5952_v25, %s6440_s4  ;;  %v238_v25 = vadd.f32 %v237_v60, %v6732_v37 }
 0xd3b   :  { %5953 = vtanh.f32 %v1918_v61  ;;  %2047 = vrot.lane.b32.xlu0 %v2003_v12, %s6439_s24  ;;  %v5621_v30 = vmul.f32 -1.442695, %v1918_v61 }
 0xd3d   :  { %5955 = vpow2.f32 %v5621_v30 }
 0xd41   :  { %v5954_v38 = vpop.eup %5953 }
 0xd42   :  { %2059 = vrot.lane.b32.xlu2 %v5954_v38, %s6440_s4 }
 0xd43   :  { %v5956_v63 = vpop.eup %5955 }
 0xd44   :  { %v2012_v0 = vadd.f32 1.0, %v5956_v63 }
 0xd46   :  { %5957 = vrcp.f32 %v2012_v0  ;;  %v2039_v4 = vand.u32 2147483648, %v2012_v0  ;;  %vm2033_vm8 = vweird.f32 %v2012_v0  ;;  %v2037_v10 = vand.u32 2147483647, %v2012_v0 }
 0xd47   :  { %5959 = vpow2.f32 %v5620_v45 }
 0xd48   :  { %v2040_v56 = vor.u32 1.1754944e-38, %v2039_v4  ;;  %vm2038_vm10 = vcmp.eq.f32.partialorder %v2037_v10, 8.507059e+37 }
 0xd4c   :  { %v5958_v31 = vpop.eup %5957 }
 0xd4d   :  { %v5960_v3 = vpop.eup %5959  ;;  %v2029_v5 = vmul.f32 %v5958_v31, %v2012_v0  ;;  %vm2034_vm7 = vweird.f32 %v5958_v31 }
 0xd4e   :  { %v2011_v8 = vadd.f32 1.0, %v5960_v3  ;;  %vm2035_vm9 = vmor %vm2033_vm8, %vm2034_vm7 }
 0xd4f   :  { %v2030_v6 = vsub.f32 1.0, %v2029_v5 }
 0xd50   :  { %5961 = vrcp.f32 %v2011_v8  ;;  %v2024_v40 = vand.u32 2147483648, %v2011_v8  ;;  %vm2018_vm12 = vweird.f32 %v2011_v8  ;;  %v2022_v35 = vand.u32 2147483647, %v2011_v8 }
 0xd51   :  { %v2031_v24 = vmul.f32 %v5958_v31, %v2030_v6 }
 0xd52   :  { %v2025_v46 = vor.u32 1.1754944e-38, %v2024_v40  ;;  %vm2023_vm14 = vcmp.eq.f32.partialorder %v2022_v35, 8.507059e+37 }
 0xd53   :  { %v2032_v9 = vadd.f32 %v5958_v31, %v2031_v24 }
 0xd55   :  { %v2036_v11 = vsel %vm2035_vm9, %v5958_v31, %v2032_v9 }
 0xd56   :  { %v5962_v62 = vpop.eup %5961  ;;  %v7084_v18 = vsel %vm2038_vm10, %v2040_v56, %v2036_v11 }
 0xd57   :  { %v2014_v15 = vmul.f32 %v5962_v62, %v2011_v8  ;;  %vm2019_vm11 = vweird.f32 %v5962_v62 }
 0xd58   :  { %vm2020_vm13 = vmor %vm2018_vm12, %vm2019_vm11 }
 0xd59   :  { %v2015_v34 = vsub.f32 1.0, %v2014_v15 }
 0xd5b   :  { %v2016_v22 = vmul.f32 %v5962_v62, %v2015_v34 }
 0xd5d   :  { %v2017_v21 = vadd.f32 %v5962_v62, %v2016_v22 }
 0xd5f   :  { %v2021_v42 = vsel %vm2020_vm13, %v5962_v62, %v2017_v21 }
 0xd60   :  { %v7094_v47 = vsel %vm2023_vm14, %v2025_v46, %v2021_v42 }
 0xd8d   :  { %v1800_v2 = vpop.permute.xlu1 %1799 }
 0xd8e   :  { %1804 = vst.msk [vmem:[#allocation5 + $0x8] sm:$0xff] %vm349_vm1, %v1800_v2 }
 0xd8f   :  { %1837 = vst.msk [vmem:[#allocation3 + $0x48] sm:$0xff] %vm349_vm1, %v1800_v2 }
 0xd95   :  { %v1844_v20 = vld [vmem:[#allocation5 + $0x8] sm:$0xff] }
 0xd9c   :  { %v2060_v16 = vpop.permute.xlu2 %2059 }
 0xd9d   :  { %v2064_v58 = vmul.f32 %v2060_v16, %v7084_v18  ;;  %v1798_v39 = vpop.permute.xlu0 %1797 }
 0xd9e   :  { %1803 = vst.msk [vmem:[#allocation5] sm:$0xff] %vm349_vm1, %v1798_v39 }
 0xd9f   :  { %1836 = vst.msk [vmem:[#allocation3 + $0x40] sm:$0xff] %vm349_vm1, %v1798_v39  ;;  %2069 = vrot.lane.b32.xlu0 %v2064_v58, %s6439_s24 }
 0xda5   :  { %v1830_v51 = vpop.permute.xlu0 %1829  ;;  %v1843_v53 = vld [vmem:[#allocation5] sm:$0xff] }
 0xda6   :  { %1834 = vst.msk [vmem:[#allocation8 + $0x8] sm:$0xff] %vm349_vm1, %v1830_v51  ;;  %5614 = vmatmul.msk.f32.vlgmr.msrb.gmra.mxu2 %vm349_vm1, %v1843_v53 }
 0xda7   :  { %1807 = vrot.lane.b32.xlu0 %v7058_v7, %s6441_s2 }
 0xdac   :  { %v2058_v44 = vpop.permute.xlu1 %2057 }
 0xdad   :  { %v2063_v48 = vmul.f32 %v2058_v44, %v7094_v47  ;;  %v2004_v23 = vld [vmem:[#allocation8 + $0x8] sm:$0xff]  ;;  %v2048_v7 = vpop.permute.xlu0 %2047 }
 0xdae   :  { %2049 = vrot.lane.b32.xlu2 %v2004_v23, %s6439_s24  ;;  %5615 = vmatmul.msk.f32.gmra.mxu2 %vm349_vm1, %v1844_v20  ;;  %v2053_v17 = vmul.f32 %v2048_v7, %v7094_v47 }
 0xdaf   :  { %2067 = vrot.lane.b32.xlu1 %v2063_v48, %s6439_s24 }
 0xe08   :  { %v2050_v50 = vpop.permute.xlu2 %2049 }
 0xe09   :  { %v2054_v1 = vmul.f32 %v2050_v50, %v7084_v18 }
 0xe11   :  { %v2070_v52 = vpop.permute.xlu0 %2069 }
 0xe12   :  { %v7101_v54 = vadd.f32 %v2070_v52, %v2054_v1  ;;  %v2179_v1 = vld [vmem:[#allocation13 + $0x18] sm:$0xff]  ;;  %v2178_v52 = vld [vmem:[#allocation13 + $0x10] sm:$0xff] }
 0xe13   :  { %2198 = vmatpush.msra.mxu3 %v2179_v1 }
 0xe14   :  { %5963 = vtanh.f32 %v7101_v54 }
 0xe15   :  { %2199 = vmatpush.msra.mxu3 %v2178_v52 }
 0xe19   :  { %v1808_v32 = vpop.permute.xlu0 %1807 }
 0xe1a   :  { %v5964_v19 = vpop.eup %5963  ;;  %1813 = vst.msk [vmem:[#allocation6] sm:$0xff] %vm349_vm1, %v1808_v32  ;;  %v2177_v32 = vld [vmem:[#allocation13 + $0x8] sm:$0xff] }
 0xe1b   :  { %2081 = vrot.lane.b32.xlu2 %v5964_v19, %s6440_s4  ;;  %v2176_v19 = vld [vmem:[#allocation13] sm:$0xff]  ;;  %2200 = vmatpush.msra.mxu3 %v2177_v32 }
 0xe1d   :  { %2201 = vmatpush.msra.mxu3 %v2176_v19 }
 0xe1f   :  { %2490 = vmatpush.msrb.mxu3 %v2179_v1 }
 0xe21   :  { %v2068_v14 = vpop.permute.xlu1 %2067  ;;  %v1919_v63 = vld [vmem:[#allocation6] sm:$0xff]  ;;  %2491 = vmatpush.msrb.mxu3 %v2178_v52 }
 0xe22   :  { %v7107_v59 = vadd.f32 %v2068_v14, %v2053_v17 }
 0xe23   :  { %2492 = vmatpush.msrb.mxu3 %v2177_v32 }
 0xe24   :  { %5965 = vtanh.f32 %v7107_v59 }
 0xe25   :  { %2493 = vmatpush.msrb.mxu3 %v2176_v19 }
 0xe29   :  { %v1872_v41 = vpop.f32.mrf.mxu2 }
 0xe2a   :  { %v5966_v36 = vpop.eup %5965  ;;  %v1878_v49 = vadd.f32 %v1872_v41, %v235_v57 }
 0xe2b   :  { %2079 = vrot.lane.b32.xlu1 %v5966_v36, %s6440_s4 }
 0xe2c   :  { %5967 = vtanh.f32 %v1878_v49  ;;  %v5618_v31 = vmul.f32 -1.442695, %v1878_v49 }
 0xe31   :  { %v1875_v61 = vpop.f32.mrf.mxu2 }
 0xe32   :  { %v5968_v12 = vpop.eup %5967  ;;  %v1879_v38 = vadd.f32 %v1875_v61, %v238_v25 }
 0xe33   :  { %1973 = vrot.lane.b32.xlu2 %v5968_v12, %s6440_s4  ;;  %1809 = vrot.lane.b32.xlu1 %v7062_v55, %s6441_s2 }
 0xe34   :  { %5969 = vtanh.f32 %v1879_v38  ;;  %v5619_v3 = vmul.f32 -1.442695, %v1879_v38 }
 0xe35   :  { %5971 = vpow2.f32 %v5618_v31 }
 0xe36   :  { %5973 = vpow2.f32 %v5619_v3 }
 0xe3a   :  { %v5970_v30 = vpop.eup %5969 }
 0xe3b   :  { %1975 = vrot.lane.b32.xlu0 %v5970_v30, %s6440_s4  ;;  %v5972_v5 = vpop.eup %5971 }
 0xe3c   :  { %v1927_v8 = vadd.f32 1.0, %v5972_v5  ;;  %v5974_v55 = vpop.eup %5973  ;;  %v276_v5 = vadd.f32 %v6656_v28, %v6687_v43 }
 0xe3d   :  { %v1928_v2 = vadd.f32 1.0, %v5974_v55 }
 0xe3e   :  { %5975 = vrcp.f32 %v1927_v8  ;;  %vm1934_vm0 = vweird.f32 %v1927_v8  ;;  %v1938_v58 = vand.u32 2147483647, %v1927_v8 }
 0xe3f   :  { %5977 = vrcp.f32 %v1928_v2  ;;  %v1955_v42 = vand.u32 2147483648, %v1928_v2  ;;  %vm1949_vm5 = vweird.f32 %v1928_v2  ;;  %v1953_v46 = vand.u32 2147483647, %v1928_v2 }
 0xe40   :  { %vm1939_vm3 = vcmp.eq.f32.partialorder %v1938_v58, 8.507059e+37 }
 0xe41   :  { %v1956_v44 = vor.u32 1.1754944e-38, %v1955_v42  ;;  %vm1954_vm7 = vcmp.eq.f32.partialorder %v1953_v46, 8.507059e+37 }
 0xe43   :  { %1963 = vrot.lane.b32.xlu0 %v1919_v63, %s6439_s24 }
 0xe44   :  { %v5976_v6 = vpop.eup %5975 }
 0xe45   :  { %v1930_v24 = vmul.f32 %v5976_v6, %v1927_v8  ;;  %v5978_v62 = vpop.eup %5977  ;;  %vm1935_vm15 = vweird.f32 %v5976_v6 }
 0xe46   :  { %v1945_v10 = vmul.f32 %v5978_v62, %v1928_v2  ;;  %vm1936_vm2 = vmor %vm1934_vm0, %vm1935_vm15  ;;  %vm1950_vm4 = vweird.f32 %v5978_v62 }
 0xe47   :  { %v1931_v9 = vsub.f32 1.0, %v1930_v24  ;;  %vm1951_vm6 = vmor %vm1949_vm5, %vm1950_vm4 }
 0xe48   :  { %v1946_v16 = vsub.f32 1.0, %v1945_v10 }
 0xe49   :  { %v1932_v4 = vmul.f32 %v5976_v6, %v1931_v9 }
 0xe4a   :  { %v1947_v34 = vmul.f32 %v5978_v62, %v1946_v16 }
 0xe4b   :  { %v1933_v15 = vadd.f32 %v5976_v6, %v1932_v4 }
 0xe4c   :  { %v1948_v35 = vadd.f32 %v5978_v62, %v1947_v34 }
 0xe4d   :  { %v1937_v39 = vsel %vm1936_vm2, %v5976_v6, %v1933_v15  ;;  %v2139_v15 = vld [vmem:[#allocation11 + $0x10] sm:$0xff] }
 0xe75   :  { %v2082_v0 = vpop.permute.xlu2 %2081 }
 0xe76   :  { %v2086_v45 = vmul.f32 %v2082_v0, %v7084_v18  ;;  %v1940_v18 = vand.u32 2147483648, %v1927_v8 }
 0xe78   :  { %2111 = vrot.lane.b32.xlu2 %v2086_v45, %s6439_s24  ;;  %v1941_v22 = vor.u32 1.1754944e-38, %v1940_v18 }
 0xe7a   :  { %v7122_v53 = vsel %vm1939_vm3, %v1941_v22, %v1937_v39 }
 0xe8d   :  { %v1974_v51 = vpop.permute.xlu2 %1973 }
 0xe8e   :  { %v1979_v40 = vmul.f32 %v1974_v51, %v7122_v53 }
 0xe9d   :  { %v2080_v11 = vpop.permute.xlu1 %2079 }
 0xe9e   :  { %v2085_v56 = vmul.f32 %v2080_v11, %v7094_v47  ;;  %v1952_v47 = vsel %vm1951_vm6, %v5978_v62, %v1948_v35  ;;  %v2140_v11 = vld [vmem:[#allocation11 + $0x18] sm:$0xff] }
 0xe9f   :  { %v1957_v23 = vsel %vm1954_vm7, %v1956_v44, %v1952_v47  ;;  %2159 = vmatpush.msra.mxu2 %v2140_v11 }
 0xea0   :  { %2109 = vrot.lane.b32.xlu1 %v2085_v56, %s6439_s24  ;;  %v2137_v56 = vld [vmem:[#allocation11] sm:$0xff] }
 0xea1   :  { %2160 = vmatpush.msra.mxu2 %v2139_v15 }
 0xea5   :  { %v1810_v21 = vpop.permute.xlu1 %1809 }
 0xea6   :  { %1814 = vst.msk [vmem:[#allocation6 + $0x8] sm:$0xff] %vm349_vm1, %v1810_v21 }
 0xea8   :  { %1983 = vrot.lane.b32.xlu1 %v1979_v40, %s6439_s24 }
 0xead   :  { %v1976_v48 = vpop.permute.xlu0 %1975  ;;  %v1920_v20 = vld [vmem:[#allocation6 + $0x8] sm:$0xff] }
 0xeae   :  { %v1980_v7 = vmul.f32 %v1976_v48, %v1957_v23  ;;  %1965 = vrot.lane.b32.xlu2 %v1920_v20, %s6439_s24 }
 0xeb0   :  { %1985 = vrot.lane.b32.xlu0 %v1980_v7, %s6439_s24 }
 0xeb5   :  { %v1964_v14 = vpop.permute.xlu0 %1963 }
 0xeb6   :  { %v1969_v33 = vmul.f32 %v1964_v14, %v7122_v53 }
 0xed2   :  { %v2112_v50 = vpop.permute.xlu2 %2111 }
 0xed3   :  { %2116 = vst.msk [vmem:[#allocation7 + $0x8] sm:$0xff] %vm349_vm1, %v2112_v50 }
 0xed4   :  { %2132 = vst.msk [vmem:[#allocation4 + $0x28] sm:$0xff] %vm349_vm1, %v2112_v50 }
 0xeda   :  { %v2175_v61 = vld [vmem:[#allocation7 + $0x8] sm:$0xff] }
 0xf08   :  { %v1966_v49 = vpop.permute.xlu2 %1965 }
 0xf09   :  { %v1970_v60 = vmul.f32 %v1966_v49, %v1957_v23 }
 0xf12   :  { %v2110_v17 = vpop.permute.xlu1 %2109 }
 0xf13   :  { %2115 = vst.msk [vmem:[#allocation7] sm:$0xff] %vm349_vm1, %v2110_v17 }
 0xf14   :  { %2131 = vst.msk [vmem:[#allocation4 + $0x20] sm:$0xff] %vm349_vm1, %v2110_v17 }
 0xf1a   :  { %v1984_v57 = vpop.permute.xlu1 %1983  ;;  %v2174_v41 = vld [vmem:[#allocation7] sm:$0xff] }
 0xf1b   :  { %v7134_v36 = vadd.f32 %v1984_v57, %v1969_v33  ;;  %5624 = vmatmul.msk.f32.vlgmr.msra.gmra.mxu3 %vm349_vm1, %v2174_v41 }
 0xf1d   :  { %5979 = vtanh.f32 %v7134_v36 }
 0xf22   :  { %v1986_v25 = vpop.permute.xlu0 %1985 }
 0xf23   :  { %v5980_v12 = vpop.eup %5979  ;;  %v7138_v38 = vadd.f32 %v1986_v25, %v1970_v60  ;;  %5625 = vmatmul.msk.f32.gmra.mxu3 %vm349_vm1, %v2175_v61 }
 0xf24   :  { %1995 = vrot.lane.b32.xlu1 %v5980_v12, %s6440_s4 }
 0xf25   :  { %5981 = vtanh.f32 %v7138_v38 }
 0xf2b   :  { %v5982_v30 = vpop.eup %5981 }
 0xf2c   :  { %1997 = vrot.lane.b32.xlu2 %v5982_v30, %s6440_s4 }
 0xf34   :  { %2119 = vrot.lane.b32.xlu2 %v7107_v59, %s6441_s2  ;;  %v279_v59 = vadd.f32 %v6658_v29, %v6687_v43  ;;  %v2138_v29 = vld [vmem:[#allocation11 + $0x8] sm:$0xff] }
 0xf35   :  { %2161 = vmatpush.msra.mxu2 %v2138_v29 }
 0xf37   :  { %2162 = vmatpush.msra.mxu2 %v2137_v56 }
 0xf39   :  { %2451 = vmatpush.msrb.mxu2 %v2140_v11 }
 0xf3b   :  { %2452 = vmatpush.msrb.mxu2 %v2139_v15 }
 0xf3d   :  { %2453 = vmatpush.msrb.mxu2 %v2138_v29 }
 0xf3f   :  { %2454 = vmatpush.msrb.mxu2 %v2137_v56 }
 0xf86   :  { %v1998_v63 = vpop.permute.xlu2 %1997 }
 0xf87   :  { %v2002_v0 = vmul.f32 %v1998_v63, %v1957_v23 }
 0xf89   :  { %2091 = vrot.lane.b32.xlu1 %v2002_v0, %s6439_s24 }
 0xf8e   :  { %v2120_v45 = vpop.permute.xlu2 %2119 }
 0xf8f   :  { %2125 = vst.msk [vmem:[#allocation8] sm:$0xff] %vm349_vm1, %v2120_v45 }
 0xf96   :  { %v1996_v31 = vpop.permute.xlu1 %1995  ;;  %v2295_v9 = vld [vmem:[#allocation8] sm:$0xff] }
 0xf97   :  { %v2001_v3 = vmul.f32 %v1996_v31, %v7122_v53 }
 0xf99   :  { %2089 = vrot.lane.b32.xlu0 %v2001_v3, %s6439_s24 }
 0xf9e   :  { %v2203_v8 = vpop.f32.mrf.mxu3 }
 0xf9f   :  { %v2209_v55 = vadd.f32 %v2203_v8, %v276_v5  ;;  %v240_v5 = vpop.f32.mrf.mxu0 }
 0xfa1   :  { %5983 = vtanh.f32 %v2209_v55  ;;  %2121 = vrot.lane.b32.xlu0 %v7101_v54, %s6441_s2  ;;  %v5628_v54 = vmul.f32 -1.442695, %v2209_v55  ;;  %v241_v55 = vadd.f32 %v240_v5, %v6732_v37 }
 0xfa6   :  { %v2206_v2 = vpop.f32.mrf.mxu3 }
 0xfa7   :  { %v5984_v6 = vpop.eup %5983  ;;  %v2210_v24 = vadd.f32 %v2206_v2, %v279_v59 }
 0xfa8   :  { %2349 = vrot.lane.b32.xlu1 %v5984_v6, %s6440_s4 }
 0xfa9   :  { %5985 = vtanh.f32 %v2210_v24  ;;  %2339 = vrot.lane.b32.xlu0 %v2295_v9, %s6439_s24  ;;  %v5629_v28 = vmul.f32 -1.442695, %v2210_v24  ;;  %v243_v24 = vpop.f32.mrf.mxu0 }
 0xfaa   :  { %v244_v9 = vadd.f32 %v243_v24, %v6732_v37 }
 0xfab   :  { %5987 = vpow2.f32 %v5629_v28 }
 0xfaf   :  { %v5986_v62 = vpop.eup %5985 }
 0xfb0   :  { %2351 = vrot.lane.b32.xlu2 %v5986_v62, %s6440_s4 }
 0xfb1   :  { %v5988_v4 = vpop.eup %5987 }
 0xfb2   :  { %v2304_v10 = vadd.f32 1.0, %v5988_v4 }
 0xfb4   :  { %5989 = vrcp.f32 %v2304_v10  ;;  %v2331_v40 = vand.u32 2147483648, %v2304_v10  ;;  %vm2325_vm9 = vweird.f32 %v2304_v10  ;;  %v2329_v35 = vand.u32 2147483647, %v2304_v10 }
 0xfb5   :  { %5991 = vpow2.f32 %v5628_v54 }
 0xfb6   :  { %v2332_v47 = vor.u32 1.1754944e-38, %v2331_v40  ;;  %vm2330_vm11 = vcmp.eq.f32.partialorder %v2329_v35, 8.507059e+37 }
 0xfba   :  { %v5990_v16 = vpop.eup %5989 }
 0xfbb   :  { %v5992_v18 = vpop.eup %5991  ;;  %v2321_v58 = vmul.f32 %v5990_v16, %v2304_v10  ;;  %vm2326_vm8 = vweird.f32 %v5990_v16 }
 0xfbc   :  { %v2303_v39 = vadd.f32 1.0, %v5992_v18  ;;  %vm2327_vm10 = vmor %vm2325_vm9, %vm2326_vm8 }
 0xfbd   :  { %v2322_v22 = vsub.f32 1.0, %v2321_v58 }
 0xfbe   :  { %5993 = vrcp.f32 %v2303_v39  ;;  %v2316_v19 = vand.u32 2147483648, %v2303_v39  ;;  %vm2310_vm13 = vweird.f32 %v2303_v39  ;;  %v2314_v17 = vand.u32 2147483647, %v2303_v39 }
 0xfbf   :  { %v2323_v51 = vmul.f32 %v5990_v16, %v2322_v22 }
 0xfc0   :  { %v2317_v33 = vor.u32 1.1754944e-38, %v2316_v19  ;;  %vm2315_vm15 = vcmp.eq.f32.partialorder %v2314_v17, 8.507059e+37 }
 0xfc1   :  { %v2324_v53 = vadd.f32 %v5990_v16, %v2323_v51 }
 0xfc3   :  { %v2328_v42 = vsel %vm2327_vm10, %v5990_v16, %v2324_v53 }
 0xfc4   :  { %v5994_v21 = vpop.eup %5993  ;;  %v7161_v48 = vsel %vm2330_vm11, %v2332_v47, %v2328_v42 }
 0xfc5   :  { %v2306_v46 = vmul.f32 %v5994_v21, %v2303_v39  ;;  %vm2311_vm12 = vweird.f32 %v5994_v21 }
 0xfc6   :  { %vm2312_vm14 = vmor %vm2310_vm13, %vm2311_vm12 }
 0xfc7   :  { %v2307_v7 = vsub.f32 1.0, %v2306_v46 }
 0xfc9   :  { %v2308_v50 = vmul.f32 %v5994_v21, %v2307_v7 }
 0xfcb   :  { %v2309_v32 = vadd.f32 %v5994_v21, %v2308_v50 }
 0xfcd   :  { %v2313_v14 = vsel %vm2312_vm14, %v5994_v21, %v2309_v32 }
 0xfce   :  { %v7171_v57 = vsel %vm2315_vm15, %v2317_v33, %v2313_v14 }
 0xffb   :  { %v2092_v34 = vpop.permute.xlu1 %2091 }
 0xffc   :  { %2096 = vst.msk [vmem:[#allocation5 + $0x8] sm:$0xff] %vm349_vm1, %v2092_v34 }
 0xffd   :  { %2129 = vst.msk [vmem:[#allocation3 + $0x58] sm:$0xff] %vm349_vm1, %v2092_v34 }
0x1003   :  { %v2136_v25 = vld [vmem:[#allocation5 + $0x8] sm:$0xff] }
0x100a   :  { %v2352_v44 = vpop.permute.xlu2 %2351 }
0x100b   :  { %v2356_v23 = vmul.f32 %v2352_v44, %v7161_v48  ;;  %v2090_v20 = vpop.permute.xlu0 %2089 }
0x100c   :  { %2095 = vst.msk [vmem:[#allocation5] sm:$0xff] %vm349_vm1, %v2090_v20 }
0x100d   :  { %2128 = vst.msk [vmem:[#allocation3 + $0x50] sm:$0xff] %vm349_vm1, %v2090_v20  ;;  %2361 = vrot.lane.b32.xlu0 %v2356_v23, %s6439_s24 }
0x1013   :  { %v2122_v1 = vpop.permute.xlu0 %2121  ;;  %v2135_v52 = vld [vmem:[#allocation5] sm:$0xff] }
0x1014   :  { %2126 = vst.msk [vmem:[#allocation8 + $0x8] sm:$0xff] %vm349_vm1, %v2122_v1  ;;  %5622 = vmatmul.msk.f32.vlgmr.msra.gmra.mxu2 %vm349_vm1, %v2135_v52 }
0x1015   :  { %2099 = vrot.lane.b32.xlu0 %v7134_v36, %s6441_s2 }
0x101a   :  { %v2350_v41 = vpop.permute.xlu1 %2349 }
0x101b   :  { %v2355_v49 = vmul.f32 %v2350_v41, %v7171_v57  ;;  %v2296_v60 = vld [vmem:[#allocation8 + $0x8] sm:$0xff]  ;;  %v2340_v36 = vpop.permute.xlu0 %2339 }
0x101c   :  { %2341 = vrot.lane.b32.xlu2 %v2296_v60, %s6439_s24  ;;  %5623 = vmatmul.msk.f32.gmra.mxu2 %vm349_vm1, %v2136_v25  ;;  %v2345_v31 = vmul.f32 %v2340_v36, %v7171_v57  ;;  %v2757_v36 = vld [vmem:[#allocation14 + $0x38] sm:$0xff] }
0x101d   :  { %2359 = vrot.lane.b32.xlu1 %v2355_v49, %s6439_s24  ;;  %3085 = vmatpush.msra.mxu3 %v2757_v36 }
0x1076   :  { %v2342_v61 = vpop.permute.xlu2 %2341 }
0x1077   :  { %v2346_v12 = vmul.f32 %v2342_v61, %v7161_v48  ;;  %v2755_v61 = vld [vmem:[#allocation14 + $0x28] sm:$0xff] }
0x1078   :  { %3086 = vmatpush.msra.mxu3 %v2755_v61 }
0x107f   :  { %v2362_v30 = vpop.permute.xlu0 %2361 }
0x1080   :  { %v7178_v63 = vadd.f32 %v2362_v30, %v2346_v12  ;;  %v2753_v12 = vld [vmem:[#allocation14 + $0x18] sm:$0xff]  ;;  %v2751_v30 = vld [vmem:[#allocation14 + $0x8] sm:$0xff] }
0x1081   :  { %3087 = vmatpush.msra.mxu3 %v2753_v12 }
0x1082   :  { %5995 = vtanh.f32 %v7178_v63 }
0x1083   :  { %3088 = vmatpush.msra.mxu3 %v2751_v30 }
0x1087   :  { %v2100_v0 = vpop.permute.xlu0 %2099 }
0x1088   :  { %v5996_v45 = vpop.eup %5995  ;;  %2105 = vst.msk [vmem:[#allocation6] sm:$0xff] %vm349_vm1, %v2100_v0 }
0x1089   :  { %2373 = vrot.lane.b32.xlu2 %v5996_v45, %s6440_s4 }
0x108f   :  { %v2360_v3 = vpop.permute.xlu1 %2359  ;;  %v2211_v54 = vld [vmem:[#allocation6] sm:$0xff] }
0x1090   :  { %v7184_v8 = vadd.f32 %v2360_v3, %v2345_v31 }
0x1092   :  { %5997 = vtanh.f32 %v7184_v8 }
0x1097   :  { %v2164_v59 = vpop.f32.mrf.mxu2 }
0x1098   :  { %v5998_v2 = vpop.eup %5997  ;;  %v2170_v6 = vadd.f32 %v2164_v59, %v241_v55 }
0x1099   :  { %2371 = vrot.lane.b32.xlu1 %v5998_v2, %s6440_s4 }
0x109a   :  { %5999 = vtanh.f32 %v2170_v6  ;;  %v5626_v29 = vmul.f32 -1.442695, %v2170_v6 }
0x109f   :  { %v2167_v62 = vpop.f32.mrf.mxu2 }
0x10a0   :  { %v6000_v28 = vpop.eup %5999  ;;  %v2171_v4 = vadd.f32 %v2167_v62, %v244_v9 }
0x10a1   :  { %2265 = vrot.lane.b32.xlu2 %v6000_v28, %s6440_s4  ;;  %2101 = vrot.lane.b32.xlu1 %v7138_v38, %s6441_s2  ;;  %v7224_v28 = vld [vmem:[#allocation3] sm:$0xff] }
0x10a2   :  { %6001 = vtanh.f32 %v2171_v4  ;;  %v5627_v56 = vmul.f32 -1.442695, %v2171_v4 }
0x10a3   :  { %6003 = vpow2.f32 %v5626_v29  ;;  %v7247_v29 = vld [vmem:[#allocation3 + $0x28] sm:$0xff] }
0x10a4   :  { %6005 = vpow2.f32 %v5627_v56  ;;  %v7255_v56 = vld [vmem:[#allocation3 + $0x38] sm:$0xff] }
0x10a8   :  { %v6002_v10 = vpop.eup %6001 }
0x10a9   :  { %2267 = vrot.lane.b32.xlu0 %v6002_v10, %s6440_s4  ;;  %v6004_v16 = vpop.eup %6003  ;;  %v7229_v10 = vld [vmem:[#allocation3 + $0x8] sm:$0xff] }
0x10aa   :  { %v2219_v18 = vadd.f32 1.0, %v6004_v16  ;;  %v6006_v38 = vpop.eup %6005  ;;  %v7259_v16 = vld [vmem:[#allocation3 + $0x40] sm:$0xff] }
0x10ab   :  { %v2220_v58 = vadd.f32 1.0, %v6006_v38  ;;  %v7267_v38 = vld [vmem:[#allocation3 + $0x50] sm:$0xff] }
0x10ac   :  { %6007 = vrcp.f32 %v2219_v18  ;;  %v2232_v47 = vand.u32 2147483648, %v2219_v18  ;;  %vm2226_vm2 = vweird.f32 %v2219_v18  ;;  %v2230_v44 = vand.u32 2147483647, %v2219_v18 }
0x10ad   :  { %6009 = vrcp.f32 %v2220_v58  ;;  %v2247_v19 = vand.u32 2147483648, %v2220_v58  ;;  %vm2241_vm6 = vweird.f32 %v2220_v58  ;;  %v2245_v17 = vand.u32 2147483647, %v2220_v58 }
0x10ae   :  { %v2233_v20 = vor.u32 1.1754944e-38, %v2232_v47  ;;  %vm2231_vm4 = vcmp.eq.f32.partialorder %v2230_v44, 8.507059e+37 }
0x10af   :  { %v2248_v33 = vor.u32 1.1754944e-38, %v2247_v19  ;;  %vm2246_vm8 = vcmp.eq.f32.partialorder %v2245_v17, 8.507059e+37  ;;  %v2756_v19 = vld [vmem:[#allocation14 + $0x30] sm:$0xff]  ;;  %v2754_v17 = vld [vmem:[#allocation14 + $0x20] sm:$0xff] }
0x10b0   :  { %3020 = vmatpush.msra.mxu2 %v2756_v19 }
0x10b1   :  { %2255 = vrot.lane.b32.xlu0 %v2211_v54, %s6439_s24  ;;  %v7235_v54 = vld [vmem:[#allocation3 + $0x10] sm:$0xff] }
0x10b2   :  { %v6008_v39 = vpop.eup %6007  ;;  %3021 = vmatpush.msra.mxu2 %v2754_v17 }
0x10b3   :  { %v2222_v34 = vmul.f32 %v6008_v39, %v2219_v18  ;;  %v6010_v51 = vpop.eup %6009  ;;  %vm2227_vm0 = vweird.f32 %v6008_v39  ;;  %v7263_v18 = vld [vmem:[#allocation3 + $0x48] sm:$0xff] }
0x10b4   :  { %v2237_v21 = vmul.f32 %v6010_v51, %v2220_v58  ;;  %vm2228_vm3 = vmor %vm2226_vm2, %vm2227_vm0  ;;  %vm2242_vm5 = vweird.f32 %v6010_v51  ;;  %v7271_v58 = vld [vmem:[#allocation3 + $0x58] sm:$0xff] }
0x10b5   :  { %v2223_v22 = vsub.f32 1.0, %v2222_v34  ;;  %vm2243_vm7 = vmor %vm2241_vm6, %vm2242_vm5 }
0x10b6   :  { %v2238_v46 = vsub.f32 1.0, %v2237_v21  ;;  %v270_v21 = vadd.f32 %v6652_v26, %v6687_v43 }
0x10b7   :  { %v2224_v53 = vmul.f32 %v6008_v39, %v2223_v22 }
0x10b8   :  { %v2239_v23 = vmul.f32 %v6010_v51, %v2238_v46 }
0x10b9   :  { %v2225_v35 = vadd.f32 %v6008_v39, %v2224_v53 }
0x10ba   :  { %v2240_v32 = vadd.f32 %v6010_v51, %v2239_v23 }
0x10bc   :  { %v2244_v14 = vsel %vm2243_vm7, %v6010_v51, %v2240_v32 }
0x10bd   :  { %v7204_v41 = vsel %vm2246_vm8, %v2248_v33, %v2244_v14  ;;  %v2752_v33 = vld [vmem:[#allocation14 + $0x10] sm:$0xff] }
0x10be   :  { %3022 = vmatpush.msra.mxu2 %v2752_v33 }
0x10e3   :  { %v2374_v11 = vpop.permute.xlu2 %2373 }
0x10e4   :  { %v2378_v15 = vmul.f32 %v2374_v11, %v7161_v48  ;;  %v2229_v48 = vsel %vm2228_vm3, %v6008_v39, %v2225_v35  ;;  %v7239_v11 = vld [vmem:[#allocation3 + $0x18] sm:$0xff] }
0x10e5   :  { %v7199_v50 = vsel %vm2231_vm4, %v2233_v20, %v2229_v48 }
0x10e6   :  { %2403 = vrot.lane.b32.xlu2 %v2378_v15, %s6439_s24  ;;  %v7243_v15 = vld [vmem:[#allocation3 + $0x20] sm:$0xff] }
0x10fb   :  { %v2266_v7 = vpop.permute.xlu2 %2265 }
0x10fc   :  { %v2271_v52 = vmul.f32 %v2266_v7, %v7199_v50 }
0x110b   :  { %v2372_v40 = vpop.permute.xlu1 %2371 }
0x110c   :  { %v2377_v42 = vmul.f32 %v2372_v40, %v7171_v57 }
0x110e   :  { %2401 = vrot.lane.b32.xlu1 %v2377_v42, %s6439_s24  ;;  %v273_v42 = vadd.f32 %v6654_v27, %v6687_v43 }
0x1113   :  { %v2102_v1 = vpop.permute.xlu1 %2101 }
0x1114   :  { %2106 = vst.msk [vmem:[#allocation6 + $0x8] sm:$0xff] %vm349_vm1, %v2102_v1 }
0x1116   :  { %2275 = vrot.lane.b32.xlu1 %v2271_v52, %s6439_s24 }
0x111b   :  { %v2268_v57 = vpop.permute.xlu0 %2267  ;;  %v2212_v49 = vld [vmem:[#allocation6 + $0x8] sm:$0xff] }
0x111c   :  { %v2272_v60 = vmul.f32 %v2268_v57, %v7204_v41  ;;  %2257 = vrot.lane.b32.xlu2 %v2212_v49, %s6439_s24  ;;  %v2750_v57 = vld [vmem:[#allocation14] sm:$0xff] }
0x111d   :  { %3023 = vmatpush.msra.mxu2 %v2750_v57 }
0x111e   :  { %2277 = vrot.lane.b32.xlu0 %v2272_v60, %s6439_s24 }
0x1123   :  { %v2256_v45 = vpop.permute.xlu0 %2255 }
0x1124   :  { %v2261_v31 = vmul.f32 %v2256_v45, %v7199_v50 }
0x1140   :  { %v2404_v25 = vpop.permute.xlu2 %2403 }
0x1141   :  { %2408 = vst.msk [vmem:[#allocation7 + $0x8] sm:$0xff] %vm349_vm1, %v2404_v25 }
0x1142   :  { %2424 = vst.msk [vmem:[#allocation4 + $0x18] sm:$0xff] %vm349_vm1, %v2404_v25 }
0x1148   :  { %v2467_v24 = vld [vmem:[#allocation7 + $0x8] sm:$0xff] }
0x1176   :  { %v2258_v59 = vpop.permute.xlu2 %2257 }
0x1177   :  { %v2262_v2 = vmul.f32 %v2258_v59, %v7204_v41 }
0x1180   :  { %v2402_v0 = vpop.permute.xlu1 %2401 }
0x1181   :  { %2407 = vst.msk [vmem:[#allocation7] sm:$0xff] %vm349_vm1, %v2402_v0 }
0x1182   :  { %2423 = vst.msk [vmem:[#allocation4 + $0x10] sm:$0xff] %vm349_vm1, %v2402_v0 }
0x1188   :  { %v2276_v3 = vpop.permute.xlu1 %2275  ;;  %v2466_v5 = vld [vmem:[#allocation7] sm:$0xff] }
0x1189   :  { %v7214_v55 = vadd.f32 %v2276_v3, %v2261_v31  ;;  %5632 = vmatmul.msk.f32.vlgmr.msrb.gmra.mxu3 %vm349_vm1, %v2466_v5 }
0x118b   :  { %6011 = vtanh.f32 %v7214_v55 }
0x1190   :  { %v2278_v6 = vpop.permute.xlu0 %2277 }
0x1191   :  { %v6012_v9 = vpop.eup %6011  ;;  %v7219_v62 = vadd.f32 %v2278_v6, %v2262_v2  ;;  %5633 = vmatmul.msk.f32.gmra.mxu3 %vm349_vm1, %v2467_v24 }
0x1192   :  { %2287 = vrot.lane.b32.xlu1 %v6012_v9, %s6440_s4 }
0x1193   :  { %6013 = vtanh.f32 %v7219_v62 }
0x1199   :  { %v6014_v4 = vpop.eup %6013  ;;  %5690 = vmatmul.msk.f32.vlgmr.msra.gmra.mxu3 %vm349_vm1, %v7224_v28 }
0x119a   :  { %2289 = vrot.lane.b32.xlu2 %v6014_v4, %s6440_s4 }
0x11a1   :  { %5691 = vmatmul.msk.f32.gmra.mxu3 %vm349_vm1, %v7229_v10 }
0x11a2   :  { %2411 = vrot.lane.b32.xlu2 %v7184_v8, %s6441_s2  ;;  %v7251_v8 = vld [vmem:[#allocation3 + $0x30] sm:$0xff] }
0x11a9   :  { %5692 = vmatmul.msk.f32.gmra.mxu3 %vm349_vm1, %v7235_v54 }
0x11b1   :  { %5693 = vmatmul.msk.f32.gmra.mxu3 %vm349_vm1, %v7239_v11 }
0x11b9   :  { %5694 = vmatmul.msk.f32.gmra.mxu3 %vm349_vm1, %v7243_v15 }
0x11c1   :  { %5695 = vmatmul.msk.f32.gmra.mxu3 %vm349_vm1, %v7247_v29 }
0x11c9   :  { %5696 = vmatmul.msk.f32.gmra.mxu3 %vm349_vm1, %v7251_v8 }
0x11d1   :  { %5697 = vmatmul.msk.f32.gmra.mxu3 %vm349_vm1, %v7255_v56 }
0x11d9   :  { %5698 = vmatmul.msk.f32.gmra.mxu3 %vm349_vm1, %v7259_v16 }
0x11e1   :  { %5699 = vmatmul.msk.f32.gmra.mxu3 %vm349_vm1, %v7263_v18 }
0x11e9   :  { %5700 = vmatmul.msk.f32.gmra.mxu3 %vm349_vm1, %v7267_v38 }
0x11f1   :  { %5701 = vmatmul.msk.f32.gmra.mxu3 %vm349_vm1, %v7271_v58 }
0x11f4   :  { %v2290_v39 = vpop.permute.xlu2 %2289 }
0x11f5   :  { %v2294_v34 = vmul.f32 %v2290_v39, %v7204_v41 }
0x11f7   :  { %2383 = vrot.lane.b32.xlu1 %v2294_v34, %s6439_s24 }
0x11fc   :  { %v2412_v22 = vpop.permute.xlu2 %2411 }
0x11fd   :  { %2417 = vst.msk [vmem:[#allocation8] sm:$0xff] %vm349_vm1, %v2412_v22 }
0x1204   :  { %v2288_v51 = vpop.permute.xlu1 %2287  ;;  %v2587_v48 = vld [vmem:[#allocation8] sm:$0xff] }
0x1205   :  { %v2293_v53 = vmul.f32 %v2288_v51, %v7199_v50 }
0x1207   :  { %2381 = vrot.lane.b32.xlu0 %v2293_v53, %s6439_s24 }
0x120c   :  { %v2495_v40 = vpop.f32.mrf.mxu3 }
0x120d   :  { %v2501_v35 = vadd.f32 %v2495_v40, %v270_v21 }
0x120f   :  { %6015 = vtanh.f32 %v2501_v35  ;;  %2413 = vrot.lane.b32.xlu0 %v7178_v63, %s6441_s2  ;;  %v5636_v63 = vmul.f32 -1.442695, %v2501_v35 }
0x1214   :  { %v2498_v46 = vpop.f32.mrf.mxu3 }
0x1215   :  { %v6016_v47 = vpop.eup %6015  ;;  %v2502_v44 = vadd.f32 %v2498_v46, %v273_v42 }
0x1216   :  { %2641 = vrot.lane.b32.xlu1 %v6016_v47, %s6440_s4 }
0x1217   :  { %6017 = vtanh.f32 %v2502_v44  ;;  %2631 = vrot.lane.b32.xlu0 %v2587_v48, %s6439_s24  ;;  %v5637_v26 = vmul.f32 -1.442695, %v2502_v44 }
0x1219   :  { %6019 = vpow2.f32 %v5637_v26 }
0x121d   :  { %v6018_v23 = vpop.eup %6017 }
0x121e   :  { %2643 = vrot.lane.b32.xlu2 %v6018_v23, %s6440_s4 }
0x121f   :  { %v6020_v20 = vpop.eup %6019 }
0x1220   :  { %v2596_v7 = vadd.f32 1.0, %v6020_v20 }
0x1222   :  { %6021 = vrcp.f32 %v2596_v7  ;;  %v2623_v60 = vand.u32 2147483648, %v2596_v7  ;;  %vm2617_vm10 = vweird.f32 %v2596_v7  ;;  %v2621_v25 = vand.u32 2147483647, %v2596_v7 }
0x1223   :  { %6023 = vpow2.f32 %v5636_v63 }
0x1224   :  { %v2624_v12 = vor.u32 1.1754944e-38, %v2623_v60  ;;  %vm2622_vm12 = vcmp.eq.f32.partialorder %v2621_v25, 8.507059e+37 }
0x1228   :  { %v6022_v27 = vpop.eup %6021 }
0x1229   :  { %v6024_v43 = vpop.eup %6023  ;;  %v2613_v50 = vmul.f32 %v6022_v27, %v2596_v7  ;;  %vm2618_vm9 = vweird.f32 %v6022_v27 }
0x122a   :  { %v2595_v1 = vadd.f32 1.0, %v6024_v43  ;;  %vm2619_vm11 = vmor %vm2617_vm10, %vm2618_vm9 }
0x122b   :  { %v2614_v32 = vsub.f32 1.0, %v2613_v50 }
0x122c   :  { %6025 = vrcp.f32 %v2595_v1  ;;  %v2608_v9 = vand.u32 2147483648, %v2595_v1  ;;  %vm2602_vm14 = vweird.f32 %v2595_v1  ;;  %v2606_v4 = vand.u32 2147483647, %v2595_v1 }
0x122d   :  { %v2615_v14 = vmul.f32 %v6022_v27, %v2614_v32 }
0x122e   :  { %v2609_v34 = vor.u32 1.1754944e-38, %v2608_v9  ;;  %vm2607_vm0 = vcmp.eq.f32.partialorder %v2606_v4, 8.507059e+37 }
0x122f   :  { %v2616_v41 = vadd.f32 %v6022_v27, %v2615_v14 }
0x1231   :  { %v2620_v36 = vsel %vm2619_vm11, %v6022_v27, %v2616_v41 }
0x1232   :  { %v6026_v49 = vpop.eup %6025  ;;  %v7291_v0 = vsel %vm2622_vm12, %v2624_v12, %v2620_v36 }
0x1233   :  { %v2598_v61 = vmul.f32 %v6026_v49, %v2595_v1  ;;  %vm2603_vm13 = vweird.f32 %v6026_v49 }
0x1234   :  { %vm2604_vm15 = vmor %vm2602_vm14, %vm2603_vm13 }
0x1235   :  { %v2599_v3 = vsub.f32 1.0, %v2598_v61 }
0x1237   :  { %v2600_v5 = vmul.f32 %v6026_v49, %v2599_v3 }
0x1239   :  { %v2601_v6 = vadd.f32 %v6026_v49, %v2600_v5 }
0x123b   :  { %v2605_v39 = vsel %vm2604_vm15, %v6026_v49, %v2601_v6 }
0x123c   :  { %v7302_v22 = vsel %vm2607_vm0, %v2609_v34, %v2605_v39 }
0x1269   :  { %v2384_v52 = vpop.permute.xlu1 %2383 }
0x126a   :  { %2388 = vst.msk [vmem:[#allocation5 + $0x8] sm:$0xff] %vm349_vm1, %v2384_v52 }
0x126b   :  { %2421 = vst.msk [vmem:[#allocation3 + $0x68] sm:$0xff] %vm349_vm1, %v2384_v52 }
0x1271   :  { %v2428_v40 = vld [vmem:[#allocation5 + $0x8] sm:$0xff] }
0x1272   :  { %v2747_v35 = vld [vmem:[#allocation3 + $0x68] sm:$0xff] }
0x1278   :  { %v2644_v30 = vpop.permute.xlu2 %2643 }
0x1279   :  { %v2648_v45 = vmul.f32 %v2644_v30, %v7291_v0  ;;  %v2382_v31 = vpop.permute.xlu0 %2381 }
0x127a   :  { %2387 = vst.msk [vmem:[#allocation5] sm:$0xff] %vm349_vm1, %v2382_v31 }
0x127b   :  { %2420 = vst.msk [vmem:[#allocation3 + $0x60] sm:$0xff] %vm349_vm1, %v2382_v31  ;;  %2653 = vrot.lane.b32.xlu0 %v2648_v45, %s6439_s24 }
0x1281   :  { %v2414_v59 = vpop.permute.xlu0 %2413  ;;  %v2427_v2 = vld [vmem:[#allocation5] sm:$0xff] }
0x1282   :  { %2418 = vst.msk [vmem:[#allocation8 + $0x8] sm:$0xff] %vm349_vm1, %v2414_v59  ;;  %5630 = vmatmul.msk.f32.vlgmr.msrb.gmra.mxu2 %vm349_vm1, %v2427_v2  ;;  %v2746_v24 = vld [vmem:[#allocation3 + $0x60] sm:$0xff] }
0x1283   :  { %5702 = vmatmul.msk.f32.gmra.mxu3 %vm349_vm1, %v2746_v24  ;;  %2391 = vrot.lane.b32.xlu0 %v7214_v55, %s6441_s2 }
0x1288   :  { %v2642_v51 = vpop.permute.xlu1 %2641 }
0x1289   :  { %v2647_v53 = vmul.f32 %v2642_v51, %v7302_v22  ;;  %v2588_v21 = vld [vmem:[#allocation8 + $0x8] sm:$0xff]  ;;  %v2632_v55 = vpop.permute.xlu0 %2631 }
0x128a   :  { %2633 = vrot.lane.b32.xlu2 %v2588_v21, %s6439_s24  ;;  %5631 = vmatmul.msk.f32.gmra.mxu2 %vm349_vm1, %v2428_v40  ;;  %v2780_v21 = vld [vmem:[#allocation14 + $0x70] sm:$0xff]  ;;  %v2781_v40 = vld [vmem:[#allocation14 + $0x78] sm:$0xff] }
0x128b   :  { %5703 = vmatmul.msk.f32.gmra.mxu3 %vm349_vm1, %v2747_v35  ;;  %2651 = vrot.lane.b32.xlu1 %v2647_v53, %s6439_s24 }
0x128c   :  { %2842 = vmatpush.msrb.mxu0 %v2780_v21  ;;  %2907 = vmatpush.msrb.mxu1 %v2781_v40  ;;  %v7484_v40 = vpop.f32.mrf.mxu3 }
0x128d   :  { %8167 = vst [vmem:[#allocation22_spill] sm:$0xff] %v7484_v40 }
0x1292   :  { %5674 = vmatmul.msk.f32.vlgmr.msra.gmra.mxu2 %vm349_vm1, %v7224_v28 }
0x129a   :  { %5675 = vmatmul.msk.f32.gmra.mxu2 %vm349_vm1, %v7229_v10 }
0x12a2   :  { %5676 = vmatmul.msk.f32.gmra.mxu2 %vm349_vm1, %v7235_v54 }
0x12aa   :  { %5677 = vmatmul.msk.f32.gmra.mxu2 %vm349_vm1, %v7239_v11 }
0x12b2   :  { %5678 = vmatmul.msk.f32.gmra.mxu2 %vm349_vm1, %v7243_v15 }
0x12ba   :  { %5679 = vmatmul.msk.f32.gmra.mxu2 %vm349_vm1, %v7247_v29 }
0x12c2   :  { %5680 = vmatmul.msk.f32.gmra.mxu2 %vm349_vm1, %v7251_v8  ;;  %v2637_v8 = vmul.f32 %v2632_v55, %v7302_v22  ;;  %v2779_v55 = vld [vmem:[#allocation14 + $0x68] sm:$0xff] }
0x12c3   :  { %2908 = vmatpush.msrb.mxu1 %v2779_v55 }
0x12ca   :  { %5681 = vmatmul.msk.f32.gmra.mxu2 %vm349_vm1, %v7255_v56 }
0x12d2   :  { %5682 = vmatmul.msk.f32.gmra.mxu2 %vm349_vm1, %v7259_v16  ;;  %v246_v16 = vpop.f32.mrf.mxu0 }
0x12da   :  { %5683 = vmatmul.msk.f32.gmra.mxu2 %vm349_vm1, %v7263_v18  ;;  %v249_v47 = vpop.f32.mrf.mxu0 }
0x12db   :  { %v250_v44 = vadd.f32 %v249_v47, %v6732_v37 }
0x12e2   :  { %5684 = vmatmul.msk.f32.gmra.mxu2 %vm349_vm1, %v7267_v38  ;;  %v247_v38 = vadd.f32 %v246_v16, %v6732_v37 }
0x12e4   :  { %v2634_v28 = vpop.permute.xlu2 %2633 }
0x12e5   :  { %v2638_v10 = vmul.f32 %v2634_v28, %v7291_v0  ;;  %v2776_v28 = vld [vmem:[#allocation14 + $0x50] sm:$0xff] }
0x12ea   :  { %5685 = vmatmul.msk.f32.gmra.mxu2 %vm349_vm1, %v7271_v58 }
0x12ed   :  { %v2654_v54 = vpop.permute.xlu0 %2653 }
0x12ee   :  { %v7334_v11 = vadd.f32 %v2654_v54, %v2638_v10  ;;  %v2777_v10 = vld [vmem:[#allocation14 + $0x58] sm:$0xff]  ;;  %v2774_v54 = vld [vmem:[#allocation14 + $0x40] sm:$0xff] }
0x12ef   :  { %2909 = vmatpush.msrb.mxu1 %v2777_v10 }
0x12f0   :  { %6027 = vtanh.f32 %v7334_v11 }
0x12f2   :  { %5686 = vmatmul.msk.f32.gmra.mxu2 %vm349_vm1, %v2746_v24 }
0x12f5   :  { %v2392_v15 = vpop.permute.xlu0 %2391 }
0x12f6   :  { %v6028_v29 = vpop.eup %6027  ;;  %2397 = vst.msk [vmem:[#allocation6] sm:$0xff] %vm349_vm1, %v2392_v15  ;;  %v2775_v15 = vld [vmem:[#allocation14 + $0x48] sm:$0xff] }
0x12f7   :  { %2665 = vrot.lane.b32.xlu2 %v6028_v29, %s6440_s4  ;;  %2910 = vmatpush.msrb.mxu1 %v2775_v15  ;;  %v7499_v15 = vpop.f32.mrf.mxu3 }
0x12f8   :  { %8168 = vst [vmem:[#allocation23_spill] sm:$0xff] %v7499_v15 }
0x12fa   :  { %5687 = vmatmul.msk.f32.gmra.mxu2 %vm349_vm1, %v2747_v35  ;;  %v2778_v35 = vld [vmem:[#allocation14 + $0x60] sm:$0xff] }
0x12fb   :  { %2843 = vmatpush.msrb.mxu0 %v2778_v35 }
0x12fd   :  { %v2652_v56 = vpop.permute.xlu1 %2651  ;;  %v2503_v7 = vld [vmem:[#allocation6] sm:$0xff]  ;;  %2844 = vmatpush.msrb.mxu0 %v2776_v28 }
0x12fe   :  { %v7342_v18 = vadd.f32 %v2652_v56, %v2637_v8 }
0x12ff   :  { %2845 = vmatpush.msrb.mxu0 %v2774_v54 }
0x1300   :  { %6029 = vtanh.f32 %v7342_v18 }
0x1305   :  { %v2456_v58 = vpop.f32.mrf.mxu2 }
0x1306   :  { %v6030_v42 = vpop.eup %6029  ;;  %v2462_v46 = vadd.f32 %v2456_v58, %v247_v38 }
0x1307   :  { %2663 = vrot.lane.b32.xlu1 %v6030_v42, %s6440_s4 }
0x1308   :  { %6031 = vtanh.f32 %v2462_v46  ;;  %v5634_v43 = vmul.f32 -1.442695, %v2462_v46 }
0x130d   :  { %v2459_v48 = vpop.f32.mrf.mxu2 }
0x130e   :  { %v6032_v23 = vpop.eup %6031  ;;  %v2463_v26 = vadd.f32 %v2459_v48, %v250_v44 }
0x130f   :  { %2557 = vrot.lane.b32.xlu2 %v6032_v23, %s6440_s4  ;;  %2393 = vrot.lane.b32.xlu1 %v7219_v62, %s6441_s2 }
0x1310   :  { %6033 = vtanh.f32 %v2463_v26  ;;  %v5635_v37 = vmul.f32 -1.442695, %v2463_v26 }
0x1311   :  { %6035 = vpow2.f32 %v5634_v43  ;;  %v2763_v43 = vld [vmem:[#allocation4 + $0x28] sm:$0xff] }
0x1312   :  { %6037 = vpow2.f32 %v5635_v37  ;;  %v2764_v37 = vld [vmem:[#allocation4 + $0x30] sm:$0xff] }
0x1316   :  { %v6034_v20 = vpop.eup %6033 }
0x1317   :  { %2559 = vrot.lane.b32.xlu0 %v6034_v20, %s6440_s4  ;;  %v6036_v50 = vpop.eup %6035 }
0x1318   :  { %v2511_v1 = vadd.f32 1.0, %v6036_v50  ;;  %v6038_v62 = vpop.eup %6037  ;;  %v2765_v50 = vld [vmem:[#allocation4 + $0x38] sm:$0xff] }
0x1319   :  { %v2512_v52 = vadd.f32 1.0, %v6038_v62  ;;  %v2768_v62 = vld [vmem:[#allocation4 + $0x50] sm:$0xff] }
0x131a   :  { %6039 = vrcp.f32 %v2511_v1  ;;  %v2524_v36 = vand.u32 2147483648, %v2511_v1  ;;  %vm2518_vm3 = vweird.f32 %v2511_v1  ;;  %v2522_v61 = vand.u32 2147483647, %v2511_v1 }
0x131b   :  { %6041 = vrcp.f32 %v2512_v52  ;;  %v2539_v2 = vand.u32 2147483648, %v2512_v52  ;;  %vm2533_vm7 = vweird.f32 %v2512_v52  ;;  %v2537_v6 = vand.u32 2147483647, %v2512_v52 }
0x131c   :  { %vm2523_vm5 = vcmp.eq.f32.partialorder %v2522_v61, 8.507059e+37 }
0x131d   :  { %v2540_v9 = vor.u32 1.1754944e-38, %v2539_v2  ;;  %vm2538_vm9 = vcmp.eq.f32.partialorder %v2537_v6, 8.507059e+37  ;;  %v3259_v6 = vld [vmem:[%s8159_s7] sm:$0xff] }
0x131f   :  { %2547 = vrot.lane.b32.xlu0 %v2503_v7, %s6439_s24  ;;  %v2760_v7 = vld [vmem:[#allocation4 + $0x10] sm:$0xff] }
0x1320   :  { %v6040_v32 = vpop.eup %6039 }
0x1321   :  { %v2514_v19 = vmul.f32 %v6040_v32, %v2511_v1  ;;  %v6042_v14 = vpop.eup %6041  ;;  %vm2519_vm2 = vweird.f32 %v6040_v32  ;;  %v2766_v1 = vld [vmem:[#allocation4 + $0x40] sm:$0xff] }
0x1322   :  { %v2529_v57 = vmul.f32 %v6042_v14, %v2512_v52  ;;  %vm2520_vm4 = vmor %vm2518_vm3, %vm2519_vm2  ;;  %vm2534_vm6 = vweird.f32 %v6042_v14  ;;  %v2769_v52 = vld [vmem:[#allocation4 + $0x58] sm:$0xff] }
0x1323   :  { %v2515_v17 = vsub.f32 1.0, %v2514_v19  ;;  %vm2535_vm8 = vmor %vm2533_vm7, %vm2534_vm6  ;;  %v2771_v19 = vld [vmem:[#allocation4 + $0x68] sm:$0xff] }
0x1324   :  { %v2530_v25 = vsub.f32 1.0, %v2529_v57  ;;  %v2772_v57 = vld [vmem:[#allocation4 + $0x70] sm:$0xff] }
0x1325   :  { %v2516_v33 = vmul.f32 %v6040_v32, %v2515_v17  ;;  %v3223_v17 = vld [vmem:[#allocation16 + $0x18] sm:$0xff] }
0x1326   :  { %v2531_v30 = vmul.f32 %v6042_v14, %v2530_v25  ;;  %3242 = vmatpush.msra.mxu0 %v3223_v17  ;;  %3528 = vmatpush.msrb.mxu2 %v3223_v17 }
0x1327   :  { %v2517_v49 = vadd.f32 %v6040_v32, %v2516_v33 }
0x1328   :  { %v2532_v59 = vadd.f32 %v6042_v14, %v2531_v30 }
0x1329   :  { %v2521_v12 = vsel %vm2520_vm4, %v6040_v32, %v2517_v49  ;;  %v2770_v32 = vld [vmem:[#allocation4 + $0x60] sm:$0xff]  ;;  %v2773_v49 = vld [vmem:[#allocation4 + $0x78] sm:$0xff] }
0x132a   :  { %v2536_v24 = vsel %vm2535_vm8, %v6042_v14, %v2532_v59  ;;  %v3260_v59 = vld [vmem:[%s8159_s7 + $0x8] sm:$0xff] }
0x132b   :  { %v7362_v39 = vsel %vm2538_vm9, %v2540_v9, %v2536_v24 }
0x1351   :  { %v2666_v63 = vpop.permute.xlu2 %2665 }
0x1352   :  { %v2670_v27 = vmul.f32 %v2666_v63, %v7291_v0  ;;  %v2525_v0 = vor.u32 1.1754944e-38, %v2524_v36  ;;  %v2761_v63 = vld [vmem:[#allocation4 + $0x18] sm:$0xff] }
0x1354   :  { %2695 = vrot.lane.b32.xlu2 %v2670_v27, %s6439_s24  ;;  %v7357_v31 = vsel %vm2523_vm5, %v2525_v0, %v2521_v12  ;;  %v2762_v27 = vld [vmem:[#allocation4 + $0x20] sm:$0xff]  ;;  %v3222_v12 = vld [vmem:[#allocation16 + $0x10] sm:$0xff]  ;;  %v3221_v0 = vld [vmem:[#allocation16 + $0x8] sm:$0xff] }
0x1355   :  { %3243 = vmatpush.msra.mxu0 %v3222_v12  ;;  %3529 = vmatpush.msrb.mxu2 %v3222_v12 }
0x1357   :  { %3244 = vmatpush.msra.mxu0 %v3221_v0  ;;  %3530 = vmatpush.msrb.mxu2 %v3221_v0 }
0x1369   :  { %v2558_v45 = vpop.permute.xlu2 %2557 }
0x136a   :  { %v2563_v5 = vmul.f32 %v2558_v45, %v7357_v31  ;;  %v3220_v45 = vld [vmem:[#allocation16] sm:$0xff] }
0x136b   :  { %3245 = vmatpush.msra.mxu0 %v3220_v45  ;;  %3531 = vmatpush.msrb.mxu2 %v3220_v45 }
0x1379   :  { %v2664_v41 = vpop.permute.xlu1 %2663 }
0x137a   :  { %v2669_v60 = vmul.f32 %v2664_v41, %v7302_v22 }
0x137c   :  { %2693 = vrot.lane.b32.xlu1 %v2669_v60, %s6439_s24 }
0x1381   :  { %v2394_v3 = vpop.permute.xlu1 %2393 }
0x1382   :  { %2398 = vst.msk [vmem:[#allocation6 + $0x8] sm:$0xff] %vm349_vm1, %v2394_v3  ;;  %v3261_v3 = vld [vmem:[%s8159_s7 + $0x10] sm:$0xff] }
0x1384   :  { %2567 = vrot.lane.b32.xlu1 %v2563_v5, %s6439_s24 }
0x1389   :  { %v2560_v4 = vpop.permute.xlu0 %2559  ;;  %v2504_v34 = vld [vmem:[#allocation6 + $0x8] sm:$0xff] }
0x138a   :  { %v2564_v22 = vmul.f32 %v2560_v4, %v7362_v39  ;;  %2549 = vrot.lane.b32.xlu2 %v2504_v34, %s6439_s24 }
0x138c   :  { %2569 = vrot.lane.b32.xlu0 %v2564_v22, %s6439_s24 }
0x1391   :  { %v2548_v8 = vpop.permute.xlu0 %2547 }
0x1392   :  { %v2553_v56 = vmul.f32 %v2548_v8, %v7357_v31 }
0x13ae   :  { %v2696_v51 = vpop.permute.xlu2 %2695 }
0x13af   :  { %2700 = vst.msk [vmem:[#allocation7 + $0x8] sm:$0xff] %vm349_vm1, %v2696_v51 }
0x13b0   :  { %2715 = vst.msk [vmem:[#allocation4 + $0x8] sm:$0xff] %vm349_vm1, %v2696_v51 }
0x13b6   :  { %v2721_v53 = vld [vmem:[#allocation7 + $0x8] sm:$0xff] }
0x13b7   :  { %5639 = vst.msk [vmem:[%s8161_s9 + $0x18] sm:$0xff] %vm349_vm1, %v2721_v53  ;;  %v2759_v26 = vld [vmem:[#allocation4 + $0x8] sm:$0xff] }
0x13b8   :  { %3213 = vst.msk [vmem:[#allocation7 + $0x8] sm:$0xff] %vm349_vm1, %v6438_v13 }
0x13bf   :  { %v3258_v34 = vld [vmem:[#allocation7 + $0x8] sm:$0xff] }
0x13e4   :  { %v2550_v46 = vpop.permute.xlu2 %2549 }
0x13e5   :  { %v2554_v47 = vmul.f32 %v2550_v46, %v7362_v39 }
0x13ee   :  { %v2694_v29 = vpop.permute.xlu1 %2693 }
0x13ef   :  { %2699 = vst.msk [vmem:[#allocation7] sm:$0xff] %vm349_vm1, %v2694_v29 }
0x13f0   :  { %2714 = vst.msk [vmem:[#allocation4] sm:$0xff] %vm349_vm1, %v2694_v29 }
0x13f6   :  { %v2720_v16 = vld [vmem:[#allocation7] sm:$0xff]  ;;  %v2568_v38 = vpop.permute.xlu1 %2567 }
0x13f7   :  { %5638 = vst.msk [vmem:[%s8161_s9 + $0x10] sm:$0xff] %vm349_vm1, %v2720_v16  ;;  %v2573_v58 = vadd.f32 %v2568_v38, %v2553_v56  ;;  %v2758_v42 = vld [vmem:[#allocation4] sm:$0xff] }
0x13f8   :  { %3212 = vst.msk [vmem:[#allocation7] sm:$0xff] %vm349_vm1, %v6438_v13  ;;  %5642 = vmatmul.msk.f32.vlgmr.msrb.gmra.mxu0 %vm349_vm1, %v2758_v42  ;;  %5658 = vmatmul.msk.f32.vlgmr.msrb.gmra.mxu1 %vm349_vm1, %v2758_v42  ;;  %v7514_v42 = vpop.f32.mrf.mxu3 }
0x13f9   :  { %6043 = vtanh.f32 %v2573_v58  ;;  %3814 = vmatpush.msrb.mxu0 %v3223_v17 }
0x13fb   :  { %3815 = vmatpush.msrb.mxu0 %v3222_v12 }
0x13fd   :  { %3816 = vmatpush.msrb.mxu0 %v3221_v0 }
0x13fe   :  { %v2570_v44 = vpop.permute.xlu0 %2569 }
0x13ff   :  { %v6044_v48 = vpop.eup %6043  ;;  %v2574_v23 = vadd.f32 %v2570_v44, %v2554_v47  ;;  %3817 = vmatpush.msrb.mxu0 %v3220_v45  ;;  %v3257_v24 = vld [vmem:[#allocation7] sm:$0xff]  ;;  %v3025_v45 = vpop.f32.mrf.mxu2 }
0x1400   :  { %5643 = vmatmul.msk.f32.gmra.mxu0 %vm349_vm1, %v2759_v26  ;;  %5659 = vmatmul.msk.f32.gmra.mxu1 %vm349_vm1, %v2759_v26  ;;  %v7521_v44 = vpop.f32.mrf.mxu3 }
0x1401   :  { %6045 = vtanh.f32 %v2574_v23  ;;  %2579 = vrot.lane.b32.xlu1 %v6044_v48, %s6440_s4  ;;  %8169 = vst [vmem:[#allocation24_spill] sm:$0xff] %v7521_v44 }
0x1407   :  { %v6046_v20 = vpop.eup %6045 }
0x1408   :  { %5644 = vmatmul.msk.f32.gmra.mxu0 %vm349_vm1, %v2760_v7  ;;  %5660 = vmatmul.msk.f32.gmra.mxu1 %vm349_vm1, %v2760_v7  ;;  %v7527_v26 = vpop.f32.mrf.mxu3 }
0x1409   :  { %2581 = vrot.lane.b32.xlu2 %v6046_v20, %s6440_s4 }
0x1410   :  { %5645 = vmatmul.msk.f32.gmra.mxu0 %vm349_vm1, %v2761_v63  ;;  %5661 = vmatmul.msk.f32.gmra.mxu1 %vm349_vm1, %v2761_v63  ;;  %v7533_v7 = vpop.f32.mrf.mxu3 }
0x1411   :  { %2683 = vrot.lane.b32.xlu2 %v2573_v58, %s6441_s2 }
0x1418   :  { %5646 = vmatmul.msk.f32.gmra.mxu0 %vm349_vm1, %v2762_v27  ;;  %5662 = vmatmul.msk.f32.gmra.mxu1 %vm349_vm1, %v2762_v27 }
0x1419   :  { %2705 = vrot.lane.b32.xlu2 %v7334_v11, %s6441_s2  ;;  %v2767_v11 = vld [vmem:[#allocation4 + $0x48] sm:$0xff] }
0x1420   :  { %5647 = vmatmul.msk.f32.gmra.mxu0 %vm349_vm1, %v2763_v43  ;;  %5663 = vmatmul.msk.f32.gmra.mxu1 %vm349_vm1, %v2763_v43  ;;  %v7539_v43 = vpop.f32.mrf.mxu3 }
0x1428   :  { %5648 = vmatmul.msk.f32.gmra.mxu0 %vm349_vm1, %v2764_v37  ;;  %5664 = vmatmul.msk.f32.gmra.mxu1 %vm349_vm1, %v2764_v37 }
0x1430   :  { %5649 = vmatmul.msk.f32.gmra.mxu0 %vm349_vm1, %v2765_v50  ;;  %5665 = vmatmul.msk.f32.gmra.mxu1 %vm349_vm1, %v2765_v50 }
0x1438   :  { %5650 = vmatmul.msk.f32.gmra.mxu0 %vm349_vm1, %v2766_v1  ;;  %5666 = vmatmul.msk.f32.gmra.mxu1 %vm349_vm1, %v2766_v1  ;;  %v7545_v1 = vpop.f32.mrf.mxu3 }
0x1440   :  { %5651 = vmatmul.msk.f32.gmra.mxu0 %vm349_vm1, %v2767_v11  ;;  %5667 = vmatmul.msk.f32.gmra.mxu1 %vm349_vm1, %v2767_v11 }
0x1448   :  { %5652 = vmatmul.msk.f32.gmra.mxu0 %vm349_vm1, %v2768_v62  ;;  %5668 = vmatmul.msk.f32.gmra.mxu1 %vm349_vm1, %v2768_v62 }
0x1450   :  { %5653 = vmatmul.msk.f32.gmra.mxu0 %vm349_vm1, %v2769_v52  ;;  %5669 = vmatmul.msk.f32.gmra.mxu1 %vm349_vm1, %v2769_v52  ;;  %v7551_v52 = vpop.f32.mrf.mxu3 }
0x1458   :  { %5654 = vmatmul.msk.f32.gmra.mxu0 %vm349_vm1, %v2770_v32  ;;  %5670 = vmatmul.msk.f32.gmra.mxu1 %vm349_vm1, %v2770_v32  ;;  %v7557_v17 = vpop.f32.mrf.mxu3 }
0x1460   :  { %5655 = vmatmul.msk.f32.gmra.mxu0 %vm349_vm1, %v2771_v19  ;;  %5671 = vmatmul.msk.f32.gmra.mxu1 %vm349_vm1, %v2771_v19 }
0x1463   :  { %v2582_v14 = vpop.permute.xlu2 %2581 }
0x1464   :  { %v2586_v33 = vmul.f32 %v2582_v14, %v7362_v39 }
0x1466   :  { %2675 = vrot.lane.b32.xlu1 %v2586_v33, %s6439_s24 }
0x1468   :  { %5656 = vmatmul.msk.f32.gmra.mxu0 %vm349_vm1, %v2772_v57  ;;  %5672 = vmatmul.msk.f32.gmra.mxu1 %vm349_vm1, %v2772_v57  ;;  %v7563_v57 = vpop.f32.mrf.mxu3 }
0x146b   :  { %v2684_v41 = vpop.permute.xlu2 %2683 }
0x146c   :  { %2689 = vst.msk [vmem:[#allocation6] sm:$0xff] %vm349_vm1, %v2684_v41 }
0x146e   :  { %2685 = vrot.lane.b32.xlu1 %v2574_v23, %s6441_s2 }
0x1470   :  { %5657 = vmatmul.msk.f32.gmra.mxu0 %vm349_vm1, %v2773_v49  ;;  %5673 = vmatmul.msk.f32.gmra.mxu1 %vm349_vm1, %v2773_v49 }
0x1473   :  { %v2725_v60 = vld [vmem:[#allocation6] sm:$0xff]  ;;  %v2706_v25 = vpop.permute.xlu2 %2705  ;;  %v2580_v36 = vpop.permute.xlu1 %2579 }
0x1474   :  { %2727 = vst.msk [vmem:[%s8162_s10] sm:$0xff] %vm349_vm1, %v2725_v60  ;;  %v2585_v61 = vmul.f32 %v2580_v36, %v7357_v31  ;;  %v3262_v31 = vld [vmem:[%s8159_s7 + $0x18] sm:$0xff]  ;;  %v7569_v60 = vpop.f32.mrf.mxu3 }
0x1475   :  { %3210 = vst.msk [vmem:[#allocation6] sm:$0xff] %vm349_vm1, %v6438_v13  ;;  %3281 = vmatpush.msra.mxu1 %v3262_v31  ;;  %3567 = vmatpush.msrb.mxu3 %v3262_v31  ;;  %v7455_v2 = vpop.f32.mrf.mxu0 }
0x1476   :  { %2710 = vst.msk [vmem:[#allocation8 + $0x8] sm:$0xff] %vm349_vm1, %v2706_v25  ;;  %2673 = vrot.lane.b32.xlu0 %v2585_v61, %s6439_s24 }
0x1477   :  { %3282 = vmatpush.msra.mxu1 %v3261_v3  ;;  %3568 = vmatpush.msrb.mxu3 %v3261_v3 }
0x1479   :  { %3283 = vmatpush.msra.mxu1 %v3260_v59  ;;  %3569 = vmatpush.msrb.mxu3 %v3260_v59 }
0x147b   :  { %3284 = vmatpush.msra.mxu1 %v3259_v6  ;;  %3570 = vmatpush.msrb.mxu3 %v3259_v6 }
0x147c   :  { %5708 = vmatmul.msk.f32.vlgmr.msra.gmra.mxu1 %vm349_vm1, %v3257_v24  ;;  %v7573_v36 = vpop.f32.mrf.mxu3 }
0x147d   :  { %v2730_v30 = vld [vmem:[#allocation8 + $0x8] sm:$0xff]  ;;  %3853 = vmatpush.msrb.mxu1 %v3262_v31  ;;  %v7471_v22 = vpop.f32.mrf.mxu0 }
0x147e   :  { %5641 = vst.msk [vmem:[%s8162_s10 + $0x18] sm:$0xff] %vm349_vm1, %v2730_v30  ;;  %2703 = vrot.lane.b32.xlu0 %v7342_v18, %s6441_s2  ;;  %v7446_v18 = vpop.f32.mrf.mxu1 }
0x147f   :  { %3215 = vst.msk [vmem:[#allocation8 + $0x8] sm:$0xff] %vm349_vm1, %v6438_v13  ;;  %3854 = vmatpush.msrb.mxu1 %v3261_v3  ;;  %v3138_v3 = vld [vmem:[%s8160_s8] sm:$0x3] }
0x1480   :  { %8165 = vst [vmem:[#allocation20_spill] sm:$0xff] %v7446_v18 }
0x1481   :  { %3855 = vmatpush.msrb.mxu1 %v3260_v59  ;;  %v7585_v59 = vperm.slane %v3138_v3, 0 }
0x1483   :  { %3856 = vmatpush.msrb.mxu1 %v3259_v6 }
0x1484   :  { %5709 = vmatmul.msk.f32.gmra.mxu1 %vm349_vm1, %v3258_v34  ;;  %v7577_v30 = vpop.f32.mrf.mxu3 }
0x1485   :  { %v7486_v35 = vpop.f32.mrf.mxu0 }
0x1486   :  { %v7462_v39 = vpop.f32.mrf.mxu1 }
0x1487   :  { %8166 = vst [vmem:[#allocation21_spill] sm:$0xff] %v7462_v39 }
0x148d   :  { %v7501_v29 = vpop.f32.mrf.mxu0 }
0x148e   :  { %v7476_v21 = vpop.f32.mrf.mxu1 }
0x1495   :  { %v7516_v46 = vpop.f32.mrf.mxu0 }
0x1496   :  { %v7497_v54 = vpop.f32.mrf.mxu1 }
0x149d   :  { %v7523_v48 = vpop.f32.mrf.mxu0 }
0x149e   :  { %v7512_v38 = vpop.f32.mrf.mxu1 }
0x14a6   :  { %v7519_v47 = vpop.f32.mrf.mxu1 }
0x14ae   :  { %v7525_v23 = vpop.f32.mrf.mxu1 }
0x14b6   :  { %v7531_v20 = vpop.f32.mrf.mxu1 }
0x14be   :  { %v7537_v27 = vpop.f32.mrf.mxu1 }
0x14c6   :  { %v7543_v50 = vpop.f32.mrf.mxu1 }
0x14ce   :  { %v7549_v62 = vpop.f32.mrf.mxu1 }
0x14d6   :  { %v7555_v19 = vpop.f32.mrf.mxu1 }
0x14d8   :  { %v2676_v5 = vpop.permute.xlu1 %2675 }
0x14d9   :  { %2680 = vst.msk [vmem:[#allocation5 + $0x8] sm:$0xff] %vm349_vm1, %v2676_v5 }
0x14da   :  { %2713 = vst.msk [vmem:[#allocation3 + $0x78] sm:$0xff] %vm349_vm1, %v2676_v5  ;;  %v3026_v5 = vadd.f32 %v3025_v45, %v7455_v2 }
0x14dc   :  { %v3144_v34 = vadd.f32 %v7585_v59, %v3026_v5 }
0x14de   :  { %v7561_v33 = vpop.f32.mrf.mxu1 }
0x14e0   :  { %v2717_v9 = vld [vmem:[#allocation5 + $0x8] sm:$0xff]  ;;  %v2686_v4 = vpop.permute.xlu1 %2685 }
0x14e1   :  { %2719 = vst.msk [vmem:[%s8161_s9 + $0x8] sm:$0xff] %vm349_vm1, %v2717_v9  ;;  %v2749_v8 = vld [vmem:[#allocation3 + $0x78] sm:$0xff] }
0x14e2   :  { %3209 = vst.msk [vmem:[#allocation5 + $0x8] sm:$0xff] %vm349_vm1, %v6438_v13 }
0x14e3   :  { %2690 = vst.msk [vmem:[#allocation6 + $0x8] sm:$0xff] %vm349_vm1, %v2686_v4  ;;  %v7587_v4 = vperm.slane %v3138_v3, 1 }
0x14e6   :  { %v7567_v49 = vpop.f32.mrf.mxu1 }
0x14e8   :  { %v2674_v51 = vpop.permute.xlu0 %2673 }
0x14e9   :  { %2679 = vst.msk [vmem:[#allocation5] sm:$0xff] %vm349_vm1, %v2674_v51  ;;  %v3219_v58 = vld [vmem:[#allocation5 + $0x8] sm:$0xff] }
0x14ea   :  { %v2726_v53 = vld [vmem:[#allocation6 + $0x8] sm:$0xff]  ;;  %2712 = vst.msk [vmem:[#allocation3 + $0x70] sm:$0xff] %vm349_vm1, %v2674_v51 }
0x14eb   :  { %2728 = vst.msk [vmem:[%s8162_s10 + $0x8] sm:$0xff] %vm349_vm1, %v2726_v53 }
0x14ec   :  { %3211 = vst.msk [vmem:[#allocation6 + $0x8] sm:$0xff] %vm349_vm1, %v6438_v13 }
0x14ee   :  { %v2954_v61 = vpop.f32.mrf.mxu1 }
0x14f0   :  { %v2716_v55 = vld [vmem:[#allocation5] sm:$0xff]  ;;  %v2704_v28 = vpop.permute.xlu0 %2703 }
0x14f1   :  { %2718 = vst.msk [vmem:[%s8161_s9] sm:$0xff] %vm349_vm1, %v2716_v55  ;;  %v2748_v10 = vld [vmem:[#allocation3 + $0x70] sm:$0xff] }
0x14f2   :  { %3208 = vst.msk [vmem:[#allocation5] sm:$0xff] %vm349_vm1, %v6438_v13  ;;  %5688 = vmatmul.msk.f32.gmra.mxu2 %vm349_vm1, %v2748_v10  ;;  %5704 = vmatmul.msk.f32.gmra.mxu3 %vm349_vm1, %v2748_v10 }
0x14f3   :  { %2709 = vst.msk [vmem:[#allocation8] sm:$0xff] %vm349_vm1, %v2704_v28  ;;  %v3028_v28 = vpop.f32.mrf.mxu2 }
0x14f6   :  { %v2957_v0 = vpop.f32.mrf.mxu1 }
0x14f9   :  { %v3218_v56 = vld [vmem:[#allocation5] sm:$0xff] }
0x14fa   :  { %v2729_v16 = vld [vmem:[#allocation8] sm:$0xff]  ;;  %5689 = vmatmul.msk.f32.gmra.mxu2 %vm349_vm1, %v2749_v8  ;;  %5705 = vmatmul.msk.f32.gmra.mxu3 %vm349_vm1, %v2749_v8  ;;  %v3029_v8 = vadd.f32 %v3028_v28, %v7471_v22 }
0x14fb   :  { %5640 = vst.msk [vmem:[%s8162_s10 + $0x10] sm:$0xff] %vm349_vm1, %v2729_v16  ;;  %5706 = vmatmul.msk.f32.vlgmr.msra.gmra.mxu0 %vm349_vm1, %v3218_v56  ;;  %v3294_v22 = vld [vmem:[#allocation6] sm:$0xff] }
0x14fc   :  { %3214 = vst.msk [vmem:[#allocation8] sm:$0xff] %vm349_vm1, %v6438_v13  ;;  %v7529_v13 = vpop.f32.mrf.mxu0  ;;  %v3146_v16 = vadd.f32 %v7585_v59, %v3029_v8 }
0x14fe   :  { %v3286_v24 = vpop.f32.mrf.mxu1 }
0x1503   :  { %5707 = vmatmul.msk.f32.gmra.mxu0 %vm349_vm1, %v3219_v58 }
0x1504   :  { %v7535_v63 = vpop.f32.mrf.mxu0 }
0x1506   :  { %v3289_v58 = vpop.f32.mrf.mxu1 }
0x150c   :  { %v7541_v37 = vpop.f32.mrf.mxu0 }
0x1514   :  { %v7547_v11 = vpop.f32.mrf.mxu0 }
0x151c   :  { %v7553_v32 = vpop.f32.mrf.mxu0 }
0x1524   :  { %v7559_v14 = vpop.f32.mrf.mxu0 }
0x152c   :  { %v7565_v41 = vpop.f32.mrf.mxu0 }
0x1534   :  { %v7571_v25 = vpop.f32.mrf.mxu0 }
0x153c   :  { %v7575_v12 = vpop.f32.mrf.mxu0 }
0x153d   :  { %8170 = vst [vmem:[#allocation25_spill] sm:$0xff] %v7575_v12 }
0x1544   :  { %v7579_v31 = vpop.f32.mrf.mxu0 }
0x1545   :  { %8171 = vst [vmem:[#allocation26_spill] sm:$0xff] %v7579_v31 }
0x1575   :  { %v3132_v6 = vpop.f32.mrf.mxu3 }
0x1576   :  { %v3133_v9 = vadd.f32 %v3132_v6, %v2954_v61 }
0x1578   :  { %v3247_v51 = vpop.f32.mrf.mxu0  ;;  %v3173_v53 = vadd.f32 %v7587_v4, %v3133_v9 }
0x1579   :  { %v3253_v55 = vadd.f32 %v3247_v51, %v3144_v34  ;;  %v3295_v34 = vld [vmem:[#allocation6 + $0x8] sm:$0xff] }
0x157a   :  { %v3292_v10 = vadd.f32 %v3286_v24, %v3173_v53 }
0x157b   :  { %6047 = vtanh.f32 %v3253_v55  ;;  %v5710_v51 = vmul.f32 -1.442695, %v3253_v55 }
0x157c   :  { %6049 = vtanh.f32 %v3292_v10  ;;  %v5712_v53 = vmul.f32 -1.442695, %v3292_v10 }
0x157d   :  { %v3135_v2 = vpop.f32.mrf.mxu3 }
0x157e   :  { %v3136_v56 = vadd.f32 %v3135_v2, %v2957_v0  ;;  %v3378_v0 = vld [vmem:[#allocation8] sm:$0xff] }
0x1580   :  { %v3250_v61 = vpop.f32.mrf.mxu0  ;;  %v3175_v45 = vadd.f32 %v7587_v4, %v3136_v56 }
0x1581   :  { %v6048_v3 = vpop.eup %6047  ;;  %v3254_v5 = vadd.f32 %v3250_v61, %v3146_v16 }
0x1582   :  { %v6050_v6 = vpop.eup %6049  ;;  %v3293_v15 = vadd.f32 %v3289_v58, %v3175_v45  ;;  %3348 = vrot.lane.b32.xlu0 %v6048_v3, %s6440_s4 }
0x1583   :  { %6051 = vtanh.f32 %v3254_v5  ;;  %3432 = vrot.lane.b32.xlu1 %v6050_v6, %s6440_s4  ;;  %v5711_v28 = vmul.f32 -1.442695, %v3254_v5 }
0x1584   :  { %6053 = vtanh.f32 %v3293_v15  ;;  %v5713_v8 = vmul.f32 -1.442695, %v3293_v15 }
0x1585   :  { %6055 = vpow2.f32 %v5710_v51 }
0x1586   :  { %6057 = vpow2.f32 %v5712_v53 }
0x1587   :  { %6059 = vpow2.f32 %v5711_v28 }
0x1588   :  { %6061 = vpow2.f32 %v5713_v8 }
0x1589   :  { %v6052_v24 = vpop.eup %6051 }
0x158a   :  { %v6054_v9 = vpop.eup %6053  ;;  %3350 = vrot.lane.b32.xlu2 %v6052_v24, %s6440_s4 }
0x158b   :  { %3338 = vrot.lane.b32.xlu1 %v3294_v22, %s6439_s24  ;;  %3434 = vrot.lane.b32.xlu0 %v6054_v9, %s6440_s4  ;;  %v6056_v2 = vpop.eup %6055 }
0x158c   :  { %v6058_v56 = vpop.eup %6057  ;;  %v3302_v16 = vadd.f32 1.0, %v6056_v2 }
0x158d   :  { %v3386_v58 = vadd.f32 1.0, %v6058_v56  ;;  %v6060_v61 = vpop.eup %6059 }
0x158e   :  { %6063 = vrcp.f32 %v3302_v16  ;;  %v6062_v45 = vpop.eup %6061  ;;  %v7601_v3 = vadd.f32 1.0, %v6060_v61  ;;  %v3315_v2 = vand.u32 2147483648, %v3302_v16  ;;  %vm3309_vm12 = vweird.f32 %v3302_v16 }
0x158f   :  { %6065 = vrcp.f32 %v3386_v58  ;;  %v7603_v6 = vadd.f32 1.0, %v6062_v45  ;;  %v3399_v39 = vand.u32 2147483648, %v3386_v58  ;;  %v3313_v31 = vand.u32 2147483647, %v3302_v16 }
0x1590   :  { %6067 = vrcp.f32 %v7601_v3  ;;  %vm3393_vm13 = vweird.f32 %v3386_v58  ;;  %vm3324_vm5 = vweird.f32 %v7601_v3 }
0x1591   :  { %6069 = vrcp.f32 %v7603_v6  ;;  %v3400_v18 = vor.u32 1.1754944e-38, %v3399_v39  ;;  %vm3314_vm0 = vcmp.eq.f32.partialorder %v3313_v31, 8.507059e+37  ;;  %v3330_v39 = vand.u32 2147483648, %v7601_v3 }
0x1592   :  { %3422 = vrot.lane.b32.xlu2 %v3378_v0, %s6439_s24  ;;  %v3414_v31 = vand.u32 2147483648, %v7603_v6  ;;  %vm3408_vm7 = vweird.f32 %v7603_v6 }
0x1594   :  { %v6064_v55 = vpop.eup %6063 }
0x1595   :  { %v6066_v10 = vpop.eup %6065  ;;  %v3305_v15 = vmul.f32 %v6064_v55, %v3302_v16  ;;  %vm3310_vm10 = vweird.f32 %v6064_v55 }
0x1596   :  { %v3389_v5 = vmul.f32 %v6066_v10, %v3386_v58  ;;  %v6068_v24 = vpop.eup %6067  ;;  %vm3394_vm11 = vweird.f32 %v6066_v10  ;;  %vm3311_vm14 = vmor %vm3309_vm12, %vm3310_vm10 }
0x1597   :  { %v3306_v22 = vsub.f32 1.0, %v3305_v15  ;;  %v6070_v0 = vpop.eup %6069  ;;  %v3320_v51 = vmul.f32 %v6068_v24, %v7601_v3  ;;  %v3397_v15 = vand.u32 2147483647, %v3386_v58  ;;  %vm3395_vm15 = vmor %vm3393_vm13, %vm3394_vm11  ;;  %vm3325_vm3 = vweird.f32 %v6068_v24 }
0x1598   :  { %v3390_v9 = vsub.f32 1.0, %v3389_v5  ;;  %v3404_v28 = vmul.f32 %v6070_v0, %v7603_v6  ;;  %vm3409_vm4 = vweird.f32 %v6070_v0  ;;  %vm3326_vm6 = vmor %vm3324_vm5, %vm3325_vm3 }
0x1599   :  { %v3321_v56 = vsub.f32 1.0, %v3320_v51  ;;  %vm3398_vm2 = vcmp.eq.f32.partialorder %v3397_v15, 8.507059e+37  ;;  %vm3410_vm8 = vmor %vm3408_vm7, %vm3409_vm4 }
0x159a   :  { %3340 = vrot.lane.b32.xlu2 %v3295_v34, %s6439_s24  ;;  %v3307_v34 = vmul.f32 %v6064_v55, %v3306_v22  ;;  %v3391_v53 = vmul.f32 %v6066_v10, %v3390_v9  ;;  %v3405_v45 = vsub.f32 1.0, %v3404_v28  ;;  %v3316_v9 = vor.u32 1.1754944e-38, %v3315_v2 }
0x159b   :  { %v3322_v22 = vmul.f32 %v6068_v24, %v3321_v56  ;;  %v3331_v2 = vor.u32 1.1754944e-38, %v3330_v39  ;;  %v3415_v56 = vor.u32 1.1754944e-38, %v3414_v31 }
0x159c   :  { %v3308_v8 = vadd.f32 %v6064_v55, %v3307_v34  ;;  %v3392_v61 = vadd.f32 %v6066_v10, %v3391_v53  ;;  %v3406_v40 = vmul.f32 %v6070_v0, %v3405_v45 }
0x159d   :  { %v3323_v58 = vadd.f32 %v6068_v24, %v3322_v22 }
0x159e   :  { %v3312_v5 = vsel %vm3311_vm14, %v6064_v55, %v3308_v8  ;;  %v3396_v12 = vsel %vm3395_vm15, %v6066_v10, %v3392_v61  ;;  %v3407_v55 = vadd.f32 %v6070_v0, %v3406_v40  ;;  %v3379_v61 = vld [vmem:[#allocation8 + $0x8] sm:$0xff] }
0x159f   :  { %v7609_v34 = vsel %vm3314_vm0, %v3316_v9, %v3312_v5  ;;  %v7611_v53 = vsel %vm3398_vm2, %v3400_v18, %v3396_v12  ;;  %v3328_v18 = vand.u32 2147483647, %v7601_v3  ;;  %v3412_v12 = vand.u32 2147483647, %v7603_v6 }
0x15a0   :  { %v3327_v40 = vsel %vm3326_vm6, %v6068_v24, %v3323_v58  ;;  %v3411_v10 = vsel %vm3410_vm8, %v6070_v0, %v3407_v55 }
0x15a1   :  { %vm3329_vm9 = vcmp.eq.f32.partialorder %v3328_v18, 8.507059e+37  ;;  %vm3413_vm10 = vcmp.eq.f32.partialorder %v3412_v12, 8.507059e+37 }
0x15a2   :  { %v3332_v45 = vsel %vm3329_vm9, %v3331_v2, %v3327_v40  ;;  %v3416_v5 = vsel %vm3413_vm10, %v3415_v56, %v3411_v10 }
0x15e4   :  { %v3351_v8 = vpop.permute.xlu2 %3350 }
0x15e5   :  { %v3355_v22 = vmul.f32 %v3351_v8, %v3332_v45 }
0x15f4   :  { %v3349_v51 = vpop.permute.xlu0 %3348 }
0x15f5   :  { %v3354_v16 = vmul.f32 %v3349_v51, %v7609_v34  ;;  %v3433_v28 = vpop.permute.xlu1 %3432 }
0x15f6   :  { %v3438_v44 = vmul.f32 %v3433_v28, %v7611_v53 }
0x15f7   :  { %3358 = vrot.lane.b32.xlu0 %v3354_v16, %s6439_s24 }
0x15f8   :  { %3442 = vrot.lane.b32.xlu1 %v3438_v44, %s6439_s24  ;;  %v3423_v44 = vpop.permute.xlu2 %3422 }
0x15f9   :  { %v3428_v0 = vmul.f32 %v3423_v44, %v7611_v53 }
0x15fd   :  { %v3435_v15 = vpop.permute.xlu0 %3434  ;;  %v3339_v6 = vpop.permute.xlu1 %3338 }
0x15fe   :  { %v3439_v3 = vmul.f32 %v3435_v15, %v3416_v5  ;;  %v3344_v24 = vmul.f32 %v3339_v6, %v7609_v34 }
0x15ff   :  { %3424 = vrot.lane.b32.xlu0 %v3379_v61, %s6439_s24 }
0x1600   :  { %3444 = vrot.lane.b32.xlu2 %v3439_v3, %s6439_s24  ;;  %3360 = vrot.lane.b32.xlu1 %v3355_v22, %s6439_s24  ;;  %v3341_v28 = vpop.permute.xlu2 %3340 }
0x1601   :  { %v3345_v55 = vmul.f32 %v3341_v28, %v3332_v45 }
0x165a   :  { %v3445_v10 = vpop.permute.xlu2 %3444 }
0x1669   :  { %v3359_v9 = vpop.permute.xlu0 %3358 }
0x166a   :  { %v3364_v51 = vadd.f32 %v3359_v9, %v3344_v24  ;;  %v3443_v16 = vpop.permute.xlu1 %3442 }
0x166b   :  { %v3448_v58 = vadd.f32 %v3443_v16, %v3428_v0 }
0x166c   :  { %6071 = vtanh.f32 %v3364_v51 }
0x166d   :  { %6073 = vtanh.f32 %v3448_v58 }
0x1671   :  { %v3425_v39 = vpop.permute.xlu0 %3424 }
0x1672   :  { %v6072_v31 = vpop.eup %6071  ;;  %v3429_v18 = vmul.f32 %v3425_v39, %v3416_v5  ;;  %v3361_v12 = vpop.permute.xlu1 %3360 }
0x1673   :  { %v6074_v40 = vpop.eup %6073  ;;  %3370 = vrot.lane.b32.xlu0 %v6072_v31, %s6440_s4  ;;  %v3365_v8 = vadd.f32 %v3361_v12, %v3345_v55 }
0x1674   :  { %v3449_v2 = vadd.f32 %v3445_v10, %v3429_v18  ;;  %3454 = vrot.lane.b32.xlu1 %v6074_v40, %s6440_s4 }
0x1675   :  { %6075 = vtanh.f32 %v3365_v8 }
0x1676   :  { %6077 = vtanh.f32 %v3449_v2 }
0x167b   :  { %v6076_v56 = vpop.eup %6075 }
0x167c   :  { %v6078_v61 = vpop.eup %6077  ;;  %3372 = vrot.lane.b32.xlu2 %v6076_v56, %s6440_s4 }
0x167d   :  { %3456 = vrot.lane.b32.xlu0 %v6078_v61, %s6440_s4 }
0x16d6   :  { %v3373_v15 = vpop.permute.xlu2 %3372 }
0x16d7   :  { %v3377_v22 = vmul.f32 %v3373_v15, %v3332_v45 }
0x16d9   :  { %3466 = vrot.lane.b32.xlu0 %v3377_v22, %s6439_s24 }
0x16e1   :  { %3494 = vrot.lane.b32.xlu0 %v3448_v58, %s6441_s2  ;;  %v3031_v58 = vpop.f32.mrf.mxu2 }
0x16e5   :  { %v3371_v3 = vpop.permute.xlu0 %3370 }
0x16e6   :  { %v3376_v44 = vmul.f32 %v3371_v3, %v7609_v34  ;;  %v3455_v6 = vpop.permute.xlu1 %3454 }
0x16e7   :  { %v3460_v24 = vmul.f32 %v3455_v6, %v7611_v53  ;;  %v3127_v6 = vadd.f32 %v7573_v36, %v7561_v33 }
0x16e8   :  { %3464 = vrot.lane.b32.xlu1 %v3376_v44, %s6439_s24 }
0x16e9   :  { %3484 = vrot.lane.b32.xlu2 %v3460_v24, %s6439_s24  ;;  %v3034_v31 = vpop.f32.mrf.mxu2 }
0x16ef   :  { %v3457_v0 = vpop.permute.xlu0 %3456 }
0x16f0   :  { %v3461_v9 = vmul.f32 %v3457_v0, %v3416_v5  ;;  %v3169_v0 = vadd.f32 %v7587_v4, %v3127_v6 }
0x16f1   :  { %3474 = vrot.lane.b32.xlu2 %v3364_v51, %s6441_s2  ;;  %v7654_v10 = vpop.f32.mrf.mxu2 }
0x16f2   :  { %3486 = vrot.lane.b32.xlu1 %v3461_v9, %s6439_s24 }
0x16f9   :  { %3496 = vrot.lane.b32.xlu2 %v3449_v2, %s6441_s2 }
0x16fa   :  { %3476 = vrot.lane.b32.xlu1 %v3365_v8, %s6441_s2  ;;  %v7656_v8 = vpop.f32.mrf.mxu2 }
0x1702   :  { %v7658_v2 = vpop.f32.mrf.mxu2 }
0x170a   :  { %v7660_v56 = vpop.f32.mrf.mxu2 }
0x1712   :  { %v7662_v61 = vpop.f32.mrf.mxu2 }
0x171a   :  { %v7664_v15 = vpop.f32.mrf.mxu2 }
0x1722   :  { %v7666_v22 = vpop.f32.mrf.mxu2 }
0x172a   :  { %v7668_v3 = vpop.f32.mrf.mxu2 }
0x1732   :  { %v7670_v44 = vpop.f32.mrf.mxu2 }
0x173a   :  { %v7674_v24 = vpop.f32.mrf.mxu2 }
0x1743   :  { %v3485_v45 = vpop.permute.xlu2 %3484 }
0x1744   :  { %3490 = vst.msk [vmem:[#allocation7] sm:$0xff] %vm349_vm1, %v3485_v45 }
0x174b   :  { %v3467_v34 = vpop.permute.xlu0 %3466  ;;  %v3475_v16 = vpop.permute.xlu2 %3474  ;;  %v3543_v53 = vld [vmem:[#allocation7] sm:$0xff] }
0x174c   :  { %3471 = vst.msk [vmem:[#allocation5 + $0x8] sm:$0xff] %vm349_vm1, %v3467_v34  ;;  %5716 = vmatmul.msk.f32.vlgmr.msrb.gmra.mxu3 %vm349_vm1, %v3543_v53  ;;  %v7677_v34 = vpop.f32.mrf.mxu2 }
0x174d   :  { %3480 = vst.msk [vmem:[#allocation6] sm:$0xff] %vm349_vm1, %v3475_v16 }
0x1753   :  { %v3495_v5 = vpop.permute.xlu0 %3494  ;;  %v3497_v51 = vpop.permute.xlu2 %3496  ;;  %v3505_v18 = vld [vmem:[#allocation5 + $0x8] sm:$0xff] }
0x1754   :  { %3500 = vst.msk [vmem:[#allocation8] sm:$0xff] %vm349_vm1, %v3495_v5  ;;  %v7680_v53 = vpop.f32.mrf.mxu2  ;;  %v3580_v5 = vld [vmem:[#allocation6] sm:$0xff] }
0x1755   :  { %3501 = vst.msk [vmem:[#allocation8 + $0x8] sm:$0xff] %vm349_vm1, %v3497_v51  ;;  %v3032_v51 = vadd.f32 %v3031_v58, %v7486_v35 }
0x1756   :  { %8172 = vst [vmem:[#allocation27_spill] sm:$0xff] %v7680_v53 }
0x1757   :  { %v3148_v33 = vadd.f32 %v7585_v59, %v3032_v51 }
0x175a   :  { %v3465_v28 = vpop.permute.xlu1 %3464 }
0x175b   :  { %3470 = vst.msk [vmem:[#allocation5] sm:$0xff] %vm349_vm1, %v3465_v28 }
0x175c   :  { %v3665_v53 = vld [vmem:[#allocation8 + $0x8] sm:$0xff] }
0x1762   :  { %v3504_v55 = vld [vmem:[#allocation5] sm:$0xff] }
0x1763   :  { %5714 = vmatmul.msk.f32.vlgmr.msrb.gmra.mxu2 %vm349_vm1, %v3504_v55  ;;  %v3035_v55 = vadd.f32 %v3034_v31, %v7501_v29 }
0x1764   :  { %v3487_v39 = vpop.permute.xlu1 %3486 }
0x1765   :  { %3491 = vst.msk [vmem:[#allocation7 + $0x8] sm:$0xff] %vm349_vm1, %v3487_v39  ;;  %v3130_v39 = vadd.f32 %v7577_v30, %v7567_v49  ;;  %v3664_v49 = vld [vmem:[#allocation8] sm:$0xff] }
0x1767   :  { %v3171_v35 = vadd.f32 %v7587_v4, %v3130_v39 }
0x176b   :  { %5715 = vmatmul.msk.f32.gmra.mxu2 %vm349_vm1, %v3505_v18  ;;  %v3150_v18 = vadd.f32 %v7585_v59, %v3035_v55 }
0x176c   :  { %v3477_v12 = vpop.permute.xlu1 %3476  ;;  %v3544_v40 = vld [vmem:[#allocation7 + $0x8] sm:$0xff] }
0x176d   :  { %3481 = vst.msk [vmem:[#allocation6 + $0x8] sm:$0xff] %vm349_vm1, %v3477_v12  ;;  %5717 = vmatmul.msk.f32.gmra.mxu3 %vm349_vm1, %v3544_v40 }
0x1774   :  { %v3581_v30 = vld [vmem:[#allocation6 + $0x8] sm:$0xff] }
0x17cf   :  { %v3572_v9 = vpop.f32.mrf.mxu3 }
0x17d0   :  { %v3578_v45 = vadd.f32 %v3572_v9, %v3169_v0 }
0x17d2   :  { %6079 = vtanh.f32 %v3578_v45  ;;  %v5720_v31 = vmul.f32 -1.442695, %v3578_v45 }
0x17d8   :  { %v6080_v16 = vpop.eup %6079 }
0x17d9   :  { %3718 = vrot.lane.b32.xlu1 %v6080_v16, %s6440_s4 }
0x17e1   :  { %3624 = vrot.lane.b32.xlu1 %v3580_v5, %s6439_s24 }
0x17e6   :  { %v3533_v36 = vpop.f32.mrf.mxu2 }
0x17e7   :  { %v3539_v28 = vadd.f32 %v3533_v36, %v3148_v33 }
0x17e9   :  { %6081 = vtanh.f32 %v3539_v28  ;;  %v5718_v55 = vmul.f32 -1.442695, %v3539_v28 }
0x17ee   :  { %v3536_v12 = vpop.f32.mrf.mxu2 }
0x17ef   :  { %v6082_v40 = vpop.eup %6081  ;;  %v3540_v6 = vadd.f32 %v3536_v12, %v3150_v18 }
0x17f0   :  { %3634 = vrot.lane.b32.xlu0 %v6082_v40, %s6440_s4  ;;  %v3575_v58 = vpop.f32.mrf.mxu3 }
0x17f1   :  { %6083 = vtanh.f32 %v3540_v6  ;;  %v3579_v0 = vadd.f32 %v3575_v58, %v3171_v35  ;;  %v5719_v16 = vmul.f32 -1.442695, %v3540_v6 }
0x17f3   :  { %6085 = vtanh.f32 %v3579_v0  ;;  %v5721_v45 = vmul.f32 -1.442695, %v3579_v0 }
0x17f4   :  { %6087 = vpow2.f32 %v5720_v31 }
0x17f5   :  { %6089 = vpow2.f32 %v5719_v16 }
0x17f7   :  { %v6084_v9 = vpop.eup %6083 }
0x17f8   :  { %3636 = vrot.lane.b32.xlu2 %v6084_v9, %s6440_s4 }
0x17f9   :  { %v6086_v29 = vpop.eup %6085 }
0x17fa   :  { %3720 = vrot.lane.b32.xlu0 %v6086_v29, %s6440_s4  ;;  %v6088_v5 = vpop.eup %6087 }
0x17fb   :  { %v3672_v51 = vadd.f32 1.0, %v6088_v5  ;;  %v6090_v33 = vpop.eup %6089 }
0x17fc   :  { %v3589_v36 = vadd.f32 1.0, %v6090_v33 }
0x17fd   :  { %6091 = vrcp.f32 %v3672_v51  ;;  %vm3679_vm12 = vweird.f32 %v3672_v51  ;;  %v3683_v31 = vand.u32 2147483647, %v3672_v51 }
0x17fe   :  { %6093 = vrcp.f32 %v3589_v36  ;;  %vm3610_vm0 = vweird.f32 %v3589_v36 }
0x17ff   :  { %6095 = vpow2.f32 %v5718_v55  ;;  %vm3684_vm14 = vcmp.eq.f32.partialorder %v3683_v31, 8.507059e+37 }
0x1800   :  { %3708 = vrot.lane.b32.xlu2 %v3664_v49, %s6439_s24 }
0x1803   :  { %v6092_v39 = vpop.eup %6091 }
0x1804   :  { %v3675_v18 = vmul.f32 %v6092_v39, %v3672_v51  ;;  %v6094_v40 = vpop.eup %6093  ;;  %vm3680_vm11 = vweird.f32 %v6092_v39 }
0x1805   :  { %v6096_v35 = vpop.eup %6095  ;;  %v3606_v9 = vmul.f32 %v6094_v40, %v3589_v36  ;;  %vm3681_vm13 = vmor %vm3679_vm12, %vm3680_vm11  ;;  %vm3611_vm15 = vweird.f32 %v6094_v40 }
0x1806   :  { %v3676_v12 = vsub.f32 1.0, %v3675_v18  ;;  %v3588_v29 = vadd.f32 1.0, %v6096_v35  ;;  %vm3612_vm2 = vmor %vm3610_vm0, %vm3611_vm15 }
0x1807   :  { %v3607_v6 = vsub.f32 1.0, %v3606_v9  ;;  %v3614_v9 = vand.u32 2147483647, %v3589_v36 }
0x1808   :  { %3626 = vrot.lane.b32.xlu2 %v3581_v30, %s6439_s24  ;;  %v3677_v58 = vmul.f32 %v6092_v39, %v3676_v12  ;;  %6097 = vrcp.f32 %v3588_v29  ;;  %v3685_v30 = vand.u32 2147483648, %v3672_v51  ;;  %vm3595_vm5 = vweird.f32 %v3588_v29 }
0x1809   :  { %6099 = vpow2.f32 %v5721_v45  ;;  %v3608_v16 = vmul.f32 %v6094_v40, %v3607_v6  ;;  %vm3615_vm3 = vcmp.eq.f32.partialorder %v3614_v9, 8.507059e+37 }
0x180a   :  { %v3678_v49 = vadd.f32 %v6092_v39, %v3677_v58  ;;  %v3686_v5 = vor.u32 1.1754944e-38, %v3685_v30  ;;  %v3616_v58 = vand.u32 2147483648, %v3589_v36  ;;  %v3601_v36 = vand.u32 2147483648, %v3588_v29 }
0x180b   :  { %v3609_v35 = vadd.f32 %v6094_v40, %v3608_v16 }
0x180c   :  { %v3682_v28 = vsel %vm3681_vm13, %v6092_v39, %v3678_v49  ;;  %v3617_v49 = vor.u32 1.1754944e-38, %v3616_v58 }
0x180d   :  { %v7695_v55 = vsel %vm3684_vm14, %v3686_v5, %v3682_v28  ;;  %v3613_v45 = vsel %vm3612_vm2, %v6094_v40, %v3609_v35  ;;  %v3602_v35 = vor.u32 1.1754944e-38, %v3601_v36 }
0x180e   :  { %v6098_v33 = vpop.eup %6097  ;;  %v7699_v30 = vsel %vm3615_vm3, %v3617_v49, %v3613_v45 }
0x180f   :  { %v6100_v12 = vpop.eup %6099  ;;  %v3591_v39 = vmul.f32 %v6098_v33, %v3588_v29  ;;  %vm3596_vm4 = vweird.f32 %v6098_v33 }
0x1810   :  { %v3673_v51 = vadd.f32 1.0, %v6100_v12  ;;  %vm3597_vm6 = vmor %vm3595_vm5, %vm3596_vm4 }
0x1811   :  { %v3592_v31 = vsub.f32 1.0, %v3591_v39 }
0x1812   :  { %6101 = vrcp.f32 %v3673_v51  ;;  %vm3694_vm9 = vweird.f32 %v3673_v51 }
0x1813   :  { %v3593_v16 = vmul.f32 %v6098_v33, %v3592_v31  ;;  %v3700_v31 = vand.u32 2147483648, %v3673_v51 }
0x1818   :  { %v6102_v5 = vpop.eup %6101 }
0x1819   :  { %v3690_v12 = vmul.f32 %v6102_v5, %v3673_v51  ;;  %vm3695_vm8 = vweird.f32 %v6102_v5 }
0x181a   :  { %vm3696_vm10 = vmor %vm3694_vm9, %vm3695_vm8 }
0x181b   :  { %v3691_v58 = vsub.f32 1.0, %v3690_v12 }
0x181d   :  { %v3692_v49 = vmul.f32 %v6102_v5, %v3691_v58 }
0x184b   :  { %v3719_v18 = vpop.permute.xlu1 %3718 }
0x184c   :  { %v3724_v0 = vmul.f32 %v3719_v18, %v7695_v55  ;;  %v3594_v18 = vadd.f32 %v6098_v33, %v3593_v16 }
0x184e   :  { %3728 = vrot.lane.b32.xlu1 %v3724_v0, %s6439_s24  ;;  %v3599_v0 = vand.u32 2147483647, %v3588_v29  ;;  %v3598_v40 = vsel %vm3597_vm6, %v6098_v33, %v3594_v18  ;;  %v3701_v29 = vor.u32 1.1754944e-38, %v3700_v31 }
0x1850   :  { %vm3600_vm7 = vcmp.eq.f32.partialorder %v3599_v0, 8.507059e+37 }
0x1851   :  { %v3603_v9 = vsel %vm3600_vm7, %v3602_v35, %v3598_v40 }
0x1852   :  { %v3637_v6 = vpop.permute.xlu2 %3636 }
0x1853   :  { %v3641_v28 = vmul.f32 %v3637_v6, %v7699_v30  ;;  %v3693_v6 = vadd.f32 %v6102_v5, %v3692_v49  ;;  %v3625_v12 = vpop.permute.xlu1 %3624 }
0x1855   :  { %v3697_v16 = vsel %vm3696_vm10, %v6102_v5, %v3693_v6  ;;  %v3630_v6 = vmul.f32 %v3625_v12, %v3603_v9 }
0x1856   :  { %3646 = vrot.lane.b32.xlu1 %v3641_v28, %s6439_s24  ;;  %v3698_v28 = vand.u32 2147483647, %v3673_v51 }
0x1858   :  { %vm3699_vm11 = vcmp.eq.f32.partialorder %v3698_v28, 8.507059e+37 }
0x1859   :  { %v3702_v18 = vsel %vm3699_vm11, %v3701_v29, %v3697_v16 }
0x185a   :  { %v3709_v0 = vpop.permute.xlu2 %3708 }
0x185b   :  { %v3714_v40 = vmul.f32 %v3709_v0, %v7695_v55 }
0x1862   :  { %v3635_v45 = vpop.permute.xlu0 %3634  ;;  %v3627_v51 = vpop.permute.xlu2 %3626 }
0x1863   :  { %v3640_v39 = vmul.f32 %v3635_v45, %v3603_v9  ;;  %v3631_v5 = vmul.f32 %v3627_v51, %v7699_v30 }
0x1865   :  { %3644 = vrot.lane.b32.xlu0 %v3640_v39, %s6439_s24 }
0x186c   :  { %v3721_v33 = vpop.permute.xlu0 %3720 }
0x186d   :  { %3710 = vrot.lane.b32.xlu0 %v3665_v53, %s6439_s24  ;;  %v3725_v36 = vmul.f32 %v3721_v33, %v3702_v18 }
0x186f   :  { %3730 = vrot.lane.b32.xlu2 %v3725_v36, %s6439_s24 }
0x18c0   :  { %v3729_v35 = vpop.permute.xlu1 %3728 }
0x18c1   :  { %v3734_v58 = vadd.f32 %v3729_v35, %v3714_v40 }
0x18c3   :  { %6103 = vtanh.f32 %v3734_v58 }
0x18c8   :  { %v3647_v45 = vpop.permute.xlu1 %3646 }
0x18c9   :  { %v6104_v39 = vpop.eup %6103  ;;  %v3651_v49 = vadd.f32 %v3647_v45, %v3631_v5  ;;  %v3731_v36 = vpop.permute.xlu2 %3730 }
0x18ca   :  { %3740 = vrot.lane.b32.xlu1 %v6104_v39, %s6440_s4 }
0x18cb   :  { %6105 = vtanh.f32 %v3651_v49 }
0x18d1   :  { %v6106_v53 = vpop.eup %6105 }
0x18d2   :  { %3658 = vrot.lane.b32.xlu2 %v6106_v53, %s6440_s4 }
0x18d7   :  { %v3645_v31 = vpop.permute.xlu0 %3644 }
0x18d8   :  { %v3650_v28 = vadd.f32 %v3645_v31, %v3630_v6 }
0x18da   :  { %6107 = vtanh.f32 %v3650_v28 }
0x18df   :  { %v3711_v16 = vpop.permute.xlu0 %3710 }
0x18e0   :  { %v6108_v29 = vpop.eup %6107  ;;  %v3715_v33 = vmul.f32 %v3711_v16, %v3702_v18 }
0x18e1   :  { %3656 = vrot.lane.b32.xlu0 %v6108_v29, %s6440_s4 }
0x18e2   :  { %v3735_v0 = vadd.f32 %v3731_v36, %v3715_v33 }
0x18e4   :  { %6109 = vtanh.f32 %v3735_v0 }
0x18ea   :  { %v6110_v40 = vpop.eup %6109 }
0x18eb   :  { %3742 = vrot.lane.b32.xlu0 %v6110_v40, %s6440_s4 }
0x192c   :  { %v3659_v35 = vpop.permute.xlu2 %3658 }
0x192d   :  { %v3663_v51 = vmul.f32 %v3659_v35, %v7699_v30 }
0x192f   :  { %3752 = vrot.lane.b32.xlu0 %v3663_v51, %s6439_s24 }
0x1937   :  { %3780 = vrot.lane.b32.xlu0 %v3734_v58, %s6441_s2 }
0x193c   :  { %v3741_v12 = vpop.permute.xlu1 %3740 }
0x193d   :  { %v3746_v5 = vmul.f32 %v3741_v12, %v7695_v55 }
0x193f   :  { %3770 = vrot.lane.b32.xlu2 %v3746_v5, %s6439_s24 }
0x1947   :  { %3760 = vrot.lane.b32.xlu2 %v3650_v28, %s6441_s2 }
0x194f   :  { %3782 = vrot.lane.b32.xlu2 %v3735_v0, %s6441_s2  ;;  %v3121_v0 = vadd.f32 %v7563_v57, %v7549_v62  ;;  %v3041_v62 = vadd.f32 %v7656_v8, %v7523_v48  ;;  %v3124_v57 = vadd.f32 %v7569_v60, %v7555_v19 }
0x1951   :  { %v3165_v40 = vadd.f32 %v7587_v4, %v3121_v0 }
0x1953   :  { %v3657_v45 = vpop.permute.xlu0 %3656 }
0x1954   :  { %v3662_v39 = vmul.f32 %v3657_v45, %v3603_v9  ;;  %v3038_v45 = vadd.f32 %v7654_v10, %v7516_v46  ;;  %v3167_v46 = vadd.f32 %v7587_v4, %v3124_v57 }
0x1956   :  { %3750 = vrot.lane.b32.xlu1 %v3662_v39, %s6439_s24  ;;  %v3152_v39 = vadd.f32 %v7585_v59, %v3038_v45 }
0x195d   :  { %v3743_v53 = vpop.permute.xlu0 %3742 }
0x195e   :  { %v3747_v6 = vmul.f32 %v3743_v53, %v3702_v18 }
0x1960   :  { %3772 = vrot.lane.b32.xlu1 %v3747_v6, %s6439_s24 }
0x1968   :  { %3762 = vrot.lane.b32.xlu1 %v3651_v49, %s6441_s2 }
0x1999   :  { %v3771_v30 = vpop.permute.xlu2 %3770 }
0x199a   :  { %3776 = vst.msk [vmem:[#allocation7] sm:$0xff] %vm349_vm1, %v3771_v30  ;;  %v3154_v30 = vadd.f32 %v7585_v59, %v3041_v62 }
0x19a1   :  { %v3753_v55 = vpop.permute.xlu0 %3752  ;;  %v3761_v58 = vpop.permute.xlu2 %3760  ;;  %v3829_v31 = vld [vmem:[#allocation7] sm:$0xff] }
0x19a2   :  { %3757 = vst.msk [vmem:[#allocation5 + $0x8] sm:$0xff] %vm349_vm1, %v3753_v55  ;;  %5724 = vmatmul.msk.f32.vlgmr.msrb.gmra.mxu1 %vm349_vm1, %v3829_v31 }
0x19a3   :  { %3766 = vst.msk [vmem:[#allocation6] sm:$0xff] %vm349_vm1, %v3761_v58 }
0x19a9   :  { %v3781_v9 = vpop.permute.xlu0 %3780  ;;  %v3783_v28 = vpop.permute.xlu2 %3782  ;;  %v3791_v29 = vld [vmem:[#allocation5 + $0x8] sm:$0xff] }
0x19aa   :  { %3786 = vst.msk [vmem:[#allocation8] sm:$0xff] %vm349_vm1, %v3781_v9  ;;  %v3866_v5 = vld [vmem:[#allocation6] sm:$0xff] }
0x19ab   :  { %3787 = vst.msk [vmem:[#allocation8 + $0x8] sm:$0xff] %vm349_vm1, %v3783_v28 }
0x19b1   :  { %v3950_v19 = vld [vmem:[#allocation8] sm:$0xff] }
0x19c8   :  { %v3751_v18 = vpop.permute.xlu1 %3750 }
0x19c9   :  { %3756 = vst.msk [vmem:[#allocation5] sm:$0xff] %vm349_vm1, %v3751_v18 }
0x19d0   :  { %v3790_v49 = vld [vmem:[#allocation5] sm:$0xff] }
0x19d1   :  { %5722 = vmatmul.msk.f32.vlgmr.msrb.gmra.mxu0 %vm349_vm1, %v3790_v49 }
0x19d2   :  { %v3773_v16 = vpop.permute.xlu1 %3772 }
0x19d3   :  { %3777 = vst.msk [vmem:[#allocation7 + $0x8] sm:$0xff] %vm349_vm1, %v3773_v16 }
0x19d9   :  { %5723 = vmatmul.msk.f32.gmra.mxu0 %vm349_vm1, %v3791_v29 }
0x19da   :  { %v3763_v33 = vpop.permute.xlu1 %3762  ;;  %v3830_v36 = vld [vmem:[#allocation7 + $0x8] sm:$0xff] }
0x19db   :  { %3767 = vst.msk [vmem:[#allocation6 + $0x8] sm:$0xff] %vm349_vm1, %v3763_v33  ;;  %5725 = vmatmul.msk.f32.gmra.mxu1 %vm349_vm1, %v3830_v36 }
0x19e2   :  { %v3867_v8 = vld [vmem:[#allocation6 + $0x8] sm:$0xff] }
0x1a1f   :  { %v3858_v35 = vpop.f32.mrf.mxu1 }
0x1a20   :  { %v3864_v51 = vadd.f32 %v3858_v35, %v3165_v40 }
0x1a22   :  { %6111 = vtanh.f32 %v3864_v51  ;;  %v5728_v60 = vmul.f32 -1.442695, %v3864_v51 }
0x1a28   :  { %v6112_v12 = vpop.eup %6111 }
0x1a29   :  { %4004 = vrot.lane.b32.xlu1 %v6112_v12, %s6440_s4 }
0x1a31   :  { %3910 = vrot.lane.b32.xlu1 %v3866_v5, %s6439_s24 }
0x1a4e   :  { %v3819_v53 = vpop.f32.mrf.mxu0 }
0x1a4f   :  { %v3825_v6 = vadd.f32 %v3819_v53, %v3152_v39 }
0x1a51   :  { %6113 = vtanh.f32 %v3825_v6  ;;  %v5726_v57 = vmul.f32 -1.442695, %v3825_v6 }
0x1a56   :  { %v3822_v55 = vpop.f32.mrf.mxu0 }
0x1a57   :  { %v6114_v58 = vpop.eup %6113  ;;  %v3826_v31 = vadd.f32 %v3822_v55, %v3154_v30 }
0x1a58   :  { %3920 = vrot.lane.b32.xlu0 %v6114_v58, %s6440_s4  ;;  %v3861_v10 = vpop.f32.mrf.mxu1 }
0x1a59   :  { %6115 = vtanh.f32 %v3826_v31  ;;  %v3865_v9 = vadd.f32 %v3861_v10, %v3167_v46  ;;  %v5727_v36 = vmul.f32 -1.442695, %v3826_v31 }
0x1a5b   :  { %6117 = vtanh.f32 %v3865_v9  ;;  %v5729_v10 = vmul.f32 -1.442695, %v3865_v9 }
0x1a5c   :  { %6119 = vpow2.f32 %v5728_v60 }
0x1a5f   :  { %v6116_v28 = vpop.eup %6115 }
0x1a60   :  { %3922 = vrot.lane.b32.xlu2 %v6116_v28, %s6440_s4 }
0x1a61   :  { %v6118_v48 = vpop.eup %6117 }
0x1a62   :  { %4006 = vrot.lane.b32.xlu0 %v6118_v48, %s6440_s4  ;;  %v6120_v18 = vpop.eup %6119 }
0x1a63   :  { %v3958_v49 = vadd.f32 1.0, %v6120_v18 }
0x1a65   :  { %6121 = vrcp.f32 %v3958_v49  ;;  %v3971_v35 = vand.u32 2147483648, %v3958_v49  ;;  %vm3965_vm13 = vweird.f32 %v3958_v49  ;;  %v3969_v12 = vand.u32 2147483647, %v3958_v49 }
0x1a66   :  { %6123 = vpow2.f32 %v5727_v36 }
0x1a67   :  { %v3972_v45 = vor.u32 1.1754944e-38, %v3971_v35  ;;  %vm3970_vm15 = vcmp.eq.f32.partialorder %v3969_v12, 8.507059e+37 }
0x1a68   :  { %3994 = vrot.lane.b32.xlu2 %v3950_v19, %s6439_s24 }
0x1a6b   :  { %v6122_v16 = vpop.eup %6121 }
0x1a6c   :  { %v3961_v29 = vmul.f32 %v6122_v16, %v3958_v49  ;;  %vm3966_vm12 = vweird.f32 %v6122_v16  ;;  %v6124_v5 = vpop.eup %6123 }
0x1a6d   :  { %vm3967_vm14 = vmor %vm3965_vm13, %vm3966_vm12  ;;  %v3875_v39 = vadd.f32 1.0, %v6124_v5 }
0x1a6e   :  { %v3962_v33 = vsub.f32 1.0, %v3961_v29 }
0x1a6f   :  { %6125 = vrcp.f32 %v3875_v39  ;;  %v3902_v6 = vand.u32 2147483648, %v3875_v39  ;;  %vm3896_vm2 = vweird.f32 %v3875_v39  ;;  %v3900_v18 = vand.u32 2147483647, %v3875_v39 }
0x1a70   :  { %3912 = vrot.lane.b32.xlu2 %v3867_v8, %s6439_s24  ;;  %v3963_v0 = vmul.f32 %v6122_v16, %v3962_v33  ;;  %6127 = vpow2.f32 %v5726_v57 }
0x1a71   :  { %v3903_v33 = vor.u32 1.1754944e-38, %v3902_v6  ;;  %vm3901_vm4 = vcmp.eq.f32.partialorder %v3900_v18, 8.507059e+37  ;;  %v3951_v6 = vld [vmem:[#allocation8 + $0x8] sm:$0xff] }
0x1a72   :  { %v3964_v40 = vadd.f32 %v6122_v16, %v3963_v0 }
0x1a74   :  { %v3968_v51 = vsel %vm3967_vm14, %v6122_v16, %v3964_v40 }
0x1a75   :  { %v7753_v53 = vsel %vm3970_vm15, %v3972_v45, %v3968_v51  ;;  %v6126_v55 = vpop.eup %6125 }
0x1a76   :  { %v6128_v58 = vpop.eup %6127  ;;  %v3892_v31 = vmul.f32 %v6126_v55, %v3875_v39  ;;  %vm3897_vm0 = vweird.f32 %v6126_v55 }
0x1a77   :  { %v3874_v46 = vadd.f32 1.0, %v6128_v58  ;;  %vm3898_vm3 = vmor %vm3896_vm2, %vm3897_vm0 }
0x1a78   :  { %v3893_v28 = vsub.f32 1.0, %v3892_v31 }
0x1a79   :  { %6129 = vrcp.f32 %v3874_v46  ;;  %v3887_v51 = vand.u32 2147483648, %v3874_v46  ;;  %vm3881_vm6 = vweird.f32 %v3874_v46  ;;  %v3885_v39 = vand.u32 2147483647, %v3874_v46 }
0x1a7a   :  { %6131 = vpow2.f32 %v5729_v10  ;;  %v3894_v48 = vmul.f32 %v6126_v55, %v3893_v28 }
0x1a7b   :  { %v3888_v57 = vor.u32 1.1754944e-38, %v3887_v51  ;;  %vm3886_vm8 = vcmp.eq.f32.partialorder %v3885_v39, 8.507059e+37 }
0x1a7c   :  { %v3895_v60 = vadd.f32 %v6126_v55, %v3894_v48 }
0x1a7e   :  { %v3899_v29 = vsel %vm3898_vm3, %v6126_v55, %v3895_v60 }
0x1a7f   :  { %v6130_v19 = vpop.eup %6129  ;;  %v7757_v0 = vsel %vm3901_vm4, %v3903_v33, %v3899_v29 }
0x1a80   :  { %v6132_v8 = vpop.eup %6131  ;;  %v3877_v16 = vmul.f32 %v6130_v19, %v3874_v46  ;;  %vm3882_vm5 = vweird.f32 %v6130_v19 }
0x1a81   :  { %v3959_v49 = vadd.f32 1.0, %v6132_v8  ;;  %vm3883_vm7 = vmor %vm3881_vm6, %vm3882_vm5 }
0x1a82   :  { %v3878_v9 = vsub.f32 1.0, %v3877_v16 }
0x1a83   :  { %6133 = vrcp.f32 %v3959_v49  ;;  %v3986_v48 = vand.u32 2147483648, %v3959_v49  ;;  %vm3980_vm10 = vweird.f32 %v3959_v49  ;;  %v3984_v60 = vand.u32 2147483647, %v3959_v49 }
0x1a84   :  { %v3879_v35 = vmul.f32 %v6130_v19, %v3878_v9 }
0x1a85   :  { %v3987_v46 = vor.u32 1.1754944e-38, %v3986_v48  ;;  %vm3985_vm12 = vcmp.eq.f32.partialorder %v3984_v60, 8.507059e+37 }
0x1a86   :  { %v3880_v5 = vadd.f32 %v6130_v19, %v3879_v35 }
0x1a89   :  { %v6134_v12 = vpop.eup %6133 }
0x1a8a   :  { %v3976_v45 = vmul.f32 %v6134_v12, %v3959_v49  ;;  %vm3981_vm9 = vweird.f32 %v6134_v12 }
0x1a8b   :  { %vm3982_vm11 = vmor %vm3980_vm10, %vm3981_vm9 }
0x1a9b   :  { %v4005_v62 = vpop.permute.xlu1 %4004 }
0x1a9c   :  { %v4010_v30 = vmul.f32 %v4005_v62, %v7753_v53  ;;  %v3884_v62 = vsel %vm3883_vm7, %v6130_v19, %v3880_v5 }
0x1a9d   :  { %v3889_v55 = vsel %vm3886_vm8, %v3888_v57, %v3884_v62 }
0x1a9e   :  { %4014 = vrot.lane.b32.xlu1 %v4010_v30, %s6439_s24  ;;  %v3977_v30 = vsub.f32 1.0, %v3976_v45 }
0x1aa0   :  { %v3978_v10 = vmul.f32 %v6134_v12, %v3977_v30 }
0x1aa2   :  { %v3979_v28 = vadd.f32 %v6134_v12, %v3978_v10 }
0x1aa3   :  { %v3911_v29 = vpop.permute.xlu1 %3910 }
0x1aa4   :  { %v3983_v8 = vsel %vm3982_vm11, %v6134_v12, %v3979_v28  ;;  %v3916_v39 = vmul.f32 %v3911_v29, %v3889_v55 }
0x1aa5   :  { %v3988_v18 = vsel %vm3985_vm12, %v3987_v46, %v3983_v8 }
0x1aba   :  { %v3923_v36 = vpop.permute.xlu2 %3922 }
0x1abb   :  { %v3927_v40 = vmul.f32 %v3923_v36, %v7757_v0 }
0x1abd   :  { %3932 = vrot.lane.b32.xlu1 %v3927_v40, %s6439_s24 }
0x1ac2   :  { %v3995_v33 = vpop.permute.xlu2 %3994 }
0x1ac3   :  { %v4000_v36 = vmul.f32 %v3995_v33, %v7753_v53 }
0x1aca   :  { %v3921_v58 = vpop.permute.xlu0 %3920  ;;  %v3913_v35 = vpop.permute.xlu2 %3912 }
0x1acb   :  { %v3926_v31 = vmul.f32 %v3921_v58, %v3889_v55  ;;  %v3917_v12 = vmul.f32 %v3913_v35, %v7757_v0  ;;  %v4080_v35 = vld [vmem:[#allocation16 + $0x10] sm:$0xff] }
0x1acd   :  { %3930 = vrot.lane.b32.xlu0 %v3926_v31, %s6439_s24 }
0x1ad4   :  { %v4007_v19 = vpop.permute.xlu0 %4006 }
0x1ad5   :  { %3996 = vrot.lane.b32.xlu0 %v3951_v6, %s6439_s24  ;;  %v4011_v16 = vmul.f32 %v4007_v19, %v3988_v18 }
0x1ad7   :  { %4016 = vrot.lane.b32.xlu2 %v4011_v16, %s6439_s24 }
0x1b10   :  { %v4015_v9 = vpop.permute.xlu1 %4014 }
0x1b11   :  { %v4020_v40 = vadd.f32 %v4015_v9, %v4000_v36 }
0x1b13   :  { %6135 = vtanh.f32 %v4020_v40 }
0x1b19   :  { %v6136_v49 = vpop.eup %6135 }
0x1b1a   :  { %4026 = vrot.lane.b32.xlu1 %v6136_v49, %s6440_s4  ;;  %v4081_v49 = vld [vmem:[#allocation16 + $0x18] sm:$0xff] }
0x1b1b   :  { %4100 = vmatpush.msra.mxu2 %v4081_v49  ;;  %4386 = vmatpush.msra.mxu0 %v4081_v49 }
0x1b1d   :  { %4101 = vmatpush.msra.mxu2 %v4080_v35  ;;  %4387 = vmatpush.msra.mxu0 %v4080_v35 }
0x1b2f   :  { %v3933_v5 = vpop.permute.xlu1 %3932 }
0x1b30   :  { %v3937_v51 = vadd.f32 %v3933_v5, %v3917_v12 }
0x1b31   :  { %v4017_v10 = vpop.permute.xlu2 %4016 }
0x1b32   :  { %6137 = vtanh.f32 %v3937_v51 }
0x1b38   :  { %v6138_v45 = vpop.eup %6137 }
0x1b39   :  { %3944 = vrot.lane.b32.xlu2 %v6138_v45, %s6440_s4  ;;  %v4079_v45 = vld [vmem:[#allocation16 + $0x8] sm:$0xff] }
0x1b3a   :  { %4102 = vmatpush.msra.mxu2 %v4079_v45  ;;  %4388 = vmatpush.msra.mxu0 %v4079_v45 }
0x1b3f   :  { %v3931_v62 = vpop.permute.xlu0 %3930 }
0x1b40   :  { %v3936_v57 = vadd.f32 %v3931_v62, %v3916_v39  ;;  %v4078_v39 = vld [vmem:[#allocation16] sm:$0xff] }
0x1b41   :  { %4103 = vmatpush.msra.mxu2 %v4078_v39  ;;  %4389 = vmatpush.msra.mxu0 %v4078_v39 }
0x1b42   :  { %6139 = vtanh.f32 %v3936_v57 }
0x1b43   :  { %4672 = vmatpush.msrb.mxu2 %v4081_v49 }
0x1b45   :  { %4673 = vmatpush.msrb.mxu2 %v4080_v35 }
0x1b47   :  { %v3997_v30 = vpop.permute.xlu0 %3996  ;;  %4674 = vmatpush.msrb.mxu2 %v4079_v45 }
0x1b48   :  { %v6140_v58 = vpop.eup %6139  ;;  %v4001_v31 = vmul.f32 %v3997_v30, %v3988_v18 }
0x1b49   :  { %3942 = vrot.lane.b32.xlu0 %v6140_v58, %s6440_s4  ;;  %4675 = vmatpush.msrb.mxu2 %v4078_v39 }
0x1b4a   :  { %v4021_v28 = vadd.f32 %v4017_v10, %v4001_v31 }
0x1b4c   :  { %6141 = vtanh.f32 %v4021_v28 }
0x1b52   :  { %v6142_v48 = vpop.eup %6141 }
0x1b53   :  { %4028 = vrot.lane.b32.xlu0 %v6142_v48, %s6440_s4 }
0x1b8c   :  { %v4027_v60 = vpop.permute.xlu1 %4026 }
0x1b8d   :  { %v4032_v8 = vmul.f32 %v4027_v60, %v7753_v53  ;;  %v4120_v53 = vld [vmem:[%s8159_s7 + $0x18] sm:$0xff] }
0x1b8e   :  { %4139 = vmatpush.msra.mxu3 %v4120_v53  ;;  %4425 = vmatpush.msra.mxu1 %v4120_v53 }
0x1b8f   :  { %4056 = vrot.lane.b32.xlu2 %v4032_v8, %s6439_s24 }
0x1b93   :  { %v3945_v6 = vpop.permute.xlu2 %3944 }
0x1b94   :  { %v3949_v46 = vmul.f32 %v3945_v6, %v7757_v0  ;;  %v4119_v0 = vld [vmem:[%s8159_s7 + $0x10] sm:$0xff] }
0x1b95   :  { %4140 = vmatpush.msra.mxu3 %v4119_v0  ;;  %4426 = vmatpush.msra.mxu1 %v4119_v0 }
0x1b96   :  { %4038 = vrot.lane.b32.xlu0 %v3949_v46, %s6439_s24 }
0x1b97   :  { %4046 = vrot.lane.b32.xlu2 %v3936_v57, %s6441_s2 }
0x1b9e   :  { %4066 = vrot.lane.b32.xlu0 %v4020_v40, %s6441_s2 }
0x1b9f   :  { %4068 = vrot.lane.b32.xlu2 %v4021_v28, %s6441_s2  ;;  %v3115_v28 = vadd.f32 %v7551_v52, %v7537_v27  ;;  %v3047_v27 = vadd.f32 %v7660_v56, %v7535_v63  ;;  %v3118_v52 = vadd.f32 %v7557_v17, %v7543_v50 }
0x1ba1   :  { %v3161_v48 = vadd.f32 %v7587_v4, %v3115_v28 }
0x1bbb   :  { %v3943_v19 = vpop.permute.xlu0 %3942 }
0x1bbc   :  { %v3948_v16 = vmul.f32 %v3943_v19, %v3889_v55  ;;  %v4118_v55 = vld [vmem:[%s8159_s7 + $0x8] sm:$0xff]  ;;  %v3044_v19 = vadd.f32 %v7658_v2, %v7529_v13  ;;  %v3163_v13 = vadd.f32 %v7587_v4, %v3118_v52 }
0x1bbd   :  { %4141 = vmatpush.msra.mxu3 %v4118_v55  ;;  %4427 = vmatpush.msra.mxu1 %v4118_v55 }
0x1bbe   :  { %4036 = vrot.lane.b32.xlu1 %v3948_v16, %s6439_s24  ;;  %v3156_v16 = vadd.f32 %v7585_v59, %v3044_v19 }
0x1bc5   :  { %v4029_v29 = vpop.permute.xlu0 %4028 }
0x1bc6   :  { %v4033_v33 = vmul.f32 %v4029_v29, %v3988_v18  ;;  %v4117_v18 = vld [vmem:[%s8159_s7] sm:$0xff] }
0x1bc7   :  { %4142 = vmatpush.msra.mxu3 %v4117_v18  ;;  %4428 = vmatpush.msra.mxu1 %v4117_v18 }
0x1bc8   :  { %4058 = vrot.lane.b32.xlu1 %v4033_v33, %s6439_s24 }
0x1bc9   :  { %4711 = vmatpush.msrb.mxu3 %v4120_v53  ;;  %v3158_v53 = vadd.f32 %v7585_v59, %v3047_v27 }
0x1bcb   :  { %4712 = vmatpush.msrb.mxu3 %v4119_v0 }
0x1bcd   :  { %4713 = vmatpush.msrb.mxu3 %v4118_v55 }
0x1bcf   :  { %4714 = vmatpush.msrb.mxu3 %v4117_v18 }
0x1bd0   :  { %4048 = vrot.lane.b32.xlu1 %v3937_v51, %s6441_s2 }
0x1be9   :  { %v4057_v36 = vpop.permute.xlu2 %4056 }
0x1bea   :  { %4062 = vst.msk [vmem:[#allocation7] sm:$0xff] %vm349_vm1, %v4057_v36 }
0x1bf1   :  { %v4047_v9 = vpop.permute.xlu2 %4046  ;;  %v4115_v40 = vld [vmem:[#allocation7] sm:$0xff] }
0x1bf2   :  { %4052 = vst.msk [vmem:[#allocation6] sm:$0xff] %vm349_vm1, %v4047_v9  ;;  %5732 = vmatmul.msk.f32.vlgmr.msra.gmra.mxu3 %vm349_vm1, %v4115_v40 }
0x1bf9   :  { %v4069_v12 = vpop.permute.xlu2 %4068  ;;  %v4152_v46 = vld [vmem:[#allocation6] sm:$0xff] }
0x1bfa   :  { %4073 = vst.msk [vmem:[#allocation8 + $0x8] sm:$0xff] %vm349_vm1, %v4069_v12 }
0x1c08   :  { %v4039_v5 = vpop.permute.xlu0 %4038 }
0x1c09   :  { %4043 = vst.msk [vmem:[#allocation5 + $0x8] sm:$0xff] %vm349_vm1, %v4039_v5 }
0x1c10   :  { %v4067_v51 = vpop.permute.xlu0 %4066  ;;  %v4077_v58 = vld [vmem:[#allocation5 + $0x8] sm:$0xff] }
0x1c11   :  { %4072 = vst.msk [vmem:[#allocation8] sm:$0xff] %vm349_vm1, %v4067_v51 }
0x1c18   :  { %v4236_v40 = vld [vmem:[#allocation8] sm:$0xff] }
0x1c30   :  { %v4037_v62 = vpop.permute.xlu1 %4036 }
0x1c31   :  { %4042 = vst.msk [vmem:[#allocation5] sm:$0xff] %vm349_vm1, %v4037_v62 }
0x1c38   :  { %v4076_v57 = vld [vmem:[#allocation5] sm:$0xff] }
0x1c39   :  { %5730 = vmatmul.msk.f32.vlgmr.msra.gmra.mxu2 %vm349_vm1, %v4076_v57 }
0x1c3a   :  { %v4059_v30 = vpop.permute.xlu1 %4058 }
0x1c3b   :  { %4063 = vst.msk [vmem:[#allocation7 + $0x8] sm:$0xff] %vm349_vm1, %v4059_v30 }
0x1c41   :  { %5731 = vmatmul.msk.f32.gmra.mxu2 %vm349_vm1, %v4077_v58 }
0x1c42   :  { %v4049_v31 = vpop.permute.xlu1 %4048  ;;  %v4116_v10 = vld [vmem:[#allocation7 + $0x8] sm:$0xff] }
0x1c43   :  { %4053 = vst.msk [vmem:[#allocation6 + $0x8] sm:$0xff] %vm349_vm1, %v4049_v31  ;;  %5733 = vmatmul.msk.f32.gmra.mxu3 %vm349_vm1, %v4116_v10 }
0x1c4a   :  { %v4153_v35 = vld [vmem:[#allocation6 + $0x8] sm:$0xff] }
0x1c75   :  { %v4144_v60 = vpop.f32.mrf.mxu3 }
0x1c76   :  { %v4150_v8 = vadd.f32 %v4144_v60, %v3161_v48 }
0x1c78   :  { %6143 = vtanh.f32 %v4150_v8  ;;  %v5736_v0 = vmul.f32 -1.442695, %v4150_v8 }
0x1c7e   :  { %v6144_v6 = vpop.eup %6143 }
0x1c7f   :  { %4290 = vrot.lane.b32.xlu1 %v6144_v6, %s6440_s4 }
0x1c87   :  { %4196 = vrot.lane.b32.xlu1 %v4152_v46, %s6439_s24 }
0x1cbc   :  { %v4105_v29 = vpop.f32.mrf.mxu2 }
0x1cbd   :  { %v4111_v33 = vadd.f32 %v4105_v29, %v3156_v16 }
0x1cbf   :  { %6145 = vtanh.f32 %v4111_v33  ;;  %v5734_v8 = vmul.f32 -1.442695, %v4111_v33 }
0x1cc4   :  { %v4108_v55 = vpop.f32.mrf.mxu2 }
0x1cc5   :  { %v6146_v18 = vpop.eup %6145  ;;  %v4112_v36 = vadd.f32 %v4108_v55, %v3158_v53 }
0x1cc6   :  { %4206 = vrot.lane.b32.xlu0 %v6146_v18, %s6440_s4  ;;  %v4147_v2 = vpop.f32.mrf.mxu3 }
0x1cc7   :  { %6147 = vtanh.f32 %v4112_v36  ;;  %v4151_v9 = vadd.f32 %v4147_v2, %v3163_v13  ;;  %v5735_v28 = vmul.f32 -1.442695, %v4112_v36 }
0x1cc8   :  { %6149 = vpow2.f32 %v5736_v0 }
0x1cc9   :  { %6151 = vtanh.f32 %v4151_v9  ;;  %v5737_v29 = vmul.f32 -1.442695, %v4151_v9 }
0x1ccd   :  { %v6148_v63 = vpop.eup %6147 }
0x1cce   :  { %v6150_v56 = vpop.eup %6149  ;;  %4208 = vrot.lane.b32.xlu2 %v6148_v63, %s6440_s4 }
0x1ccf   :  { %v4244_v50 = vadd.f32 1.0, %v6150_v56  ;;  %v6152_v17 = vpop.eup %6151 }
0x1cd0   :  { %4292 = vrot.lane.b32.xlu0 %v6152_v17, %s6440_s4 }
0x1cd1   :  { %6153 = vrcp.f32 %v4244_v50  ;;  %v4257_v39 = vand.u32 2147483648, %v4244_v50  ;;  %vm4251_vm14 = vweird.f32 %v4244_v50  ;;  %v4255_v62 = vand.u32 2147483647, %v4244_v50 }
0x1cd2   :  { %6155 = vpow2.f32 %v5735_v28 }
0x1cd3   :  { %v4258_v30 = vor.u32 1.1754944e-38, %v4257_v39  ;;  %vm4256_vm0 = vcmp.eq.f32.partialorder %v4255_v62, 8.507059e+37 }
0x1cd6   :  { %4280 = vrot.lane.b32.xlu2 %v4236_v40, %s6439_s24 }
0x1cd7   :  { %v6154_v49 = vpop.eup %6153 }
0x1cd8   :  { %v4247_v12 = vmul.f32 %v6154_v49, %v4244_v50  ;;  %vm4252_vm13 = vweird.f32 %v6154_v49  ;;  %v6156_v48 = vpop.eup %6155 }
0x1cd9   :  { %vm4253_vm15 = vmor %vm4251_vm14, %vm4252_vm13  ;;  %v4161_v60 = vadd.f32 1.0, %v6156_v48 }
0x1cda   :  { %v4248_v5 = vsub.f32 1.0, %v4247_v12 }
0x1cdb   :  { %6157 = vrcp.f32 %v4161_v60  ;;  %v4188_v18 = vand.u32 2147483648, %v4161_v60  ;;  %vm4182_vm3 = vweird.f32 %v4161_v60  ;;  %v4186_v36 = vand.u32 2147483647, %v4161_v60 }
0x1cdc   :  { %v4249_v51 = vmul.f32 %v6154_v49, %v4248_v5  ;;  %6159 = vpow2.f32 %v5734_v8 }
0x1cdd   :  { %v4189_v63 = vor.u32 1.1754944e-38, %v4188_v18  ;;  %vm4187_vm5 = vcmp.eq.f32.partialorder %v4186_v36, 8.507059e+37 }
0x1cde   :  { %4198 = vrot.lane.b32.xlu2 %v4153_v35, %s6439_s24  ;;  %v4250_v45 = vadd.f32 %v6154_v49, %v4249_v51 }
0x1ce0   :  { %v4254_v57 = vsel %vm4253_vm15, %v6154_v49, %v4250_v45 }
0x1ce1   :  { %v7823_v58 = vsel %vm4256_vm0, %v4258_v30, %v4254_v57  ;;  %v6158_v6 = vpop.eup %6157 }
0x1ce2   :  { %v6160_v46 = vpop.eup %6159  ;;  %v4178_v19 = vmul.f32 %v6158_v6, %v4161_v60  ;;  %vm4183_vm2 = vweird.f32 %v6158_v6 }
0x1ce3   :  { %v4160_v16 = vadd.f32 1.0, %v6160_v46  ;;  %vm4184_vm4 = vmor %vm4182_vm3, %vm4183_vm2 }
0x1ce4   :  { %v4179_v27 = vsub.f32 1.0, %v4178_v19 }
0x1ce5   :  { %6161 = vrcp.f32 %v4160_v16  ;;  %v4173_v12 = vand.u32 2147483648, %v4160_v16  ;;  %vm4167_vm7 = vweird.f32 %v4160_v16  ;;  %v4171_v51 = vand.u32 2147483647, %v4160_v16 }
0x1ce6   :  { %6163 = vpow2.f32 %v5737_v29  ;;  %v4180_v52 = vmul.f32 %v6158_v6, %v4179_v27 }
0x1ce7   :  { %v4174_v39 = vor.u32 1.1754944e-38, %v4173_v12  ;;  %vm4172_vm9 = vcmp.eq.f32.partialorder %v4171_v51, 8.507059e+37 }
0x1ce8   :  { %v4181_v0 = vadd.f32 %v6158_v6, %v4180_v52 }
0x1cea   :  { %v4185_v2 = vsel %vm4184_vm4, %v6158_v6, %v4181_v0  ;;  %v4237_v6 = vld [vmem:[#allocation8 + $0x8] sm:$0xff] }
0x1ceb   :  { %v6162_v53 = vpop.eup %6161  ;;  %v7827_v50 = vsel %vm4187_vm5, %v4189_v63, %v4185_v2 }
0x1cec   :  { %v6164_v55 = vpop.eup %6163  ;;  %v4163_v13 = vmul.f32 %v6162_v53, %v4160_v16  ;;  %vm4168_vm6 = vweird.f32 %v6162_v53 }
0x1ced   :  { %v4245_v33 = vadd.f32 1.0, %v6164_v55  ;;  %vm4169_vm8 = vmor %vm4167_vm7, %vm4168_vm6 }
0x1cee   :  { %v4164_v9 = vsub.f32 1.0, %v4163_v13 }
0x1cef   :  { %6165 = vrcp.f32 %v4245_v33  ;;  %v4272_v48 = vand.u32 2147483648, %v4245_v33  ;;  %vm4266_vm11 = vweird.f32 %v4245_v33  ;;  %v4270_v60 = vand.u32 2147483647, %v4245_v33 }
0x1cf0   :  { %v4165_v40 = vmul.f32 %v6162_v53, %v4164_v9 }
0x1cf1   :  { %v4291_v31 = vpop.permute.xlu1 %4290  ;;  %v4273_v46 = vor.u32 1.1754944e-38, %v4272_v48  ;;  %vm4271_vm13 = vcmp.eq.f32.partialorder %v4270_v60, 8.507059e+37 }
0x1cf2   :  { %v4296_v10 = vmul.f32 %v4291_v31, %v7823_v58  ;;  %v4166_v35 = vadd.f32 %v6162_v53, %v4165_v40 }
0x1cf4   :  { %4300 = vrot.lane.b32.xlu1 %v4296_v10, %s6439_s24  ;;  %v4170_v45 = vsel %vm4169_vm8, %v6162_v53, %v4166_v35 }
0x1cf5   :  { %v6166_v49 = vpop.eup %6165  ;;  %v4175_v57 = vsel %vm4172_vm9, %v4174_v39, %v4170_v45 }
0x1cf6   :  { %v4262_v5 = vmul.f32 %v6166_v49, %v4245_v33  ;;  %vm4267_vm10 = vweird.f32 %v6166_v49 }
0x1cf7   :  { %vm4268_vm12 = vmor %vm4266_vm11, %vm4267_vm10 }
0x1cf8   :  { %v4263_v62 = vsub.f32 1.0, %v4262_v5 }
0x1cf9   :  { %v4197_v27 = vpop.permute.xlu1 %4196 }
0x1cfa   :  { %v4264_v10 = vmul.f32 %v6166_v49, %v4263_v62 }
0x1cfc   :  { %v4265_v28 = vadd.f32 %v6166_v49, %v4264_v10 }
0x1cfe   :  { %v4269_v8 = vsel %vm4268_vm12, %v6166_v49, %v4265_v28 }
0x1cff   :  { %v4274_v16 = vsel %vm4271_vm13, %v4273_v46, %v4269_v8 }
0x1d28   :  { %v4209_v56 = vpop.permute.xlu2 %4208 }
0x1d29   :  { %v4213_v17 = vmul.f32 %v4209_v56, %v7827_v50  ;;  %v4202_v56 = vmul.f32 %v4197_v27, %v4175_v57 }
0x1d2b   :  { %4218 = vrot.lane.b32.xlu1 %v4213_v17, %s6439_s24 }
0x1d30   :  { %v4281_v52 = vpop.permute.xlu2 %4280 }
0x1d31   :  { %v4286_v53 = vmul.f32 %v4281_v52, %v7823_v58 }
0x1d38   :  { %v4207_v30 = vpop.permute.xlu0 %4206  ;;  %v4199_v36 = vpop.permute.xlu2 %4198 }
0x1d39   :  { %v4212_v31 = vmul.f32 %v4207_v30, %v4175_v57  ;;  %v4203_v33 = vmul.f32 %v4199_v36, %v7827_v50 }
0x1d3b   :  { %4216 = vrot.lane.b32.xlu0 %v4212_v31, %s6439_s24 }
0x1d42   :  { %v4293_v19 = vpop.permute.xlu0 %4292 }
0x1d43   :  { %4282 = vrot.lane.b32.xlu0 %v4237_v6, %s6439_s24  ;;  %v4297_v29 = vmul.f32 %v4293_v19, %v4274_v16 }
0x1d45   :  { %4302 = vrot.lane.b32.xlu2 %v4297_v29, %s6439_s24 }
0x1d66   :  { %v4301_v0 = vpop.permute.xlu1 %4300 }
0x1d67   :  { %v4306_v55 = vadd.f32 %v4301_v0, %v4286_v53  ;;  %v3109_v53 = vadd.f32 %v7539_v43, %v7525_v23 }
0x1d69   :  { %6167 = vtanh.f32 %v4306_v55  ;;  %v3157_v0 = vadd.f32 %v7587_v4, %v3109_v53 }
0x1d6f   :  { %v6168_v18 = vpop.eup %6167 }
0x1d70   :  { %4312 = vrot.lane.b32.xlu1 %v6168_v18, %s6440_s4 }
0x1d9d   :  { %v4219_v13 = vpop.permute.xlu1 %4218 }
0x1d9e   :  { %v4223_v2 = vadd.f32 %v4219_v13, %v4203_v33 }
0x1d9f   :  { %v4303_v12 = vpop.permute.xlu2 %4302 }
0x1da0   :  { %6169 = vtanh.f32 %v4223_v2 }
0x1da6   :  { %v6170_v63 = vpop.eup %6169 }
0x1da7   :  { %4230 = vrot.lane.b32.xlu2 %v6170_v63, %s6440_s4  ;;  %v3050_v63 = vadd.f32 %v7662_v61, %v7541_v37 }
0x1da9   :  { %v3160_v23 = vadd.f32 %v7585_v59, %v3050_v63 }
0x1dad   :  { %v4217_v9 = vpop.permute.xlu0 %4216 }
0x1dae   :  { %v4222_v17 = vadd.f32 %v4217_v9, %v4202_v56 }
0x1db0   :  { %6171 = vtanh.f32 %v4222_v17 }
0x1db5   :  { %v4283_v40 = vpop.permute.xlu0 %4282 }
0x1db6   :  { %v6172_v49 = vpop.eup %6171  ;;  %v4287_v35 = vmul.f32 %v4283_v40, %v4274_v16  ;;  %v3112_v40 = vadd.f32 %v7545_v1, %v7531_v20 }
0x1db7   :  { %4228 = vrot.lane.b32.xlu0 %v6172_v49, %s6440_s4 }
0x1db8   :  { %v4307_v5 = vadd.f32 %v4303_v12, %v4287_v35  ;;  %v3159_v37 = vadd.f32 %v7587_v4, %v3112_v40 }
0x1dba   :  { %6173 = vtanh.f32 %v4307_v5 }
0x1dc0   :  { %v6174_v51 = vpop.eup %6173 }
0x1dc1   :  { %4314 = vrot.lane.b32.xlu0 %v6174_v51, %s6440_s4 }
0x1de2   :  { %v4313_v45 = vpop.permute.xlu1 %4312 }
0x1de3   :  { %v4318_v39 = vmul.f32 %v4313_v45, %v7823_v58 }
0x1de5   :  { %4342 = vrot.lane.b32.xlu2 %v4318_v39, %s6439_s24 }
0x1ded   :  { %4332 = vrot.lane.b32.xlu2 %v4222_v17, %s6441_s2  ;;  %v3053_v17 = vadd.f32 %v7664_v15, %v7547_v11 }
0x1def   :  { %v3162_v35 = vadd.f32 %v7585_v59, %v3053_v17 }
0x1df5   :  { %4354 = vrot.lane.b32.xlu2 %v4307_v5, %s6441_s2 }
0x1e01   :  { %v4231_v62 = vpop.permute.xlu2 %4230 }
0x1e02   :  { %v4235_v30 = vmul.f32 %v4231_v62, %v7827_v50 }
0x1e04   :  { %4324 = vrot.lane.b32.xlu0 %v4235_v30, %s6439_s24 }
0x1e0c   :  { %4352 = vrot.lane.b32.xlu0 %v4306_v55, %s6441_s2 }
0x1e29   :  { %v4229_v31 = vpop.permute.xlu0 %4228 }
0x1e2a   :  { %v4234_v10 = vmul.f32 %v4229_v31, %v4175_v57 }
0x1e2c   :  { %4322 = vrot.lane.b32.xlu1 %v4234_v10, %s6439_s24 }
0x1e33   :  { %v4315_v28 = vpop.permute.xlu0 %4314 }
0x1e34   :  { %v4319_v48 = vmul.f32 %v4315_v28, %v4274_v16 }
0x1e36   :  { %4344 = vrot.lane.b32.xlu1 %v4319_v48, %s6439_s24 }
0x1e3e   :  { %4334 = vrot.lane.b32.xlu1 %v4223_v2, %s6441_s2 }
0x1e3f   :  { %v4343_v58 = vpop.permute.xlu2 %4342 }
0x1e40   :  { %4348 = vst.msk [vmem:[#allocation7] sm:$0xff] %vm349_vm1, %v4343_v58 }
0x1e47   :  { %v4333_v60 = vpop.permute.xlu2 %4332  ;;  %v4401_v8 = vld [vmem:[#allocation7] sm:$0xff] }
0x1e48   :  { %4338 = vst.msk [vmem:[#allocation6] sm:$0xff] %vm349_vm1, %v4333_v60  ;;  %5740 = vmatmul.msk.f32.vlgmr.msra.gmra.mxu1 %vm349_vm1, %v4401_v8 }
0x1e4f   :  { %v4355_v50 = vpop.permute.xlu2 %4354  ;;  %v4438_v33 = vld [vmem:[#allocation6] sm:$0xff] }
0x1e50   :  { %4359 = vst.msk [vmem:[#allocation8 + $0x8] sm:$0xff] %vm349_vm1, %v4355_v50 }
0x1e76   :  { %v4325_v57 = vpop.permute.xlu0 %4324 }
0x1e77   :  { %4329 = vst.msk [vmem:[#allocation5 + $0x8] sm:$0xff] %vm349_vm1, %v4325_v57 }
0x1e7e   :  { %v4353_v6 = vpop.permute.xlu0 %4352  ;;  %v4363_v29 = vld [vmem:[#allocation5 + $0x8] sm:$0xff] }
0x1e7f   :  { %4358 = vst.msk [vmem:[#allocation8] sm:$0xff] %vm349_vm1, %v4353_v6 }
0x1e86   :  { %v4522_v10 = vld [vmem:[#allocation8] sm:$0xff] }
0x1e9e   :  { %v4323_v46 = vpop.permute.xlu1 %4322 }
0x1e9f   :  { %4328 = vst.msk [vmem:[#allocation5] sm:$0xff] %vm349_vm1, %v4323_v46 }
0x1ea6   :  { %v4362_v19 = vld [vmem:[#allocation5] sm:$0xff] }
0x1ea7   :  { %5738 = vmatmul.msk.f32.vlgmr.msra.gmra.mxu0 %vm349_vm1, %v4362_v19 }
0x1ea8   :  { %v4345_v16 = vpop.permute.xlu1 %4344 }
0x1ea9   :  { %4349 = vst.msk [vmem:[#allocation7 + $0x8] sm:$0xff] %vm349_vm1, %v4345_v16 }
0x1eaf   :  { %5739 = vmatmul.msk.f32.gmra.mxu0 %vm349_vm1, %v4363_v29 }
0x1eb0   :  { %v4335_v27 = vpop.permute.xlu1 %4334  ;;  %v4402_v52 = vld [vmem:[#allocation7 + $0x8] sm:$0xff] }
0x1eb1   :  { %4339 = vst.msk [vmem:[#allocation6 + $0x8] sm:$0xff] %vm349_vm1, %v4335_v27  ;;  %5741 = vmatmul.msk.f32.gmra.mxu1 %vm349_vm1, %v4402_v52 }
0x1eb8   :  { %v4439_v50 = vld [vmem:[#allocation6 + $0x8] sm:$0xff] }
0x1ec5   :  { %v4430_v55 = vpop.f32.mrf.mxu1 }
0x1ec6   :  { %v4436_v18 = vadd.f32 %v4430_v55, %v3157_v0 }
0x1ec8   :  { %6175 = vtanh.f32 %v4436_v18  ;;  %v5744_v13 = vmul.f32 -1.442695, %v4436_v18 }
0x1eca   :  { %6177 = vpow2.f32 %v5744_v13 }
0x1ece   :  { %v6176_v36 = vpop.eup %6175 }
0x1ecf   :  { %4576 = vrot.lane.b32.xlu1 %v6176_v36, %s6440_s4 }
0x1ed0   :  { %v6178_v2 = vpop.eup %6177 }
0x1ed1   :  { %v4530_v56 = vadd.f32 1.0, %v6178_v2 }
0x1ed3   :  { %6179 = vrcp.f32 %v4530_v56  ;;  %v4543_v30 = vand.u32 2147483648, %v4530_v56  ;;  %vm4537_vm15 = vweird.f32 %v4530_v56  ;;  %v4541_v31 = vand.u32 2147483647, %v4530_v56 }
0x1ed5   :  { %v4544_v48 = vor.u32 1.1754944e-38, %v4543_v30  ;;  %vm4542_vm2 = vcmp.eq.f32.partialorder %v4541_v31, 8.507059e+37 }
0x1ed7   :  { %4482 = vrot.lane.b32.xlu1 %v4438_v33, %s6439_s24 }
0x1ed9   :  { %v6180_v49 = vpop.eup %6179 }
0x1eda   :  { %v4533_v45 = vmul.f32 %v6180_v49, %v4530_v56  ;;  %vm4538_vm14 = vweird.f32 %v6180_v49 }
0x1edb   :  { %vm4539_vm0 = vmor %vm4537_vm15, %vm4538_vm14 }
0x1edc   :  { %v4534_v62 = vsub.f32 1.0, %v4533_v45 }
0x1ede   :  { %v4535_v20 = vmul.f32 %v6180_v49, %v4534_v62 }
0x1ee0   :  { %v4536_v15 = vadd.f32 %v6180_v49, %v4535_v20 }
0x1ee2   :  { %v4540_v28 = vsel %vm4539_vm0, %v6180_v49, %v4536_v15 }
0x1ee3   :  { %v7880_v58 = vsel %vm4542_vm2, %v4544_v48, %v4540_v28  ;;  %v4523_v48 = vld [vmem:[#allocation8 + $0x8] sm:$0xff] }
0x1f24   :  { %v4391_v43 = vpop.f32.mrf.mxu0 }
0x1f25   :  { %v4397_v9 = vadd.f32 %v4391_v43, %v3160_v23 }
0x1f27   :  { %6181 = vtanh.f32 %v4397_v9  ;;  %v5742_v19 = vmul.f32 -1.442695, %v4397_v9 }
0x1f2c   :  { %v4394_v12 = vpop.f32.mrf.mxu0 }
0x1f2d   :  { %v6182_v5 = vpop.eup %6181  ;;  %v4398_v51 = vadd.f32 %v4394_v12, %v3162_v35 }
0x1f2e   :  { %4492 = vrot.lane.b32.xlu0 %v6182_v5, %s6440_s4  ;;  %v4433_v61 = vpop.f32.mrf.mxu1 }
0x1f2f   :  { %6183 = vtanh.f32 %v4398_v51  ;;  %v4437_v39 = vadd.f32 %v4433_v61, %v3159_v37  ;;  %v5743_v57 = vmul.f32 -1.442695, %v4398_v51 }
0x1f31   :  { %6185 = vtanh.f32 %v4437_v39  ;;  %v5745_v53 = vmul.f32 -1.442695, %v4437_v39 }
0x1f32   :  { %6187 = vpow2.f32 %v5743_v57 }
0x1f35   :  { %v6184_v11 = vpop.eup %6183 }
0x1f36   :  { %4494 = vrot.lane.b32.xlu2 %v6184_v11, %s6440_s4 }
0x1f37   :  { %v6186_v1 = vpop.eup %6185 }
0x1f38   :  { %4578 = vrot.lane.b32.xlu0 %v6186_v1, %s6440_s4  ;;  %v6188_v6 = vpop.eup %6187 }
0x1f39   :  { %v4447_v46 = vadd.f32 1.0, %v6188_v6 }
0x1f3b   :  { %6189 = vrcp.f32 %v4447_v46  ;;  %v4474_v13 = vand.u32 2147483648, %v4447_v46  ;;  %vm4468_vm4 = vweird.f32 %v4447_v46  ;;  %v4472_v2 = vand.u32 2147483647, %v4447_v46 }
0x1f3c   :  { %6191 = vpow2.f32 %v5742_v19 }
0x1f3d   :  { %v4475_v43 = vor.u32 1.1754944e-38, %v4474_v13  ;;  %vm4473_vm6 = vcmp.eq.f32.partialorder %v4472_v2, 8.507059e+37 }
0x1f3e   :  { %4566 = vrot.lane.b32.xlu2 %v4522_v10, %s6439_s24 }
0x1f41   :  { %v4577_v60 = vpop.permute.xlu1 %4576  ;;  %v6190_v16 = vpop.eup %6189 }
0x1f42   :  { %v4582_v8 = vmul.f32 %v4577_v60, %v7880_v58  ;;  %v6192_v29 = vpop.eup %6191  ;;  %v4464_v27 = vmul.f32 %v6190_v16, %v4447_v46  ;;  %vm4469_vm3 = vweird.f32 %v6190_v16 }
0x1f43   :  { %v4446_v52 = vadd.f32 1.0, %v6192_v29  ;;  %vm4470_vm5 = vmor %vm4468_vm4, %vm4469_vm3 }
0x1f44   :  { %4586 = vrot.lane.b32.xlu1 %v4582_v8, %s6439_s24  ;;  %v4465_v0 = vsub.f32 1.0, %v4464_v27 }
0x1f45   :  { %6193 = vrcp.f32 %v4446_v52  ;;  %v4459_v51 = vand.u32 2147483648, %v4446_v52  ;;  %vm4453_vm8 = vweird.f32 %v4446_v52  ;;  %v4457_v61 = vand.u32 2147483647, %v4446_v52 }
0x1f46   :  { %4484 = vrot.lane.b32.xlu2 %v4439_v50, %s6439_s24  ;;  %6195 = vpow2.f32 %v5745_v53  ;;  %v4466_v55 = vmul.f32 %v6190_v16, %v4465_v0 }
0x1f47   :  { %v4460_v39 = vor.u32 1.1754944e-38, %v4459_v51  ;;  %vm4458_vm10 = vcmp.eq.f32.partialorder %v4457_v61, 8.507059e+37 }
0x1f48   :  { %v4467_v36 = vadd.f32 %v6190_v16, %v4466_v55 }
0x1f49   :  { %v4483_v57 = vpop.permute.xlu1 %4482 }
0x1f4a   :  { %v4471_v23 = vsel %vm4470_vm5, %v6190_v16, %v4467_v36 }
0x1f4b   :  { %v6194_v18 = vpop.eup %6193  ;;  %v7885_v17 = vsel %vm4473_vm6, %v4475_v43, %v4471_v23 }
0x1f4c   :  { %v6196_v33 = vpop.eup %6195  ;;  %v4449_v56 = vmul.f32 %v6194_v18, %v4446_v52  ;;  %vm4454_vm7 = vweird.f32 %v6194_v18 }
0x1f4d   :  { %v4531_v63 = vadd.f32 1.0, %v6196_v33  ;;  %vm4455_vm9 = vmor %vm4453_vm8, %vm4454_vm7 }
0x1f4e   :  { %v4450_v40 = vsub.f32 1.0, %v4449_v56 }
0x1f4f   :  { %6197 = vrcp.f32 %v4531_v63  ;;  %v4558_v31 = vand.u32 2147483648, %v4531_v63  ;;  %vm4552_vm12 = vweird.f32 %v4531_v63  ;;  %v4556_v10 = vand.u32 2147483647, %v4531_v63 }
0x1f50   :  { %v4451_v35 = vmul.f32 %v6194_v18, %v4450_v40 }
0x1f51   :  { %v4559_v60 = vor.u32 1.1754944e-38, %v4558_v31  ;;  %vm4557_vm14 = vcmp.eq.f32.partialorder %v4556_v10, 8.507059e+37 }
0x1f52   :  { %v4452_v5 = vadd.f32 %v6194_v18, %v4451_v35 }
0x1f54   :  { %v4456_v45 = vsel %vm4455_vm9, %v6194_v18, %v4452_v5 }
0x1f55   :  { %v6198_v12 = vpop.eup %6197  ;;  %v4461_v11 = vsel %vm4458_vm10, %v4460_v39, %v4456_v45 }
0x1f56   :  { %v4548_v37 = vmul.f32 %v6198_v12, %v4531_v63  ;;  %vm4553_vm11 = vweird.f32 %v6198_v12  ;;  %v4488_v36 = vmul.f32 %v4483_v57, %v4461_v11 }
0x1f57   :  { %vm4554_vm13 = vmor %vm4552_vm12, %vm4553_vm11 }
0x1f58   :  { %v4549_v62 = vsub.f32 1.0, %v4548_v37 }
0x1f5a   :  { %v4550_v15 = vmul.f32 %v6198_v12, %v4549_v62 }
0x1f5c   :  { %v4551_v30 = vadd.f32 %v6198_v12, %v4550_v15 }
0x1f5e   :  { %v4555_v28 = vsel %vm4554_vm13, %v6198_v12, %v4551_v30  ;;  %v3103_v30 = vadd.f32 %v7527_v26, %v7512_v38 }
0x1f5f   :  { %v4560_v50 = vsel %vm4557_vm14, %v4559_v60, %v4555_v28 }
0x1f90   :  { %v4495_v9 = vpop.permute.xlu2 %4494 }
0x1f91   :  { %v4499_v49 = vmul.f32 %v4495_v9, %v7885_v17 }
0x1f93   :  { %4504 = vrot.lane.b32.xlu1 %v4499_v49, %s6439_s24 }
0x1f98   :  { %v4567_v46 = vpop.permute.xlu2 %4566 }
0x1f99   :  { %v4572_v19 = vmul.f32 %v4567_v46, %v7880_v58 }
0x1fa0   :  { %v4493_v20 = vpop.permute.xlu0 %4492  ;;  %v4485_v52 = vpop.permute.xlu2 %4484 }
0x1fa1   :  { %v4498_v1 = vmul.f32 %v4493_v20, %v4461_v11  ;;  %v4489_v53 = vmul.f32 %v4485_v52, %v7885_v17 }
0x1fa3   :  { %4502 = vrot.lane.b32.xlu0 %v4498_v1, %s6439_s24 }
0x1faa   :  { %v4579_v8 = vpop.permute.xlu0 %4578 }
0x1fab   :  { %4568 = vrot.lane.b32.xlu0 %v4523_v48, %s6439_s24  ;;  %v4583_v6 = vmul.f32 %v4579_v8, %v4560_v50  ;;  %v3153_v48 = vadd.f32 %v7587_v4, %v3103_v30 }
0x1fad   :  { %4588 = vrot.lane.b32.xlu2 %v4583_v6, %s6439_s24 }
0x1fb6   :  { %v4587_v16 = vpop.permute.xlu1 %4586 }
0x1fb7   :  { %v4592_v29 = vadd.f32 %v4587_v16, %v4572_v19 }
0x1fb9   :  { %6199 = vtanh.f32 %v4592_v29 }
0x1fbf   :  { %v6200_v27 = vpop.eup %6199 }
0x1fc0   :  { %4598 = vrot.lane.b32.xlu1 %v6200_v27, %s6440_s4  ;;  %v3056_v27 = vadd.f32 %v7666_v22, %v7553_v32  ;;  %v3106_v22 = vadd.f32 %v7533_v7, %v7519_v47 }
0x2005   :  { %v4505_v0 = vpop.permute.xlu1 %4504 }
0x2006   :  { %v4509_v55 = vadd.f32 %v4505_v0, %v4489_v53  ;;  %v3164_v53 = vadd.f32 %v7585_v59, %v3056_v27 }
0x2007   :  { %v4589_v23 = vpop.permute.xlu2 %4588 }
0x2008   :  { %6201 = vtanh.f32 %v4509_v55 }
0x200e   :  { %v6202_v18 = vpop.eup %6201 }
0x200f   :  { %4516 = vrot.lane.b32.xlu2 %v6202_v18, %s6440_s4 }
0x2015   :  { %v4503_v33 = vpop.permute.xlu0 %4502 }
0x2016   :  { %v4508_v13 = vadd.f32 %v4503_v33, %v4488_v36 }
0x2018   :  { %6203 = vtanh.f32 %v4508_v13 }
0x201d   :  { %v4569_v2 = vpop.permute.xlu0 %4568 }
0x201e   :  { %v6204_v63 = vpop.eup %6203  ;;  %v4573_v56 = vmul.f32 %v4569_v2, %v4560_v50 }
0x201f   :  { %4514 = vrot.lane.b32.xlu0 %v6204_v63, %s6440_s4 }
0x2020   :  { %v4593_v43 = vadd.f32 %v4589_v23, %v4573_v56 }
0x2022   :  { %6205 = vtanh.f32 %v4593_v43 }
0x2028   :  { %v6206_v9 = vpop.eup %6205 }
0x2029   :  { %4600 = vrot.lane.b32.xlu0 %v6206_v9, %s6440_s4 }
0x2032   :  { %v4599_v40 = vpop.permute.xlu1 %4598 }
0x2033   :  { %v4604_v49 = vmul.f32 %v4599_v40, %v7880_v58 }
0x2035   :  { %4628 = vrot.lane.b32.xlu2 %v4604_v49, %s6439_s24 }
0x203d   :  { %4618 = vrot.lane.b32.xlu2 %v4508_v13, %s6441_s2  ;;  %v3059_v13 = vadd.f32 %v7668_v3, %v7559_v14  ;;  %v3155_v14 = vadd.f32 %v7587_v4, %v3106_v22 }
0x203f   :  { %v3166_v23 = vadd.f32 %v7585_v59, %v3059_v13 }
0x2045   :  { %4640 = vrot.lane.b32.xlu2 %v4593_v43, %s6441_s2 }
0x2069   :  { %v4517_v35 = vpop.permute.xlu2 %4516 }
0x206a   :  { %v4521_v12 = vmul.f32 %v4517_v35, %v7885_v17 }
0x206c   :  { %4610 = vrot.lane.b32.xlu0 %v4521_v12, %s6439_s24 }
0x2074   :  { %4638 = vrot.lane.b32.xlu0 %v4592_v29, %s6441_s2 }
0x208f   :  { %v4629_v5 = vpop.permute.xlu2 %4628 }
0x2090   :  { %4634 = vst.msk [vmem:[#allocation7] sm:$0xff] %vm349_vm1, %v4629_v5 }
0x2091   :  { %v4515_v51 = vpop.permute.xlu0 %4514 }
0x2092   :  { %v4520_v37 = vmul.f32 %v4515_v51, %v4461_v11 }
0x2094   :  { %4608 = vrot.lane.b32.xlu1 %v4520_v37, %s6439_s24 }
0x2097   :  { %v4619_v58 = vpop.permute.xlu2 %4618  ;;  %v4687_v61 = vld [vmem:[#allocation7] sm:$0xff] }
0x2098   :  { %4624 = vst.msk [vmem:[#allocation6] sm:$0xff] %vm349_vm1, %v4619_v58  ;;  %5748 = vmatmul.msk.f32.vlgmr.msrb.gmra.mxu3 %vm349_vm1, %v4687_v61 }
0x209b   :  { %v4601_v45 = vpop.permute.xlu0 %4600 }
0x209c   :  { %v4605_v39 = vmul.f32 %v4601_v45, %v4560_v50 }
0x209e   :  { %4630 = vrot.lane.b32.xlu1 %v4605_v39, %s6439_s24 }
0x209f   :  { %v4641_v17 = vpop.permute.xlu2 %4640  ;;  %v4724_v57 = vld [vmem:[#allocation6] sm:$0xff] }
0x20a0   :  { %4645 = vst.msk [vmem:[#allocation8 + $0x8] sm:$0xff] %vm349_vm1, %v4641_v17 }
0x20a6   :  { %4620 = vrot.lane.b32.xlu1 %v4509_v55, %s6441_s2 }
0x20de   :  { %v4611_v62 = vpop.permute.xlu0 %4610 }
0x20df   :  { %4615 = vst.msk [vmem:[#allocation5 + $0x8] sm:$0xff] %vm349_vm1, %v4611_v62 }
0x20e6   :  { %v4639_v11 = vpop.permute.xlu0 %4638  ;;  %v4649_v31 = vld [vmem:[#allocation5 + $0x8] sm:$0xff] }
0x20e7   :  { %4644 = vst.msk [vmem:[#allocation8] sm:$0xff] %vm349_vm1, %v4639_v11 }
0x20ee   :  { %v4808_v7 = vld [vmem:[#allocation8] sm:$0xff] }
0x2106   :  { %v4609_v20 = vpop.permute.xlu1 %4608 }
0x2107   :  { %4614 = vst.msk [vmem:[#allocation5] sm:$0xff] %vm349_vm1, %v4609_v20 }
0x210e   :  { %v4648_v1 = vld [vmem:[#allocation5] sm:$0xff] }
0x210f   :  { %5746 = vmatmul.msk.f32.vlgmr.msrb.gmra.mxu2 %vm349_vm1, %v4648_v1 }
0x2110   :  { %v4631_v15 = vpop.permute.xlu1 %4630 }
0x2111   :  { %4635 = vst.msk [vmem:[#allocation7 + $0x8] sm:$0xff] %vm349_vm1, %v4631_v15 }
0x2117   :  { %5747 = vmatmul.msk.f32.gmra.mxu2 %vm349_vm1, %v4649_v31 }
0x2118   :  { %v4621_v10 = vpop.permute.xlu1 %4620  ;;  %v4688_v28 = vld [vmem:[#allocation7 + $0x8] sm:$0xff] }
0x2119   :  { %4625 = vst.msk [vmem:[#allocation6 + $0x8] sm:$0xff] %vm349_vm1, %v4621_v10  ;;  %5749 = vmatmul.msk.f32.gmra.mxu3 %vm349_vm1, %v4688_v28 }
0x211b   :  { %v4716_v60 = vpop.f32.mrf.mxu3 }
0x211c   :  { %v4722_v8 = vadd.f32 %v4716_v60, %v3153_v48 }
0x211e   :  { %6207 = vtanh.f32 %v4722_v8  ;;  %v5752_v38 = vmul.f32 -1.442695, %v4722_v8 }
0x2120   :  { %6209 = vpow2.f32 %v5752_v38  ;;  %v4725_v12 = vld [vmem:[#allocation6 + $0x8] sm:$0xff] }
0x2124   :  { %v6208_v50 = vpop.eup %6207 }
0x2125   :  { %4862 = vrot.lane.b32.xlu1 %v6208_v50, %s6440_s4 }
0x2126   :  { %v6210_v26 = vpop.eup %6209 }
0x2127   :  { %v4816_v6 = vadd.f32 1.0, %v6210_v26 }
0x2129   :  { %6211 = vrcp.f32 %v4816_v6  ;;  %v4829_v0 = vand.u32 2147483648, %v4816_v6  ;;  %vm4823_vm0 = vweird.f32 %v4816_v6  ;;  %v4827_v18 = vand.u32 2147483647, %v4816_v6 }
0x212b   :  { %v4830_v2 = vor.u32 1.1754944e-38, %v4829_v0  ;;  %vm4828_vm3 = vcmp.eq.f32.partialorder %v4827_v18, 8.507059e+37 }
0x212d   :  { %4768 = vrot.lane.b32.xlu1 %v4724_v57, %s6439_s24 }
0x212f   :  { %v6212_v46 = vpop.eup %6211 }
0x2130   :  { %v4819_v19 = vmul.f32 %v6212_v46, %v4816_v6  ;;  %vm4824_vm15 = vweird.f32 %v6212_v46 }
0x2131   :  { %vm4825_vm2 = vmor %vm4823_vm0, %vm4824_vm15 }
0x2132   :  { %v4820_v16 = vsub.f32 1.0, %v4819_v19 }
0x2134   :  { %v4821_v29 = vmul.f32 %v6212_v46, %v4820_v16 }
0x2136   :  { %v4822_v52 = vadd.f32 %v6212_v46, %v4821_v29 }
0x2138   :  { %v4826_v33 = vsel %vm4825_vm2, %v6212_v46, %v4822_v52 }
0x2139   :  { %v7930_v63 = vsel %vm4828_vm3, %v4830_v2, %v4826_v33 }
0x2192   :  { %v4677_v55 = vpop.f32.mrf.mxu2 }
0x2193   :  { %v4683_v36 = vadd.f32 %v4677_v55, %v3164_v53 }
0x2195   :  { %6213 = vtanh.f32 %v4683_v36  ;;  %v5750_v58 = vmul.f32 -1.442695, %v4683_v36 }
0x2197   :  { %v4863_v32 = vpop.permute.xlu1 %4862 }
0x2198   :  { %v4868_v56 = vmul.f32 %v4863_v32, %v7930_v63 }
0x219a   :  { %v4680_v43 = vpop.f32.mrf.mxu2  ;;  %4872 = vrot.lane.b32.xlu1 %v4868_v56, %s6439_s24 }
0x219b   :  { %v6214_v9 = vpop.eup %6213  ;;  %v4684_v40 = vadd.f32 %v4680_v43, %v3166_v23 }
0x219c   :  { %4778 = vrot.lane.b32.xlu0 %v6214_v9, %s6440_s4  ;;  %v4719_v3 = vpop.f32.mrf.mxu3 }
0x219d   :  { %6215 = vtanh.f32 %v4684_v40  ;;  %v4723_v49 = vadd.f32 %v4719_v3, %v3155_v14  ;;  %v5751_v5 = vmul.f32 -1.442695, %v4684_v40  ;;  %v4809_v3 = vld [vmem:[#allocation8 + $0x8] sm:$0xff] }
0x219f   :  { %6217 = vtanh.f32 %v4723_v49  ;;  %v5753_v62 = vmul.f32 -1.442695, %v4723_v49  ;;  %v4769_v46 = vpop.permute.xlu1 %4768 }
0x21a0   :  { %6219 = vpow2.f32 %v5751_v5 }
0x21a3   :  { %v6216_v35 = vpop.eup %6215 }
0x21a4   :  { %4780 = vrot.lane.b32.xlu2 %v6216_v35, %s6440_s4 }
0x21a5   :  { %v6218_v47 = vpop.eup %6217 }
0x21a6   :  { %4864 = vrot.lane.b32.xlu0 %v6218_v47, %s6440_s4  ;;  %v6220_v51 = vpop.eup %6219 }
0x21a7   :  { %v4733_v37 = vadd.f32 1.0, %v6220_v51 }
0x21a9   :  { %6221 = vrcp.f32 %v4733_v37  ;;  %v4760_v31 = vand.u32 2147483648, %v4733_v37  ;;  %vm4754_vm5 = vweird.f32 %v4733_v37  ;;  %v4758_v10 = vand.u32 2147483647, %v4733_v37 }
0x21aa   :  { %6223 = vpow2.f32 %v5750_v58 }
0x21ab   :  { %v4761_v8 = vor.u32 1.1754944e-38, %v4760_v31  ;;  %vm4759_vm7 = vcmp.eq.f32.partialorder %v4758_v10, 8.507059e+37  ;;  %v4977_v10 = vld [vmem:[%s8159_s7 + $0x10] sm:$0xff] }
0x21ac   :  { %4852 = vrot.lane.b32.xlu2 %v4808_v7, %s6439_s24 }
0x21af   :  { %v6222_v61 = vpop.eup %6221 }
0x21b0   :  { %v6224_v45 = vpop.eup %6223  ;;  %v4750_v39 = vmul.f32 %v6222_v61, %v4733_v37  ;;  %vm4755_vm4 = vweird.f32 %v6222_v61 }
0x21b1   :  { %v4732_v17 = vadd.f32 1.0, %v6224_v45  ;;  %vm4756_vm6 = vmor %vm4754_vm5, %vm4755_vm4 }
0x21b2   :  { %v4751_v11 = vsub.f32 1.0, %v4750_v39 }
0x21b3   :  { %6225 = vrcp.f32 %v4732_v17  ;;  %v4745_v29 = vand.u32 2147483648, %v4732_v17  ;;  %vm4739_vm9 = vweird.f32 %v4732_v17  ;;  %v4743_v53 = vand.u32 2147483647, %v4732_v17 }
0x21b4   :  { %4770 = vrot.lane.b32.xlu2 %v4725_v12, %s6439_s24  ;;  %6227 = vpow2.f32 %v5753_v62  ;;  %v4752_v20 = vmul.f32 %v6222_v61, %v4751_v11 }
0x21b5   :  { %v4746_v18 = vor.u32 1.1754944e-38, %v4745_v29  ;;  %vm4744_vm11 = vcmp.eq.f32.partialorder %v4743_v53, 8.507059e+37  ;;  %v4938_v53 = vld [vmem:[#allocation16 + $0x10] sm:$0xff] }
0x21b6   :  { %v4753_v15 = vadd.f32 %v6222_v61, %v4752_v20 }
0x21b8   :  { %v4757_v60 = vsel %vm4756_vm6, %v6222_v61, %v4753_v15 }
0x21b9   :  { %v6226_v1 = vpop.eup %6225  ;;  %v7943_v57 = vsel %vm4759_vm7, %v4761_v8, %v4757_v60 }
0x21ba   :  { %v6228_v30 = vpop.eup %6227  ;;  %v4735_v48 = vmul.f32 %v6226_v1, %v4732_v17  ;;  %vm4740_vm8 = vweird.f32 %v6226_v1 }
0x21bb   :  { %v4817_v28 = vadd.f32 1.0, %v6228_v30  ;;  %vm4741_vm10 = vmor %vm4739_vm9, %vm4740_vm8 }
0x21bc   :  { %v4736_v38 = vsub.f32 1.0, %v4735_v48  ;;  %v4975_v48 = vld [vmem:[%s8159_s7] sm:$0xff] }
0x21bd   :  { %6229 = vrcp.f32 %v4817_v28  ;;  %v4844_v9 = vand.u32 2147483648, %v4817_v28  ;;  %vm4838_vm13 = vweird.f32 %v4817_v28  ;;  %v4842_v40 = vand.u32 2147483647, %v4817_v28 }
0x21be   :  { %v4737_v6 = vmul.f32 %v6226_v1, %v4736_v38 }
0x21bf   :  { %v4845_v49 = vor.u32 1.1754944e-38, %v4844_v9  ;;  %vm4843_vm15 = vcmp.eq.f32.partialorder %v4842_v40, 8.507059e+37 }
0x21c0   :  { %v4738_v16 = vadd.f32 %v6226_v1, %v4737_v6 }
0x21c2   :  { %v4742_v0 = vsel %vm4741_vm10, %v6226_v1, %v4738_v16 }
0x21c3   :  { %v6230_v19 = vpop.eup %6229  ;;  %v7950_v2 = vsel %vm4744_vm11, %v4746_v18, %v4742_v0  ;;  %v4937_v0 = vld [vmem:[#allocation16 + $0x8] sm:$0xff]  ;;  %v3097_v18 = vadd.f32 %v7514_v42, %v7476_v21 }
0x21c4   :  { %v4834_v52 = vmul.f32 %v6230_v19, %v4817_v28  ;;  %vm4839_vm12 = vweird.f32 %v6230_v19  ;;  %v4774_v61 = vmul.f32 %v4769_v46, %v7950_v2  ;;  %v4976_v28 = vld [vmem:[%s8159_s7 + $0x8] sm:$0xff] }
0x21c5   :  { %vm4840_vm14 = vmor %vm4838_vm13, %vm4839_vm12 }
0x21c6   :  { %v4835_v33 = vsub.f32 1.0, %v4834_v52  ;;  %v4939_v52 = vld [vmem:[#allocation16 + $0x18] sm:$0xff] }
0x21c7   :  { %4958 = vmatpush.msrb.mxu0 %v4939_v52  ;;  %5244 = vmatpush.msra.mxu2 %v4939_v52 }
0x21c8   :  { %v4836_v56 = vmul.f32 %v6230_v19, %v4835_v33 }
0x21c9   :  { %4959 = vmatpush.msrb.mxu0 %v4938_v53  ;;  %5245 = vmatpush.msra.mxu2 %v4938_v53 }
0x21ca   :  { %v4837_v23 = vadd.f32 %v6230_v19, %v4836_v56 }
0x21cb   :  { %4960 = vmatpush.msrb.mxu0 %v4937_v0  ;;  %5246 = vmatpush.msra.mxu2 %v4937_v0 }
0x21cc   :  { %v4841_v14 = vsel %vm4840_vm14, %v6230_v19, %v4837_v23 }
0x21cd   :  { %v4846_v47 = vsel %vm4843_vm15, %v4845_v49, %v4841_v14 }
0x21fe   :  { %v4781_v50 = vpop.permute.xlu2 %4780 }
0x21ff   :  { %v4785_v26 = vmul.f32 %v4781_v50, %v7943_v57 }
0x2201   :  { %4790 = vrot.lane.b32.xlu1 %v4785_v26, %s6439_s24 }
0x2206   :  { %v4853_v27 = vpop.permute.xlu2 %4852 }
0x2207   :  { %v4858_v55 = vmul.f32 %v4853_v27, %v7930_v63 }
0x220c   :  { %v4873_v36 = vpop.permute.xlu1 %4872 }
0x220d   :  { %v7948_v13 = vadd.f32 %v4873_v36, %v4858_v55  ;;  %v4936_v55 = vld [vmem:[#allocation16] sm:$0xff]  ;;  %v3149_v36 = vadd.f32 %v7587_v4, %v3097_v18 }
0x220e   :  { %v4779_v32 = vpop.permute.xlu0 %4778  ;;  %v4771_v12 = vpop.permute.xlu2 %4770  ;;  %4961 = vmatpush.msrb.mxu0 %v4936_v55  ;;  %5247 = vmatpush.msra.mxu2 %v4936_v55 }
0x220f   :  { %6231 = vtanh.f32 %v7948_v13  ;;  %v4784_v22 = vmul.f32 %v4779_v32, %v7950_v2  ;;  %v4775_v5 = vmul.f32 %v4771_v12, %v7943_v57 }
0x2211   :  { %4788 = vrot.lane.b32.xlu0 %v4784_v22, %s6439_s24 }
0x2215   :  { %v6232_v43 = vpop.eup %6231 }
0x2216   :  { %4884 = vrot.lane.b32.xlu1 %v6232_v43, %s6440_s4 }
0x2218   :  { %v4865_v35 = vpop.permute.xlu0 %4864 }
0x2219   :  { %4854 = vrot.lane.b32.xlu0 %v4809_v3, %s6439_s24  ;;  %v4869_v7 = vmul.f32 %v4865_v35, %v4846_v47 }
0x221b   :  { %4874 = vrot.lane.b32.xlu2 %v4869_v7, %s6439_s24 }
0x2273   :  { %v4791_v51 = vpop.permute.xlu1 %4790 }
0x2274   :  { %v4795_v37 = vadd.f32 %v4791_v51, %v4775_v5 }
0x2275   :  { %v4875_v15 = vpop.permute.xlu2 %4874 }
0x2276   :  { %6233 = vtanh.f32 %v4795_v37 }
0x227c   :  { %v6234_v58 = vpop.eup %6233 }
0x227d   :  { %4802 = vrot.lane.b32.xlu2 %v6234_v58, %s6440_s4 }
0x2283   :  { %v4789_v45 = vpop.permute.xlu0 %4788 }
0x2284   :  { %v4794_v39 = vadd.f32 %v4789_v45, %v4774_v61 }
0x2286   :  { %6235 = vtanh.f32 %v4794_v39 }
0x2288   :  { %v4885_v17 = vpop.permute.xlu1 %4884 }
0x2289   :  { %v4890_v62 = vmul.f32 %v4885_v17, %v7930_v63  ;;  %v4978_v63 = vld [vmem:[%s8159_s7 + $0x18] sm:$0xff] }
0x228a   :  { %4997 = vmatpush.msrb.mxu1 %v4978_v63  ;;  %5283 = vmatpush.msra.mxu3 %v4978_v63 }
0x228b   :  { %v4855_v11 = vpop.permute.xlu0 %4854  ;;  %4914 = vrot.lane.b32.xlu2 %v4890_v62, %s6439_s24 }
0x228c   :  { %v6236_v20 = vpop.eup %6235  ;;  %v4859_v1 = vmul.f32 %v4855_v11, %v4846_v47  ;;  %4998 = vmatpush.msrb.mxu1 %v4977_v10  ;;  %5284 = vmatpush.msra.mxu3 %v4977_v10 }
0x228d   :  { %4800 = vrot.lane.b32.xlu0 %v6236_v20, %s6440_s4  ;;  %v3065_v20 = vadd.f32 %v7674_v24, %v7571_v25 }
0x228e   :  { %v4879_v30 = vadd.f32 %v4875_v15, %v4859_v1  ;;  %4999 = vmatpush.msrb.mxu1 %v4976_v28  ;;  %5285 = vmatpush.msra.mxu3 %v4976_v28  ;;  %v8173_v1 = vld [vmem:[#allocation24_spill] sm:$0xff] }
0x228f   :  { %v3100_v15 = vadd.f32 %v8173_v1, %v7497_v54 }
0x2290   :  { %6237 = vtanh.f32 %v4879_v30  ;;  %5000 = vmatpush.msrb.mxu1 %v4975_v48  ;;  %5286 = vmatpush.msra.mxu3 %v4975_v48 }
0x2293   :  { %4904 = vrot.lane.b32.xlu2 %v4794_v39, %s6441_s2  ;;  %v3062_v39 = vadd.f32 %v7670_v44, %v7565_v41  ;;  %v3151_v41 = vadd.f32 %v7587_v4, %v3100_v15 }
0x2295   :  { %v3168_v17 = vadd.f32 %v7585_v59, %v3062_v39 }
0x2296   :  { %v6238_v31 = vpop.eup %6237 }
0x2297   :  { %4886 = vrot.lane.b32.xlu0 %v6238_v31, %s6440_s4 }
0x229b   :  { %4926 = vrot.lane.b32.xlu2 %v4879_v30, %s6441_s2  ;;  %v3170_v30 = vadd.f32 %v7585_v59, %v3065_v20 }
0x22d7   :  { %v4803_v60 = vpop.permute.xlu2 %4802 }
0x22d8   :  { %v4807_v8 = vmul.f32 %v4803_v60, %v7943_v57 }
0x22da   :  { %4896 = vrot.lane.b32.xlu0 %v4807_v8, %s6439_s24 }
0x22e2   :  { %4924 = vrot.lane.b32.xlu0 %v7948_v13, %s6441_s2 }
0x22e5   :  { %v4915_v50 = vpop.permute.xlu2 %4914 }
0x22e6   :  { %4920 = vst.msk [vmem:[#allocation7] sm:$0xff] %vm349_vm1, %v4915_v50 }
0x22ed   :  { %v4905_v38 = vpop.permute.xlu2 %4904  ;;  %v4973_v26 = vld [vmem:[#allocation7] sm:$0xff] }
0x22ee   :  { %4910 = vst.msk [vmem:[#allocation6] sm:$0xff] %vm349_vm1, %v4905_v38  ;;  %5756 = vmatmul.msk.f32.vlgmr.msrb.gmra.mxu1 %vm349_vm1, %v4973_v26 }
0x22f5   :  { %v4927_v6 = vpop.permute.xlu2 %4926  ;;  %v5010_v56 = vld [vmem:[#allocation6] sm:$0xff] }
0x22f6   :  { %4931 = vst.msk [vmem:[#allocation8 + $0x8] sm:$0xff] %vm349_vm1, %v4927_v6 }
0x22fd   :  { %v5095_v1 = vld [vmem:[#allocation8 + $0x8] sm:$0xff] }
0x22ff   :  { %v4801_v46 = vpop.permute.xlu0 %4800 }
0x2300   :  { %v4806_v57 = vmul.f32 %v4801_v46, %v7950_v2 }
0x2302   :  { %4894 = vrot.lane.b32.xlu1 %v4806_v57, %s6439_s24 }
0x2309   :  { %v4887_v19 = vpop.permute.xlu0 %4886 }
0x230a   :  { %v4891_v16 = vmul.f32 %v4887_v19, %v4846_v47 }
0x230c   :  { %4916 = vrot.lane.b32.xlu1 %v4891_v16, %s6439_s24 }
0x2314   :  { %4906 = vrot.lane.b32.xlu1 %v4795_v37, %s6441_s2 }
0x234c   :  { %v4897_v29 = vpop.permute.xlu0 %4896 }
0x234d   :  { %4901 = vst.msk [vmem:[#allocation5 + $0x8] sm:$0xff] %vm349_vm1, %v4897_v29 }
0x2354   :  { %v4925_v27 = vpop.permute.xlu0 %4924  ;;  %v4935_v21 = vld [vmem:[#allocation5 + $0x8] sm:$0xff] }
0x2355   :  { %4930 = vst.msk [vmem:[#allocation8] sm:$0xff] %vm349_vm1, %v4925_v27 }
0x235c   :  { %v5094_v54 = vld [vmem:[#allocation8] sm:$0xff] }
0x236b   :  { %v5002_v33 = vpop.f32.mrf.mxu1 }
0x236c   :  { %v5008_v13 = vadd.f32 %v5002_v33, %v3149_v36 }
0x236e   :  { %6239 = vtanh.f32 %v5008_v13  ;;  %v5760_v9 = vmul.f32 -1.442695, %v5008_v13 }
0x2370   :  { %6241 = vpow2.f32 %v5760_v9 }
0x2374   :  { %v6240_v2 = vpop.eup %6239  ;;  %v4895_v32 = vpop.permute.xlu1 %4894 }
0x2375   :  { %4900 = vst.msk [vmem:[#allocation5] sm:$0xff] %vm349_vm1, %v4895_v32  ;;  %5148 = vrot.lane.b32.xlu1 %v6240_v2, %s6440_s4 }
0x2376   :  { %v6242_v40 = vpop.eup %6241 }
0x2377   :  { %v5102_v14 = vadd.f32 1.0, %v6242_v40 }
0x2379   :  { %6243 = vrcp.f32 %v5102_v14  ;;  %v5115_v12 = vand.u32 2147483648, %v5102_v14  ;;  %vm5109_vm2 = vweird.f32 %v5102_v14  ;;  %v5113_v5 = vand.u32 2147483647, %v5102_v14 }
0x237b   :  { %v5116_v37 = vor.u32 1.1754944e-38, %v5115_v12  ;;  %vm5114_vm4 = vcmp.eq.f32.partialorder %v5113_v5, 8.507059e+37 }
0x237c   :  { %v4934_v22 = vld [vmem:[#allocation5] sm:$0xff] }
0x237d   :  { %5754 = vmatmul.msk.f32.vlgmr.msrb.gmra.mxu0 %vm349_vm1, %v4934_v22  ;;  %5054 = vrot.lane.b32.xlu1 %v5010_v56, %s6439_s24 }
0x237e   :  { %v4917_v23 = vpop.permute.xlu1 %4916 }
0x237f   :  { %4921 = vst.msk [vmem:[#allocation7 + $0x8] sm:$0xff] %vm349_vm1, %v4917_v23  ;;  %v6244_v3 = vpop.eup %6243 }
0x2380   :  { %v5105_v49 = vmul.f32 %v6244_v3, %v5102_v14  ;;  %vm5110_vm0 = vweird.f32 %v6244_v3 }
0x2381   :  { %vm5111_vm3 = vmor %vm5109_vm2, %vm5110_vm0 }
0x2382   :  { %v5106_v35 = vsub.f32 1.0, %v5105_v49 }
0x2384   :  { %v5107_v47 = vmul.f32 %v6244_v3, %v5106_v35 }
0x2385   :  { %5755 = vmatmul.msk.f32.gmra.mxu0 %vm349_vm1, %v4935_v21 }
0x2386   :  { %v4907_v42 = vpop.permute.xlu1 %4906  ;;  %v4974_v43 = vld [vmem:[#allocation7 + $0x8] sm:$0xff]  ;;  %v5108_v7 = vadd.f32 %v6244_v3, %v5107_v47 }
0x2387   :  { %4911 = vst.msk [vmem:[#allocation6 + $0x8] sm:$0xff] %vm349_vm1, %v4907_v42  ;;  %5757 = vmatmul.msk.f32.gmra.mxu1 %vm349_vm1, %v4974_v43 }
0x2388   :  { %v5112_v51 = vsel %vm5111_vm3, %v6244_v3, %v5108_v7 }
0x2389   :  { %v8004_v58 = vsel %vm5114_vm4, %v5116_v37, %v5112_v51 }
0x238e   :  { %v5011_v24 = vld [vmem:[#allocation6 + $0x8] sm:$0xff] }
0x23e7   :  { %v5149_v61 = vpop.permute.xlu1 %5148 }
0x23e8   :  { %v5154_v45 = vmul.f32 %v5149_v61, %v8004_v58 }
0x23ea   :  { %5158 = vrot.lane.b32.xlu1 %v5154_v45, %s6439_s24 }
0x23ef   :  { %v5055_v23 = vpop.permute.xlu1 %5054 }
0x23fa   :  { %v4963_v62 = vpop.f32.mrf.mxu0 }
0x23fb   :  { %v4969_v11 = vadd.f32 %v4963_v62, %v3168_v17 }
0x23fd   :  { %6245 = vtanh.f32 %v4969_v11  ;;  %v5758_v38 = vmul.f32 -1.442695, %v4969_v11 }
0x2402   :  { %v4966_v31 = vpop.f32.mrf.mxu0 }
0x2403   :  { %v6246_v63 = vpop.eup %6245  ;;  %v4970_v10 = vadd.f32 %v4966_v31, %v3170_v30 }
0x2404   :  { %5064 = vrot.lane.b32.xlu0 %v6246_v63, %s6440_s4  ;;  %v5005_v44 = vpop.f32.mrf.mxu1 }
0x2405   :  { %6247 = vtanh.f32 %v4970_v10  ;;  %v5009_v28 = vadd.f32 %v5005_v44, %v3151_v41  ;;  %v5759_v60 = vmul.f32 -1.442695, %v4970_v10 }
0x2407   :  { %6249 = vtanh.f32 %v5009_v28  ;;  %v5761_v19 = vmul.f32 -1.442695, %v5009_v28 }
0x2408   :  { %6251 = vpow2.f32 %v5759_v60 }
0x240b   :  { %v6248_v48 = vpop.eup %6247 }
0x240c   :  { %5066 = vrot.lane.b32.xlu2 %v6248_v48, %s6440_s4 }
0x240d   :  { %v6250_v25 = vpop.eup %6249 }
0x240e   :  { %5150 = vrot.lane.b32.xlu0 %v6250_v25, %s6440_s4  ;;  %v6252_v8 = vpop.eup %6251 }
0x240f   :  { %v5019_v50 = vadd.f32 1.0, %v6252_v8 }
0x2411   :  { %6253 = vrcp.f32 %v5019_v50  ;;  %v5046_v0 = vand.u32 2147483648, %v5019_v50  ;;  %vm5040_vm6 = vweird.f32 %v5019_v50  ;;  %v5044_v55 = vand.u32 2147483647, %v5019_v50 }
0x2412   :  { %6255 = vpow2.f32 %v5758_v38 }
0x2413   :  { %v5047_v13 = vor.u32 1.1754944e-38, %v5046_v0  ;;  %vm5045_vm8 = vcmp.eq.f32.partialorder %v5044_v55, 8.507059e+37 }
0x2414   :  { %5138 = vrot.lane.b32.xlu2 %v5094_v54, %s6439_s24 }
0x2417   :  { %v6254_v26 = vpop.eup %6253 }
0x2418   :  { %v6256_v6 = vpop.eup %6255  ;;  %v5036_v46 = vmul.f32 %v6254_v26, %v5019_v50  ;;  %vm5041_vm5 = vweird.f32 %v6254_v26 }
0x2419   :  { %v5018_v57 = vadd.f32 1.0, %v6256_v6  ;;  %vm5042_vm7 = vmor %vm5040_vm6, %vm5041_vm5 }
0x241a   :  { %v5037_v16 = vsub.f32 1.0, %v5036_v46 }
0x241b   :  { %6257 = vrcp.f32 %v5018_v57  ;;  %v5031_v3 = vand.u32 2147483648, %v5018_v57  ;;  %vm5025_vm10 = vweird.f32 %v5018_v57  ;;  %v5029_v47 = vand.u32 2147483647, %v5018_v57 }
0x241c   :  { %5056 = vrot.lane.b32.xlu2 %v5011_v24, %s6439_s24  ;;  %6259 = vpow2.f32 %v5761_v19  ;;  %v5038_v29 = vmul.f32 %v6254_v26, %v5037_v16 }
0x241d   :  { %v5032_v12 = vor.u32 1.1754944e-38, %v5031_v3  ;;  %vm5030_vm12 = vcmp.eq.f32.partialorder %v5029_v47, 8.507059e+37  ;;  %v8176_v47 = vld [vmem:[#allocation25_spill] sm:$0xff] }
0x241e   :  { %v5039_v52 = vadd.f32 %v6254_v26, %v5038_v29 }
0x2420   :  { %v5043_v36 = vsel %vm5042_vm7, %v6254_v26, %v5039_v52 }
0x2421   :  { %v6258_v27 = vpop.eup %6257  ;;  %v8022_v32 = vsel %vm5045_vm8, %v5047_v13, %v5043_v36  ;;  %v8174_v13 = vld [vmem:[#allocation20_spill] sm:$0xff] }
0x2422   :  { %v6260_v53 = vpop.eup %6259  ;;  %v5021_v33 = vmul.f32 %v6258_v27, %v5018_v57  ;;  %vm5026_vm9 = vweird.f32 %v6258_v27 }
0x2423   :  { %v5103_v18 = vadd.f32 1.0, %v6260_v53  ;;  %vm5027_vm11 = vmor %vm5025_vm10, %vm5026_vm9 }
0x2424   :  { %v5022_v56 = vsub.f32 1.0, %v5021_v33 }
0x2425   :  { %6261 = vrcp.f32 %v5103_v18  ;;  %v5130_v62 = vand.u32 2147483648, %v5103_v18  ;;  %vm5124_vm14 = vweird.f32 %v5103_v18  ;;  %v5128_v11 = vand.u32 2147483647, %v5103_v18 }
0x2426   :  { %v5023_v21 = vmul.f32 %v6258_v27, %v5022_v56 }
0x2427   :  { %v5131_v15 = vor.u32 1.1754944e-38, %v5130_v62  ;;  %vm5129_vm0 = vcmp.eq.f32.partialorder %v5128_v11, 8.507059e+37  ;;  %v8180_v62 = vld [vmem:[#allocation23_spill] sm:$0xff] }
0x2428   :  { %v5024_v40 = vadd.f32 %v6258_v27, %v5023_v21 }
0x242a   :  { %v5028_v7 = vsel %vm5027_vm11, %v6258_v27, %v5024_v40 }
0x242b   :  { %v6262_v42 = vpop.eup %6261  ;;  %v5033_v37 = vsel %vm5030_vm12, %v5032_v12, %v5028_v7  ;;  %v3068_v7 = vadd.f32 %v7677_v34, %v8176_v47 }
0x242c   :  { %v5120_v49 = vmul.f32 %v6262_v42, %v5103_v18  ;;  %vm5125_vm13 = vweird.f32 %v6262_v42  ;;  %v5060_v25 = vmul.f32 %v5055_v23, %v5033_v37 }
0x242d   :  { %vm5126_vm15 = vmor %vm5124_vm14, %vm5125_vm13  ;;  %v3172_v12 = vadd.f32 %v7585_v59, %v3068_v7 }
0x242e   :  { %v5121_v5 = vsub.f32 1.0, %v5120_v49 }
0x2430   :  { %v5122_v45 = vmul.f32 %v6262_v42, %v5121_v5 }
0x2432   :  { %v5123_v17 = vadd.f32 %v6262_v42, %v5122_v45  ;;  %v8178_v45 = vld [vmem:[#allocation27_spill] sm:$0xff] }
0x2434   :  { %v5127_v20 = vsel %vm5126_vm15, %v6262_v42, %v5123_v17  ;;  %v8179_v17 = vld [vmem:[#allocation21_spill] sm:$0xff] }
0x2435   :  { %v5132_v31 = vsel %vm5129_vm0, %v5131_v15, %v5127_v20  ;;  %v3094_v11 = vadd.f32 %v8180_v62, %v8179_v17 }
0x2437   :  { %v3147_v34 = vadd.f32 %v7587_v4, %v3094_v11 }
0x245c   :  { %v5159_v14 = vpop.permute.xlu1 %5158 }
0x2466   :  { %v5067_v2 = vpop.permute.xlu2 %5066 }
0x2467   :  { %v5071_v22 = vmul.f32 %v5067_v2, %v8022_v32  ;;  %v8175_v2 = vld [vmem:[#allocation22_spill] sm:$0xff] }
0x2469   :  { %5076 = vrot.lane.b32.xlu1 %v5071_v22, %s6439_s24 }
0x246e   :  { %v5139_v43 = vpop.permute.xlu2 %5138 }
0x246f   :  { %v5144_v9 = vmul.f32 %v5139_v43, %v8004_v58 }
0x2471   :  { %v8027_v35 = vadd.f32 %v5159_v14, %v5144_v9 }
0x2473   :  { %6263 = vtanh.f32 %v8027_v35 }
0x2476   :  { %v5065_v51 = vpop.permute.xlu0 %5064  ;;  %v5057_v10 = vpop.permute.xlu2 %5056 }
0x2477   :  { %v5070_v61 = vmul.f32 %v5065_v51, %v5033_v37  ;;  %v5061_v41 = vmul.f32 %v5057_v10, %v8022_v32 }
0x2479   :  { %v6264_v39 = vpop.eup %6263  ;;  %5074 = vrot.lane.b32.xlu0 %v5070_v61, %s6439_s24  ;;  %v8177_v61 = vld [vmem:[#allocation26_spill] sm:$0xff] }
0x247a   :  { %5170 = vrot.lane.b32.xlu1 %v6264_v39, %s6440_s4  ;;  %v3071_v39 = vadd.f32 %v8178_v45, %v8177_v61 }
0x2480   :  { %v5151_v30 = vpop.permute.xlu0 %5150 }
0x2481   :  { %5140 = vrot.lane.b32.xlu0 %v5095_v1, %s6439_s24  ;;  %v5155_v63 = vmul.f32 %v5151_v30, %v5132_v31  ;;  %v3174_v1 = vadd.f32 %v7585_v59, %v3071_v39 }
0x2483   :  { %5160 = vrot.lane.b32.xlu2 %v5155_v63, %s6439_s24 }
0x24db   :  { %v5077_v44 = vpop.permute.xlu1 %5076 }
0x24dc   :  { %v5081_v28 = vadd.f32 %v5077_v44, %v5061_v41 }
0x24dd   :  { %v5161_v6 = vpop.permute.xlu2 %5160 }
0x24de   :  { %6265 = vtanh.f32 %v5081_v28 }
0x24e4   :  { %v6266_v48 = vpop.eup %6265 }
0x24e5   :  { %5088 = vrot.lane.b32.xlu2 %v6266_v48, %s6440_s4 }
0x24eb   :  { %v5075_v54 = vpop.permute.xlu0 %5074 }
0x24ec   :  { %v5080_v24 = vadd.f32 %v5075_v54, %v5060_v25  ;;  %v5171_v60 = vpop.permute.xlu1 %5170 }
0x24ed   :  { %v5176_v8 = vmul.f32 %v5171_v60, %v8004_v58 }
0x24ee   :  { %6267 = vtanh.f32 %v5080_v24 }
0x24ef   :  { %5200 = vrot.lane.b32.xlu2 %v5176_v8, %s6439_s24 }
0x24f3   :  { %v5141_v50 = vpop.permute.xlu0 %5140 }
0x24f4   :  { %v6268_v38 = vpop.eup %6267  ;;  %v5145_v26 = vmul.f32 %v5141_v50, %v5132_v31 }
0x24f5   :  { %5086 = vrot.lane.b32.xlu0 %v6268_v38, %s6440_s4 }
0x24f6   :  { %v5165_v46 = vadd.f32 %v5161_v6, %v5145_v26 }
0x24f7   :  { %5190 = vrot.lane.b32.xlu2 %v5080_v24, %s6441_s2 }
0x24f8   :  { %6269 = vtanh.f32 %v5165_v46 }
0x24fe   :  { %v6270_v57 = vpop.eup %6269 }
0x24ff   :  { %5172 = vrot.lane.b32.xlu0 %v6270_v57, %s6440_s4  ;;  %5212 = vrot.lane.b32.xlu2 %v5165_v46, %s6441_s2 }
0x253f   :  { %v5089_v19 = vpop.permute.xlu2 %5088 }
0x2540   :  { %v5093_v58 = vmul.f32 %v5089_v19, %v8022_v32  ;;  %v3091_v32 = vadd.f32 %v8175_v2, %v8174_v13 }
0x2542   :  { %5182 = vrot.lane.b32.xlu0 %v5093_v58, %s6439_s24  ;;  %v3145_v22 = vadd.f32 %v7587_v4, %v3091_v32 }
0x2549   :  { %v5201_v16 = vpop.permute.xlu2 %5200 }
0x254a   :  { %5206 = vst.msk [vmem:[#allocation7] sm:$0xff] %vm349_vm1, %v5201_v16  ;;  %5192 = vrot.lane.b32.xlu0 %v5081_v28, %s6441_s2 }
0x2551   :  { %v5191_v29 = vpop.permute.xlu2 %5190  ;;  %v5259_v27 = vld [vmem:[#allocation7] sm:$0xff] }
0x2552   :  { %5196 = vst.msk [vmem:[#allocation6] sm:$0xff] %vm349_vm1, %v5191_v29  ;;  %5764 = vmatmul.msk.f32.vlgmr.msra.gmra.mxu3 %vm349_vm1, %v5259_v27 }
0x2559   :  { %v5213_v52 = vpop.permute.xlu2 %5212  ;;  %v5296_v25 = vld [vmem:[#allocation6] sm:$0xff] }
0x255a   :  { %5217 = vst.msk [vmem:[#allocation8 + $0x8] sm:$0xff] %vm349_vm1, %v5213_v52 }
0x2561   :  { %v5381_v8 = vld [vmem:[#allocation8 + $0x8] sm:$0xff] }
0x2567   :  { %v5087_v53 = vpop.permute.xlu0 %5086 }
0x2568   :  { %v5092_v0 = vmul.f32 %v5087_v53, %v5033_v37 }
0x256a   :  { %5180 = vrot.lane.b32.xlu1 %v5092_v0, %s6439_s24 }
0x2571   :  { %v5173_v55 = vpop.permute.xlu0 %5172 }
0x2572   :  { %v5177_v18 = vmul.f32 %v5173_v55, %v5132_v31 }
0x2574   :  { %5202 = vrot.lane.b32.xlu1 %v5177_v18, %s6439_s24 }
0x257c   :  { %5210 = vrot.lane.b32.xlu1 %v8027_v35, %s6441_s2 }
0x25b4   :  { %v5183_v36 = vpop.permute.xlu0 %5182 }
0x25b5   :  { %5187 = vst.msk [vmem:[#allocation5 + $0x8] sm:$0xff] %vm349_vm1, %v5183_v36 }
0x25bc   :  { %v5193_v33 = vpop.permute.xlu0 %5192  ;;  %v5221_v14 = vld [vmem:[#allocation5 + $0x8] sm:$0xff] }
0x25bd   :  { %5197 = vst.msk [vmem:[#allocation6 + $0x8] sm:$0xff] %vm349_vm1, %v5193_v33 }
0x25c4   :  { %v5297_v40 = vld [vmem:[#allocation6 + $0x8] sm:$0xff] }
0x25d5   :  { %v5288_v56 = vpop.f32.mrf.mxu3 }
0x25d6   :  { %v5294_v23 = vadd.f32 %v5288_v56, %v3145_v22 }
0x25d8   :  { %6271 = vtanh.f32 %v5294_v23  ;;  %v5768_v35 = vmul.f32 -1.442695, %v5294_v23 }
0x25da   :  { %6273 = vpow2.f32 %v5768_v35 }
0x25dc   :  { %v5181_v21 = vpop.permute.xlu1 %5180 }
0x25dd   :  { %5186 = vst.msk [vmem:[#allocation5] sm:$0xff] %vm349_vm1, %v5181_v21 }
0x25de   :  { %v6272_v42 = vpop.eup %6271 }
0x25df   :  { %5434 = vrot.lane.b32.xlu2 %v6272_v42, %s6440_s4 }
0x25e0   :  { %v6274_v37 = vpop.eup %6273 }
0x25e1   :  { %v5388_v20 = vadd.f32 1.0, %v6274_v37 }
0x25e3   :  { %v5401_v60 = vand.u32 2147483648, %v5388_v20  ;;  %vm5395_vm3 = vweird.f32 %v5388_v20  ;;  %v5399_v50 = vand.u32 2147483647, %v5388_v20 }
0x25e4   :  { %v5220_v43 = vld [vmem:[#allocation5] sm:$0xff] }
0x25e5   :  { %5762 = vmatmul.msk.f32.vlgmr.msra.gmra.mxu2 %vm349_vm1, %v5220_v43  ;;  %v5402_v26 = vor.u32 1.1754944e-38, %v5401_v60  ;;  %vm5400_vm5 = vcmp.eq.f32.partialorder %v5399_v50, 8.507059e+37 }
0x25e6   :  { %v5203_v9 = vpop.permute.xlu1 %5202 }
0x25e7   :  { %5207 = vst.msk [vmem:[#allocation7 + $0x8] sm:$0xff] %vm349_vm1, %v5203_v9  ;;  %5342 = vrot.lane.b32.xlu2 %v5297_v40, %s6439_s24 }
0x25ed   :  { %5763 = vmatmul.msk.f32.gmra.mxu2 %vm349_vm1, %v5221_v14 }
0x25ee   :  { %v5211_v3 = vpop.permute.xlu1 %5210  ;;  %v5260_v49 = vld [vmem:[#allocation7 + $0x8] sm:$0xff] }
0x25ef   :  { %5216 = vst.msk [vmem:[#allocation8] sm:$0xff] %vm349_vm1, %v5211_v3  ;;  %5765 = vmatmul.msk.f32.gmra.mxu3 %vm349_vm1, %v5260_v49 }
0x25f6   :  { %v5380_v24 = vld [vmem:[#allocation8] sm:$0xff] }
0x2639   :  { %v5435_v6 = vpop.permute.xlu2 %5434 }
0x2668   :  { %v5249_v5 = vpop.f32.mrf.mxu2 }
0x2669   :  { %v5255_v51 = vadd.f32 %v5249_v5, %v3172_v12 }
0x266b   :  { %6275 = vtanh.f32 %v5255_v51  ;;  %v5766_v19 = vmul.f32 -1.442695, %v5255_v51 }
0x266c   :  { %6277 = vrcp.f32 %v5388_v20 }
0x2670   :  { %v5252_v15 = vpop.f32.mrf.mxu2 }
0x2671   :  { %v6276_v30 = vpop.eup %6275  ;;  %v5256_v31 = vadd.f32 %v5252_v15, %v3174_v1 }
0x2672   :  { %5350 = vrot.lane.b32.xlu0 %v6276_v30, %s6440_s4  ;;  %v5291_v63 = vpop.f32.mrf.mxu3  ;;  %v6278_v41 = vpop.eup %6277 }
0x2673   :  { %6279 = vtanh.f32 %v5256_v31  ;;  %v5295_v10 = vadd.f32 %v5291_v63, %v3147_v34  ;;  %v5391_v28 = vmul.f32 %v6278_v41, %v5388_v20  ;;  %vm5396_vm2 = vweird.f32 %v6278_v41 }
0x2674   :  { %vm5397_vm4 = vmor %vm5395_vm3, %vm5396_vm2  ;;  %v5767_v58 = vmul.f32 -1.442695, %v5256_v31 }
0x2675   :  { %6281 = vtanh.f32 %v5295_v10  ;;  %v5392_v59 = vsub.f32 1.0, %v5391_v28  ;;  %v5769_v27 = vmul.f32 -1.442695, %v5295_v10 }
0x2676   :  { %6283 = vpow2.f32 %v5766_v19 }
0x2677   :  { %v5393_v54 = vmul.f32 %v6278_v41, %v5392_v59  ;;  %6285 = vpow2.f32 %v5767_v58 }
0x2679   :  { %v6280_v44 = vpop.eup %6279  ;;  %v5394_v4 = vadd.f32 %v6278_v41, %v5393_v54 }
0x267a   :  { %5352 = vrot.lane.b32.xlu1 %v6280_v44, %s6440_s4 }
0x267b   :  { %v6282_v48 = vpop.eup %6281  ;;  %v5398_v38 = vsel %vm5397_vm4, %v6278_v41, %v5394_v4 }
0x267c   :  { %5436 = vrot.lane.b32.xlu0 %v6282_v48, %s6440_s4  ;;  %v8081_v46 = vsel %vm5400_vm5, %v5402_v26, %v5398_v38  ;;  %v6284_v16 = vpop.eup %6283 }
0x267d   :  { %v5440_v57 = vmul.f32 %v5435_v6, %v8081_v46  ;;  %v5304_v29 = vadd.f32 1.0, %v6284_v16  ;;  %v6286_v52 = vpop.eup %6285 }
0x267e   :  { %v5305_v53 = vadd.f32 1.0, %v6286_v52 }
0x267f   :  { %6287 = vrcp.f32 %v5304_v29  ;;  %v5317_v21 = vand.u32 2147483648, %v5304_v29  ;;  %vm5311_vm7 = vweird.f32 %v5304_v29  ;;  %v5315_v43 = vand.u32 2147483647, %v5304_v29 }
0x2680   :  { %6289 = vpow2.f32 %v5769_v27  ;;  %v5332_v12 = vand.u32 2147483648, %v5305_v53  ;;  %vm5326_vm11 = vweird.f32 %v5305_v53  ;;  %v5330_v51 = vand.u32 2147483647, %v5305_v53 }
0x2681   :  { %6291 = vrcp.f32 %v5305_v53  ;;  %v5318_v14 = vor.u32 1.1754944e-38, %v5317_v21  ;;  %vm5316_vm9 = vcmp.eq.f32.partialorder %v5315_v43, 8.507059e+37 }
0x2682   :  { %5340 = vrot.lane.b32.xlu1 %v5296_v25, %s6439_s24  ;;  %v5333_v61 = vor.u32 1.1754944e-38, %v5332_v12  ;;  %vm5331_vm14 = vcmp.eq.f32.partialorder %v5330_v51, 8.507059e+37  ;;  %v5343_v25 = vpop.permute.xlu2 %5342 }
0x2684   :  { %5424 = vrot.lane.b32.xlu0 %v5380_v24, %s6439_s24 }
0x2685   :  { %v6288_v0 = vpop.eup %6287 }
0x2686   :  { %v6290_v55 = vpop.eup %6289  ;;  %v5307_v36 = vmul.f32 %v6288_v0, %v5304_v29  ;;  %vm5312_vm6 = vweird.f32 %v6288_v0 }
0x2687   :  { %v5389_v18 = vadd.f32 1.0, %v6290_v55  ;;  %v6292_v13 = vpop.eup %6291  ;;  %vm5313_vm8 = vmor %vm5311_vm7, %vm5312_vm6 }
0x2688   :  { %v5308_v33 = vsub.f32 1.0, %v5307_v36  ;;  %v5322_v32 = vmul.f32 %v6292_v13, %v5305_v53  ;;  %vm5327_vm10 = vweird.f32 %v6292_v13 }
0x2689   :  { %6293 = vrcp.f32 %v5389_v18  ;;  %vm5328_vm12 = vmor %vm5326_vm11, %vm5327_vm10  ;;  %v5416_v39 = vand.u32 2147483648, %v5389_v18  ;;  %vm5410_vm15 = vweird.f32 %v5389_v18  ;;  %v5414_v11 = vand.u32 2147483647, %v5389_v18 }
0x268a   :  { %5426 = vrot.lane.b32.xlu1 %v5381_v8, %s6439_s24  ;;  %v5309_v2 = vmul.f32 %v6288_v0, %v5308_v33  ;;  %v5323_v23 = vsub.f32 1.0, %v5322_v32 }
0x268b   :  { %v5417_v15 = vor.u32 1.1754944e-38, %v5416_v39  ;;  %vm5415_vm2 = vcmp.eq.f32.partialorder %v5414_v11, 8.507059e+37 }
0x268c   :  { %v5310_v56 = vadd.f32 %v6288_v0, %v5309_v2  ;;  %v5324_v40 = vmul.f32 %v6292_v13, %v5323_v23 }
0x268e   :  { %v5314_v9 = vsel %vm5313_vm8, %v6288_v0, %v5310_v56  ;;  %v5325_v7 = vadd.f32 %v6292_v13, %v5324_v40 }
0x268f   :  { %v6294_v22 = vpop.eup %6293  ;;  %v8085_v35 = vsel %vm5316_vm9, %v5318_v14, %v5314_v9 }
0x2690   :  { %v5406_v42 = vmul.f32 %v6294_v22, %v5389_v18  ;;  %v5329_v37 = vsel %vm5328_vm12, %v6292_v13, %v5325_v7  ;;  %vm5411_vm13 = vweird.f32 %v6294_v22 }
0x2691   :  { %v8089_v17 = vsel %vm5331_vm14, %v5333_v61, %v5329_v37  ;;  %vm5412_vm0 = vmor %vm5410_vm15, %vm5411_vm13 }
0x2692   :  { %5444 = vrot.lane.b32.xlu1 %v5440_v57, %s6439_s24  ;;  %v5407_v3 = vsub.f32 1.0, %v5406_v42  ;;  %v5347_v6 = vmul.f32 %v5343_v25, %v8089_v17 }
0x2694   :  { %v5408_v5 = vmul.f32 %v6294_v22, %v5407_v3 }
0x2696   :  { %v5409_v45 = vadd.f32 %v6294_v22, %v5408_v5 }
0x2698   :  { %v5413_v1 = vsel %vm5412_vm0, %v6294_v22, %v5409_v45 }
0x2699   :  { %v5418_v31 = vsel %vm5415_vm2, %v5417_v15, %v5413_v1 }
0x26e4   :  { %v5351_v49 = vpop.permute.xlu0 %5350 }
0x26e5   :  { %v5356_v47 = vmul.f32 %v5351_v49, %v8085_v35 }
0x26e7   :  { %5360 = vrot.lane.b32.xlu2 %v5356_v47, %s6439_s24 }
0x26ec   :  { %v5353_v62 = vpop.permute.xlu1 %5352 }
0x26ed   :  { %v5357_v20 = vmul.f32 %v5353_v62, %v8089_v17 }
0x26ee   :  { %v5437_v30 = vpop.permute.xlu0 %5436 }
0x26ef   :  { %5362 = vrot.lane.b32.xlu0 %v5357_v20, %s6439_s24  ;;  %v5441_v34 = vmul.f32 %v5437_v30, %v5418_v31 }
0x26f1   :  { %5446 = vrot.lane.b32.xlu2 %v5441_v34, %s6439_s24 }
0x26f4   :  { %v5341_v63 = vpop.permute.xlu1 %5340 }
0x26f5   :  { %v5346_v54 = vmul.f32 %v5341_v63, %v8085_v35 }
0x26f6   :  { %v5425_v41 = vpop.permute.xlu0 %5424 }
0x26f7   :  { %v5430_v44 = vmul.f32 %v5425_v41, %v8081_v46 }
0x26fc   :  { %v5427_v10 = vpop.permute.xlu1 %5426 }
0x26fd   :  { %v5431_v8 = vmul.f32 %v5427_v10, %v5418_v31 }
0x2704   :  { %v5445_v28 = vpop.permute.xlu1 %5444 }
0x2705   :  { %v5450_v48 = vadd.f32 %v5445_v28, %v5430_v44 }
0x2707   :  { %6295 = vtanh.f32 %v5450_v48 }
0x270d   :  { %v6296_v59 = vpop.eup %6295 }
0x270e   :  { %5456 = vrot.lane.b32.xlu2 %v6296_v59, %s6440_s4 }
0x2741   :  { %v5361_v24 = vpop.permute.xlu2 %5360 }
0x2742   :  { %v5366_v4 = vadd.f32 %v5361_v24, %v5346_v54 }
0x2744   :  { %6297 = vtanh.f32 %v5366_v4 }
0x274a   :  { %v6298_v60 = vpop.eup %6297 }
0x274b   :  { %5372 = vrot.lane.b32.xlu0 %v6298_v60, %s6440_s4  ;;  %v5447_v50 = vpop.permute.xlu2 %5446 }
0x274c   :  { %v5451_v38 = vadd.f32 %v5447_v50, %v5431_v8 }
0x274e   :  { %6299 = vtanh.f32 %v5451_v38 }
0x2754   :  { %v6300_v26 = vpop.eup %6299 }
0x2755   :  { %5458 = vrot.lane.b32.xlu0 %v6300_v26, %s6440_s4 }
0x275d   :  { %5476 = vrot.lane.b32.xlu0 %v5366_v4, %s6441_s2 }
0x2761   :  { %v5363_v57 = vpop.permute.xlu0 %5362 }
0x2762   :  { %v5367_v19 = vadd.f32 %v5363_v57, %v5347_v6 }
0x2764   :  { %6301 = vtanh.f32 %v5367_v19 }
0x2768   :  { %v5457_v58 = vpop.permute.xlu2 %5456 }
0x2769   :  { %v5462_v16 = vmul.f32 %v5457_v58, %v8081_v46 }
0x276a   :  { %v6302_v29 = vpop.eup %6301 }
0x276b   :  { %5374 = vrot.lane.b32.xlu1 %v6302_v29, %s6440_s4  ;;  %5486 = vrot.lane.b32.xlu2 %v5462_v16, %s6439_s24 }
0x2773   :  { %5478 = vrot.lane.b32.xlu1 %v5367_v19, %s6441_s2 }
0x27bd   :  { %v5373_v27 = vpop.permute.xlu0 %5372 }
0x27be   :  { %v5378_v52 = vmul.f32 %v5373_v27, %v8085_v35 }
0x27c0   :  { %5466 = vrot.lane.b32.xlu1 %v5378_v52, %s6439_s24 }
0x27c5   :  { %v5487_v53 = vpop.permute.xlu2 %5486 }
0x27c6   :  { %5492 = vst.msk [vmem:[#allocation7] sm:$0xff] %vm349_vm1, %v5487_v53 }
0x27c7   :  { %v5459_v0 = vpop.permute.xlu0 %5458 }
0x27c8   :  { %5496 = vrot.lane.b32.xlu1 %v5450_v48, %s6441_s2  ;;  %v5463_v55 = vmul.f32 %v5459_v0, %v5418_v31 }
0x27ca   :  { %5488 = vrot.lane.b32.xlu0 %v5463_v55, %s6439_s24 }
0x27cd   :  { %v5509_v46 = vld [vmem:[#allocation7] sm:$0xff] }
0x27ce   :  { %5772 = vst.msk [vmem:[%s8161_s9 + $0x30] sm:$0xff] %vm349_vm1, %v5509_v46 }
0x27cf   :  { %v5477_v18 = vpop.permute.xlu0 %5476 }
0x27d0   :  { %5482 = vst.msk [vmem:[#allocation6] sm:$0xff] %vm349_vm1, %v5477_v18 }
0x27d7   :  { %v5514_v36 = vld [vmem:[#allocation6] sm:$0xff] }
0x27d8   :  { %5774 = vst.msk [vmem:[%s8162_s10 + $0x20] sm:$0xff] %vm349_vm1, %v5514_v36 }
0x27dd   :  { %v5375_v33 = vpop.permute.xlu1 %5374 }
0x27de   :  { %v5379_v13 = vmul.f32 %v5375_v33, %v8089_v17 }
0x27e0   :  { %5468 = vrot.lane.b32.xlu2 %v5379_v13, %s6439_s24 }
0x27e5   :  { %v5479_v2 = vpop.permute.xlu1 %5478 }
0x27e6   :  { %5483 = vst.msk [vmem:[#allocation6 + $0x8] sm:$0xff] %vm349_vm1, %v5479_v2 }
0x27e8   :  { %5498 = vrot.lane.b32.xlu2 %v5451_v38, %s6441_s2 }
0x27ed   :  { %v5515_v32 = vld [vmem:[#allocation6 + $0x8] sm:$0xff] }
0x27ee   :  { %5775 = vst.msk [vmem:[%s8162_s10 + $0x28] sm:$0xff] %vm349_vm1, %v5515_v32 }
0x2832   :  { %v5467_v22 = vpop.permute.xlu1 %5466 }
0x2833   :  { %5472 = vst.msk [vmem:[#allocation5] sm:$0xff] %vm349_vm1, %v5467_v22 }
0x283a   :  { %v5504_v56 = vld [vmem:[#allocation5] sm:$0xff]  ;;  %v5469_v23 = vpop.permute.xlu2 %5468  ;;  %v5497_v21 = vpop.permute.xlu1 %5496 }
0x283b   :  { %5770 = vst.msk [vmem:[%s8161_s9 + $0x20] sm:$0xff] %vm349_vm1, %v5504_v56 }
0x283c   :  { %5473 = vst.msk [vmem:[#allocation5 + $0x8] sm:$0xff] %vm349_vm1, %v5469_v23  ;;  %v5489_v42 = vpop.permute.xlu0 %5488 }
0x283d   :  { %5502 = vst.msk [vmem:[#allocation8] sm:$0xff] %vm349_vm1, %v5497_v21 }
0x283e   :  { %5493 = vst.msk [vmem:[#allocation7 + $0x8] sm:$0xff] %vm349_vm1, %v5489_v42 }
0x2842   :  { %v5499_v43 = vpop.permute.xlu2 %5498 }
0x2843   :  { %v5505_v9 = vld [vmem:[#allocation5 + $0x8] sm:$0xff]  ;;  %5503 = vst.msk [vmem:[#allocation8 + $0x8] sm:$0xff] %vm349_vm1, %v5499_v43 }
0x2844   :  { %5771 = vst.msk [vmem:[%s8161_s9 + $0x28] sm:$0xff] %vm349_vm1, %v5505_v9  ;;  %v5519_v40 = vld [vmem:[#allocation8] sm:$0xff] }
0x2845   :  { %5776 = vst.msk [vmem:[%s8162_s10 + $0x30] sm:$0xff] %vm349_vm1, %v5519_v40  ;;  %v5510_v14 = vld [vmem:[#allocation7 + $0x8] sm:$0xff] }
0x2846   :  { %5773 = vst.msk [vmem:[%s8161_s9 + $0x38] sm:$0xff] %vm349_vm1, %v5510_v14 }
0x284a   :  { %v5520_v3 = vld [vmem:[#allocation8 + $0x8] sm:$0xff] }
0x284b   :  { %5777 = vst.msk [vmem:[%s8162_s10 + $0x38] sm:$0xff] %vm349_vm1, %v5520_v3 }
0x284c   :  { %5532 = vsyncpa [#allocation10], 1 }
0x284d   :  { %5533 = vsyncpa [#allocation12], 1 }
0x284e   :  { %5534 = vsyncpa [#allocation15], 1 }

</bundles_post_ra>
